<compile_context>
chip_gen: v7x
topology: tpu7x:2x2x1
jax: 0.10.0
libtpu: 0.0.40
codegen_flags: <defaults>
</compile_context>

<pallas_src>
import jax
import jax.numpy as jnp
from jax.experimental import pallas as pl
from jax.experimental.pallas import tpu as pltpu


# ----------------------------- Pallas kernels ------------------------------ #

def matmul_stats_kernel(x_ref, w_ref, y_ref, sum_ref, sq_ref):
    # x: (tm, K) bf16, w: (K, tn) bf16 -> y: (tm, tn) f32
    # sum/sq: (1, tn) f32 accumulated over the (inner, "arbitrary") row axis.
    y = jnp.dot(x_ref[...], w_ref[...], preferred_element_type=jnp.float32)
    y_ref[...] = y

    @pl.when(pl.program_id(1) == 0)
    def _():
        sum_ref[...] = jnp.zeros_like(sum_ref)
        sq_ref[...] = jnp.zeros_like(sq_ref)

    sum_ref[...] += jnp.sum(y, axis=0, keepdims=True)
    sq_ref[...] += jnp.sum(y * y, axis=0, keepdims=True)


def bn_relu_kernel(y_ref, scale_ref, shift_ref, o_ref):
    # Fused BN affine + ReLU, bf16 output: max(0, y*scale + shift)
    o_ref[...] = jnp.maximum(
        y_ref[...] * scale_ref[...] + shift_ref[...], 0.0
    ).astype(o_ref.dtype)


def matmul_bias_kernel(x_ref, w_ref, b_ref, o_ref):
    # Final 1x1 conv: (tm, K) @ (K, Nout) + (1, Nout)
    o_ref[...] = (
        jnp.dot(x_ref[...], w_ref[...], preferred_element_type=jnp.float32)
        + b_ref[...]
    )


# ----------------------------- Pallas wrappers ------------------------------ #

def _col_tile(C, cap=512):
    """Lane-dense column tile (multiple of 128) giving >=2 tiles when possible."""
    if C <= 128:
        return C
    tn = max(128, min(cap, C // 2))
    assert C % tn == 0, (C, tn)
    return tn


def matmul_stats(x_bf16, w_bf16, tm=512):
    """(M, K)@(K, C) with fused per-column sum / sum-of-squares accumulation."""
    M, K = x_bf16.shape
    C = w_bf16.shape[1]
    tm = min(tm, M)
    assert M % tm == 0
    tn = _col_tile(C)
    return pl.pallas_call(
        matmul_stats_kernel,
        out_shape=(
            jax.ShapeDtypeStruct((M, C), jnp.float32),
            jax.ShapeDtypeStruct((1, C), jnp.float32),
            jax.ShapeDtypeStruct((1, C), jnp.float32),
        ),
        grid_spec=pltpu.PrefetchScalarGridSpec(
            num_scalar_prefetch=0,
            grid=(C // tn, M // tm),           # (parallel cols, arbitrary rows)
            in_specs=[
                pl.BlockSpec((tm, K), lambda j, i: (i, 0)),
                pl.BlockSpec((K, tn), lambda j, i: (0, j)),
            ],
            out_specs=(
                pl.BlockSpec((tm, tn), lambda j, i: (i, j)),
                pl.BlockSpec((1, tn), lambda j, i: (0, j)),   # resident over i
                pl.BlockSpec((1, tn), lambda j, i: (0, j)),   # resident over i
            ),
        ),
        compiler_params=pltpu.CompilerParams(
            dimension_semantics=("parallel", "arbitrary")
        ),
    )(x_bf16, w_bf16)


def bn_relu_bf16(y, scale, shift, tm=512):
    M, C = y.shape
    tm = min(tm, M)
    assert M % tm == 0
    tn = _col_tile(C)
    return pl.pallas_call(
        bn_relu_kernel,
        out_shape=jax.ShapeDtypeStruct((M, C), jnp.bfloat16),
        grid_spec=pltpu.PrefetchScalarGridSpec(
            num_scalar_prefetch=0,
            grid=(C // tn, M // tm),
            in_specs=[
                pl.BlockSpec((tm, tn), lambda j, i: (i, j)),
                pl.BlockSpec((1, tn), lambda j, i: (0, j)),
                pl.BlockSpec((1, tn), lambda j, i: (0, j)),
            ],
            out_specs=pl.BlockSpec((tm, tn), lambda j, i: (i, j)),
        ),
        compiler_params=pltpu.CompilerParams(
            dimension_semantics=("parallel", "parallel")
        ),
    )(y, scale, shift)


def matmul_bias(x_bf16, w_bf16, b_f32, tm=512):
    M, K = x_bf16.shape
    Nout = w_bf16.shape[1]
    tm = min(tm, M)
    assert M % tm == 0
    return pl.pallas_call(
        matmul_bias_kernel,
        out_shape=jax.ShapeDtypeStruct((M, Nout), jnp.float32),
        grid_spec=pltpu.PrefetchScalarGridSpec(
            num_scalar_prefetch=0,
            grid=(M // tm,),
            in_specs=[
                pl.BlockSpec((tm, K), lambda i: (i, 0)),
                pl.BlockSpec((K, Nout), lambda i: (0, 0)),
                pl.BlockSpec((1, Nout), lambda i: (0, 0)),
            ],
            out_specs=pl.BlockSpec((tm, Nout), lambda i: (i, 0)),
        ),
        compiler_params=pltpu.CompilerParams(
            dimension_semantics=("parallel",)
        ),
    )(x_bf16, w_bf16, b_f32.reshape(1, Nout))


# ---------------------------- UNetDecoder forward --------------------------- #

def up_block(x_flat_bf16, N, H, W, w, gamma, beta, eps=1e-5):
    """ConvTranspose2d(k=2,s=2) [bias dropped] + BatchNorm2d(train stats) + ReLU.

    Input  x: (N*H*W, Cin) bf16, rows are pixels (n, h, w) in row-major order.
    Output z: (N*2H*2W, Cout) bf16, same row convention at the doubled resolution.
    """
    Cin = x_flat_bf16.shape[1]
    Cout = w.shape[1]
    C4 = 4 * Cout
    M = N * H * W

    # (Cin, Cout, 2, 2) -> (Cin, 4*Cout), columns ordered (a, b, cout)
    w_mat = jnp.transpose(w, (0, 2, 3, 1)).reshape(Cin, C4).astype(jnp.bfloat16)
    # NOTE: ConvTranspose bias omitted — exactly cancelled by BN mean subtraction.

    y, s, q = matmul_stats(x_flat_bf16, w_mat)          # y:(M,4Cout) f32, s/q:(1,4Cout)

    # Fold the 4 sub-pixel groups into per-channel stats (tiny XLA ops).
    cnt = jnp.float32(M * 4)
    s_c = s.reshape(4, Cout).sum(axis=0)
    q_c = q.reshape(4, Cout).sum(axis=0)
    mean = s_c / cnt
    var = jnp.maximum(q_c / cnt - mean * mean, 0.0)      # guard f32 cancellation
    scale_c = gamma / jnp.sqrt(var + eps)
    shift_c = beta - mean * scale_c
    scale = jnp.tile(scale_c, 4).reshape(1, C4)
    shift = jnp.tile(shift_c, 4).reshape(1, C4)

    z = bn_relu_bf16(y, scale, shift)                    # (M, 4Cout) bf16, lane-dense

    # Sub-pixel interleave (row permutation only): (n,h,w,a,b,c) -> (n,2h,2w,c)
    z = (
        z.reshape(N, H, W, 2, 2, Cout)
        .transpose(0, 1, 3, 2, 4, 5)
        .reshape(N * 2 * H * 2 * W, Cout)
    )
    return z, 2 * H, 2 * W


@jax.jit
def unet_decoder_forward(x_nchw, params, eps=1e-5):
    N, Cin, H, W = x_nchw.shape
    x = (
        jnp.transpose(x_nchw, (0, 2, 3, 1))
        .reshape(N * H * W, Cin)
        .astype(jnp.bfloat16)
    )
    h, w_sp = H, W
    for (wt, _b, gamma, beta) in params["ups"]:
        x, h, w_sp = up_block(x, N, h, w_sp, wt, gamma, beta, eps)

    # Final 1x1 conv; pad output channels to 128 for lane-dense stores.
    wf, bf = params["final"]
    Co, Cin_f = wf.shape[0], wf.shape[1]
    Co_pad = max(128, ((Co + 127) // 128) * 128)
    w_mat = jnp.pad(wf.reshape(Co, Cin_f).T, ((0, 0), (0, Co_pad - Co)))
    b_pad = jnp.pad(bf, (0, Co_pad - Co))
    y = matmul_bias(x, w_mat.astype(jnp.bfloat16), b_pad)    # (M, Co_pad) f32
    y = y[:, :Co].reshape(N, h, w_sp, Co)
    return jnp.transpose(y, (0, 3, 1, 2))                    # NHWC -> NCHW


# ----------------------------- pure-JAX reference ---------------------------- #

def reference_forward(x_nchw, params, eps=1e-5):
    hi = jax.lax.Precision.HIGHEST
    x = x_nchw
    for (w, b, gamma, beta) in params["ups"]:
        y = jnp.einsum("nihw,ioab->nohawb", x, w, precision=hi)
        Nn, Co, Hh, _, Ww, _ = y.shape
        y = y.reshape(Nn, Co, 2 * Hh, 2 * Ww) + b[None, :, None, None]
        mean = y.mean(axis=(0, 2, 3), keepdims=True)
        var = ((y - mean) ** 2).mean(axis=(0, 2, 3), keepdims=True)
        y = (y - mean) / jnp.sqrt(var + eps)
        y = y * gamma[None, :, None, None] + beta[None, :, None, None]
        x = jnp.maximum(y, 0.0)
    wf, bf = params["final"]
    out = (
        jnp.einsum("nihw,oi->nohw", x, wf.reshape(wf.shape[0], wf.shape[1]),
                   precision=hi)
        + bf[None, :, None, None]
    )
    return out


# ------------------------------------ main ----------------------------------- #

def make_params(key, in_channels, num_classes):
    chans = [(in_channels, 512), (512, 256), (256, 128), (128, 64)]
    keys = jax.random.split(key, 4 * len(chans) + 2)
    ups = []
    ki = 0
    for cin, cout in chans:
        w = jax.random.normal(keys[ki], (cin, cout, 2, 2), jnp.float32)
        w = w / jnp.sqrt(float(cin * 4))
        b = 0.1 * jax.random.normal(keys[ki + 1], (cout,), jnp.float32)
        gamma = 1.0 + 0.1 * jax.random.normal(keys[ki + 2], (cout,), jnp.float32)
        beta = 0.1 * jax.random.normal(keys[ki + 3], (cout,), jnp.float32)
        ups.append((w, b, gamma, beta))
        ki += 4
    wf = jax.random.normal(keys[ki], (num_classes, 64, 1, 1), jnp.float32)
    wf = wf / jnp.sqrt(64.0)
    bf = 0.1 * jax.random.normal(keys[ki + 1], (num_classes,), jnp.float32)
    return {"ups": ups, "final": (wf, bf)}


if __name__ == "__main__":
    key = jax.random.PRNGKey(0)
    kp, kx = jax.random.split(key)

    in_channels = 64       # small constructor arg for the synthetic test
    num_classes = 21       # module default
    N, H, W = 2, 4, 4      # output = (2, 21, 64, 64)

    params = make_params(kp, in_channels, num_classes)
    x = jax.random.normal(kx, (N, in_channels, H, W), jnp.float32)

    out = jax.block_until_ready(unet_decoder_forward(x, params))
    assert out.shape == (N, num_classes, 16 * H, 16 * W), out.shape

    ref = jax.block_until_ready(reference_forward(x, params))
    max_err = float(jnp.max(jnp.abs(out - ref)))
    # bf16 MXU operands (f32 accumulation / f32 BN math): agreement at ~1e-2.
    assert max_err < 1e-1, f"mismatch vs reference: {max_err}"

    print("KERNEL_OK")
</pallas_src>

<mosaic_0001>
module attributes {stable_mosaic.version = 11 : i64} {
  func.func @matmul_stats_kernel(%arg0: i32, %arg1: i32, %arg2: memref<32x64xbf16, #tpu.memory_space<vmem>>, %arg3: memref<64x512xbf16, #tpu.memory_space<vmem>>, %arg4: memref<32x512xf32, #tpu.memory_space<vmem>>, %arg5: memref<1x512xf32, #tpu.memory_space<vmem>>, %arg6: memref<1x512xf32, #tpu.memory_space<vmem>>) attributes {dimension_semantics = [#tpu.dimension_semantics<parallel>, #tpu.dimension_semantics<arbitrary>], iteration_bounds = array<i64: 4, 1>, scalar_prefetch = 0 : i64, scratch_operands = 0 : i64, tpu.core_type = #tpu.core_type<tc>, window_params = [{transform_indices = @transform_0, window_bounds = array<i64: 32, 64>}, {transform_indices = @transform_1, window_bounds = array<i64: 64, 512>}, {transform_indices = @transform_2, window_bounds = array<i64: 32, 512>}, {transform_indices = @transform_3, window_bounds = array<i64: 1, 512>}, {transform_indices = @transform_4, window_bounds = array<i64: 1, 512>}]} {
    %c0 = arith.constant 0 : index
    %c0_0 = arith.constant 0 : index
    %0 = vector.load %arg2[%c0, %c0_0] : memref<32x64xbf16, #tpu.memory_space<vmem>>, vector<32x64xbf16>
    %c0_1 = arith.constant 0 : index
    %c0_2 = arith.constant 0 : index
    %1 = vector.load %arg3[%c0_1, %c0_2] : memref<64x512xbf16, #tpu.memory_space<vmem>>, vector<64x512xbf16>
    %cst = arith.constant dense<0.000000e+00> : vector<32x512xf32>
    %2 = tpu.matmul %0, %1, %cst {dimension_numbers = #tpu.dot_dimension_numbers<[1], [0], [0], [1], [0, 0, 1, 1], [], []>} : vector<32x64xbf16>, vector<64x512xbf16>, vector<32x512xf32> -> vector<32x512xf32>
    %c0_3 = arith.constant 0 : index
    %c0_4 = arith.constant 0 : index
    %3 = vector.load %arg4[%c0_3, %c0_4] : memref<32x512xf32, #tpu.memory_space<vmem>>, vector<32x512xf32>
    tpu.vector_store %arg4[%c0_3, %c0_4], %2 {strides = array<i32>} : memref<32x512xf32, #tpu.memory_space<vmem>>, vector<32x512xf32>,
    %c0_i32 = arith.constant 0 : i32
    %4 = arith.cmpi eq, %arg1, %c0_i32 : i32
    %5 = arith.extui %4 : i1 to i32
    %c0_i32_5 = arith.constant 0 : i32
    %6 = arith.cmpi ne, %5, %c0_i32_5 : i32
    scf.if %6 {
      %cst_16 = arith.constant 0.000000e+00 : f32
      %18 = vector.broadcast %cst_16 : f32 to vector<1x512xf32>
      %c0_17 = arith.constant 0 : index
      %c0_18 = arith.constant 0 : index
      %19 = vector.load %arg5[%c0_17, %c0_18] : memref<1x512xf32, #tpu.memory_space<vmem>>, vector<1x512xf32>
      tpu.vector_store %arg5[%c0_17, %c0_18], %18 {strides = array<i32>} : memref<1x512xf32, #tpu.memory_space<vmem>>, vector<1x512xf32>,
      %cst_19 = arith.constant 0.000000e+00 : f32
      %20 = vector.broadcast %cst_19 : f32 to vector<1x512xf32>
      %c0_20 = arith.constant 0 : index
      %c0_21 = arith.constant 0 : index
      %21 = vector.load %arg6[%c0_20, %c0_21] : memref<1x512xf32, #tpu.memory_space<vmem>>, vector<1x512xf32>
      tpu.vector_store %arg6[%c0_20, %c0_21], %20 {strides = array<i32>} : memref<1x512xf32, #tpu.memory_space<vmem>>, vector<1x512xf32>,
    } else {
    }
    %c0_6 = arith.constant 0 : index
    %c0_7 = arith.constant 0 : index
    %7 = vector.load %arg5[%c0_6, %c0_7] : memref<1x512xf32, #tpu.memory_space<vmem>>, vector<1x512xf32>
    %cst_8 = arith.constant dense<0.000000e+00> : vector<512xf32>
    %8 = vector.multi_reduction <add>, %2, %cst_8 [0] : vector<32x512xf32> to vector<512xf32>
    %9 = vector.shape_cast %8 : vector<512xf32> to vector<1x512xf32>
    %10 = arith.addf %7, %9 : vector<1x512xf32>
    %c0_9 = arith.constant 0 : index
    %c0_10 = arith.constant 0 : index
    %11 = vector.load %arg5[%c0_9, %c0_10] : memref<1x512xf32, #tpu.memory_space<vmem>>, vector<1x512xf32>
    tpu.vector_store %arg5[%c0_9, %c0_10], %10 {strides = array<i32>} : memref<1x512xf32, #tpu.memory_space<vmem>>, vector<1x512xf32>,
    %c0_11 = arith.constant 0 : index
    %c0_12 = arith.constant 0 : index
    %12 = vector.load %arg6[%c0_11, %c0_12] : memref<1x512xf32, #tpu.memory_space<vmem>>, vector<1x512xf32>
    %13 = arith.mulf %2, %2 : vector<32x512xf32>
    %cst_13 = arith.constant dense<0.000000e+00> : vector<512xf32>
    %14 = vector.multi_reduction <add>, %13, %cst_13 [0] : vector<32x512xf32> to vector<512xf32>
    %15 = vector.shape_cast %14 : vector<512xf32> to vector<1x512xf32>
    %16 = arith.addf %12, %15 : vector<1x512xf32>
    %c0_14 = arith.constant 0 : index
    %c0_15 = arith.constant 0 : index
    %17 = vector.load %arg6[%c0_14, %c0_15] : memref<1x512xf32, #tpu.memory_space<vmem>>, vector<1x512xf32>
    tpu.vector_store %arg6[%c0_14, %c0_15], %16 {strides = array<i32>} : memref<1x512xf32, #tpu.memory_space<vmem>>, vector<1x512xf32>,
    return
  }
  func.func @transform_0(%arg0: i32, %arg1: i32) -> (i32, i32) {
    %c0_i32 = arith.constant 0 : i32
    %c0_i32_0 = arith.constant 0 : i32
    return %arg1, %c0_i32 : i32, i32
  }
  func.func @transform_1(%arg0: i32, %arg1: i32) -> (i32, i32) {
    %c0_i32 = arith.constant 0 : i32
    %c0_i32_0 = arith.constant 0 : i32
    return %c0_i32, %arg0 : i32, i32
  }
  func.func @transform_2(%arg0: i32, %arg1: i32) -> (i32, i32) {
    %c0_i32 = arith.constant 0 : i32
    return %arg1, %arg0 : i32, i32
  }
  func.func @transform_3(%arg0: i32, %arg1: i32) -> (i32, i32) {
    %c0_i32 = arith.constant 0 : i32
    %c0_i32_0 = arith.constant 0 : i32
    return %c0_i32, %arg0 : i32, i32
  }
  func.func @transform_4(%arg0: i32, %arg1: i32) -> (i32, i32) {
    %c0_i32 = arith.constant 0 : i32
    %c0_i32_0 = arith.constant 0 : i32
    return %c0_i32, %arg0 : i32, i32
  }
}

module attributes {stable_mosaic.version = 11 : i64} {
  func.func @bn_relu_kernel(%arg0: i32, %arg1: i32, %arg2: memref<32x512xf32, #tpu.memory_space<vmem>>, %arg3: memref<1x512xf32, #tpu.memory_space<vmem>>, %arg4: memref<1x512xf32, #tpu.memory_space<vmem>>, %arg5: memref<32x512xbf16, #tpu.memory_space<vmem>>) attributes {dimension_semantics = [#tpu.dimension_semantics<parallel>, #tpu.dimension_semantics<parallel>], iteration_bounds = array<i64: 4, 1>, scalar_prefetch = 0 : i64, scratch_operands = 0 : i64, tpu.core_type = #tpu.core_type<tc>, window_params = [{transform_indices = @transform_0, window_bounds = array<i64: 32, 512>}, {transform_indices = @transform_1, window_bounds = array<i64: 1, 512>}, {transform_indices = @transform_2, window_bounds = array<i64: 1, 512>}, {transform_indices = @transform_3, window_bounds = array<i64: 32, 512>}]} {
    %c0 = arith.constant 0 : index
    %c0_0 = arith.constant 0 : index
    %0 = vector.load %arg2[%c0, %c0_0] : memref<32x512xf32, #tpu.memory_space<vmem>>, vector<32x512xf32>
    %c0_1 = arith.constant 0 : index
    %c0_2 = arith.constant 0 : index
    %1 = vector.load %arg3[%c0_1, %c0_2] : memref<1x512xf32, #tpu.memory_space<vmem>>, vector<1x512xf32>
    %2 = vector.broadcast %1 : vector<1x512xf32> to vector<32x512xf32>
    %3 = arith.mulf %0, %2 : vector<32x512xf32>
    %c0_3 = arith.constant 0 : index
    %c0_4 = arith.constant 0 : index
    %4 = vector.load %arg4[%c0_3, %c0_4] : memref<1x512xf32, #tpu.memory_space<vmem>>, vector<1x512xf32>
    %5 = vector.broadcast %4 : vector<1x512xf32> to vector<32x512xf32>
    %6 = arith.addf %3, %5 : vector<32x512xf32>
    %cst = arith.constant 0.000000e+00 : f32
    %7 = vector.broadcast %cst : f32 to vector<32x512xf32>
    %8 = arith.maximumf %6, %7 : vector<32x512xf32>
    %9 = arith.truncf %8 : vector<32x512xf32> to vector<32x512xbf16>
    %c0_5 = arith.constant 0 : index
    %c0_6 = arith.constant 0 : index
    %10 = vector.load %arg5[%c0_5, %c0_6] : memref<32x512xbf16, #tpu.memory_space<vmem>>, vector<32x512xbf16>
    tpu.vector_store %arg5[%c0_5, %c0_6], %9 {strides = array<i32>} : memref<32x512xbf16, #tpu.memory_space<vmem>>, vector<32x512xbf16>,
    return
  }
  func.func @transform_0(%arg0: i32, %arg1: i32) -> (i32, i32) {
    %c0_i32 = arith.constant 0 : i32
    return %arg1, %arg0 : i32, i32
  }
  func.func @transform_1(%arg0: i32, %arg1: i32) -> (i32, i32) {
    %c0_i32 = arith.constant 0 : i32
    %c0_i32_0 = arith.constant 0 : i32
    return %c0_i32, %arg0 : i32, i32
  }
  func.func @transform_2(%arg0: i32, %arg1: i32) -> (i32, i32) {
    %c0_i32 = arith.constant 0 : i32
    %c0_i32_0 = arith.constant 0 : i32
    return %c0_i32, %arg0 : i32, i32
  }
  func.func @transform_3(%arg0: i32, %arg1: i32) -> (i32, i32) {
    %c0_i32 = arith.constant 0 : i32
    return %arg1, %arg0 : i32, i32
  }
}

module attributes {stable_mosaic.version = 11 : i64} {
  func.func @matmul_stats_kernel(%arg0: i32, %arg1: i32, %arg2: memref<128x512xbf16, #tpu.memory_space<vmem>>, %arg3: memref<512x512xbf16, #tpu.memory_space<vmem>>, %arg4: memref<128x512xf32, #tpu.memory_space<vmem>>, %arg5: memref<1x512xf32, #tpu.memory_space<vmem>>, %arg6: memref<1x512xf32, #tpu.memory_space<vmem>>) attributes {dimension_semantics = [#tpu.dimension_semantics<parallel>, #tpu.dimension_semantics<arbitrary>], iteration_bounds = array<i64: 2, 1>, scalar_prefetch = 0 : i64, scratch_operands = 0 : i64, tpu.core_type = #tpu.core_type<tc>, window_params = [{transform_indices = @transform_0, window_bounds = array<i64: 128, 512>}, {transform_indices = @transform_1, window_bounds = array<i64: 512, 512>}, {transform_indices = @transform_2, window_bounds = array<i64: 128, 512>}, {transform_indices = @transform_3, window_bounds = array<i64: 1, 512>}, {transform_indices = @transform_4, window_bounds = array<i64: 1, 512>}]} {
    %c0 = arith.constant 0 : index
    %c0_0 = arith.constant 0 : index
    %0 = vector.load %arg2[%c0, %c0_0] : memref<128x512xbf16, #tpu.memory_space<vmem>>, vector<128x512xbf16>
    %c0_1 = arith.constant 0 : index
    %c0_2 = arith.constant 0 : index
    %1 = vector.load %arg3[%c0_1, %c0_2] : memref<512x512xbf16, #tpu.memory_space<vmem>>, vector<512x512xbf16>
    %cst = arith.constant dense<0.000000e+00> : vector<128x512xf32>
    %2 = tpu.matmul %0, %1, %cst {dimension_numbers = #tpu.dot_dimension_numbers<[1], [0], [0], [1], [0, 0, 1, 1], [], []>} : vector<128x512xbf16>, vector<512x512xbf16>, vector<128x512xf32> -> vector<128x512xf32>
    %c0_3 = arith.constant 0 : index
    %c0_4 = arith.constant 0 : index
    %3 = vector.load %arg4[%c0_3, %c0_4] : memref<128x512xf32, #tpu.memory_space<vmem>>, vector<128x512xf32>
    tpu.vector_store %arg4[%c0_3, %c0_4], %2 {strides = array<i32>} : memref<128x512xf32, #tpu.memory_space<vmem>>, vector<128x512xf32>,
    %c0_i32 = arith.constant 0 : i32
    %4 = arith.cmpi eq, %arg1, %c0_i32 : i32
    %5 = arith.extui %4 : i1 to i32
    %c0_i32_5 = arith.constant 0 : i32
    %6 = arith.cmpi ne, %5, %c0_i32_5 : i32
    scf.if %6 {
      %cst_16 = arith.constant 0.000000e+00 : f32
      %18 = vector.broadcast %cst_16 : f32 to vector<1x512xf32>
      %c0_17 = arith.constant 0 : index
      %c0_18 = arith.constant 0 : index
      %19 = vector.load %arg5[%c0_17, %c0_18] : memref<1x512xf32, #tpu.memory_space<vmem>>, vector<1x512xf32>
      tpu.vector_store %arg5[%c0_17, %c0_18], %18 {strides = array<i32>} : memref<1x512xf32, #tpu.memory_space<vmem>>, vector<1x512xf32>,
      %cst_19 = arith.constant 0.000000e+00 : f32
      %20 = vector.broadcast %cst_19 : f32 to vector<1x512xf32>
      %c0_20 = arith.constant 0 : index
      %c0_21 = arith.constant 0 : index
      %21 = vector.load %arg6[%c0_20, %c0_21] : memref<1x512xf32, #tpu.memory_space<vmem>>, vector<1x512xf32>
      tpu.vector_store %arg6[%c0_20, %c0_21], %20 {strides = array<i32>} : memref<1x512xf32, #tpu.memory_space<vmem>>, vector<1x512xf32>,
    } else {
    }
    %c0_6 = arith.constant 0 : index
    %c0_7 = arith.constant 0 : index
    %7 = vector.load %arg5[%c0_6, %c0_7] : memref<1x512xf32, #tpu.memory_space<vmem>>, vector<1x512xf32>
    %cst_8 = arith.constant dense<0.000000e+00> : vector<512xf32>
    %8 = vector.multi_reduction <add>, %2, %cst_8 [0] : vector<128x512xf32> to vector<512xf32>
    %9 = vector.shape_cast %8 : vector<512xf32> to vector<1x512xf32>
    %10 = arith.addf %7, %9 : vector<1x512xf32>
    %c0_9 = arith.constant 0 : index
    %c0_10 = arith.constant 0 : index
    %11 = vector.load %arg5[%c0_9, %c0_10] : memref<1x512xf32, #tpu.memory_space<vmem>>, vector<1x512xf32>
    tpu.vector_store %arg5[%c0_9, %c0_10], %10 {strides = array<i32>} : memref<1x512xf32, #tpu.memory_space<vmem>>, vector<1x512xf32>,
    %c0_11 = arith.constant 0 : index
    %c0_12 = arith.constant 0 : index
    %12 = vector.load %arg6[%c0_11, %c0_12] : memref<1x512xf32, #tpu.memory_space<vmem>>, vector<1x512xf32>
    %13 = arith.mulf %2, %2 : vector<128x512xf32>
    %cst_13 = arith.constant dense<0.000000e+00> : vector<512xf32>
    %14 = vector.multi_reduction <add>, %13, %cst_13 [0] : vector<128x512xf32> to vector<512xf32>
    %15 = vector.shape_cast %14 : vector<512xf32> to vector<1x512xf32>
    %16 = arith.addf %12, %15 : vector<1x512xf32>
    %c0_14 = arith.constant 0 : index
    %c0_15 = arith.constant 0 : index
    %17 = vector.load %arg6[%c0_14, %c0_15] : memref<1x512xf32, #tpu.memory_space<vmem>>, vector<1x512xf32>
    tpu.vector_store %arg6[%c0_14, %c0_15], %16 {strides = array<i32>} : memref<1x512xf32, #tpu.memory_space<vmem>>, vector<1x512xf32>,
    return
  }
  func.func @transform_0(%arg0: i32, %arg1: i32) -> (i32, i32) {
    %c0_i32 = arith.constant 0 : i32
    %c0_i32_0 = arith.constant 0 : i32
    return %arg1, %c0_i32 : i32, i32
  }
  func.func @transform_1(%arg0: i32, %arg1: i32) -> (i32, i32) {
    %c0_i32 = arith.constant 0 : i32
    %c0_i32_0 = arith.constant 0 : i32
    return %c0_i32, %arg0 : i32, i32
  }
  func.func @transform_2(%arg0: i32, %arg1: i32) -> (i32, i32) {
    %c0_i32 = arith.constant 0 : i32
    return %arg1, %arg0 : i32, i32
  }
  func.func @transform_3(%arg0: i32, %arg1: i32) -> (i32, i32) {
    %c0_i32 = arith.constant 0 : i32
    %c0_i32_0 = arith.constant 0 : i32
    return %c0_i32, %arg0 : i32, i32
  }
  func.func @transform_4(%arg0: i32, %arg1: i32) -> (i32, i32) {
    %c0_i32 = arith.constant 0 : i32
    %c0_i32_0 = arith.constant 0 : i32
    return %c0_i32, %arg0 : i32, i32
  }
}

module attributes {stable_mosaic.version = 11 : i64} {
  func.func @bn_relu_kernel(%arg0: i32, %arg1: i32, %arg2: memref<128x512xf32, #tpu.memory_space<vmem>>, %arg3: memref<1x512xf32, #tpu.memory_space<vmem>>, %arg4: memref<1x512xf32, #tpu.memory_space<vmem>>, %arg5: memref<128x512xbf16, #tpu.memory_space<vmem>>) attributes {dimension_semantics = [#tpu.dimension_semantics<parallel>, #tpu.dimension_semantics<parallel>], iteration_bounds = array<i64: 2, 1>, scalar_prefetch = 0 : i64, scratch_operands = 0 : i64, tpu.core_type = #tpu.core_type<tc>, window_params = [{transform_indices = @transform_0, window_bounds = array<i64: 128, 512>}, {transform_indices = @transform_1, window_bounds = array<i64: 1, 512>}, {transform_indices = @transform_2, window_bounds = array<i64: 1, 512>}, {transform_indices = @transform_3, window_bounds = array<i64: 128, 512>}]} {
    %c0 = arith.constant 0 : index
    %c0_0 = arith.constant 0 : index
    %0 = vector.load %arg2[%c0, %c0_0] : memref<128x512xf32, #tpu.memory_space<vmem>>, vector<128x512xf32>
    %c0_1 = arith.constant 0 : index
    %c0_2 = arith.constant 0 : index
    %1 = vector.load %arg3[%c0_1, %c0_2] : memref<1x512xf32, #tpu.memory_space<vmem>>, vector<1x512xf32>
    %2 = vector.broadcast %1 : vector<1x512xf32> to vector<128x512xf32>
    %3 = arith.mulf %0, %2 : vector<128x512xf32>
    %c0_3 = arith.constant 0 : index
    %c0_4 = arith.constant 0 : index
    %4 = vector.load %arg4[%c0_3, %c0_4] : memref<1x512xf32, #tpu.memory_space<vmem>>, vector<1x512xf32>
    %5 = vector.broadcast %4 : vector<1x512xf32> to vector<128x512xf32>
    %6 = arith.addf %3, %5 : vector<128x512xf32>
    %cst = arith.constant 0.000000e+00 : f32
    %7 = vector.broadcast %cst : f32 to vector<128x512xf32>
    %8 = arith.maximumf %6, %7 : vector<128x512xf32>
    %9 = arith.truncf %8 : vector<128x512xf32> to vector<128x512xbf16>
    %c0_5 = arith.constant 0 : index
    %c0_6 = arith.constant 0 : index
    %10 = vector.load %arg5[%c0_5, %c0_6] : memref<128x512xbf16, #tpu.memory_space<vmem>>, vector<128x512xbf16>
    tpu.vector_store %arg5[%c0_5, %c0_6], %9 {strides = array<i32>} : memref<128x512xbf16, #tpu.memory_space<vmem>>, vector<128x512xbf16>,
    return
  }
  func.func @transform_0(%arg0: i32, %arg1: i32) -> (i32, i32) {
    %c0_i32 = arith.constant 0 : i32
    return %arg1, %arg0 : i32, i32
  }
  func.func @transform_1(%arg0: i32, %arg1: i32) -> (i32, i32) {
    %c0_i32 = arith.constant 0 : i32
    %c0_i32_0 = arith.constant 0 : i32
    return %c0_i32, %arg0 : i32, i32
  }
  func.func @transform_2(%arg0: i32, %arg1: i32) -> (i32, i32) {
    %c0_i32 = arith.constant 0 : i32
    %c0_i32_0 = arith.constant 0 : i32
    return %c0_i32, %arg0 : i32, i32
  }
  func.func @transform_3(%arg0: i32, %arg1: i32) -> (i32, i32) {
    %c0_i32 = arith.constant 0 : i32
    return %arg1, %arg0 : i32, i32
  }
}

module attributes {stable_mosaic.version = 11 : i64} {
  func.func @matmul_stats_kernel(%arg0: i32, %arg1: i32, %arg2: memref<512x256xbf16, #tpu.memory_space<vmem>>, %arg3: memref<256x256xbf16, #tpu.memory_space<vmem>>, %arg4: memref<512x256xf32, #tpu.memory_space<vmem>>, %arg5: memref<1x256xf32, #tpu.memory_space<vmem>>, %arg6: memref<1x256xf32, #tpu.memory_space<vmem>>) attributes {dimension_semantics = [#tpu.dimension_semantics<parallel>, #tpu.dimension_semantics<arbitrary>], iteration_bounds = array<i64: 2, 1>, scalar_prefetch = 0 : i64, scratch_operands = 0 : i64, tpu.core_type = #tpu.core_type<tc>, window_params = [{transform_indices = @transform_0, window_bounds = array<i64: 512, 256>}, {transform_indices = @transform_1, window_bounds = array<i64: 256, 256>}, {transform_indices = @transform_2, window_bounds = array<i64: 512, 256>}, {transform_indices = @transform_3, window_bounds = array<i64: 1, 256>}, {transform_indices = @transform_4, window_bounds = array<i64: 1, 256>}]} {
    %c0 = arith.constant 0 : index
    %c0_0 = arith.constant 0 : index
    %0 = vector.load %arg2[%c0, %c0_0] : memref<512x256xbf16, #tpu.memory_space<vmem>>, vector<512x256xbf16>
    %c0_1 = arith.constant 0 : index
    %c0_2 = arith.constant 0 : index
    %1 = vector.load %arg3[%c0_1, %c0_2] : memref<256x256xbf16, #tpu.memory_space<vmem>>, vector<256x256xbf16>
    %cst = arith.constant dense<0.000000e+00> : vector<512x256xf32>
    %2 = tpu.matmul %0, %1, %cst {dimension_numbers = #tpu.dot_dimension_numbers<[1], [0], [0], [1], [0, 0, 1, 1], [], []>} : vector<512x256xbf16>, vector<256x256xbf16>, vector<512x256xf32> -> vector<512x256xf32>
    %c0_3 = arith.constant 0 : index
    %c0_4 = arith.constant 0 : index
    %3 = vector.load %arg4[%c0_3, %c0_4] : memref<512x256xf32, #tpu.memory_space<vmem>>, vector<512x256xf32>
    tpu.vector_store %arg4[%c0_3, %c0_4], %2 {strides = array<i32>} : memref<512x256xf32, #tpu.memory_space<vmem>>, vector<512x256xf32>,
    %c0_i32 = arith.constant 0 : i32
    %4 = arith.cmpi eq, %arg1, %c0_i32 : i32
    %5 = arith.extui %4 : i1 to i32
    %c0_i32_5 = arith.constant 0 : i32
    %6 = arith.cmpi ne, %5, %c0_i32_5 : i32
    scf.if %6 {
      %cst_16 = arith.constant 0.000000e+00 : f32
      %18 = vector.broadcast %cst_16 : f32 to vector<1x256xf32>
      %c0_17 = arith.constant 0 : index
      %c0_18 = arith.constant 0 : index
      %19 = vector.load %arg5[%c0_17, %c0_18] : memref<1x256xf32, #tpu.memory_space<vmem>>, vector<1x256xf32>
      tpu.vector_store %arg5[%c0_17, %c0_18], %18 {strides = array<i32>} : memref<1x256xf32, #tpu.memory_space<vmem>>, vector<1x256xf32>,
      %cst_19 = arith.constant 0.000000e+00 : f32
      %20 = vector.broadcast %cst_19 : f32 to vector<1x256xf32>
      %c0_20 = arith.constant 0 : index
      %c0_21 = arith.constant 0 : index
      %21 = vector.load %arg6[%c0_20, %c0_21] : memref<1x256xf32, #tpu.memory_space<vmem>>, vector<1x256xf32>
      tpu.vector_store %arg6[%c0_20, %c0_21], %20 {strides = array<i32>} : memref<1x256xf32, #tpu.memory_space<vmem>>, vector<1x256xf32>,
    } else {
    }
    %c0_6 = arith.constant 0 : index
    %c0_7 = arith.constant 0 : index
    %7 = vector.load %arg5[%c0_6, %c0_7] : memref<1x256xf32, #tpu.memory_space<vmem>>, vector<1x256xf32>
    %cst_8 = arith.constant dense<0.000000e+00> : vector<256xf32>
    %8 = vector.multi_reduction <add>, %2, %cst_8 [0] : vector<512x256xf32> to vector<256xf32>
    %9 = vector.shape_cast %8 : vector<256xf32> to vector<1x256xf32>
    %10 = arith.addf %7, %9 : vector<1x256xf32>
    %c0_9 = arith.constant 0 : index
    %c0_10 = arith.constant 0 : index
    %11 = vector.load %arg5[%c0_9, %c0_10] : memref<1x256xf32, #tpu.memory_space<vmem>>, vector<1x256xf32>
    tpu.vector_store %arg5[%c0_9, %c0_10], %10 {strides = array<i32>} : memref<1x256xf32, #tpu.memory_space<vmem>>, vector<1x256xf32>,
    %c0_11 = arith.constant 0 : index
    %c0_12 = arith.constant 0 : index
    %12 = vector.load %arg6[%c0_11, %c0_12] : memref<1x256xf32, #tpu.memory_space<vmem>>, vector<1x256xf32>
    %13 = arith.mulf %2, %2 : vector<512x256xf32>
    %cst_13 = arith.constant dense<0.000000e+00> : vector<256xf32>
    %14 = vector.multi_reduction <add>, %13, %cst_13 [0] : vector<512x256xf32> to vector<256xf32>
    %15 = vector.shape_cast %14 : vector<256xf32> to vector<1x256xf32>
    %16 = arith.addf %12, %15 : vector<1x256xf32>
    %c0_14 = arith.constant 0 : index
    %c0_15 = arith.constant 0 : index
    %17 = vector.load %arg6[%c0_14, %c0_15] : memref<1x256xf32, #tpu.memory_space<vmem>>, vector<1x256xf32>
    tpu.vector_store %arg6[%c0_14, %c0_15], %16 {strides = array<i32>} : memref<1x256xf32, #tpu.memory_space<vmem>>, vector<1x256xf32>,
    return
  }
  func.func @transform_0(%arg0: i32, %arg1: i32) -> (i32, i32) {
    %c0_i32 = arith.constant 0 : i32
    %c0_i32_0 = arith.constant 0 : i32
    return %arg1, %c0_i32 : i32, i32
  }
  func.func @transform_1(%arg0: i32, %arg1: i32) -> (i32, i32) {
    %c0_i32 = arith.constant 0 : i32
    %c0_i32_0 = arith.constant 0 : i32
    return %c0_i32, %arg0 : i32, i32
  }
  func.func @transform_2(%arg0: i32, %arg1: i32) -> (i32, i32) {
    %c0_i32 = arith.constant 0 : i32
    return %arg1, %arg0 : i32, i32
  }
  func.func @transform_3(%arg0: i32, %arg1: i32) -> (i32, i32) {
    %c0_i32 = arith.constant 0 : i32
    %c0_i32_0 = arith.constant 0 : i32
    return %c0_i32, %arg0 : i32, i32
  }
  func.func @transform_4(%arg0: i32, %arg1: i32) -> (i32, i32) {
    %c0_i32 = arith.constant 0 : i32
    %c0_i32_0 = arith.constant 0 : i32
    return %c0_i32, %arg0 : i32, i32
  }
}

module attributes {stable_mosaic.version = 11 : i64} {
  func.func @bn_relu_kernel(%arg0: i32, %arg1: i32, %arg2: memref<512x256xf32, #tpu.memory_space<vmem>>, %arg3: memref<1x256xf32, #tpu.memory_space<vmem>>, %arg4: memref<1x256xf32, #tpu.memory_space<vmem>>, %arg5: memref<512x256xbf16, #tpu.memory_space<vmem>>) attributes {dimension_semantics = [#tpu.dimension_semantics<parallel>, #tpu.dimension_semantics<parallel>], iteration_bounds = array<i64: 2, 1>, scalar_prefetch = 0 : i64, scratch_operands = 0 : i64, tpu.core_type = #tpu.core_type<tc>, window_params = [{transform_indices = @transform_0, window_bounds = array<i64: 512, 256>}, {transform_indices = @transform_1, window_bounds = array<i64: 1, 256>}, {transform_indices = @transform_2, window_bounds = array<i64: 1, 256>}, {transform_indices = @transform_3, window_bounds = array<i64: 512, 256>}]} {
    %c0 = arith.constant 0 : index
    %c0_0 = arith.constant 0 : index
    %0 = vector.load %arg2[%c0, %c0_0] : memref<512x256xf32, #tpu.memory_space<vmem>>, vector<512x256xf32>
    %c0_1 = arith.constant 0 : index
    %c0_2 = arith.constant 0 : index
    %1 = vector.load %arg3[%c0_1, %c0_2] : memref<1x256xf32, #tpu.memory_space<vmem>>, vector<1x256xf32>
    %2 = vector.broadcast %1 : vector<1x256xf32> to vector<512x256xf32>
    %3 = arith.mulf %0, %2 : vector<512x256xf32>
    %c0_3 = arith.constant 0 : index
    %c0_4 = arith.constant 0 : index
    %4 = vector.load %arg4[%c0_3, %c0_4] : memref<1x256xf32, #tpu.memory_space<vmem>>, vector<1x256xf32>
    %5 = vector.broadcast %4 : vector<1x256xf32> to vector<512x256xf32>
    %6 = arith.addf %3, %5 : vector<512x256xf32>
    %cst = arith.constant 0.000000e+00 : f32
    %7 = vector.broadcast %cst : f32 to vector<512x256xf32>
    %8 = arith.maximumf %6, %7 : vector<512x256xf32>
    %9 = arith.truncf %8 : vector<512x256xf32> to vector<512x256xbf16>
    %c0_5 = arith.constant 0 : index
    %c0_6 = arith.constant 0 : index
    %10 = vector.load %arg5[%c0_5, %c0_6] : memref<512x256xbf16, #tpu.memory_space<vmem>>, vector<512x256xbf16>
    tpu.vector_store %arg5[%c0_5, %c0_6], %9 {strides = array<i32>} : memref<512x256xbf16, #tpu.memory_space<vmem>>, vector<512x256xbf16>,
    return
  }
  func.func @transform_0(%arg0: i32, %arg1: i32) -> (i32, i32) {
    %c0_i32 = arith.constant 0 : i32
    return %arg1, %arg0 : i32, i32
  }
  func.func @transform_1(%arg0: i32, %arg1: i32) -> (i32, i32) {
    %c0_i32 = arith.constant 0 : i32
    %c0_i32_0 = arith.constant 0 : i32
    return %c0_i32, %arg0 : i32, i32
  }
  func.func @transform_2(%arg0: i32, %arg1: i32) -> (i32, i32) {
    %c0_i32 = arith.constant 0 : i32
    %c0_i32_0 = arith.constant 0 : i32
    return %c0_i32, %arg0 : i32, i32
  }
  func.func @transform_3(%arg0: i32, %arg1: i32) -> (i32, i32) {
    %c0_i32 = arith.constant 0 : i32
    return %arg1, %arg0 : i32, i32
  }
}

module attributes {stable_mosaic.version = 11 : i64} {
  func.func @matmul_stats_kernel(%arg0: i32, %arg1: i32, %arg2: memref<512x128xbf16, #tpu.memory_space<vmem>>, %arg3: memref<128x128xbf16, #tpu.memory_space<vmem>>, %arg4: memref<512x128xf32, #tpu.memory_space<vmem>>, %arg5: memref<1x128xf32, #tpu.memory_space<vmem>>, %arg6: memref<1x128xf32, #tpu.memory_space<vmem>>) attributes {dimension_semantics = [#tpu.dimension_semantics<parallel>, #tpu.dimension_semantics<arbitrary>], iteration_bounds = array<i64: 2, 4>, scalar_prefetch = 0 : i64, scratch_operands = 0 : i64, tpu.core_type = #tpu.core_type<tc>, window_params = [{transform_indices = @transform_0, window_bounds = array<i64: 512, 128>}, {transform_indices = @transform_1, window_bounds = array<i64: 128, 128>}, {transform_indices = @transform_2, window_bounds = array<i64: 512, 128>}, {transform_indices = @transform_3, window_bounds = array<i64: 1, 128>}, {transform_indices = @transform_4, window_bounds = array<i64: 1, 128>}]} {
    %c0 = arith.constant 0 : index
    %c0_0 = arith.constant 0 : index
    %0 = vector.load %arg2[%c0, %c0_0] : memref<512x128xbf16, #tpu.memory_space<vmem>>, vector<512x128xbf16>
    %c0_1 = arith.constant 0 : index
    %c0_2 = arith.constant 0 : index
    %1 = vector.load %arg3[%c0_1, %c0_2] : memref<128x128xbf16, #tpu.memory_space<vmem>>, vector<128x128xbf16>
    %cst = arith.constant dense<0.000000e+00> : vector<512x128xf32>
    %2 = tpu.matmul %0, %1, %cst {dimension_numbers = #tpu.dot_dimension_numbers<[1], [0], [0], [1], [0, 0, 1, 1], [], []>} : vector<512x128xbf16>, vector<128x128xbf16>, vector<512x128xf32> -> vector<512x128xf32>
    %c0_3 = arith.constant 0 : index
    %c0_4 = arith.constant 0 : index
    %3 = vector.load %arg4[%c0_3, %c0_4] : memref<512x128xf32, #tpu.memory_space<vmem>>, vector<512x128xf32>
    tpu.vector_store %arg4[%c0_3, %c0_4], %2 {strides = array<i32>} : memref<512x128xf32, #tpu.memory_space<vmem>>, vector<512x128xf32>,
    %c0_i32 = arith.constant 0 : i32
    %4 = arith.cmpi eq, %arg1, %c0_i32 : i32
    %5 = arith.extui %4 : i1 to i32
    %c0_i32_5 = arith.constant 0 : i32
    %6 = arith.cmpi ne, %5, %c0_i32_5 : i32
    scf.if %6 {
      %cst_16 = arith.constant 0.000000e+00 : f32
      %18 = vector.broadcast %cst_16 : f32 to vector<1x128xf32>
      %c0_17 = arith.constant 0 : index
      %c0_18 = arith.constant 0 : index
      %19 = vector.load %arg5[%c0_17, %c0_18] : memref<1x128xf32, #tpu.memory_space<vmem>>, vector<1x128xf32>
      tpu.vector_store %arg5[%c0_17, %c0_18], %18 {strides = array<i32>} : memref<1x128xf32, #tpu.memory_space<vmem>>, vector<1x128xf32>,
      %cst_19 = arith.constant 0.000000e+00 : f32
      %20 = vector.broadcast %cst_19 : f32 to vector<1x128xf32>
      %c0_20 = arith.constant 0 : index
      %c0_21 = arith.constant 0 : index
      %21 = vector.load %arg6[%c0_20, %c0_21] : memref<1x128xf32, #tpu.memory_space<vmem>>, vector<1x128xf32>
      tpu.vector_store %arg6[%c0_20, %c0_21], %20 {strides = array<i32>} : memref<1x128xf32, #tpu.memory_space<vmem>>, vector<1x128xf32>,
    } else {
    }
    %c0_6 = arith.constant 0 : index
    %c0_7 = arith.constant 0 : index
    %7 = vector.load %arg5[%c0_6, %c0_7] : memref<1x128xf32, #tpu.memory_space<vmem>>, vector<1x128xf32>
    %cst_8 = arith.constant dense<0.000000e+00> : vector<128xf32>
    %8 = vector.multi_reduction <add>, %2, %cst_8 [0] : vector<512x128xf32> to vector<128xf32>
    %9 = vector.shape_cast %8 : vector<128xf32> to vector<1x128xf32>
    %10 = arith.addf %7, %9 : vector<1x128xf32>
    %c0_9 = arith.constant 0 : index
    %c0_10 = arith.constant 0 : index
    %11 = vector.load %arg5[%c0_9, %c0_10] : memref<1x128xf32, #tpu.memory_space<vmem>>, vector<1x128xf32>
    tpu.vector_store %arg5[%c0_9, %c0_10], %10 {strides = array<i32>} : memref<1x128xf32, #tpu.memory_space<vmem>>, vector<1x128xf32>,
    %c0_11 = arith.constant 0 : index
    %c0_12 = arith.constant 0 : index
    %12 = vector.load %arg6[%c0_11, %c0_12] : memref<1x128xf32, #tpu.memory_space<vmem>>, vector<1x128xf32>
    %13 = arith.mulf %2, %2 : vector<512x128xf32>
    %cst_13 = arith.constant dense<0.000000e+00> : vector<128xf32>
    %14 = vector.multi_reduction <add>, %13, %cst_13 [0] : vector<512x128xf32> to vector<128xf32>
    %15 = vector.shape_cast %14 : vector<128xf32> to vector<1x128xf32>
    %16 = arith.addf %12, %15 : vector<1x128xf32>
    %c0_14 = arith.constant 0 : index
    %c0_15 = arith.constant 0 : index
    %17 = vector.load %arg6[%c0_14, %c0_15] : memref<1x128xf32, #tpu.memory_space<vmem>>, vector<1x128xf32>
    tpu.vector_store %arg6[%c0_14, %c0_15], %16 {strides = array<i32>} : memref<1x128xf32, #tpu.memory_space<vmem>>, vector<1x128xf32>,
    return
  }
  func.func @transform_0(%arg0: i32, %arg1: i32) -> (i32, i32) {
    %c0_i32 = arith.constant 0 : i32
    %c0_i32_0 = arith.constant 0 : i32
    return %arg1, %c0_i32 : i32, i32
  }
  func.func @transform_1(%arg0: i32, %arg1: i32) -> (i32, i32) {
    %c0_i32 = arith.constant 0 : i32
    %c0_i32_0 = arith.constant 0 : i32
    return %c0_i32, %arg0 : i32, i32
  }
  func.func @transform_2(%arg0: i32, %arg1: i32) -> (i32, i32) {
    %c0_i32 = arith.constant 0 : i32
    return %arg1, %arg0 : i32, i32
  }
  func.func @transform_3(%arg0: i32, %arg1: i32) -> (i32, i32) {
    %c0_i32 = arith.constant 0 : i32
    %c0_i32_0 = arith.constant 0 : i32
    return %c0_i32, %arg0 : i32, i32
  }
  func.func @transform_4(%arg0: i32, %arg1: i32) -> (i32, i32) {
    %c0_i32 = arith.constant 0 : i32
    %c0_i32_0 = arith.constant 0 : i32
    return %c0_i32, %arg0 : i32, i32
  }
}

module attributes {stable_mosaic.version = 11 : i64} {
  func.func @bn_relu_kernel(%arg0: i32, %arg1: i32, %arg2: memref<512x128xf32, #tpu.memory_space<vmem>>, %arg3: memref<1x128xf32, #tpu.memory_space<vmem>>, %arg4: memref<1x128xf32, #tpu.memory_space<vmem>>, %arg5: memref<512x128xbf16, #tpu.memory_space<vmem>>) attributes {dimension_semantics = [#tpu.dimension_semantics<parallel>, #tpu.dimension_semantics<parallel>], iteration_bounds = array<i64: 2, 4>, scalar_prefetch = 0 : i64, scratch_operands = 0 : i64, tpu.core_type = #tpu.core_type<tc>, window_params = [{transform_indices = @transform_0, window_bounds = array<i64: 512, 128>}, {transform_indices = @transform_1, window_bounds = array<i64: 1, 128>}, {transform_indices = @transform_2, window_bounds = array<i64: 1, 128>}, {transform_indices = @transform_3, window_bounds = array<i64: 512, 128>}]} {
    %c0 = arith.constant 0 : index
    %c0_0 = arith.constant 0 : index
    %0 = vector.load %arg2[%c0, %c0_0] : memref<512x128xf32, #tpu.memory_space<vmem>>, vector<512x128xf32>
    %c0_1 = arith.constant 0 : index
    %c0_2 = arith.constant 0 : index
    %1 = vector.load %arg3[%c0_1, %c0_2] : memref<1x128xf32, #tpu.memory_space<vmem>>, vector<1x128xf32>
    %2 = vector.broadcast %1 : vector<1x128xf32> to vector<512x128xf32>
    %3 = arith.mulf %0, %2 : vector<512x128xf32>
    %c0_3 = arith.constant 0 : index
    %c0_4 = arith.constant 0 : index
    %4 = vector.load %arg4[%c0_3, %c0_4] : memref<1x128xf32, #tpu.memory_space<vmem>>, vector<1x128xf32>
    %5 = vector.broadcast %4 : vector<1x128xf32> to vector<512x128xf32>
    %6 = arith.addf %3, %5 : vector<512x128xf32>
    %cst = arith.constant 0.000000e+00 : f32
    %7 = vector.broadcast %cst : f32 to vector<512x128xf32>
    %8 = arith.maximumf %6, %7 : vector<512x128xf32>
    %9 = arith.truncf %8 : vector<512x128xf32> to vector<512x128xbf16>
    %c0_5 = arith.constant 0 : index
    %c0_6 = arith.constant 0 : index
    %10 = vector.load %arg5[%c0_5, %c0_6] : memref<512x128xbf16, #tpu.memory_space<vmem>>, vector<512x128xbf16>
    tpu.vector_store %arg5[%c0_5, %c0_6], %9 {strides = array<i32>} : memref<512x128xbf16, #tpu.memory_space<vmem>>, vector<512x128xbf16>,
    return
  }
  func.func @transform_0(%arg0: i32, %arg1: i32) -> (i32, i32) {
    %c0_i32 = arith.constant 0 : i32
    return %arg1, %arg0 : i32, i32
  }
  func.func @transform_1(%arg0: i32, %arg1: i32) -> (i32, i32) {
    %c0_i32 = arith.constant 0 : i32
    %c0_i32_0 = arith.constant 0 : i32
    return %c0_i32, %arg0 : i32, i32
  }
  func.func @transform_2(%arg0: i32, %arg1: i32) -> (i32, i32) {
    %c0_i32 = arith.constant 0 : i32
    %c0_i32_0 = arith.constant 0 : i32
    return %c0_i32, %arg0 : i32, i32
  }
  func.func @transform_3(%arg0: i32, %arg1: i32) -> (i32, i32) {
    %c0_i32 = arith.constant 0 : i32
    return %arg1, %arg0 : i32, i32
  }
}

module attributes {stable_mosaic.version = 11 : i64} {
  func.func @matmul_bias_kernel(%arg0: i32, %arg1: memref<512x64xbf16, #tpu.memory_space<vmem>>, %arg2: memref<64x128xbf16, #tpu.memory_space<vmem>>, %arg3: memref<1x128xf32, #tpu.memory_space<vmem>>, %arg4: memref<512x128xf32, #tpu.memory_space<vmem>>) attributes {dimension_semantics = [#tpu.dimension_semantics<parallel>], iteration_bounds = array<i64: 16>, scalar_prefetch = 0 : i64, scratch_operands = 0 : i64, tpu.core_type = #tpu.core_type<tc>, window_params = [{transform_indices = @transform_0, window_bounds = array<i64: 512, 64>}, {pipeline_mode = #tpu.pipeline_mode<synchronous>, transform_indices = @transform_1, window_bounds = array<i64: 64, 128>}, {pipeline_mode = #tpu.pipeline_mode<synchronous>, transform_indices = @transform_2, window_bounds = array<i64: 1, 128>}, {transform_indices = @transform_3, window_bounds = array<i64: 512, 128>}]} {
    %c0 = arith.constant 0 : index
    %c0_0 = arith.constant 0 : index
    %0 = vector.load %arg1[%c0, %c0_0] : memref<512x64xbf16, #tpu.memory_space<vmem>>, vector<512x64xbf16>
    %c0_1 = arith.constant 0 : index
    %c0_2 = arith.constant 0 : index
    %1 = vector.load %arg2[%c0_1, %c0_2] : memref<64x128xbf16, #tpu.memory_space<vmem>>, vector<64x128xbf16>
    %cst = arith.constant dense<0.000000e+00> : vector<512x128xf32>
    %2 = tpu.matmul %0, %1, %cst {dimension_numbers = #tpu.dot_dimension_numbers<[1], [0], [0], [1], [0, 0, 1, 1], [], []>} : vector<512x64xbf16>, vector<64x128xbf16>, vector<512x128xf32> -> vector<512x128xf32>
    %c0_3 = arith.constant 0 : index
    %c0_4 = arith.constant 0 : index
    %3 = vector.load %arg3[%c0_3, %c0_4] : memref<1x128xf32, #tpu.memory_space<vmem>>, vector<1x128xf32>
    %4 = vector.broadcast %3 : vector<1x128xf32> to vector<512x128xf32>
    %5 = arith.addf %2, %4 : vector<512x128xf32>
    %c0_5 = arith.constant 0 : index
    %c0_6 = arith.constant 0 : index
    %6 = vector.load %arg4[%c0_5, %c0_6] : memref<512x128xf32, #tpu.memory_space<vmem>>, vector<512x128xf32>
    tpu.vector_store %arg4[%c0_5, %c0_6], %5 {strides = array<i32>} : memref<512x128xf32, #tpu.memory_space<vmem>>, vector<512x128xf32>,
    return
  }
  func.func @transform_0(%arg0: i32) -> (i32, i32) {
    %c0_i32 = arith.constant 0 : i32
    %c0_i32_0 = arith.constant 0 : i32
    return %arg0, %c0_i32 : i32, i32
  }
  func.func @transform_1(%arg0: i32) -> (i32, i32) {
    %c0_i32 = arith.constant 0 : i32
    %c0_i32_0 = arith.constant 0 : i32
    %c0_i32_1 = arith.constant 0 : i32
    return %c0_i32, %c0_i32_0 : i32, i32
  }
  func.func @transform_2(%arg0: i32) -> (i32, i32) {
    %c0_i32 = arith.constant 0 : i32
    %c0_i32_0 = arith.constant 0 : i32
    %c0_i32_1 = arith.constant 0 : i32
    return %c0_i32, %c0_i32_0 : i32, i32
  }
  func.func @transform_3(%arg0: i32) -> (i32, i32) {
    %c0_i32 = arith.constant 0 : i32
    %c0_i32_0 = arith.constant 0 : i32
    return %arg0, %c0_i32 : i32, i32
  }
}

</mosaic_0001>

<bundles_post_ra>
// kernel: unet_decoder_forward.9
= control target key start
LH: loop header
LB: loop body
LE: loop exit
PB: predicated region body
PF: predicated region fallthrough
CT: control target
= control target key end

     0   :  { %s1088_s15 = smov 0   ;;  %s1090_s16 = smov 0   ;;  %s1259_s0 = inlined_call_operand.vmem [shape: bf16[32,64], index: 0, kind: input, shape index: {}]   ;;  %s1260_s1 = inlined_call_operand.vmem [shape: bf16[64,2048], index: 1, kind: input, shape index: {}]   ;;  %s1261_s2 = inlined_call_operand.vmem [shape: f32[32,2048], index: 2, kind: output, shape index: {0}]   ;;  %s1262_s3 = inlined_call_operand.vmem [shape: f32[1,2048], index: 3, kind: output, shape index: {1}]   ;;  %s1263_s4 = inlined_call_operand.vmem [shape: f32[1,2048], index: 4, kind: output, shape index: {2}]  }
   0x1   :  { %s1092_s17 = smov 0   ;;  %s1094_s18 = smov 0  }
   0x2   :  { %s1096_s19 = smov 0  }
   0x3 LB: > { %s27_s20 = sadd.s32 1, %s1054_s18  ;;  %s909_s21 = sadd.s32 4294967295, %s1058_s19   ;;  %s1058_s19 = sphi %s1096_s19, %s15_s19   ;;  %s1054_s18 = sphi %s1094_s18, %s1270_s18   ;;  %s1050_s17 = sphi %s1092_s17, %s1269_s17   ;;  %s1046_s16 = sphi %s1090_s16, %s1268_s16   ;;  %s1042_s15 = sphi %s1088_s15, %s1267_s15  }
   0x4   : > { %p29_p0 = scmp.ge.s32.totalorder %s27_s20, 4  ;;  %p67_p1 = scmp.ne.s32.totalorder %s1046_s16, %s1042_s15 }
   0x5   : > { %p68_p2 = scmp.eq.s32.totalorder %s1058_s19, 0  ;;  %p99_p4 = scmp.eq.s32.totalorder %s909_s21, 3 }
   0x6   : > { %s1272_s20 = smov (%p29_p0, %s27_s20), 0  ;;  %s60_s23 = sadd.s32 1, %s1046_s16 }
   0x7   : > { %p69_p3 = por %p68_p2, %p67_p1  ;;  %s57_s22 = ssub.s32 %s1054_s18, %s1272_s20 }
   0x8   : > { %p58_p5 = scmp.eq.s32.totalorder %s57_s22, 0  ;;  %p1123_p6 = por %p99_p4, %p67_p1 }
   0x9   : > { %p913_p7 = scmp.ge.s32.totalorder %s1058_s19, 4 }
   0xa   : > { %s1128_s25 = scalar_select %p58_p5, %s1046_s16, %s60_s23  }
   0xb   : > { %182 = sbr.rel (%p913_p7) target bundleno = 30 (0x1e), region = 20 }
  0x12   : > { %185 = sbr.rel (!%p69_p3) target bundleno = 30 (0x1e), region = 24  ;;  %s187_s26 = sand.u32 (%p69_p3), 1, %s1046_s16  }
  0x13   : > { %s949_s27 = sshll.u32 (%p69_p3), %s1054_s18, 4  ;;  %s914_s28 = sshll.u32 (%p69_p3), %s187_s26, 7 }
  0x14   : > { %s1136_s5 = scalar_lea.vmem (%p69_p3), %s1260_s1, %s949_s27  ;;  %s189_s6 = scalar_lea.vmem (%p69_p3), [#allocation2], %s914_s28 }
  0x15   : > { %v205_v0 = vld [vmem:[%s1136_s5] sm:$0xff] (%p69_p3)  ;;  %v207_v1 = vld [vmem:[%s1136_s5 + $0x8] sm:$0xff] (%p69_p3) }
  0x16   : > { %v209_v2 = vld [vmem:[%s1136_s5 + $0x40] sm:$0xff] (%p69_p3)  ;;  %206 = vst [vmem:[%s189_s6] sm:$0xff] (%p69_p3), %v205_v0  ;;  %208 = vst [vmem:[%s189_s6 + $0x8] sm:$0xff] (%p69_p3), %v207_v1  ;;  %v211_v3 = vld [vmem:[%s1136_s5 + $0x48] sm:$0xff] (%p69_p3) }
  0x17   : > { %210 = vst [vmem:[%s189_s6 + $0x10] sm:$0xff] (%p69_p3), %v209_v2  ;;  %v213_v4 = vld [vmem:[%s1136_s5 + $0x80] sm:$0xff] (%p69_p3)  ;;  %v215_v5 = vld [vmem:[%s1136_s5 + $0x88] sm:$0xff] (%p69_p3)  ;;  %212 = vst [vmem:[%s189_s6 + $0x18] sm:$0xff] (%p69_p3), %v211_v3 }
  0x18   : > { %214 = vst [vmem:[%s189_s6 + $0x20] sm:$0xff] (%p69_p3), %v213_v4  ;;  %216 = vst [vmem:[%s189_s6 + $0x28] sm:$0xff] (%p69_p3), %v215_v5  ;;  %v217_v6 = vld [vmem:[%s1136_s5 + $0xc0] sm:$0xff] (%p69_p3)  ;;  %v219_v7 = vld [vmem:[%s1136_s5 + $0xc8] sm:$0xff] (%p69_p3) }
  0x19   : > { %v221_v8 = vld [vmem:[%s1136_s5 + $0x100] sm:$0xff]  ;;  %218 = vst [vmem:[%s189_s6 + $0x30] sm:$0xff] %v217_v6  ;;  %220 = vst [vmem:[%s189_s6 + $0x38] sm:$0xff] %v219_v7  ;;  %v223_v9 = vld [vmem:[%s1136_s5 + $0x108] sm:$0xff] }
  0x1a   : > { %222 = vst [vmem:[%s189_s6 + $0x40] sm:$0xff] %v221_v8  ;;  %v225_v10 = vld [vmem:[%s1136_s5 + $0x140] sm:$0xff]  ;;  %v227_v11 = vld [vmem:[%s1136_s5 + $0x148] sm:$0xff]  ;;  %224 = vst [vmem:[%s189_s6 + $0x48] sm:$0xff] %v223_v9 }
  0x1b   : > { %226 = vst [vmem:[%s189_s6 + $0x50] sm:$0xff] %v225_v10  ;;  %228 = vst [vmem:[%s189_s6 + $0x58] sm:$0xff] %v227_v11  ;;  %v229_v12 = vld [vmem:[%s1136_s5 + $0x180] sm:$0xff]  ;;  %v231_v13 = vld [vmem:[%s1136_s5 + $0x188] sm:$0xff] }
  0x1c   : > { %v233_v14 = vld [vmem:[%s1136_s5 + $0x1c0] sm:$0xff]  ;;  %230 = vst [vmem:[%s189_s6 + $0x60] sm:$0xff] %v229_v12  ;;  %232 = vst [vmem:[%s189_s6 + $0x68] sm:$0xff] %v231_v13  ;;  %v235_v15 = vld [vmem:[%s1136_s5 + $0x1c8] sm:$0xff] }
  0x1d   : > { %234 = vst [vmem:[%s189_s6 + $0x70] sm:$0xff] %v233_v14  ;;  %236 = vst [vmem:[%s189_s6 + $0x78] sm:$0xff] %v235_v15 }
  0x1e PF: > { %p917_p8 = scmp.ge.s32.totalorder %s1058_s19, 1  ;;  %p241_p9 = scmp.lt.s32.totalorder %s1058_s19, 5 }
  0x20   : > { %p242_p10 = pnand %p917_p8, %p241_p9 }
  0x21   : > { %s248_s7 = sand.u32 (!%p242_p10), 1, %s1042_s15   ;;  %v1060_v16 = vmov (!%p242_p10), 0   ;;  %v1018_v33 = vld [vmem:[%s1259_s0] sm:$0xff] (!%p242_p10)   ;;  %vm415_vm0 = vcmask (!%p242_p10), 523264   ;;  %v1019_v34 = vld [vmem:[%s1259_s0 + $0x8] sm:$0xff] (!%p242_p10)   ;;  %s920_s14 = sshll.u32 (!%p242_p10), %s1050_s17, 2  ;;  %v548_v35 = vlaneseq (!%p242_p10) }
  0x22   : > { %245 = sbr.rel (%p242_p10) target bundleno = 306 (0x132), region = 47  ;;  %s1157_s8 = sshll.u32 (!%p242_p10), %s248_s7, 7  ;;  %454 = vmatprep.mubr.bf16.mxu0 (!%p242_p10), %v1060_v16  ;;  %507 = vmatprep.mubr.bf16.mxu1 (!%p242_p10), %v1060_v16  ;;  %v1061_v37 = vmov (!%p242_p10), 0.0   ;;  %v1062_v42 = vmov (!%p242_p10), 1966171168  }
  0x23   : > { %s250_s9 = scalar_lea.vmem (!%p242_p10), [#allocation2], %s1157_s8  ;;  %p295_p11 = scmp.lt.s32.totalorder (!%p242_p10), %s920_s14, 15  ;;  %vm1172_vm1 = vcmp.lt.s32.totalorder (!%p242_p10), %v548_v35, 512  ;;  %v1192_v43 = vunpack.c.l.s4 (!%p242_p10), %v1062_v42  ;;  %v1201_v3 = vshrl.u32 (!%p242_p10), %v548_v35, 7 }
  0x24   : > { %v994_v17 = vld [vmem:[%s250_s9 + $0x4] ss:$16 sps:$4 sm:$0xff] (!%p242_p10)   ;;  %v996_v18 = vld [vmem:[%s250_s9 + $0xc] ss:$16 sps:$4 sm:$0xff] (!%p242_p10)   ;;  %v998_v19 = vld [vmem:[%s250_s9] ss:$16 sps:$4 sm:$0xff] (!%p242_p10)  }
  0x25   : > { %422 = vmatprep.subr.bf16.mxu0 (!%p242_p10), %v994_v17  ;;  %v999_v20 = vld [vmem:[%s250_s9 + $0x8] ss:$16 sps:$4 sm:$0xff] (!%p242_p10)   ;;  %475 = vmatprep.subr.bf16.mxu1 (!%p242_p10), %v996_v18  ;;  %v1000_v21 = vld [vmem:[%s250_s9 + $0x24] ss:$16 sps:$4 sm:$0xff] (!%p242_p10)   ;;  %v1002_v22 = vld [vmem:[%s250_s9 + $0x2c] ss:$16 sps:$4 sm:$0xff] (!%p242_p10)   ;;  %v599_v2 = vunpack.c.0.s8 (!%p242_p10), %v1192_v43 }
  0x26   : > { %423 = vmatpush1.bf16.msra.mxu0 (!%p242_p10), %v998_v19  ;;  %476 = vmatpush1.bf16.msra.mxu1 (!%p242_p10), %v999_v20  ;;  %v1004_v23 = vld [vmem:[%s250_s9 + $0x20] ss:$16 sps:$4 sm:$0xff] (!%p242_p10)   ;;  %v1005_v24 = vld [vmem:[%s250_s9 + $0x28] ss:$16 sps:$4 sm:$0xff] (!%p242_p10)   ;;  %v1006_v25 = vld [vmem:[%s250_s9 + $0x44] ss:$16 sps:$4 sm:$0xff] (!%p242_p10)  }
  0x27   : > { %424 = vmatprep.subr.bf16.mxu0 (!%p242_p10), %v1000_v21  ;;  %477 = vmatprep.subr.bf16.mxu1 (!%p242_p10), %v1002_v22  ;;  %v1008_v26 = vld [vmem:[%s250_s9 + $0x4c] ss:$16 sps:$4 sm:$0xff] (!%p242_p10)   ;;  %v1010_v27 = vld [vmem:[%s250_s9 + $0x40] ss:$16 sps:$4 sm:$0xff] (!%p242_p10)   ;;  %v1011_v28 = vld [vmem:[%s250_s9 + $0x48] ss:$16 sps:$4 sm:$0xff] (!%p242_p10)  }
  0x28   : > { %v1012_v29 = vld [vmem:[%s250_s9 + $0x64] ss:$16 sps:$4 sm:$0xff] (!%p242_p10)   ;;  %v1014_v30 = vld [vmem:[%s250_s9 + $0x6c] ss:$16 sps:$4 sm:$0xff] (!%p242_p10)   ;;  %v1016_v31 = vld [vmem:[%s250_s9 + $0x60] ss:$16 sps:$4 sm:$0xff] (!%p242_p10)  }
  0x29   : > { %v1017_v32 = vld [vmem:[%s250_s9 + $0x68] ss:$16 sps:$4 sm:$0xff]   ;;  %s1274_s14 = smov (!%p295_p11, %s920_s14), 15  ;;  %s1188_s28 = scalar_lea.vmem [#allocation3], %s1157_s8 }
  0x2a   : > { %425 = vmatpush1.bf16.msra.mxu0 %v1004_v23  ;;  %478 = vmatpush1.bf16.msra.mxu1 %v1005_v24  ;;  %s1170_s22 = scalar_lea.vmem %s1262_s3, %s1274_s14  ;;  %s1182_s27 = scalar_lea.vmem %s1263_s4, %s1274_s14 }
  0x2b   : > { %426 = vmatprep.subr.bf16.mxu0 %v1006_v25  ;;  %479 = vmatprep.subr.bf16.mxu1 %v1008_v26  ;;  %552 = vst.msk [vmem:[%s1170_s22] sm:$0xf] %vm1172_vm1, %v1061_v37  ;;  %553 = vst.msk [vmem:[%s1182_s27] sm:$0xf] %vm1172_vm1, %v1061_v37  ;;  %s950_s29 = sshll.u32 (%p1123_p6), %s1050_s17, 5 }
  0x2c   : > { %s730_s6 = scalar_lea.vmem (%p1123_p6), %s1261_s2, %s950_s29 }
  0x2e   : > { %427 = vmatpush1.bf16.msra.mxu0 %v1010_v27  ;;  %480 = vmatpush1.bf16.msra.mxu1 %v1011_v28 }
  0x2f   : > { %428 = vmatprep.subr.bf16.mxu0 %v1012_v29  ;;  %481 = vmatprep.subr.bf16.mxu1 %v1014_v30 }
  0x32   : > { %429 = vmatpush1.bf16.msra.mxu0 %v1016_v31  ;;  %482 = vmatpush1.bf16.msra.mxu1 %v1017_v32 }
  0x35   : > { %940 = vmatmul.mubr.msk.bf16.vlgmr.msra.gmra.mrb[0].mxu0 %vm415_vm0, %v1018_v33  ;;  %942 = vmatmul.mubr.msk.bf16.vlgmr.msra.gmra.mrb[0].mxu1 %vm415_vm0, %v1018_v33 }
  0x36   : > { %464 = vmatprep.mubr.bf16.mxu0 %v1060_v16  ;;  %517 = vmatprep.mubr.bf16.mxu1 %v1060_v16 }
  0x3d   : > { %941 = vmatmul.mubr.msk.bf16.gmra.mrb[4].mxu0 %vm415_vm0, %v1019_v34  ;;  %943 = vmatmul.mubr.msk.bf16.gmra.mrb[4].mxu1 %vm415_vm0, %v1019_v34 }
 0x108   : > { %v456_v38 = vpop.f32.mrb[0].mxu0  ;;  %v509_v39 = vpop.f32.mrb[0].mxu1 }
 0x109   : > { %528 = vst [vmem:[%s1188_s28] sm:$0xff] %v456_v38  ;;  %530 = vst [vmem:[%s1188_s28 + $0x10] sm:$0xff] %v509_v39  ;;  %v458_v40 = vpop.f32.mrb[1].mxu0  ;;  %v511_v41 = vpop.f32.mrb[1].mxu1  ;;  %v627_v44 = vmul.f32 %v456_v38, %v456_v38  ;;  %v629_v45 = vmul.f32 %v509_v39, %v509_v39 }
 0x10a   : > { %529 = vst [vmem:[%s1188_s28 + $0x8] sm:$0xff] %v458_v40  ;;  %v628_v46 = vmul.f32 %v458_v40, %v458_v40  ;;  %531 = vst [vmem:[%s1188_s28 + $0x18] sm:$0xff] %v511_v41  ;;  %v630_v47 = vmul.f32 %v511_v41, %v511_v41  ;;  %v460_v48 = vpop.f32.mrb[2].mxu0  ;;  %v513_v49 = vpop.f32.mrb[2].mxu1 }
 0x10b   : > { %532 = vst [vmem:[%s1188_s28 + $0x20] sm:$0xff] %v460_v48  ;;  %v555_v50 = vadd.f32 %v460_v48, %v456_v38  ;;  %v631_v51 = vmul.f32 %v460_v48, %v460_v48  ;;  %534 = vst [vmem:[%s1188_s28 + $0x30] sm:$0xff] %v513_v49  ;;  %v573_v52 = vadd.f32 %v513_v49, %v509_v39  ;;  %v462_v54 = vpop.f32.mrb[3].mxu0  ;;  %v515_v55 = vpop.f32.mrb[3].mxu1 }
 0x10c   : > { %v633_v53 = vmul.f32 %v513_v49, %v513_v49  ;;  %533 = vst [vmem:[%s1188_s28 + $0x28] sm:$0xff] %v462_v54  ;;  %v564_v56 = vadd.f32 %v462_v54, %v458_v40  ;;  %v632_v57 = vmul.f32 %v462_v54, %v462_v54  ;;  %535 = vst [vmem:[%s1188_s28 + $0x38] sm:$0xff] %v515_v55 }
 0x10d   : > { %v582_v58 = vadd.f32 %v515_v55, %v511_v41  ;;  %v634_v59 = vmul.f32 %v515_v55, %v515_v55  ;;  %v643_v60 = vadd.f32 %v631_v51, %v627_v44 }
 0x10e   : > { %v661_v61 = vadd.f32 %v633_v53, %v629_v45  ;;  %v652_v62 = vadd.f32 %v632_v57, %v628_v46 }
 0x10f   : > { %v670_v63 = vadd.f32 %v634_v59, %v630_v47 }
 0x110   : > { %v466_v0 = vpop.f32.mrb[4].mxu0  ;;  %v519_v1 = vpop.f32.mrb[4].mxu1 }
 0x111   : > { %536 = vst [vmem:[%s1188_s28 + $0x40] sm:$0xff] %v466_v0  ;;  %v556_v4 = vadd.f32 %v555_v50, %v466_v0  ;;  %v635_v5 = vmul.f32 %v466_v0, %v466_v0  ;;  %538 = vst [vmem:[%s1188_s28 + $0x50] sm:$0xff] %v519_v1  ;;  %v574_v6 = vadd.f32 %v573_v52, %v519_v1  ;;  %v468_v8 = vpop.f32.mrb[5].mxu0  ;;  %v521_v9 = vpop.f32.mrb[5].mxu1  ;;  %v749_v36 = vld [vmem:[%s1188_s28 + $0x18] sm:$0xff] (%p1123_p6) }
 0x112   : > { %v637_v7 = vmul.f32 %v519_v1, %v519_v1  ;;  %537 = vst [vmem:[%s1188_s28 + $0x48] sm:$0xff] %v468_v8  ;;  %v565_v10 = vadd.f32 %v564_v56, %v468_v8  ;;  %v636_v11 = vmul.f32 %v468_v8, %v468_v8  ;;  %539 = vst [vmem:[%s1188_s28 + $0x58] sm:$0xff] %v521_v9  ;;  %v470_v14 = vpop.f32.mrb[6].mxu0  ;;  %v523_v15 = vpop.f32.mrb[6].mxu1 }
 0x113   : > { %v583_v12 = vadd.f32 %v582_v58, %v521_v9  ;;  %v638_v13 = vmul.f32 %v521_v9, %v521_v9  ;;  %v644_v16 = vadd.f32 %v643_v60, %v635_v5  ;;  %540 = vst [vmem:[%s1188_s28 + $0x60] sm:$0xff] %v470_v14  ;;  %v557_v18 = vadd.f32 %v556_v4, %v470_v14  ;;  %v472_v20 = vpop.f32.mrb[7].mxu0  ;;  %v525_v21 = vpop.f32.mrb[7].mxu1 }
 0x114   : > { %v662_v17 = vadd.f32 %v661_v61, %v637_v7  ;;  %v639_v19 = vmul.f32 %v470_v14, %v470_v14  ;;  %542 = vst [vmem:[%s1188_s28 + $0x70] sm:$0xff] %v523_v15  ;;  %v653_v22 = vadd.f32 %v652_v62, %v636_v11  ;;  %v575_v24 = vadd.f32 %v574_v6, %v523_v15 }
 0x115   : > { %v671_v23 = vadd.f32 %v670_v63, %v638_v13  ;;  %v641_v25 = vmul.f32 %v523_v15, %v523_v15  ;;  %541 = vst [vmem:[%s1188_s28 + $0x68] sm:$0xff] %v472_v20  ;;  %543 = vst [vmem:[%s1188_s28 + $0x78] sm:$0xff] %v525_v21  ;;  %v558_v26 = vrot.slane %v557_v18, 4  ;;  %v566_v28 = vadd.f32 %v565_v10, %v472_v20 }
 0x116   : > { %v645_v27 = vadd.f32 %v644_v16, %v639_v19  ;;  %v640_v29 = vmul.f32 %v472_v20, %v472_v20  ;;  %v576_v30 = vrot.slane %v575_v24, 4  ;;  %v584_v32 = vadd.f32 %v583_v12, %v525_v21  ;;  %750 = vst [vmem:[%s730_s6 + $0x18] sm:$0xff] (%p1123_p6), %v749_v36 }
 0x117   : > { %v663_v31 = vadd.f32 %v662_v17, %v641_v25  ;;  %v642_v33 = vmul.f32 %v525_v21, %v525_v21  ;;  %v559_v34 = vadd.f32 %v558_v26, %v557_v18  ;;  %v567_v37 = vrot.slane %v566_v28, 4 }
 0x118   : > { %v646_v35 = vrot.slane %v645_v27, 4  ;;  %v654_v38 = vadd.f32 %v653_v22, %v640_v29  ;;  %v577_v39 = vadd.f32 %v576_v30, %v575_v24  ;;  %v585_v41 = vrot.slane %v584_v32, 4 }
 0x119   : > { %v664_v40 = vrot.slane %v663_v31, 4  ;;  %v672_v42 = vadd.f32 %v671_v23, %v642_v33  ;;  %v560_v44 = vrot.slane %v559_v34, 2  ;;  %v568_v46 = vadd.f32 %v567_v37, %v566_v28  ;;  %v743_v37 = vld [vmem:[%s1188_s28] sm:$0xff] (%p1123_p6) }
 0x11a   : > { %v647_v45 = vadd.f32 %v646_v35, %v645_v27  ;;  %v655_v47 = vrot.slane %v654_v38, 4  ;;  %v578_v48 = vrot.slane %v577_v39, 2  ;;  %v586_v50 = vadd.f32 %v585_v41, %v584_v32  ;;  %v626_v32 = vld [vmem:[%s1182_s27] sm:$0xf]  ;;  %v753_v41 = vld [vmem:[%s1188_s28 + $0x28] sm:$0xff] (%p1123_p6)  ;;  %744 = vst [vmem:[%s730_s6] sm:$0xff] (%p1123_p6), %v743_v37 }
 0x11b   : > { %v665_v49 = vadd.f32 %v664_v40, %v663_v31  ;;  %v673_v51 = vrot.slane %v672_v42, 4  ;;  %v561_v52 = vadd.f32 %v560_v44, %v559_v34  ;;  %v569_v54 = vrot.slane %v568_v46, 2  ;;  %v751_v40 = vld [vmem:[%s1188_s28 + $0x20] sm:$0xff] (%p1123_p6)  ;;  %754 = vst [vmem:[%s730_s6 + $0x88] sm:$0xff] (%p1123_p6), %v753_v41  ;;  %v757_v44 = vld [vmem:[%s1188_s28 + $0x38] sm:$0xff] (%p1123_p6) }
 0x11c   : > { %v648_v53 = vrot.slane %v647_v45, 2  ;;  %v656_v55 = vadd.f32 %v655_v47, %v654_v38  ;;  %v579_v56 = vadd.f32 %v578_v48, %v577_v39  ;;  %v587_v58 = vrot.slane %v586_v50, 2  ;;  %v745_v38 = vld [vmem:[%s1188_s28 + $0x8] sm:$0xff] (%p1123_p6)  ;;  %v747_v39 = vld [vmem:[%s1188_s28 + $0x10] sm:$0xff] (%p1123_p6)  ;;  %752 = vst [vmem:[%s730_s6 + $0x80] sm:$0xff] (%p1123_p6), %v751_v40  ;;  %758 = vst [vmem:[%s730_s6 + $0x98] sm:$0xff] (%p1123_p6), %v757_v44 }
 0x11d   : > { %v666_v57 = vrot.slane %v665_v49, 2  ;;  %v674_v59 = vadd.f32 %v673_v51, %v672_v42  ;;  %v562_v60 = vrot.slane %v561_v52, 1  ;;  %v570_v62 = vadd.f32 %v569_v54, %v568_v46  ;;  %746 = vst [vmem:[%s730_s6 + $0x8] sm:$0xff] (%p1123_p6), %v745_v38  ;;  %748 = vst [vmem:[%s730_s6 + $0x10] sm:$0xff] (%p1123_p6), %v747_v39  ;;  %v755_v42 = vld [vmem:[%s1188_s28 + $0x30] sm:$0xff] (%p1123_p6)  ;;  %v761_v46 = vld [vmem:[%s1188_s28 + $0x48] sm:$0xff] (%p1123_p6) }
 0x11e   : > { %v649_v61 = vadd.f32 %v648_v53, %v647_v45  ;;  %v657_v63 = vrot.slane %v656_v55, 2  ;;  %v580_v0 = vrot.slane %v579_v56, 1  ;;  %v588_v4 = vadd.f32 %v587_v58, %v586_v50  ;;  %v759_v45 = vld [vmem:[%s1188_s28 + $0x40] sm:$0xff] (%p1123_p6)  ;;  %756 = vst [vmem:[%s730_s6 + $0x90] sm:$0xff] (%p1123_p6), %v755_v42  ;;  %v763_v47 = vld [vmem:[%s1188_s28 + $0x50] sm:$0xff] (%p1123_p6)  ;;  %v765_v48 = vld [vmem:[%s1188_s28 + $0x58] sm:$0xff] (%p1123_p6) }
 0x11f   : > { %v667_v1 = vadd.f32 %v666_v57, %v665_v49  ;;  %v675_v5 = vrot.slane %v674_v59, 2  ;;  %v563_v6 = vadd.f32 %v562_v60, %v561_v52  ;;  %v571_v8 = vrot.slane %v570_v62, 1  ;;  %760 = vst [vmem:[%s730_s6 + $0x100] sm:$0xff] (%p1123_p6), %v759_v45  ;;  %762 = vst [vmem:[%s730_s6 + $0x108] sm:$0xff] (%p1123_p6), %v761_v46  ;;  %v767_v49 = vld [vmem:[%s1188_s28 + $0x60] sm:$0xff] (%p1123_p6)  ;;  %v769_v50 = vld [vmem:[%s1188_s28 + $0x68] sm:$0xff] (%p1123_p6) }
 0x120   : > { %v650_v7 = vrot.slane %v649_v61, 1  ;;  %v658_v9 = vadd.f32 %v657_v63, %v656_v55  ;;  %v581_v10 = vadd.f32 %v580_v0, %v579_v56  ;;  %v589_v12 = vrot.slane %v588_v4, 1  ;;  %764 = vst [vmem:[%s730_s6 + $0x110] sm:$0xff] (%p1123_p6), %v763_v47  ;;  %766 = vst [vmem:[%s730_s6 + $0x118] sm:$0xff] (%p1123_p6), %v765_v48  ;;  %v771_v51 = vld [vmem:[%s1188_s28 + $0x70] sm:$0xff] (%p1123_p6)  ;;  %v773_v52 = vld [vmem:[%s1188_s28 + $0x78] sm:$0xff] (%p1123_p6) }
 0x121   : > { %v668_v11 = vrot.slane %v667_v1, 1  ;;  %v676_v13 = vadd.f32 %v675_v5, %v674_v59  ;;  %v572_v15 = vadd.f32 %v571_v8, %v570_v62  ;;  %v602_v16 = vsub.s32 %v599_v2, %v1201_v3  ;;  %v554_v2 = vld [vmem:[%s1170_s22] sm:$0xf]  ;;  %768 = vst [vmem:[%s730_s6 + $0x180] sm:$0xff] (%p1123_p6), %v767_v49  ;;  %770 = vst [vmem:[%s730_s6 + $0x188] sm:$0xff] (%p1123_p6), %v769_v50 }
 0x122   : > { %v651_v14 = vadd.f32 %v650_v7, %v649_v61  ;;  %v659_v17 = vrot.slane %v658_v9, 1  ;;  %v590_v19 = vadd.f32 %v589_v12, %v588_v4  ;;  %772 = vst [vmem:[%s730_s6 + $0x190] sm:$0xff] (%p1123_p6), %v771_v51  ;;  %774 = vst [vmem:[%s730_s6 + $0x198] sm:$0xff] (%p1123_p6), %v773_v52 }
 0x123   : > { %v669_v18 = vadd.f32 %v668_v11, %v667_v1  ;;  %v677_v20 = vrot.slane %v676_v13, 1  ;;  %v595_v21 = vcombine.low %v563_v6, %v572_v15 }
 0x124   : > { %v660_v22 = vadd.f32 %v659_v17, %v658_v9  ;;  %v596_v23 = vcombine.low %v581_v10, %v590_v19 }
 0x125   : > { %v678_v24 = vadd.f32 %v677_v20, %v676_v13  ;;  %v603_v25 = vrot.slane %v595_v21, %v602_v16 }
 0x126   : > { %v683_v26 = vcombine.low %v651_v14, %v660_v22  ;;  %v610_v27 = vrot.slane %v596_v23, %v602_v16 }
 0x127   : > { %v684_v28 = vcombine.low %v669_v18, %v678_v24 }
 0x128   : > { %v691_v29 = vrot.slane %v683_v26, %v602_v16  ;;  %v611_v30 = vcombine.low %v603_v25, %v610_v27 }
 0x129   : > { %v698_v43 = vrot.slane %v684_v28, %v602_v16 }
 0x12a   : > { %v618_v3 = vrot.slane %v611_v30, %v602_v16 }
 0x12b   : > { %v699_v31 = vcombine.low %v691_v29, %v698_v43  ;;  %724 = sbr.rel (!%p1123_p6) target bundleno = 306 (0x132), region = 59 }
 0x12c   : > { %v620_v33 = vadd.f32 %v618_v3, %v554_v2 }
 0x12d   : > { %v706_v34 = vrot.slane %v699_v31, %v602_v16 }
 0x12e   : > { %625 = vst.msk [vmem:[%s1170_s22] sm:$0xf] %vm1172_vm1, %v620_v33 }
 0x12f   : > { %v708_v35 = vadd.f32 %v706_v34, %v626_v32 }
 0x131   : > { %709 = vst.msk [vmem:[%s1182_s27] sm:$0xf] %vm1172_vm1, %v708_v35 }
 0x132 PF: > { %s15_s19 = sadd.s32 1, %s1058_s19   ;;  %s1267_s15 = smov %s1046_s16 }
 0x133   : > { %p12_p12 = scmp.ge.s32.totalorder %s15_s19, 6   ;;  %s1268_s16 = smov %s1128_s25 }
 0x134   : > { %s1269_s17 = smov %s1054_s18  ;;  %s1270_s18 = smov %s1272_s20 }
 0x135   :  { %14 = sbr.rel (!%p12_p12) target bundleno = 3 (0x3), region = 140 }

// kernel: unet_decoder_forward.10
= control target key start
LH: loop header
LB: loop body
LE: loop exit
PB: predicated region body
PF: predicated region fallthrough
CT: control target
= control target key end

     0   :  { %s708_s12 = smov 0   ;;  %s710_s13 = smov 0   ;;  %s860_s0 = inlined_call_operand.vmem [shape: f32[32,2048], index: 0, kind: input, shape index: {}]   ;;  %s861_s1 = inlined_call_operand.vmem [shape: f32[1,2048], index: 1, kind: input, shape index: {}]   ;;  %s862_s2 = inlined_call_operand.vmem [shape: f32[1,2048], index: 2, kind: input, shape index: {}]   ;;  %s863_s3 = inlined_call_operand.vmem [shape: bf16[32,2048], index: 3, kind: output, shape index: {}]  }
   0x1   :  { %s712_s14 = smov 0   ;;  %s714_s15 = smov 0  }
   0x2   :  { %s716_s16 = smov 0  }
   0x3 LB: > { %s25_s17 = sadd.s32 1, %s682_s15  ;;  %s573_s18 = sadd.s32 4294967295, %s686_s16   ;;  %s686_s16 = sphi %s716_s16, %s13_s16   ;;  %s682_s15 = sphi %s714_s15, %s868_s15   ;;  %s678_s14 = sphi %s712_s14, %s867_s14   ;;  %s674_s13 = sphi %s710_s13, %s866_s13   ;;  %s670_s12 = sphi %s708_s12, %s865_s12  }
   0x4   : > { %p27_p0 = scmp.ge.s32.totalorder %s25_s17, 4  ;;  %p41_p1 = scmp.ne.s32.totalorder %s674_s13, %s670_s12 }
   0x5   : > { %p42_p2 = scmp.eq.s32.totalorder %s686_s16, 0  ;;  %p125_p4 = scmp.eq.s32.totalorder %s573_s18, 3 }
   0x6   : > { %s870_s17 = smov (%p27_p0, %s25_s17), 0  ;;  %s34_s20 = sadd.s32 1, %s674_s13 }
   0x7   : > { %p43_p3 = por %p42_p2, %p41_p1  ;;  %s30_s19 = ssub.s32 %s682_s15, %s870_s17 }
   0x8   : > { %p32_p5 = scmp.eq.s32.totalorder %s30_s19, 0  ;;  %p743_p6 = por %p125_p4, %p41_p1 }
   0x9   : > { %p576_p7 = scmp.ge.s32.totalorder %s686_s16, 4 }
   0xa   : > { %s748_s22 = scalar_select %p32_p5, %s674_s13, %s34_s20  }
   0xb   : > { %147 = sbr.rel (%p576_p7) target bundleno = 30 (0x1e), region = 16 }
  0x12   : > { %150 = sbr.rel (!%p43_p3) target bundleno = 30 (0x1e), region = 20  ;;  %s152_s23 = sand.u32 (%p43_p3), 1, %s674_s13  }
  0x13   : > { %s598_s24 = sshll.u32 (%p43_p3), %s682_s15, 5  ;;  %s577_s25 = sshll.u32 (%p43_p3), %s152_s23, 7 }
  0x14   : > { %s756_s28 = scalar_lea.vmem (%p43_p3), %s860_s0, %s598_s24  ;;  %s154_s29 = scalar_lea.vmem (%p43_p3), [#allocation2], %s577_s25 }
  0x15   : > { %v173_v0 = vld [vmem:[%s756_s28] sm:$0xff] (%p43_p3)  ;;  %v175_v1 = vld [vmem:[%s756_s28 + $0x8] sm:$0xff] (%p43_p3)  ;;  %v177_v2 = vld [vmem:[%s756_s28 + $0x10] sm:$0xff] (%p43_p3) }
  0x16   : > { %174 = vst [vmem:[%s154_s29] sm:$0xff] (%p43_p3), %v173_v0  ;;  %176 = vst [vmem:[%s154_s29 + $0x8] sm:$0xff] (%p43_p3), %v175_v1  ;;  %v179_v3 = vld [vmem:[%s756_s28 + $0x18] sm:$0xff] (%p43_p3)  ;;  %v181_v4 = vld [vmem:[%s756_s28 + $0x80] sm:$0xff] (%p43_p3) }
  0x17   : > { %178 = vst [vmem:[%s154_s29 + $0x10] sm:$0xff] (%p43_p3), %v177_v2  ;;  %v183_v5 = vld [vmem:[%s756_s28 + $0x88] sm:$0xff] (%p43_p3)  ;;  %180 = vst [vmem:[%s154_s29 + $0x18] sm:$0xff] (%p43_p3), %v179_v3  ;;  %v185_v6 = vld [vmem:[%s756_s28 + $0x90] sm:$0xff] (%p43_p3) }
  0x18   : > { %182 = vst [vmem:[%s154_s29 + $0x20] sm:$0xff] (%p43_p3), %v181_v4  ;;  %184 = vst [vmem:[%s154_s29 + $0x28] sm:$0xff] (%p43_p3), %v183_v5  ;;  %v187_v7 = vld [vmem:[%s756_s28 + $0x98] sm:$0xff] (%p43_p3)  ;;  %v189_v8 = vld [vmem:[%s756_s28 + $0x100] sm:$0xff] (%p43_p3) }
  0x19   : > { %186 = vst [vmem:[%s154_s29 + $0x30] sm:$0xff] %v185_v6  ;;  %188 = vst [vmem:[%s154_s29 + $0x38] sm:$0xff] %v187_v7  ;;  %v191_v9 = vld [vmem:[%s756_s28 + $0x108] sm:$0xff]  ;;  %v193_v10 = vld [vmem:[%s756_s28 + $0x110] sm:$0xff] }
  0x1a   : > { %190 = vst [vmem:[%s154_s29 + $0x40] sm:$0xff] %v189_v8  ;;  %v195_v11 = vld [vmem:[%s756_s28 + $0x118] sm:$0xff]  ;;  %192 = vst [vmem:[%s154_s29 + $0x48] sm:$0xff] %v191_v9  ;;  %v197_v12 = vld [vmem:[%s756_s28 + $0x180] sm:$0xff] }
  0x1b   : > { %194 = vst [vmem:[%s154_s29 + $0x50] sm:$0xff] %v193_v10  ;;  %196 = vst [vmem:[%s154_s29 + $0x58] sm:$0xff] %v195_v11  ;;  %v199_v13 = vld [vmem:[%s756_s28 + $0x188] sm:$0xff]  ;;  %v201_v14 = vld [vmem:[%s756_s28 + $0x190] sm:$0xff] }
  0x1c   : > { %198 = vst [vmem:[%s154_s29 + $0x60] sm:$0xff] %v197_v12  ;;  %200 = vst [vmem:[%s154_s29 + $0x68] sm:$0xff] %v199_v13  ;;  %v203_v15 = vld [vmem:[%s756_s28 + $0x198] sm:$0xff] }
  0x1d   : > { %202 = vst [vmem:[%s154_s29 + $0x70] sm:$0xff] %v201_v14  ;;  %204 = vst [vmem:[%s154_s29 + $0x78] sm:$0xff] %v203_v15 }
  0x1e PF: > { %p580_p8 = scmp.ge.s32.totalorder %s686_s16, 1  ;;  %p225_p9 = scmp.lt.s32.totalorder %s686_s16, 5 }
  0x20   : > { %p226_p10 = pnand %p580_p8, %p225_p9 }
  0x21   : > { %s232_s30 = sand.u32 (!%p226_p10), 1, %s670_s12   ;;  %s583_s4 = sshll.u32 (!%p226_p10), %s678_s14, 2  ;;  %v294_v16 = vlaneseq (!%p226_p10) }
  0x22   : > { %229 = sbr.rel (%p226_p10) target bundleno = 73 (0x49), region = 51  ;;  %s581_s5 = sshll.u32 (!%p226_p10), %s232_s30, 7 }
  0x23   : > { %v295_v17 = vshrl.u32 (!%p226_p10), %v294_v16, 7  ;;  %p265_p11 = scmp.lt.s32.totalorder (!%p226_p10), %s583_s4, 15  ;;  %s780_s6 = scalar_lea.vmem (!%p226_p10), [#allocation2], %s581_s5 }
  0x24   : > { %v276_v20 = vld [vmem:[%s780_s6] sm:$0xff] (!%p226_p10)  ;;  %v277_v23 = vld [vmem:[%s780_s6 + $0x8] sm:$0xff] (!%p226_p10)  ;;  %v278_v24 = vld [vmem:[%s780_s6 + $0x10] sm:$0xff] (!%p226_p10)  ;;  %s802_s19 = sshll.u32 (!%p226_p10), %s232_s30, 6 }
  0x25   : > { %v296_v18 = vsub.s32 (!%p226_p10), 0, %v295_v17  ;;  %v300_v19 = vsub.s32 (!%p226_p10), 1, %v295_v17  ;;  %v304_v21 = vsub.s32 (!%p226_p10), 2, %v295_v17  ;;  %v308_v22 = vsub.s32 (!%p226_p10), 3, %v295_v17  ;;  %v280_v25 = vld [vmem:[%s780_s6 + $0x20] sm:$0xff] (!%p226_p10)  ;;  %v281_v28 = vld [vmem:[%s780_s6 + $0x28] sm:$0xff] (!%p226_p10) }
  0x26   : > { %v279_v33 = vld [vmem:[%s780_s6 + $0x18] sm:$0xff] (!%p226_p10)  ;;  %v282_v34 = vld [vmem:[%s780_s6 + $0x30] sm:$0xff] (!%p226_p10)  ;;  %v284_v56 = vld [vmem:[%s780_s6 + $0x40] sm:$0xff] (!%p226_p10)  ;;  %s817_s12 = scalar_lea.vmem (!%p226_p10), [#allocation3], %s802_s19 }
  0x27   : > { %v283_v35 = vld [vmem:[%s780_s6 + $0x38] sm:$0xff] (!%p226_p10)  ;;  %v285_v57 = vld [vmem:[%s780_s6 + $0x48] sm:$0xff] (!%p226_p10)  ;;  %v286_v62 = vld [vmem:[%s780_s6 + $0x50] sm:$0xff] (!%p226_p10) }
  0x28   : > { %v287_v63 = vld [vmem:[%s780_s6 + $0x58] sm:$0xff] (!%p226_p10)  ;;  %v288_v4 = vld [vmem:[%s780_s6 + $0x60] sm:$0xff] (!%p226_p10)  ;;  %v289_v5 = vld [vmem:[%s780_s6 + $0x68] sm:$0xff] (!%p226_p10) }
  0x29   : > { %s872_s4 = smov (!%p265_p11, %s583_s4), 15  ;;  %v290_v10 = vld [vmem:[%s780_s6 + $0x70] sm:$0xff]  ;;  %v291_v11 = vld [vmem:[%s780_s6 + $0x78] sm:$0xff]  ;;  %s607_s20 = sshll.u32 (%p743_p6), %s678_s14, 4 }
  0x2a   : > { %s267_s9 = scalar_lea.vmem %s861_s1, %s872_s4  ;;  %s272_s18 = scalar_lea.vmem %s862_s2, %s872_s4 }
  0x2b   : > { %v292_v26 = vld [vmem:[%s267_s9] sm:$0xf]  ;;  %s452_s25 = scalar_lea.vmem (%p743_p6), %s863_s3, %s607_s20 }
  0x2c   : > { %v330_v27 = vld [vmem:[%s272_s18] sm:$0xf]  ;;  %v297_v29 = vrot.slane %v292_v26, %v296_v18  ;;  %v301_v30 = vrot.slane %v292_v26, %v300_v19  ;;  %v305_v36 = vrot.slane %v292_v26, %v304_v21  ;;  %v309_v37 = vrot.slane %v292_v26, %v308_v22 }
  0x2d   : > { %v793_v31 = vrot.slane %v330_v27, %v296_v18  ;;  %v795_v32 = vrot.slane %v330_v27, %v300_v19  ;;  %v343_v38 = vrot.slane %v330_v27, %v304_v21  ;;  %v347_v39 = vrot.slane %v330_v27, %v308_v22 }
  0x2e   : > { %v314_v40 = vmul.f32 %v297_v29, %v276_v20  ;;  %v315_v41 = vmul.f32 %v301_v30, %v277_v23  ;;  %v318_v42 = vmul.f32 %v297_v29, %v280_v25  ;;  %v319_v43 = vmul.f32 %v301_v30, %v281_v28 }
  0x2f   : > { %v316_v44 = vmul.f32 %v305_v36, %v278_v24  ;;  %v317_v45 = vmul.f32 %v309_v37, %v279_v33  ;;  %v320_v46 = vmul.f32 %v305_v36, %v282_v34  ;;  %v321_v47 = vmul.f32 %v309_v37, %v283_v35 }
  0x30   : > { %v352_v48 = vadd.f32 %v793_v31, %v314_v40  ;;  %v353_v49 = vadd.f32 %v795_v32, %v315_v41  ;;  %v356_v50 = vadd.f32 %v793_v31, %v318_v42  ;;  %v357_v51 = vadd.f32 %v795_v32, %v319_v43 }
  0x31   : > { %v354_v52 = vadd.f32 %v343_v38, %v316_v44  ;;  %v355_v53 = vadd.f32 %v347_v39, %v317_v45  ;;  %v358_v54 = vadd.f32 %v343_v38, %v320_v46  ;;  %v359_v55 = vadd.f32 %v347_v39, %v321_v47 }
  0x32   : > { %v368_v58 = vmax.f32 %v352_v48, 0.0  ;;  %v369_v59 = vmax.f32 %v353_v49, 0.0  ;;  %v372_v60 = vmax.f32 %v356_v50, 0.0  ;;  %v373_v61 = vmax.f32 %v357_v51, 0.0 }
  0x33   : > { %v370_v0 = vmax.f32 %v354_v52, 0.0  ;;  %v371_v1 = vmax.f32 %v355_v53, 0.0  ;;  %v374_v2 = vmax.f32 %v358_v54, 0.0  ;;  %v375_v3 = vmax.f32 %v359_v55, 0.0 }
  0x34   : > { %v599_v6 = vpack.c.bf16 %v369_v59, %v368_v58  ;;  %v601_v7 = vpack.c.bf16 %v373_v61, %v372_v60  ;;  %v322_v8 = vmul.f32 %v297_v29, %v284_v56  ;;  %v323_v9 = vmul.f32 %v301_v30, %v285_v57 }
  0x35   : > { %v600_v12 = vpack.c.bf16 %v371_v1, %v370_v0  ;;  %v602_v13 = vpack.c.bf16 %v375_v3, %v374_v2  ;;  %v324_v14 = vmul.f32 %v305_v36, %v286_v62  ;;  %v325_v15 = vmul.f32 %v309_v37, %v287_v63 }
  0x36   : > { %432 = vst [vmem:[%s817_s12] sm:$0xff] %v599_v6  ;;  %434 = vst [vmem:[%s817_s12 + $0x10] sm:$0xff] %v601_v7  ;;  %v360_v16 = vadd.f32 %v793_v31, %v322_v8  ;;  %v361_v17 = vadd.f32 %v795_v32, %v323_v9  ;;  %v326_v18 = vmul.f32 %v297_v29, %v288_v4 }
  0x37   : > { %v327_v19 = vmul.f32 %v301_v30, %v289_v5  ;;  %433 = vst [vmem:[%s817_s12 + $0x8] sm:$0xff] %v600_v12  ;;  %435 = vst [vmem:[%s817_s12 + $0x18] sm:$0xff] %v602_v13  ;;  %v362_v20 = vadd.f32 %v343_v38, %v324_v14  ;;  %v363_v21 = vadd.f32 %v347_v39, %v325_v15 }
  0x38   : > { %v328_v22 = vmul.f32 %v305_v36, %v290_v10  ;;  %v329_v23 = vmul.f32 %v309_v37, %v291_v11  ;;  %v376_v24 = vmax.f32 %v360_v16, 0.0  ;;  %v377_v25 = vmax.f32 %v361_v17, 0.0 }
  0x39   : > { %v364_v26 = vadd.f32 %v793_v31, %v326_v18  ;;  %v365_v27 = vadd.f32 %v795_v32, %v327_v19  ;;  %v378_v28 = vmax.f32 %v362_v20, 0.0  ;;  %v379_v33 = vmax.f32 %v363_v21, 0.0 }
  0x3a   : > { %v366_v29 = vadd.f32 %v343_v38, %v328_v22  ;;  %v367_v30 = vadd.f32 %v347_v39, %v329_v23  ;;  %v603_v34 = vpack.c.bf16 %v377_v25, %v376_v24  ;;  %446 = sbr.rel (!%p743_p6) target bundleno = 73 (0x49), region = 59 }
  0x3b   : > { %v380_v35 = vmax.f32 %v364_v26, 0.0  ;;  %v381_v40 = vmax.f32 %v365_v27, 0.0  ;;  %v604_v41 = vpack.c.bf16 %v379_v33, %v378_v28 }
  0x3c   : > { %v382_v36 = vmax.f32 %v366_v29, 0.0  ;;  %v383_v42 = vmax.f32 %v367_v30, 0.0  ;;  %436 = vst [vmem:[%s817_s12 + $0x20] sm:$0xff] %v603_v34 }
  0x3d   : > { %v605_v37 = vpack.c.bf16 %v381_v40, %v380_v35  ;;  %437 = vst [vmem:[%s817_s12 + $0x28] sm:$0xff] %v604_v41  ;;  %v465_v31 = vld [vmem:[%s817_s12] sm:$0xff] (%p743_p6)  ;;  %v469_v38 = vld [vmem:[%s817_s12 + $0x10] sm:$0xff] (%p743_p6) }
  0x3e   : > { %v606_v43 = vpack.c.bf16 %v383_v42, %v382_v36  ;;  %v467_v32 = vld [vmem:[%s817_s12 + $0x8] sm:$0xff] (%p743_p6)  ;;  %v471_v39 = vld [vmem:[%s817_s12 + $0x18] sm:$0xff] (%p743_p6)  ;;  %466 = vst [vmem:[%s452_s25] sm:$0xff] (%p743_p6), %v465_v31  ;;  %470 = vst [vmem:[%s452_s25 + $0x40] sm:$0xff] (%p743_p6), %v469_v38 }
  0x3f   : > { %438 = vst [vmem:[%s817_s12 + $0x30] sm:$0xff] %v605_v37  ;;  %468 = vst [vmem:[%s452_s25 + $0x8] sm:$0xff] (%p743_p6), %v467_v32 }
  0x40   : > { %439 = vst [vmem:[%s817_s12 + $0x38] sm:$0xff] %v606_v43  ;;  %472 = vst [vmem:[%s452_s25 + $0x48] sm:$0xff] (%p743_p6), %v471_v39 }
  0x43   : > { %v473_v44 = vld [vmem:[%s817_s12 + $0x20] sm:$0xff] }
  0x44   : > { %v475_v45 = vld [vmem:[%s817_s12 + $0x28] sm:$0xff]  ;;  %474 = vst [vmem:[%s452_s25 + $0x80] sm:$0xff] %v473_v44 }
  0x45   : > { %476 = vst [vmem:[%s452_s25 + $0x88] sm:$0xff] %v475_v45 }
  0x46   : > { %v477_v46 = vld [vmem:[%s817_s12 + $0x30] sm:$0xff] }
  0x47   : > { %v479_v47 = vld [vmem:[%s817_s12 + $0x38] sm:$0xff]  ;;  %478 = vst [vmem:[%s452_s25 + $0xc0] sm:$0xff] %v477_v46 }
  0x48   : > { %480 = vst [vmem:[%s452_s25 + $0xc8] sm:$0xff] %v479_v47 }
  0x49 PF: > { %s13_s16 = sadd.s32 1, %s686_s16   ;;  %s865_s12 = smov %s674_s13 }
  0x4a   : > { %p10_p12 = scmp.ge.s32.totalorder %s13_s16, 6   ;;  %s866_s13 = smov %s748_s22 }
  0x4b   : > { %s867_s14 = smov %s682_s15  ;;  %s868_s15 = smov %s870_s17 }
  0x4c   :  { %12 = sbr.rel (!%p10_p12) target bundleno = 3 (0x3), region = 119 }

// kernel: unet_decoder_forward.11
= control target key start
LH: loop header
LB: loop body
LE: loop exit
PB: predicated region body
PF: predicated region fallthrough
CT: control target
= control target key end

     0   :  { %s3205_s15 = smov 0   ;;  %s3207_s16 = smov 0   ;;  %s4002_s0 = inlined_call_operand.vmem [shape: bf16[128,512], index: 0, kind: input, shape index: {}]   ;;  %s4003_s1 = inlined_call_operand.vmem [shape: bf16[512,1024], index: 1, kind: input, shape index: {}]   ;;  %s4004_s2 = inlined_call_operand.vmem [shape: f32[128,1024], index: 2, kind: output, shape index: {0}]   ;;  %s4005_s3 = inlined_call_operand.vmem [shape: f32[1,1024], index: 3, kind: output, shape index: {1}]   ;;  %s4006_s4 = inlined_call_operand.vmem [shape: f32[1,1024], index: 4, kind: output, shape index: {2}]  }
   0x1   :  { %s3209_s17 = smov 0   ;;  %s3211_s18 = smov 0  }
   0x2   :  { %s3213_s19 = smov 0  }
   0x3 LB: > { %s27_s20 = sadd.s32 1, %s3172_s18  ;;  %s2612_s21 = sadd.s32 4294967295, %s3176_s19   ;;  %s3176_s19 = sphi %s3213_s19, %s15_s19   ;;  %s3172_s18 = sphi %s3211_s18, %s4013_s18   ;;  %s3168_s17 = sphi %s3209_s17, %s4012_s17   ;;  %s3164_s16 = sphi %s3207_s16, %s4011_s16   ;;  %s3160_s15 = sphi %s3205_s15, %s4010_s15  }
   0x4   : > { %p29_p0 = scmp.ge.s32.totalorder %s27_s20, 2  ;;  %p67_p1 = scmp.ne.s32.totalorder %s3164_s16, %s3160_s15 }
   0x5   : > { %p68_p2 = scmp.eq.s32.totalorder %s3176_s19, 0  ;;  %p99_p4 = scmp.eq.s32.totalorder %s2612_s21, 1 }
   0x6   : > { %s4015_s20 = smov (%p29_p0, %s27_s20), 0  ;;  %s60_s23 = sadd.s32 1, %s3164_s16 }
   0x7   : > { %p69_p3 = por %p68_p2, %p67_p1  ;;  %s57_s22 = ssub.s32 %s3172_s18, %s4015_s20 }
   0x8   : > { %p58_p5 = scmp.eq.s32.totalorder %s57_s22, 0  ;;  %p3240_p6 = por %p99_p4, %p67_p1 }
   0x9   : > { %p2616_p7 = scmp.ge.s32.totalorder %s3176_s19, 2 }
   0xa   : > { %s3245_s25 = scalar_select %p58_p5, %s3164_s16, %s60_s23  }
   0xb   : > { %183 = sbr.rel (%p2616_p7) target bundleno = 86 (0x56), region = 20 }
  0x12   : > { %186 = sbr.rel (!%p69_p3) target bundleno = 86 (0x56), region = 24  ;;  %s188_s26 = sand.u32 (%p69_p3), 1, %s3164_s16  }
  0x13   : > { %s2790_s27 = sshll.u32 (%p69_p3), %s3172_s18, 4  ;;  %s2617_s28 = sshll.u32 (%p69_p3), %s188_s26, 10 }
  0x14   : > { %s3253_s5 = scalar_lea.vmem (%p69_p3), %s4003_s1, %s2790_s27  ;;  %s3258_s6 = scalar_lea.vmem (%p69_p3), [#allocation2], %s2617_s28 }
  0x15   : > { %v206_v0 = vld [vmem:[%s3253_s5] sm:$0xff] (%p69_p3)  ;;  %v208_v1 = vld [vmem:[%s3253_s5 + $0x8] sm:$0xff] (%p69_p3) }
  0x16   : > { %v210_v2 = vld [vmem:[%s3253_s5 + $0x20] sm:$0xff] (%p69_p3)  ;;  %207 = vst [vmem:[%s3258_s6] sm:$0xff] (%p69_p3), %v206_v0  ;;  %209 = vst [vmem:[%s3258_s6 + $0x8] sm:$0xff] (%p69_p3), %v208_v1  ;;  %v212_v3 = vld [vmem:[%s3253_s5 + $0x28] sm:$0xff] (%p69_p3) }
  0x17   : > { %211 = vst [vmem:[%s3258_s6 + $0x10] sm:$0xff] (%p69_p3), %v210_v2  ;;  %v214_v4 = vld [vmem:[%s3253_s5 + $0x40] sm:$0xff] (%p69_p3)  ;;  %v216_v5 = vld [vmem:[%s3253_s5 + $0x48] sm:$0xff] (%p69_p3)  ;;  %213 = vst [vmem:[%s3258_s6 + $0x18] sm:$0xff] (%p69_p3), %v212_v3 }
  0x18   : > { %215 = vst [vmem:[%s3258_s6 + $0x20] sm:$0xff] (%p69_p3), %v214_v4  ;;  %217 = vst [vmem:[%s3258_s6 + $0x28] sm:$0xff] (%p69_p3), %v216_v5  ;;  %v218_v6 = vld [vmem:[%s3253_s5 + $0x60] sm:$0xff] (%p69_p3)  ;;  %v220_v7 = vld [vmem:[%s3253_s5 + $0x68] sm:$0xff] (%p69_p3) }
  0x19   : > { %v222_v8 = vld [vmem:[%s3253_s5 + $0x80] sm:$0xff]  ;;  %219 = vst [vmem:[%s3258_s6 + $0x30] sm:$0xff] %v218_v6  ;;  %221 = vst [vmem:[%s3258_s6 + $0x38] sm:$0xff] %v220_v7  ;;  %v224_v9 = vld [vmem:[%s3253_s5 + $0x88] sm:$0xff] }
  0x1a   : > { %223 = vst [vmem:[%s3258_s6 + $0x40] sm:$0xff] %v222_v8  ;;  %v226_v10 = vld [vmem:[%s3253_s5 + $0xa0] sm:$0xff]  ;;  %v228_v11 = vld [vmem:[%s3253_s5 + $0xa8] sm:$0xff]  ;;  %225 = vst [vmem:[%s3258_s6 + $0x48] sm:$0xff] %v224_v9 }
  0x1b   : > { %227 = vst [vmem:[%s3258_s6 + $0x50] sm:$0xff] %v226_v10  ;;  %229 = vst [vmem:[%s3258_s6 + $0x58] sm:$0xff] %v228_v11  ;;  %v230_v12 = vld [vmem:[%s3253_s5 + $0xc0] sm:$0xff]  ;;  %v232_v13 = vld [vmem:[%s3253_s5 + $0xc8] sm:$0xff] }
  0x1c   : > { %v234_v14 = vld [vmem:[%s3253_s5 + $0xe0] sm:$0xff]  ;;  %231 = vst [vmem:[%s3258_s6 + $0x60] sm:$0xff] %v230_v12  ;;  %233 = vst [vmem:[%s3258_s6 + $0x68] sm:$0xff] %v232_v13  ;;  %v236_v15 = vld [vmem:[%s3253_s5 + $0xe8] sm:$0xff] }
  0x1d   : > { %235 = vst [vmem:[%s3258_s6 + $0x70] sm:$0xff] %v234_v14  ;;  %v238_v16 = vld [vmem:[%s3253_s5 + $0x100] sm:$0xff]  ;;  %v240_v17 = vld [vmem:[%s3253_s5 + $0x108] sm:$0xff]  ;;  %237 = vst [vmem:[%s3258_s6 + $0x78] sm:$0xff] %v236_v15 }
  0x1e   : > { %239 = vst [vmem:[%s3258_s6 + $0x80] sm:$0xff] %v238_v16  ;;  %241 = vst [vmem:[%s3258_s6 + $0x88] sm:$0xff] %v240_v17  ;;  %v242_v18 = vld [vmem:[%s3253_s5 + $0x120] sm:$0xff]  ;;  %v244_v19 = vld [vmem:[%s3253_s5 + $0x128] sm:$0xff] }
  0x1f   : > { %v246_v20 = vld [vmem:[%s3253_s5 + $0x140] sm:$0xff]  ;;  %243 = vst [vmem:[%s3258_s6 + $0x90] sm:$0xff] %v242_v18  ;;  %245 = vst [vmem:[%s3258_s6 + $0x98] sm:$0xff] %v244_v19  ;;  %v248_v21 = vld [vmem:[%s3253_s5 + $0x148] sm:$0xff] }
  0x20   : > { %247 = vst [vmem:[%s3258_s6 + $0xa0] sm:$0xff] %v246_v20  ;;  %v250_v22 = vld [vmem:[%s3253_s5 + $0x160] sm:$0xff]  ;;  %v252_v23 = vld [vmem:[%s3253_s5 + $0x168] sm:$0xff]  ;;  %249 = vst [vmem:[%s3258_s6 + $0xa8] sm:$0xff] %v248_v21 }
  0x21   : > { %251 = vst [vmem:[%s3258_s6 + $0xb0] sm:$0xff] %v250_v22  ;;  %253 = vst [vmem:[%s3258_s6 + $0xb8] sm:$0xff] %v252_v23  ;;  %v254_v24 = vld [vmem:[%s3253_s5 + $0x180] sm:$0xff]  ;;  %v256_v25 = vld [vmem:[%s3253_s5 + $0x188] sm:$0xff] }
  0x22   : > { %v258_v26 = vld [vmem:[%s3253_s5 + $0x1a0] sm:$0xff]  ;;  %255 = vst [vmem:[%s3258_s6 + $0xc0] sm:$0xff] %v254_v24  ;;  %257 = vst [vmem:[%s3258_s6 + $0xc8] sm:$0xff] %v256_v25  ;;  %v260_v27 = vld [vmem:[%s3253_s5 + $0x1a8] sm:$0xff] }
  0x23   : > { %259 = vst [vmem:[%s3258_s6 + $0xd0] sm:$0xff] %v258_v26  ;;  %v262_v28 = vld [vmem:[%s3253_s5 + $0x1c0] sm:$0xff]  ;;  %v264_v29 = vld [vmem:[%s3253_s5 + $0x1c8] sm:$0xff]  ;;  %261 = vst [vmem:[%s3258_s6 + $0xd8] sm:$0xff] %v260_v27 }
  0x24   : > { %263 = vst [vmem:[%s3258_s6 + $0xe0] sm:$0xff] %v262_v28  ;;  %265 = vst [vmem:[%s3258_s6 + $0xe8] sm:$0xff] %v264_v29  ;;  %v266_v30 = vld [vmem:[%s3253_s5 + $0x1e0] sm:$0xff]  ;;  %v268_v31 = vld [vmem:[%s3253_s5 + $0x1e8] sm:$0xff] }
  0x25   : > { %v270_v32 = vld [vmem:[%s3253_s5 + $0x200] sm:$0xff]  ;;  %267 = vst [vmem:[%s3258_s6 + $0xf0] sm:$0xff] %v266_v30  ;;  %269 = vst [vmem:[%s3258_s6 + $0xf8] sm:$0xff] %v268_v31  ;;  %v272_v33 = vld [vmem:[%s3253_s5 + $0x208] sm:$0xff] }
  0x26   : > { %271 = vst [vmem:[%s3258_s6 + $0x100] sm:$0xff] %v270_v32  ;;  %v274_v34 = vld [vmem:[%s3253_s5 + $0x220] sm:$0xff]  ;;  %v276_v35 = vld [vmem:[%s3253_s5 + $0x228] sm:$0xff]  ;;  %273 = vst [vmem:[%s3258_s6 + $0x108] sm:$0xff] %v272_v33 }
  0x27   : > { %275 = vst [vmem:[%s3258_s6 + $0x110] sm:$0xff] %v274_v34  ;;  %277 = vst [vmem:[%s3258_s6 + $0x118] sm:$0xff] %v276_v35  ;;  %v278_v36 = vld [vmem:[%s3253_s5 + $0x240] sm:$0xff]  ;;  %v280_v37 = vld [vmem:[%s3253_s5 + $0x248] sm:$0xff] }
  0x28   : > { %v282_v38 = vld [vmem:[%s3253_s5 + $0x260] sm:$0xff]  ;;  %279 = vst [vmem:[%s3258_s6 + $0x120] sm:$0xff] %v278_v36  ;;  %281 = vst [vmem:[%s3258_s6 + $0x128] sm:$0xff] %v280_v37  ;;  %v284_v39 = vld [vmem:[%s3253_s5 + $0x268] sm:$0xff] }
  0x29   : > { %283 = vst [vmem:[%s3258_s6 + $0x130] sm:$0xff] %v282_v38  ;;  %v286_v40 = vld [vmem:[%s3253_s5 + $0x280] sm:$0xff]  ;;  %v288_v41 = vld [vmem:[%s3253_s5 + $0x288] sm:$0xff]  ;;  %285 = vst [vmem:[%s3258_s6 + $0x138] sm:$0xff] %v284_v39 }
  0x2a   : > { %287 = vst [vmem:[%s3258_s6 + $0x140] sm:$0xff] %v286_v40  ;;  %289 = vst [vmem:[%s3258_s6 + $0x148] sm:$0xff] %v288_v41  ;;  %v290_v42 = vld [vmem:[%s3253_s5 + $0x2a0] sm:$0xff]  ;;  %v292_v43 = vld [vmem:[%s3253_s5 + $0x2a8] sm:$0xff] }
  0x2b   : > { %v294_v44 = vld [vmem:[%s3253_s5 + $0x2c0] sm:$0xff]  ;;  %291 = vst [vmem:[%s3258_s6 + $0x150] sm:$0xff] %v290_v42  ;;  %293 = vst [vmem:[%s3258_s6 + $0x158] sm:$0xff] %v292_v43  ;;  %v296_v45 = vld [vmem:[%s3253_s5 + $0x2c8] sm:$0xff] }
  0x2c   : > { %295 = vst [vmem:[%s3258_s6 + $0x160] sm:$0xff] %v294_v44  ;;  %v298_v46 = vld [vmem:[%s3253_s5 + $0x2e0] sm:$0xff]  ;;  %v300_v47 = vld [vmem:[%s3253_s5 + $0x2e8] sm:$0xff]  ;;  %297 = vst [vmem:[%s3258_s6 + $0x168] sm:$0xff] %v296_v45 }
  0x2d   : > { %299 = vst [vmem:[%s3258_s6 + $0x170] sm:$0xff] %v298_v46  ;;  %301 = vst [vmem:[%s3258_s6 + $0x178] sm:$0xff] %v300_v47  ;;  %v302_v48 = vld [vmem:[%s3253_s5 + $0x300] sm:$0xff]  ;;  %v304_v49 = vld [vmem:[%s3253_s5 + $0x308] sm:$0xff] }
  0x2e   : > { %v306_v50 = vld [vmem:[%s3253_s5 + $0x320] sm:$0xff]  ;;  %303 = vst [vmem:[%s3258_s6 + $0x180] sm:$0xff] %v302_v48  ;;  %305 = vst [vmem:[%s3258_s6 + $0x188] sm:$0xff] %v304_v49  ;;  %v308_v51 = vld [vmem:[%s3253_s5 + $0x328] sm:$0xff] }
  0x2f   : > { %307 = vst [vmem:[%s3258_s6 + $0x190] sm:$0xff] %v306_v50  ;;  %v310_v52 = vld [vmem:[%s3253_s5 + $0x340] sm:$0xff]  ;;  %v312_v53 = vld [vmem:[%s3253_s5 + $0x348] sm:$0xff]  ;;  %309 = vst [vmem:[%s3258_s6 + $0x198] sm:$0xff] %v308_v51 }
  0x30   : > { %311 = vst [vmem:[%s3258_s6 + $0x1a0] sm:$0xff] %v310_v52  ;;  %313 = vst [vmem:[%s3258_s6 + $0x1a8] sm:$0xff] %v312_v53  ;;  %v314_v54 = vld [vmem:[%s3253_s5 + $0x360] sm:$0xff]  ;;  %v316_v55 = vld [vmem:[%s3253_s5 + $0x368] sm:$0xff] }
  0x31   : > { %v318_v56 = vld [vmem:[%s3253_s5 + $0x380] sm:$0xff]  ;;  %315 = vst [vmem:[%s3258_s6 + $0x1b0] sm:$0xff] %v314_v54  ;;  %317 = vst [vmem:[%s3258_s6 + $0x1b8] sm:$0xff] %v316_v55  ;;  %v320_v57 = vld [vmem:[%s3253_s5 + $0x388] sm:$0xff] }
  0x32   : > { %319 = vst [vmem:[%s3258_s6 + $0x1c0] sm:$0xff] %v318_v56  ;;  %v322_v58 = vld [vmem:[%s3253_s5 + $0x3a0] sm:$0xff]  ;;  %v324_v59 = vld [vmem:[%s3253_s5 + $0x3a8] sm:$0xff]  ;;  %321 = vst [vmem:[%s3258_s6 + $0x1c8] sm:$0xff] %v320_v57 }
  0x33   : > { %323 = vst [vmem:[%s3258_s6 + $0x1d0] sm:$0xff] %v322_v58  ;;  %325 = vst [vmem:[%s3258_s6 + $0x1d8] sm:$0xff] %v324_v59  ;;  %v326_v60 = vld [vmem:[%s3253_s5 + $0x3c0] sm:$0xff]  ;;  %v328_v61 = vld [vmem:[%s3253_s5 + $0x3c8] sm:$0xff] }
  0x34   : > { %v330_v62 = vld [vmem:[%s3253_s5 + $0x3e0] sm:$0xff]  ;;  %327 = vst [vmem:[%s3258_s6 + $0x1e0] sm:$0xff] %v326_v60  ;;  %329 = vst [vmem:[%s3258_s6 + $0x1e8] sm:$0xff] %v328_v61  ;;  %v332_v63 = vld [vmem:[%s3253_s5 + $0x3e8] sm:$0xff] }
  0x35   : > { %331 = vst [vmem:[%s3258_s6 + $0x1f0] sm:$0xff] %v330_v62  ;;  %v334_v0 = vld [vmem:[%s3253_s5 + $0x400] sm:$0xff]  ;;  %v336_v1 = vld [vmem:[%s3253_s5 + $0x408] sm:$0xff]  ;;  %333 = vst [vmem:[%s3258_s6 + $0x1f8] sm:$0xff] %v332_v63 }
  0x36   : > { %335 = vst [vmem:[%s3258_s6 + $0x200] sm:$0xff] %v334_v0  ;;  %337 = vst [vmem:[%s3258_s6 + $0x208] sm:$0xff] %v336_v1  ;;  %v338_v2 = vld [vmem:[%s3253_s5 + $0x420] sm:$0xff]  ;;  %v340_v3 = vld [vmem:[%s3253_s5 + $0x428] sm:$0xff] }
  0x37   : > { %v342_v4 = vld [vmem:[%s3253_s5 + $0x440] sm:$0xff]  ;;  %339 = vst [vmem:[%s3258_s6 + $0x210] sm:$0xff] %v338_v2  ;;  %341 = vst [vmem:[%s3258_s6 + $0x218] sm:$0xff] %v340_v3  ;;  %v344_v5 = vld [vmem:[%s3253_s5 + $0x448] sm:$0xff] }
  0x38   : > { %343 = vst [vmem:[%s3258_s6 + $0x220] sm:$0xff] %v342_v4  ;;  %v346_v6 = vld [vmem:[%s3253_s5 + $0x460] sm:$0xff]  ;;  %v348_v7 = vld [vmem:[%s3253_s5 + $0x468] sm:$0xff]  ;;  %345 = vst [vmem:[%s3258_s6 + $0x228] sm:$0xff] %v344_v5 }
  0x39   : > { %347 = vst [vmem:[%s3258_s6 + $0x230] sm:$0xff] %v346_v6  ;;  %349 = vst [vmem:[%s3258_s6 + $0x238] sm:$0xff] %v348_v7  ;;  %v350_v8 = vld [vmem:[%s3253_s5 + $0x480] sm:$0xff]  ;;  %v352_v9 = vld [vmem:[%s3253_s5 + $0x488] sm:$0xff] }
  0x3a   : > { %v354_v10 = vld [vmem:[%s3253_s5 + $0x4a0] sm:$0xff]  ;;  %351 = vst [vmem:[%s3258_s6 + $0x240] sm:$0xff] %v350_v8  ;;  %353 = vst [vmem:[%s3258_s6 + $0x248] sm:$0xff] %v352_v9  ;;  %v356_v11 = vld [vmem:[%s3253_s5 + $0x4a8] sm:$0xff] }
  0x3b   : > { %355 = vst [vmem:[%s3258_s6 + $0x250] sm:$0xff] %v354_v10  ;;  %v358_v12 = vld [vmem:[%s3253_s5 + $0x4c0] sm:$0xff]  ;;  %v360_v13 = vld [vmem:[%s3253_s5 + $0x4c8] sm:$0xff]  ;;  %357 = vst [vmem:[%s3258_s6 + $0x258] sm:$0xff] %v356_v11 }
  0x3c   : > { %359 = vst [vmem:[%s3258_s6 + $0x260] sm:$0xff] %v358_v12  ;;  %361 = vst [vmem:[%s3258_s6 + $0x268] sm:$0xff] %v360_v13  ;;  %v362_v14 = vld [vmem:[%s3253_s5 + $0x4e0] sm:$0xff]  ;;  %v364_v15 = vld [vmem:[%s3253_s5 + $0x4e8] sm:$0xff] }
  0x3d   : > { %v366_v16 = vld [vmem:[%s3253_s5 + $0x500] sm:$0xff]  ;;  %363 = vst [vmem:[%s3258_s6 + $0x270] sm:$0xff] %v362_v14  ;;  %365 = vst [vmem:[%s3258_s6 + $0x278] sm:$0xff] %v364_v15  ;;  %v368_v17 = vld [vmem:[%s3253_s5 + $0x508] sm:$0xff] }
  0x3e   : > { %367 = vst [vmem:[%s3258_s6 + $0x280] sm:$0xff] %v366_v16  ;;  %v370_v18 = vld [vmem:[%s3253_s5 + $0x520] sm:$0xff]  ;;  %v372_v19 = vld [vmem:[%s3253_s5 + $0x528] sm:$0xff]  ;;  %369 = vst [vmem:[%s3258_s6 + $0x288] sm:$0xff] %v368_v17 }
  0x3f   : > { %371 = vst [vmem:[%s3258_s6 + $0x290] sm:$0xff] %v370_v18  ;;  %373 = vst [vmem:[%s3258_s6 + $0x298] sm:$0xff] %v372_v19  ;;  %v374_v20 = vld [vmem:[%s3253_s5 + $0x540] sm:$0xff]  ;;  %v376_v21 = vld [vmem:[%s3253_s5 + $0x548] sm:$0xff] }
  0x40   : > { %v378_v22 = vld [vmem:[%s3253_s5 + $0x560] sm:$0xff]  ;;  %375 = vst [vmem:[%s3258_s6 + $0x2a0] sm:$0xff] %v374_v20  ;;  %377 = vst [vmem:[%s3258_s6 + $0x2a8] sm:$0xff] %v376_v21  ;;  %v380_v23 = vld [vmem:[%s3253_s5 + $0x568] sm:$0xff] }
  0x41   : > { %379 = vst [vmem:[%s3258_s6 + $0x2b0] sm:$0xff] %v378_v22  ;;  %v382_v24 = vld [vmem:[%s3253_s5 + $0x580] sm:$0xff]  ;;  %v384_v25 = vld [vmem:[%s3253_s5 + $0x588] sm:$0xff]  ;;  %381 = vst [vmem:[%s3258_s6 + $0x2b8] sm:$0xff] %v380_v23 }
  0x42   : > { %383 = vst [vmem:[%s3258_s6 + $0x2c0] sm:$0xff] %v382_v24  ;;  %385 = vst [vmem:[%s3258_s6 + $0x2c8] sm:$0xff] %v384_v25  ;;  %v386_v26 = vld [vmem:[%s3253_s5 + $0x5a0] sm:$0xff]  ;;  %v388_v27 = vld [vmem:[%s3253_s5 + $0x5a8] sm:$0xff] }
  0x43   : > { %v390_v28 = vld [vmem:[%s3253_s5 + $0x5c0] sm:$0xff]  ;;  %387 = vst [vmem:[%s3258_s6 + $0x2d0] sm:$0xff] %v386_v26  ;;  %389 = vst [vmem:[%s3258_s6 + $0x2d8] sm:$0xff] %v388_v27  ;;  %v392_v29 = vld [vmem:[%s3253_s5 + $0x5c8] sm:$0xff] }
  0x44   : > { %391 = vst [vmem:[%s3258_s6 + $0x2e0] sm:$0xff] %v390_v28  ;;  %v394_v30 = vld [vmem:[%s3253_s5 + $0x5e0] sm:$0xff]  ;;  %v396_v31 = vld [vmem:[%s3253_s5 + $0x5e8] sm:$0xff]  ;;  %393 = vst [vmem:[%s3258_s6 + $0x2e8] sm:$0xff] %v392_v29 }
  0x45   : > { %395 = vst [vmem:[%s3258_s6 + $0x2f0] sm:$0xff] %v394_v30  ;;  %397 = vst [vmem:[%s3258_s6 + $0x2f8] sm:$0xff] %v396_v31  ;;  %v398_v32 = vld [vmem:[%s3253_s5 + $0x600] sm:$0xff]  ;;  %v400_v33 = vld [vmem:[%s3253_s5 + $0x608] sm:$0xff] }
  0x46   : > { %v402_v34 = vld [vmem:[%s3253_s5 + $0x620] sm:$0xff]  ;;  %399 = vst [vmem:[%s3258_s6 + $0x300] sm:$0xff] %v398_v32  ;;  %401 = vst [vmem:[%s3258_s6 + $0x308] sm:$0xff] %v400_v33  ;;  %v404_v35 = vld [vmem:[%s3253_s5 + $0x628] sm:$0xff] }
  0x47   : > { %403 = vst [vmem:[%s3258_s6 + $0x310] sm:$0xff] %v402_v34  ;;  %v406_v36 = vld [vmem:[%s3253_s5 + $0x640] sm:$0xff]  ;;  %v408_v37 = vld [vmem:[%s3253_s5 + $0x648] sm:$0xff]  ;;  %405 = vst [vmem:[%s3258_s6 + $0x318] sm:$0xff] %v404_v35 }
  0x48   : > { %407 = vst [vmem:[%s3258_s6 + $0x320] sm:$0xff] %v406_v36  ;;  %409 = vst [vmem:[%s3258_s6 + $0x328] sm:$0xff] %v408_v37  ;;  %v410_v38 = vld [vmem:[%s3253_s5 + $0x660] sm:$0xff]  ;;  %v412_v39 = vld [vmem:[%s3253_s5 + $0x668] sm:$0xff] }
  0x49   : > { %v414_v40 = vld [vmem:[%s3253_s5 + $0x680] sm:$0xff]  ;;  %411 = vst [vmem:[%s3258_s6 + $0x330] sm:$0xff] %v410_v38  ;;  %413 = vst [vmem:[%s3258_s6 + $0x338] sm:$0xff] %v412_v39  ;;  %v416_v41 = vld [vmem:[%s3253_s5 + $0x688] sm:$0xff] }
  0x4a   : > { %415 = vst [vmem:[%s3258_s6 + $0x340] sm:$0xff] %v414_v40  ;;  %v418_v42 = vld [vmem:[%s3253_s5 + $0x6a0] sm:$0xff]  ;;  %v420_v43 = vld [vmem:[%s3253_s5 + $0x6a8] sm:$0xff]  ;;  %417 = vst [vmem:[%s3258_s6 + $0x348] sm:$0xff] %v416_v41 }
  0x4b   : > { %419 = vst [vmem:[%s3258_s6 + $0x350] sm:$0xff] %v418_v42  ;;  %421 = vst [vmem:[%s3258_s6 + $0x358] sm:$0xff] %v420_v43  ;;  %v422_v44 = vld [vmem:[%s3253_s5 + $0x6c0] sm:$0xff]  ;;  %v424_v45 = vld [vmem:[%s3253_s5 + $0x6c8] sm:$0xff] }
  0x4c   : > { %v426_v46 = vld [vmem:[%s3253_s5 + $0x6e0] sm:$0xff]  ;;  %423 = vst [vmem:[%s3258_s6 + $0x360] sm:$0xff] %v422_v44  ;;  %425 = vst [vmem:[%s3258_s6 + $0x368] sm:$0xff] %v424_v45  ;;  %v428_v47 = vld [vmem:[%s3253_s5 + $0x6e8] sm:$0xff] }
  0x4d   : > { %427 = vst [vmem:[%s3258_s6 + $0x370] sm:$0xff] %v426_v46  ;;  %v430_v48 = vld [vmem:[%s3253_s5 + $0x700] sm:$0xff]  ;;  %v432_v49 = vld [vmem:[%s3253_s5 + $0x708] sm:$0xff]  ;;  %429 = vst [vmem:[%s3258_s6 + $0x378] sm:$0xff] %v428_v47 }
  0x4e   : > { %431 = vst [vmem:[%s3258_s6 + $0x380] sm:$0xff] %v430_v48  ;;  %433 = vst [vmem:[%s3258_s6 + $0x388] sm:$0xff] %v432_v49  ;;  %v434_v50 = vld [vmem:[%s3253_s5 + $0x720] sm:$0xff]  ;;  %v436_v51 = vld [vmem:[%s3253_s5 + $0x728] sm:$0xff] }
  0x4f   : > { %v438_v52 = vld [vmem:[%s3253_s5 + $0x740] sm:$0xff]  ;;  %435 = vst [vmem:[%s3258_s6 + $0x390] sm:$0xff] %v434_v50  ;;  %437 = vst [vmem:[%s3258_s6 + $0x398] sm:$0xff] %v436_v51  ;;  %v440_v53 = vld [vmem:[%s3253_s5 + $0x748] sm:$0xff] }
  0x50   : > { %439 = vst [vmem:[%s3258_s6 + $0x3a0] sm:$0xff] %v438_v52  ;;  %v442_v54 = vld [vmem:[%s3253_s5 + $0x760] sm:$0xff]  ;;  %v444_v55 = vld [vmem:[%s3253_s5 + $0x768] sm:$0xff]  ;;  %441 = vst [vmem:[%s3258_s6 + $0x3a8] sm:$0xff] %v440_v53 }
  0x51   : > { %443 = vst [vmem:[%s3258_s6 + $0x3b0] sm:$0xff] %v442_v54  ;;  %445 = vst [vmem:[%s3258_s6 + $0x3b8] sm:$0xff] %v444_v55  ;;  %v446_v56 = vld [vmem:[%s3253_s5 + $0x780] sm:$0xff]  ;;  %v448_v57 = vld [vmem:[%s3253_s5 + $0x788] sm:$0xff] }
  0x52   : > { %v450_v58 = vld [vmem:[%s3253_s5 + $0x7a0] sm:$0xff]  ;;  %447 = vst [vmem:[%s3258_s6 + $0x3c0] sm:$0xff] %v446_v56  ;;  %449 = vst [vmem:[%s3258_s6 + $0x3c8] sm:$0xff] %v448_v57  ;;  %v452_v59 = vld [vmem:[%s3253_s5 + $0x7a8] sm:$0xff] }
  0x53   : > { %451 = vst [vmem:[%s3258_s6 + $0x3d0] sm:$0xff] %v450_v58  ;;  %v454_v60 = vld [vmem:[%s3253_s5 + $0x7c0] sm:$0xff]  ;;  %v456_v61 = vld [vmem:[%s3253_s5 + $0x7c8] sm:$0xff]  ;;  %453 = vst [vmem:[%s3258_s6 + $0x3d8] sm:$0xff] %v452_v59 }
  0x54   : > { %455 = vst [vmem:[%s3258_s6 + $0x3e0] sm:$0xff] %v454_v60  ;;  %457 = vst [vmem:[%s3258_s6 + $0x3e8] sm:$0xff] %v456_v61  ;;  %v458_v62 = vld [vmem:[%s3253_s5 + $0x7e0] sm:$0xff]  ;;  %v460_v63 = vld [vmem:[%s3253_s5 + $0x7e8] sm:$0xff] }
  0x55   : > { %459 = vst [vmem:[%s3258_s6 + $0x3f0] sm:$0xff] %v458_v62  ;;  %461 = vst [vmem:[%s3258_s6 + $0x3f8] sm:$0xff] %v460_v63 }
  0x56 PF: > { %p2620_p8 = scmp.ge.s32.totalorder %s3176_s19, 1  ;;  %p466_p9 = scmp.lt.s32.totalorder %s3176_s19, 3 }
  0x58   : > { %p467_p10 = pnand %p2620_p8, %p466_p9 }
  0x59   : > { %s473_s7 = sand.u32 (!%p467_p10), 1, %s3160_s15   ;;  %v2996_v0 = vld [vmem:[%s4002_s0 + $0x4] ss:$16 sps:$4 sm:$0xff] (!%p467_p10)   ;;  %s2623_s6 = sshll.u32 (!%p467_p10), %s3168_s17, 2 }
  0x5a   : > { %470 = sbr.rel (%p467_p10) target bundleno = 532 (0x214), region = 47  ;;  %s2621_s8 = sshll.u32 (!%p467_p10), %s473_s7, 10  ;;  %1523 = vmatprep.mubr.bf16.mxu0 (!%p467_p10), %v2996_v0  ;;  %1749 = vmatprep.mubr.bf16.mxu1 (!%p467_p10), %v2996_v0 }
  0x5b   : > { %s3521_s11 = scalar_lea.vmem (!%p467_p10), [#allocation2], %s2621_s8  ;;  %p522_p11 = scmp.lt.s32.totalorder (!%p467_p10), %s2623_s6, 7 }
  0x5c   : > { %v2898_v1 = vld [vmem:[%s3521_s11 + $0x4] ss:$16 sps:$4 sm:$0xff] (!%p467_p10)   ;;  %v2900_v2 = vld [vmem:[%s3521_s11 + $0xc] ss:$16 sps:$4 sm:$0xff] (!%p467_p10)   ;;  %v2902_v3 = vld [vmem:[%s3521_s11] ss:$16 sps:$4 sm:$0xff] (!%p467_p10)  }
  0x5d   : > { %1491 = vmatprep.subr.bf16.mxu0 (!%p467_p10), %v2898_v1  ;;  %v2903_v4 = vld [vmem:[%s3521_s11 + $0x8] ss:$16 sps:$4 sm:$0xff] (!%p467_p10)   ;;  %1717 = vmatprep.subr.bf16.mxu1 (!%p467_p10), %v2900_v2  ;;  %v2904_v5 = vld [vmem:[%s3521_s11 + $0x24] ss:$16 sps:$4 sm:$0xff] (!%p467_p10)   ;;  %v2906_v6 = vld [vmem:[%s3521_s11 + $0x2c] ss:$16 sps:$4 sm:$0xff] (!%p467_p10)  }
  0x5e   : > { %1492 = vmatpush1.bf16.msra.mxu0 (!%p467_p10), %v2902_v3  ;;  %1718 = vmatpush1.bf16.msra.mxu1 (!%p467_p10), %v2903_v4  ;;  %v2908_v7 = vld [vmem:[%s3521_s11 + $0x20] ss:$16 sps:$4 sm:$0xff] (!%p467_p10)   ;;  %v2909_v8 = vld [vmem:[%s3521_s11 + $0x28] ss:$16 sps:$4 sm:$0xff] (!%p467_p10)   ;;  %v2910_v9 = vld [vmem:[%s3521_s11 + $0x44] ss:$16 sps:$4 sm:$0xff] (!%p467_p10)  }
  0x5f   : > { %1493 = vmatprep.subr.bf16.mxu0 (!%p467_p10), %v2904_v5  ;;  %1719 = vmatprep.subr.bf16.mxu1 (!%p467_p10), %v2906_v6  ;;  %v2912_v10 = vld [vmem:[%s3521_s11 + $0x4c] ss:$16 sps:$4 sm:$0xff] (!%p467_p10)   ;;  %v2914_v11 = vld [vmem:[%s3521_s11 + $0x40] ss:$16 sps:$4 sm:$0xff] (!%p467_p10)   ;;  %v2915_v12 = vld [vmem:[%s3521_s11 + $0x48] ss:$16 sps:$4 sm:$0xff] (!%p467_p10)  }
  0x60   : > { %v2916_v13 = vld [vmem:[%s3521_s11 + $0x64] ss:$16 sps:$4 sm:$0xff] (!%p467_p10)   ;;  %v2918_v14 = vld [vmem:[%s3521_s11 + $0x6c] ss:$16 sps:$4 sm:$0xff] (!%p467_p10)   ;;  %v2920_v15 = vld [vmem:[%s3521_s11 + $0x60] ss:$16 sps:$4 sm:$0xff] (!%p467_p10)  }
  0x61   : > { %v2921_v16 = vld [vmem:[%s3521_s11 + $0x68] ss:$16 sps:$4 sm:$0xff]   ;;  %v2922_v17 = vld [vmem:[%s3521_s11 + $0x84] ss:$16 sps:$4 sm:$0xff]   ;;  %v2924_v18 = vld [vmem:[%s3521_s11 + $0x8c] ss:$16 sps:$4 sm:$0xff]  }
  0x62   : > { %1494 = vmatpush1.bf16.msra.mxu0 %v2908_v7  ;;  %1720 = vmatpush1.bf16.msra.mxu1 %v2909_v8  ;;  %v2926_v19 = vld [vmem:[%s3521_s11 + $0x80] ss:$16 sps:$4 sm:$0xff]   ;;  %v2927_v20 = vld [vmem:[%s3521_s11 + $0x88] ss:$16 sps:$4 sm:$0xff]   ;;  %v2928_v21 = vld [vmem:[%s3521_s11 + $0xa4] ss:$16 sps:$4 sm:$0xff]  }
  0x63   : > { %1495 = vmatprep.subr.bf16.mxu0 %v2910_v9  ;;  %1721 = vmatprep.subr.bf16.mxu1 %v2912_v10  ;;  %v2930_v22 = vld [vmem:[%s3521_s11 + $0xac] ss:$16 sps:$4 sm:$0xff]   ;;  %v2932_v23 = vld [vmem:[%s3521_s11 + $0xa0] ss:$16 sps:$4 sm:$0xff]   ;;  %v2933_v24 = vld [vmem:[%s3521_s11 + $0xa8] ss:$16 sps:$4 sm:$0xff]  }
  0x64   : > { %v2934_v25 = vld [vmem:[%s3521_s11 + $0xc4] ss:$16 sps:$4 sm:$0xff]   ;;  %v2936_v26 = vld [vmem:[%s3521_s11 + $0xcc] ss:$16 sps:$4 sm:$0xff]   ;;  %v2938_v27 = vld [vmem:[%s3521_s11 + $0xc0] ss:$16 sps:$4 sm:$0xff]  }
  0x65   : > { %v2939_v28 = vld [vmem:[%s3521_s11 + $0xc8] ss:$16 sps:$4 sm:$0xff]   ;;  %v2940_v29 = vld [vmem:[%s3521_s11 + $0xe4] ss:$16 sps:$4 sm:$0xff]   ;;  %v2942_v30 = vld [vmem:[%s3521_s11 + $0xec] ss:$16 sps:$4 sm:$0xff]  }
  0x66   : > { %1496 = vmatpush1.bf16.msra.mxu0 %v2914_v11  ;;  %1722 = vmatpush1.bf16.msra.mxu1 %v2915_v12  ;;  %v2944_v31 = vld [vmem:[%s3521_s11 + $0xe0] ss:$16 sps:$4 sm:$0xff]   ;;  %v2945_v32 = vld [vmem:[%s3521_s11 + $0xe8] ss:$16 sps:$4 sm:$0xff]   ;;  %v2946_v33 = vld [vmem:[%s3521_s11 + $0x104] ss:$16 sps:$4 sm:$0xff]  }
  0x67   : > { %1497 = vmatprep.subr.bf16.mxu0 %v2916_v13  ;;  %1723 = vmatprep.subr.bf16.mxu1 %v2918_v14  ;;  %v2948_v34 = vld [vmem:[%s3521_s11 + $0x10c] ss:$16 sps:$4 sm:$0xff]   ;;  %v2950_v35 = vld [vmem:[%s3521_s11 + $0x100] ss:$16 sps:$4 sm:$0xff]   ;;  %v2951_v36 = vld [vmem:[%s3521_s11 + $0x108] ss:$16 sps:$4 sm:$0xff]  }
  0x68   : > { %v2952_v37 = vld [vmem:[%s3521_s11 + $0x124] ss:$16 sps:$4 sm:$0xff]   ;;  %v2954_v38 = vld [vmem:[%s3521_s11 + $0x12c] ss:$16 sps:$4 sm:$0xff]   ;;  %v2956_v39 = vld [vmem:[%s3521_s11 + $0x120] ss:$16 sps:$4 sm:$0xff]  }
  0x69   : > { %v2957_v40 = vld [vmem:[%s3521_s11 + $0x128] ss:$16 sps:$4 sm:$0xff]   ;;  %v2958_v41 = vld [vmem:[%s3521_s11 + $0x144] ss:$16 sps:$4 sm:$0xff]   ;;  %v2960_v42 = vld [vmem:[%s3521_s11 + $0x14c] ss:$16 sps:$4 sm:$0xff]  }
  0x6a   : > { %1498 = vmatpush1.bf16.msra.mxu0 %v2920_v15  ;;  %1724 = vmatpush1.bf16.msra.mxu1 %v2921_v16  ;;  %v2962_v43 = vld [vmem:[%s3521_s11 + $0x140] ss:$16 sps:$4 sm:$0xff]   ;;  %v2963_v44 = vld [vmem:[%s3521_s11 + $0x148] ss:$16 sps:$4 sm:$0xff]   ;;  %v2964_v45 = vld [vmem:[%s3521_s11 + $0x164] ss:$16 sps:$4 sm:$0xff]  }
  0x6b   : > { %1499 = vmatprep.subr.bf16.mxu0 %v2922_v17  ;;  %1725 = vmatprep.subr.bf16.mxu1 %v2924_v18  ;;  %v2966_v46 = vld [vmem:[%s3521_s11 + $0x16c] ss:$16 sps:$4 sm:$0xff]   ;;  %v2968_v47 = vld [vmem:[%s3521_s11 + $0x160] ss:$16 sps:$4 sm:$0xff]   ;;  %v2969_v48 = vld [vmem:[%s3521_s11 + $0x168] ss:$16 sps:$4 sm:$0xff]  }
  0x6c   : > { %v2970_v49 = vld [vmem:[%s3521_s11 + $0x184] ss:$16 sps:$4 sm:$0xff]   ;;  %v2972_v50 = vld [vmem:[%s3521_s11 + $0x18c] ss:$16 sps:$4 sm:$0xff]   ;;  %v2974_v51 = vld [vmem:[%s3521_s11 + $0x180] ss:$16 sps:$4 sm:$0xff]  }
  0x6d   : > { %v2975_v52 = vld [vmem:[%s3521_s11 + $0x188] ss:$16 sps:$4 sm:$0xff]   ;;  %v2976_v53 = vld [vmem:[%s3521_s11 + $0x1a4] ss:$16 sps:$4 sm:$0xff]   ;;  %v2978_v54 = vld [vmem:[%s3521_s11 + $0x1ac] ss:$16 sps:$4 sm:$0xff]  }
  0x6e   : > { %1500 = vmatpush1.bf16.msra.mxu0 %v2926_v19  ;;  %1726 = vmatpush1.bf16.msra.mxu1 %v2927_v20  ;;  %v2980_v55 = vld [vmem:[%s3521_s11 + $0x1a0] ss:$16 sps:$4 sm:$0xff]   ;;  %v2981_v56 = vld [vmem:[%s3521_s11 + $0x1a8] ss:$16 sps:$4 sm:$0xff]   ;;  %v2982_v57 = vld [vmem:[%s3521_s11 + $0x1c4] ss:$16 sps:$4 sm:$0xff]  }
  0x6f   : > { %1501 = vmatprep.subr.bf16.mxu0 %v2928_v21  ;;  %1727 = vmatprep.subr.bf16.mxu1 %v2930_v22  ;;  %v2984_v58 = vld [vmem:[%s3521_s11 + $0x1cc] ss:$16 sps:$4 sm:$0xff]   ;;  %v2986_v59 = vld [vmem:[%s3521_s11 + $0x1c0] ss:$16 sps:$4 sm:$0xff]   ;;  %v2987_v60 = vld [vmem:[%s3521_s11 + $0x1c8] ss:$16 sps:$4 sm:$0xff]  }
  0x70   : > { %v2988_v61 = vld [vmem:[%s3521_s11 + $0x1e4] ss:$16 sps:$4 sm:$0xff]   ;;  %v2990_v62 = vld [vmem:[%s3521_s11 + $0x1ec] ss:$16 sps:$4 sm:$0xff]   ;;  %v2992_v63 = vld [vmem:[%s3521_s11 + $0x1e0] ss:$16 sps:$4 sm:$0xff]  }
  0x71   : > { %v2993_v0 = vld [vmem:[%s3521_s11 + $0x1e8] ss:$16 sps:$4 sm:$0xff]   ;;  %v2999_v1 = vld [vmem:[%s3521_s11 + $0x204] ss:$16 sps:$4 sm:$0xff]   ;;  %v3002_v2 = vld [vmem:[%s3521_s11 + $0x20c] ss:$16 sps:$4 sm:$0xff]  }
  0x72   : > { %1502 = vmatpush1.bf16.msra.mxu0 %v2932_v23  ;;  %1728 = vmatpush1.bf16.msra.mxu1 %v2933_v24  ;;  %v2994_v3 = vld [vmem:[%s4002_s0] ss:$16 sps:$4 sm:$0xff]   ;;  %v3000_v5 = vld [vmem:[%s3521_s11 + $0x208] ss:$16 sps:$4 sm:$0xff]   ;;  %v3005_v6 = vld [vmem:[%s3521_s11 + $0x224] ss:$16 sps:$4 sm:$0xff]  }
  0x73   : > { %1503 = vmatprep.subr.bf16.mxu0 %v2934_v25  ;;  %1729 = vmatprep.subr.bf16.mxu1 %v2936_v26  ;;  %v2997_v4 = vld [vmem:[%s3521_s11 + $0x200] ss:$16 sps:$4 sm:$0xff]   ;;  %v3008_v7 = vld [vmem:[%s3521_s11 + $0x22c] ss:$16 sps:$4 sm:$0xff]   ;;  %v3009_v8 = vld [vmem:[%s4002_s0 + $0x24] ss:$16 sps:$4 sm:$0xff]  }
  0x74   : > { %v3003_v9 = vld [vmem:[%s3521_s11 + $0x220] ss:$16 sps:$4 sm:$0xff]   ;;  %v3006_v10 = vld [vmem:[%s3521_s11 + $0x228] ss:$16 sps:$4 sm:$0xff]   ;;  %v3014_v11 = vld [vmem:[%s3521_s11 + $0x244] ss:$16 sps:$4 sm:$0xff]  }
  0x75   : > { %v3017_v12 = vld [vmem:[%s3521_s11 + $0x24c] ss:$16 sps:$4 sm:$0xff]   ;;  %v3011_v13 = vld [vmem:[%s4002_s0 + $0x20] ss:$16 sps:$4 sm:$0xff]   ;;  %v3015_v15 = vld [vmem:[%s3521_s11 + $0x248] ss:$16 sps:$4 sm:$0xff]  }
  0x76   : > { %1504 = vmatpush1.bf16.msra.mxu0 %v2938_v27  ;;  %1730 = vmatpush1.bf16.msra.mxu1 %v2939_v28  ;;  %v3012_v14 = vld [vmem:[%s3521_s11 + $0x240] ss:$16 sps:$4 sm:$0xff]   ;;  %v3020_v16 = vld [vmem:[%s3521_s11 + $0x264] ss:$16 sps:$4 sm:$0xff]   ;;  %v3023_v17 = vld [vmem:[%s3521_s11 + $0x26c] ss:$16 sps:$4 sm:$0xff]  }
  0x77   : > { %1505 = vmatprep.subr.bf16.mxu0 %v2940_v29  ;;  %1731 = vmatprep.subr.bf16.mxu1 %v2942_v30  ;;  %v3024_v18 = vld [vmem:[%s4002_s0 + $0x44] ss:$16 sps:$4 sm:$0xff]   ;;  %v3018_v19 = vld [vmem:[%s3521_s11 + $0x260] ss:$16 sps:$4 sm:$0xff]   ;;  %v3021_v20 = vld [vmem:[%s3521_s11 + $0x268] ss:$16 sps:$4 sm:$0xff]  }
  0x78   : > { %v3029_v21 = vld [vmem:[%s3521_s11 + $0x284] ss:$16 sps:$4 sm:$0xff]   ;;  %v3032_v22 = vld [vmem:[%s3521_s11 + $0x28c] ss:$16 sps:$4 sm:$0xff]   ;;  %v3026_v23 = vld [vmem:[%s4002_s0 + $0x40] ss:$16 sps:$4 sm:$0xff]  }
  0x79   : > { %v3027_v24 = vld [vmem:[%s3521_s11 + $0x280] ss:$16 sps:$4 sm:$0xff]   ;;  %v3030_v25 = vld [vmem:[%s3521_s11 + $0x288] ss:$16 sps:$4 sm:$0xff]   ;;  %v3035_v26 = vld [vmem:[%s3521_s11 + $0x2a4] ss:$16 sps:$4 sm:$0xff]  }
  0x7a   : > { %1506 = vmatpush1.bf16.msra.mxu0 %v2944_v31  ;;  %1732 = vmatpush1.bf16.msra.mxu1 %v2945_v32  ;;  %v3038_v27 = vld [vmem:[%s3521_s11 + $0x2ac] ss:$16 sps:$4 sm:$0xff]   ;;  %v3039_v28 = vld [vmem:[%s4002_s0 + $0x64] ss:$16 sps:$4 sm:$0xff]   ;;  %v3033_v29 = vld [vmem:[%s3521_s11 + $0x2a0] ss:$16 sps:$4 sm:$0xff]  }
  0x7b   : > { %1507 = vmatprep.subr.bf16.mxu0 %v2946_v33  ;;  %1733 = vmatprep.subr.bf16.mxu1 %v2948_v34  ;;  %v3036_v30 = vld [vmem:[%s3521_s11 + $0x2a8] ss:$16 sps:$4 sm:$0xff]   ;;  %v3044_v31 = vld [vmem:[%s3521_s11 + $0x2c4] ss:$16 sps:$4 sm:$0xff]   ;;  %v3047_v32 = vld [vmem:[%s3521_s11 + $0x2cc] ss:$16 sps:$4 sm:$0xff]  }
  0x7c   : > { %v3041_v33 = vld [vmem:[%s4002_s0 + $0x60] ss:$16 sps:$4 sm:$0xff]   ;;  %s4017_s6 = smov (!%p522_p11, %s2623_s6), 7  ;;  %s2622_s21 = sshll.u32 %s473_s7, 9 }
  0x7d   : > { %v3042_v34 = vld [vmem:[%s3521_s11 + $0x2c0] ss:$16 sps:$4 sm:$0xff]   ;;  %s3748_s10 = scalar_lea.vmem %s4005_s3, %s4017_s6  ;;  %s3761_s14 = scalar_lea.vmem %s4006_s4, %s4017_s6 }
  0x7e   : > { %1508 = vmatpush1.bf16.msra.mxu0 %v2950_v35  ;;  %1734 = vmatpush1.bf16.msra.mxu1 %v2951_v36  ;;  %v3045_v35 = vld [vmem:[%s3521_s11 + $0x2c8] ss:$16 sps:$4 sm:$0xff]   ;;  %v3050_v36 = vld [vmem:[%s3521_s11 + $0x2e4] ss:$16 sps:$4 sm:$0xff]   ;;  %s3768_s22 = scalar_lea.vmem [#allocation3], %s2622_s21  ;;  %s2791_s15 = sshll.u32 (%p3240_p6), %s3168_s17, 5 }
  0x7f   : > { %1509 = vmatprep.subr.bf16.mxu0 %v2952_v37  ;;  %1735 = vmatprep.subr.bf16.mxu1 %v2954_v38  ;;  %v3053_v37 = vld [vmem:[%s3521_s11 + $0x2ec] ss:$16 sps:$4 sm:$0xff]   ;;  %v3054_v38 = vld [vmem:[%s4002_s0 + $0x84] ss:$16 sps:$4 sm:$0xff]   ;;  %s3860_s23 = scalar_lea.vmem (%p3240_p6), %s4004_s2, %s2791_s15 }
  0x82   : > { %1510 = vmatpush1.bf16.msra.mxu0 %v2956_v39  ;;  %1736 = vmatpush1.bf16.msra.mxu1 %v2957_v40  ;;  %v3048_v39 = vld [vmem:[%s3521_s11 + $0x2e0] ss:$16 sps:$4 sm:$0xff]   ;;  %v3051_v40 = vld [vmem:[%s3521_s11 + $0x2e8] ss:$16 sps:$4 sm:$0xff]  }
  0x83   : > { %1511 = vmatprep.subr.bf16.mxu0 %v2958_v41  ;;  %1737 = vmatprep.subr.bf16.mxu1 %v2960_v42  ;;  %v3059_v41 = vld [vmem:[%s3521_s11 + $0x304] ss:$16 sps:$4 sm:$0xff]   ;;  %v3062_v42 = vld [vmem:[%s3521_s11 + $0x30c] ss:$16 sps:$4 sm:$0xff]  }
  0x86   : > { %1512 = vmatpush1.bf16.msra.mxu0 %v2962_v43  ;;  %1738 = vmatpush1.bf16.msra.mxu1 %v2963_v44  ;;  %v3056_v43 = vld [vmem:[%s4002_s0 + $0x80] ss:$16 sps:$4 sm:$0xff]  }
  0x87   : > { %1513 = vmatprep.subr.bf16.mxu0 %v2964_v45  ;;  %1739 = vmatprep.subr.bf16.mxu1 %v2966_v46  ;;  %v3057_v44 = vld [vmem:[%s3521_s11 + $0x300] ss:$16 sps:$4 sm:$0xff]   ;;  %v3060_v45 = vld [vmem:[%s3521_s11 + $0x308] ss:$16 sps:$4 sm:$0xff]   ;;  %v3065_v46 = vld [vmem:[%s3521_s11 + $0x324] ss:$16 sps:$4 sm:$0xff]  }
  0x8a   : > { %1514 = vmatpush1.bf16.msra.mxu0 %v2968_v47  ;;  %1740 = vmatpush1.bf16.msra.mxu1 %v2969_v48  ;;  %v3068_v47 = vld [vmem:[%s3521_s11 + $0x32c] ss:$16 sps:$4 sm:$0xff]   ;;  %v3069_v48 = vld [vmem:[%s4002_s0 + $0xa4] ss:$16 sps:$4 sm:$0xff]  }
  0x8b   : > { %1515 = vmatprep.subr.bf16.mxu0 %v2970_v49  ;;  %1741 = vmatprep.subr.bf16.mxu1 %v2972_v50  ;;  %v3063_v49 = vld [vmem:[%s3521_s11 + $0x320] ss:$16 sps:$4 sm:$0xff]   ;;  %v3066_v50 = vld [vmem:[%s3521_s11 + $0x328] ss:$16 sps:$4 sm:$0xff]  }
  0x8e   : > { %1516 = vmatpush1.bf16.msra.mxu0 %v2974_v51  ;;  %1742 = vmatpush1.bf16.msra.mxu1 %v2975_v52  ;;  %v3074_v51 = vld [vmem:[%s3521_s11 + $0x344] ss:$16 sps:$4 sm:$0xff]   ;;  %v3077_v52 = vld [vmem:[%s3521_s11 + $0x34c] ss:$16 sps:$4 sm:$0xff]  }
  0x8f   : > { %1517 = vmatprep.subr.bf16.mxu0 %v2976_v53  ;;  %1743 = vmatprep.subr.bf16.mxu1 %v2978_v54  ;;  %v3071_v53 = vld [vmem:[%s4002_s0 + $0xa0] ss:$16 sps:$4 sm:$0xff]  }
  0x90   : > { %v3072_v54 = vld [vmem:[%s3521_s11 + $0x340] ss:$16 sps:$4 sm:$0xff]  }
  0x92   : > { %1518 = vmatpush1.bf16.msra.mxu0 %v2980_v55  ;;  %1744 = vmatpush1.bf16.msra.mxu1 %v2981_v56  ;;  %v3075_v55 = vld [vmem:[%s3521_s11 + $0x348] ss:$16 sps:$4 sm:$0xff]   ;;  %v3080_v56 = vld [vmem:[%s3521_s11 + $0x364] ss:$16 sps:$4 sm:$0xff]  }
  0x93   : > { %1519 = vmatprep.subr.bf16.mxu0 %v2982_v57  ;;  %1745 = vmatprep.subr.bf16.mxu1 %v2984_v58  ;;  %v3083_v57 = vld [vmem:[%s3521_s11 + $0x36c] ss:$16 sps:$4 sm:$0xff]   ;;  %v3084_v58 = vld [vmem:[%s4002_s0 + $0xc4] ss:$16 sps:$4 sm:$0xff]  }
  0x96   : > { %1520 = vmatpush1.bf16.msra.mxu0 %v2986_v59  ;;  %1746 = vmatpush1.bf16.msra.mxu1 %v2987_v60  ;;  %v3078_v59 = vld [vmem:[%s3521_s11 + $0x360] ss:$16 sps:$4 sm:$0xff]   ;;  %v3081_v60 = vld [vmem:[%s3521_s11 + $0x368] ss:$16 sps:$4 sm:$0xff]  }
  0x97   : > { %1521 = vmatprep.subr.bf16.mxu0 %v2988_v61  ;;  %1747 = vmatprep.subr.bf16.mxu1 %v2990_v62  ;;  %v3089_v61 = vld [vmem:[%s3521_s11 + $0x384] ss:$16 sps:$4 sm:$0xff]   ;;  %v3092_v62 = vld [vmem:[%s3521_s11 + $0x38c] ss:$16 sps:$4 sm:$0xff]  }
  0x9a   : > { %1522 = vmatpush1.bf16.msra.mxu0 %v2992_v63  ;;  %1748 = vmatpush1.bf16.msra.mxu1 %v2993_v0  ;;  %v3086_v63 = vld [vmem:[%s4002_s0 + $0xc0] ss:$16 sps:$4 sm:$0xff]  }
  0x9b   : > { %1604 = vmatprep.subr.bf16.mxu0 %v2999_v1  ;;  %1830 = vmatprep.subr.bf16.mxu1 %v3002_v2  ;;  %v3087_v0 = vld [vmem:[%s3521_s11 + $0x380] ss:$16 sps:$4 sm:$0xff]   ;;  %v3090_v1 = vld [vmem:[%s3521_s11 + $0x388] ss:$16 sps:$4 sm:$0xff]   ;;  %v3095_v2 = vld [vmem:[%s3521_s11 + $0x3a4] ss:$16 sps:$4 sm:$0xff]  }
  0x9d   : > { %1524 = vmatmul.mubr.bf16.vlgmr.msra.gmra.mrb[0].mxu0 %v2994_v3  ;;  %1750 = vmatmul.mubr.bf16.vlgmr.msra.gmra.mrb[0].mxu1 %v2994_v3  ;;  %v3098_v3 = vld [vmem:[%s3521_s11 + $0x3ac] ss:$16 sps:$4 sm:$0xff]  }
  0x9e   : > { %1605 = vmatpush1.bf16.msra.mxu0 %v2997_v4  ;;  %1831 = vmatpush1.bf16.msra.mxu1 %v3000_v5  ;;  %v3099_v4 = vld [vmem:[%s4002_s0 + $0xe4] ss:$16 sps:$4 sm:$0xff]   ;;  %v3093_v5 = vld [vmem:[%s3521_s11 + $0x3a0] ss:$16 sps:$4 sm:$0xff]  }
  0x9f   : > { %1606 = vmatprep.subr.bf16.mxu0 %v3005_v6  ;;  %1832 = vmatprep.subr.bf16.mxu1 %v3008_v7  ;;  %v3096_v6 = vld [vmem:[%s3521_s11 + $0x3a8] ss:$16 sps:$4 sm:$0xff]   ;;  %v3104_v7 = vld [vmem:[%s3521_s11 + $0x3c4] ss:$16 sps:$4 sm:$0xff]  }
  0xa0   : > { %1533 = vmatprep.mubr.bf16.mxu0 %v3009_v8  ;;  %1759 = vmatprep.mubr.bf16.mxu1 %v3009_v8  ;;  %v3107_v8 = vld [vmem:[%s3521_s11 + $0x3cc] ss:$16 sps:$4 sm:$0xff]  }
  0xa2   : > { %1607 = vmatpush1.bf16.msra.mxu0 %v3003_v9  ;;  %1833 = vmatpush1.bf16.msra.mxu1 %v3006_v10  ;;  %v3101_v9 = vld [vmem:[%s4002_s0 + $0xe0] ss:$16 sps:$4 sm:$0xff]  }
  0xa3   : > { %1608 = vmatprep.subr.bf16.mxu0 %v3014_v11  ;;  %1834 = vmatprep.subr.bf16.mxu1 %v3017_v12  ;;  %v3102_v10 = vld [vmem:[%s3521_s11 + $0x3c0] ss:$16 sps:$4 sm:$0xff]   ;;  %v3105_v11 = vld [vmem:[%s3521_s11 + $0x3c8] ss:$16 sps:$4 sm:$0xff]   ;;  %v3110_v12 = vld [vmem:[%s3521_s11 + $0x3e4] ss:$16 sps:$4 sm:$0xff]  }
  0xa5   : > { %1534 = vmatmul.mubr.bf16.gmra.mrb[4].mxu0 %v3011_v13  ;;  %1760 = vmatmul.mubr.bf16.gmra.mrb[4].mxu1 %v3011_v13  ;;  %v3113_v13 = vld [vmem:[%s3521_s11 + $0x3ec] ss:$16 sps:$4 sm:$0xff]  }
  0xa6   : > { %1609 = vmatpush1.bf16.msra.mxu0 %v3012_v14  ;;  %1835 = vmatpush1.bf16.msra.mxu1 %v3015_v15  ;;  %v3116_v14 = vld [vmem:[%s4002_s0 + $0xc] ss:$16 sps:$4 sm:$0xff]   ;;  %v3108_v15 = vld [vmem:[%s3521_s11 + $0x3e0] ss:$16 sps:$4 sm:$0xff]  }
  0xa7   : > { %1610 = vmatprep.subr.bf16.mxu0 %v3020_v16  ;;  %1836 = vmatprep.subr.bf16.mxu1 %v3023_v17  ;;  %v3111_v16 = vld [vmem:[%s3521_s11 + $0x3e8] ss:$16 sps:$4 sm:$0xff]  }
  0xa8   : > { %1543 = vmatprep.mubr.bf16.mxu0 %v3024_v18  ;;  %1769 = vmatprep.mubr.bf16.mxu1 %v3024_v18  ;;  %v3114_v17 = vld [vmem:[%s4002_s0 + $0x8] ss:$16 sps:$4 sm:$0xff]   ;;  %v3117_v18 = vld [vmem:[%s4002_s0 + $0x2c] ss:$16 sps:$4 sm:$0xff]  }
  0xaa   : > { %1611 = vmatpush1.bf16.msra.mxu0 %v3018_v19  ;;  %1837 = vmatpush1.bf16.msra.mxu1 %v3021_v20  ;;  %v3119_v19 = vld [vmem:[%s4002_s0 + $0x28] ss:$16 sps:$4 sm:$0xff]   ;;  %v3120_v20 = vld [vmem:[%s4002_s0 + $0x4c] ss:$16 sps:$4 sm:$0xff]  }
  0xab   : > { %1612 = vmatprep.subr.bf16.mxu0 %v3029_v21  ;;  %1838 = vmatprep.subr.bf16.mxu1 %v3032_v22  ;;  %v3122_v21 = vld [vmem:[%s4002_s0 + $0x48] ss:$16 sps:$4 sm:$0xff]   ;;  %v3123_v22 = vld [vmem:[%s4002_s0 + $0x6c] ss:$16 sps:$4 sm:$0xff]  }
  0xad   : > { %1544 = vmatmul.mubr.bf16.gmra.mrb[8].mxu0 %v3026_v23  ;;  %1770 = vmatmul.mubr.bf16.gmra.mrb[8].mxu1 %v3026_v23  ;;  %v3125_v23 = vld [vmem:[%s4002_s0 + $0x68] ss:$16 sps:$4 sm:$0xff]  }
  0xae   : > { %1613 = vmatpush1.bf16.msra.mxu0 %v3027_v24  ;;  %1839 = vmatpush1.bf16.msra.mxu1 %v3030_v25  ;;  %v3126_v24 = vld [vmem:[%s4002_s0 + $0x8c] ss:$16 sps:$4 sm:$0xff]   ;;  %v3128_v25 = vld [vmem:[%s4002_s0 + $0x88] ss:$16 sps:$4 sm:$0xff]  }
  0xaf   : > { %1614 = vmatprep.subr.bf16.mxu0 %v3035_v26  ;;  %1840 = vmatprep.subr.bf16.mxu1 %v3038_v27  ;;  %v3129_v26 = vld [vmem:[%s4002_s0 + $0xac] ss:$16 sps:$4 sm:$0xff]   ;;  %v3131_v27 = vld [vmem:[%s4002_s0 + $0xa8] ss:$16 sps:$4 sm:$0xff]  }
  0xb0   : > { %1553 = vmatprep.mubr.bf16.mxu0 %v3039_v28  ;;  %1779 = vmatprep.mubr.bf16.mxu1 %v3039_v28  ;;  %v3132_v28 = vld [vmem:[%s4002_s0 + $0xcc] ss:$16 sps:$4 sm:$0xff]  }
  0xb2   : > { %1615 = vmatpush1.bf16.msra.mxu0 %v3033_v29  ;;  %1841 = vmatpush1.bf16.msra.mxu1 %v3036_v30  ;;  %v3134_v29 = vld [vmem:[%s4002_s0 + $0xc8] ss:$16 sps:$4 sm:$0xff]   ;;  %v3135_v30 = vld [vmem:[%s4002_s0 + $0xec] ss:$16 sps:$4 sm:$0xff]  }
  0xb3   : > { %1616 = vmatprep.subr.bf16.mxu0 %v3044_v31  ;;  %1842 = vmatprep.subr.bf16.mxu1 %v3047_v32  ;;  %v3137_v31 = vld [vmem:[%s4002_s0 + $0xe8] ss:$16 sps:$4 sm:$0xff]   ;;  %v2011_v32 = vlaneseq }
  0xb5   : > { %1554 = vmatmul.mubr.bf16.gmra.mrb[12].mxu0 %v3041_v33  ;;  %1780 = vmatmul.mubr.bf16.gmra.mrb[12].mxu1 %v3041_v33  ;;  %vm3751_vm0 = vcmp.lt.s32.totalorder %v2011_v32, 512 }
  0xb6   : > { %1617 = vmatpush1.bf16.msra.mxu0 %v3042_v34  ;;  %1843 = vmatpush1.bf16.msra.mxu1 %v3045_v35  ;;  %v3178_v34 = vmov 0.0  }
  0xb7   : > { %1618 = vmatprep.subr.bf16.mxu0 %v3050_v36  ;;  %1844 = vmatprep.subr.bf16.mxu1 %v3053_v37  ;;  %2015 = vst.msk [vmem:[%s3748_s10] sm:$0xf] %vm3751_vm0, %v3178_v34  ;;  %2016 = vst.msk [vmem:[%s3761_s14] sm:$0xf] %vm3751_vm0, %v3178_v34 }
  0xb8   : > { %1563 = vmatprep.mubr.bf16.mxu0 %v3054_v38  ;;  %1789 = vmatprep.mubr.bf16.mxu1 %v3054_v38 }
  0xba   : > { %1619 = vmatpush1.bf16.msra.mxu0 %v3048_v39  ;;  %1845 = vmatpush1.bf16.msra.mxu1 %v3051_v40 }
  0xbb   : > { %1620 = vmatprep.subr.bf16.mxu0 %v3059_v41  ;;  %1846 = vmatprep.subr.bf16.mxu1 %v3062_v42 }
  0xbd   : > { %1564 = vmatmul.mubr.bf16.gmra.mrb[16].mxu0 %v3056_v43  ;;  %1790 = vmatmul.mubr.bf16.gmra.mrb[16].mxu1 %v3056_v43 }
  0xbe   : > { %1621 = vmatpush1.bf16.msra.mxu0 %v3057_v44  ;;  %1847 = vmatpush1.bf16.msra.mxu1 %v3060_v45 }
  0xbf   : > { %1622 = vmatprep.subr.bf16.mxu0 %v3065_v46  ;;  %1848 = vmatprep.subr.bf16.mxu1 %v3068_v47 }
  0xc0   : > { %1573 = vmatprep.mubr.bf16.mxu0 %v3069_v48  ;;  %1799 = vmatprep.mubr.bf16.mxu1 %v3069_v48 }
  0xc2   : > { %1623 = vmatpush1.bf16.msra.mxu0 %v3063_v49  ;;  %1849 = vmatpush1.bf16.msra.mxu1 %v3066_v50 }
  0xc3   : > { %1624 = vmatprep.subr.bf16.mxu0 %v3074_v51  ;;  %1850 = vmatprep.subr.bf16.mxu1 %v3077_v52 }
  0xc5   : > { %1574 = vmatmul.mubr.bf16.gmra.mrb[20].mxu0 %v3071_v53  ;;  %1800 = vmatmul.mubr.bf16.gmra.mrb[20].mxu1 %v3071_v53 }
  0xc6   : > { %1625 = vmatpush1.bf16.msra.mxu0 %v3072_v54  ;;  %1851 = vmatpush1.bf16.msra.mxu1 %v3075_v55 }
  0xc7   : > { %1626 = vmatprep.subr.bf16.mxu0 %v3080_v56  ;;  %1852 = vmatprep.subr.bf16.mxu1 %v3083_v57 }
  0xc8   : > { %1583 = vmatprep.mubr.bf16.mxu0 %v3084_v58  ;;  %1809 = vmatprep.mubr.bf16.mxu1 %v3084_v58 }
  0xca   : > { %1627 = vmatpush1.bf16.msra.mxu0 %v3078_v59  ;;  %1853 = vmatpush1.bf16.msra.mxu1 %v3081_v60 }
  0xcb   : > { %1628 = vmatprep.subr.bf16.mxu0 %v3089_v61  ;;  %1854 = vmatprep.subr.bf16.mxu1 %v3092_v62 }
  0xcd   : > { %1584 = vmatmul.mubr.bf16.gmra.mrb[24].mxu0 %v3086_v63  ;;  %1810 = vmatmul.mubr.bf16.gmra.mrb[24].mxu1 %v3086_v63 }
  0xce   : > { %1629 = vmatpush1.bf16.msra.mxu0 %v3087_v0  ;;  %1855 = vmatpush1.bf16.msra.mxu1 %v3090_v1 }
  0xcf   : > { %1630 = vmatprep.subr.bf16.mxu0 %v3095_v2  ;;  %1856 = vmatprep.subr.bf16.mxu1 %v3098_v3 }
  0xd0   : > { %1593 = vmatprep.mubr.bf16.mxu0 %v3099_v4  ;;  %1819 = vmatprep.mubr.bf16.mxu1 %v3099_v4 }
  0xd2   : > { %1631 = vmatpush1.bf16.msra.mxu0 %v3093_v5  ;;  %1857 = vmatpush1.bf16.msra.mxu1 %v3096_v6 }
  0xd3   : > { %1632 = vmatprep.subr.bf16.mxu0 %v3104_v7  ;;  %1858 = vmatprep.subr.bf16.mxu1 %v3107_v8 }
  0xd5   : > { %1594 = vmatmul.mubr.bf16.gmra.mrb[28].mxu0 %v3101_v9  ;;  %1820 = vmatmul.mubr.bf16.gmra.mrb[28].mxu1 %v3101_v9 }
  0xd6   : > { %1633 = vmatpush1.bf16.msra.mxu0 %v3102_v10  ;;  %1859 = vmatpush1.bf16.msra.mxu1 %v3105_v11 }
  0xd7   : > { %1634 = vmatprep.subr.bf16.mxu0 %v3110_v12  ;;  %1860 = vmatprep.subr.bf16.mxu1 %v3113_v13 }
  0xd8   : > { %1636 = vmatprep.mubr.bf16.mxu0 %v3116_v14  ;;  %1862 = vmatprep.mubr.bf16.mxu1 %v3116_v14 }
  0xda   : > { %1635 = vmatpush1.bf16.msra.mxu0 %v3108_v15  ;;  %1861 = vmatpush1.bf16.msra.mxu1 %v3111_v16 }
  0xdd   : > { %1637 = vmatmul.mubr.bf16.vlgmr.msra.gmra.mrb[0].mxu0 %v3114_v17  ;;  %1863 = vmatmul.mubr.bf16.vlgmr.msra.gmra.mrb[0].mxu1 %v3114_v17 }
  0xde   : > { %1646 = vmatprep.mubr.bf16.mxu0 %v3117_v18  ;;  %1872 = vmatprep.mubr.bf16.mxu1 %v3117_v18 }
  0xe5   : > { %1647 = vmatmul.mubr.bf16.gmra.mrb[4].mxu0 %v3119_v19  ;;  %1873 = vmatmul.mubr.bf16.gmra.mrb[4].mxu1 %v3119_v19 }
  0xe6   : > { %1656 = vmatprep.mubr.bf16.mxu0 %v3120_v20  ;;  %1882 = vmatprep.mubr.bf16.mxu1 %v3120_v20 }
  0xed   : > { %1657 = vmatmul.mubr.bf16.gmra.mrb[8].mxu0 %v3122_v21  ;;  %1883 = vmatmul.mubr.bf16.gmra.mrb[8].mxu1 %v3122_v21 }
  0xee   : > { %1666 = vmatprep.mubr.bf16.mxu0 %v3123_v22  ;;  %1892 = vmatprep.mubr.bf16.mxu1 %v3123_v22 }
  0xf5   : > { %1667 = vmatmul.mubr.bf16.gmra.mrb[12].mxu0 %v3125_v23  ;;  %1893 = vmatmul.mubr.bf16.gmra.mrb[12].mxu1 %v3125_v23 }
  0xf6   : > { %1676 = vmatprep.mubr.bf16.mxu0 %v3126_v24  ;;  %1902 = vmatprep.mubr.bf16.mxu1 %v3126_v24 }
  0xfd   : > { %1677 = vmatmul.mubr.bf16.gmra.mrb[16].mxu0 %v3128_v25  ;;  %1903 = vmatmul.mubr.bf16.gmra.mrb[16].mxu1 %v3128_v25 }
  0xfe   : > { %1686 = vmatprep.mubr.bf16.mxu0 %v3129_v26  ;;  %1912 = vmatprep.mubr.bf16.mxu1 %v3129_v26 }
 0x105   : > { %1687 = vmatmul.mubr.bf16.gmra.mrb[20].mxu0 %v3131_v27  ;;  %1913 = vmatmul.mubr.bf16.gmra.mrb[20].mxu1 %v3131_v27 }
 0x106   : > { %1696 = vmatprep.mubr.bf16.mxu0 %v3132_v28  ;;  %1922 = vmatprep.mubr.bf16.mxu1 %v3132_v28 }
 0x10d   : > { %1697 = vmatmul.mubr.bf16.gmra.mrb[24].mxu0 %v3134_v29  ;;  %1923 = vmatmul.mubr.bf16.gmra.mrb[24].mxu1 %v3134_v29 }
 0x10e   : > { %1706 = vmatprep.mubr.bf16.mxu0 %v3135_v30  ;;  %1932 = vmatprep.mubr.bf16.mxu1 %v3135_v30 }
 0x115   : > { %1707 = vmatmul.mubr.bf16.gmra.mrb[28].mxu0 %v3137_v31  ;;  %1933 = vmatmul.mubr.bf16.gmra.mrb[28].mxu1 %v3137_v31 }
 0x1b0   : > { %v1638_v35 = vpop.f32.mrb[0].mxu0  ;;  %v1864_v36 = vpop.f32.mrb[0].mxu1 }
 0x1b1   : > { %1943 = vst [vmem:[%s3768_s22] sm:$0xff] %v1638_v35  ;;  %1945 = vst [vmem:[%s3768_s22 + $0x10] sm:$0xff] %v1864_v36  ;;  %v1640_v37 = vpop.f32.mrb[1].mxu0  ;;  %v1866_v38 = vpop.f32.mrb[1].mxu1  ;;  %v2138_v39 = vmul.f32 %v1638_v35, %v1638_v35  ;;  %v2140_v40 = vmul.f32 %v1864_v36, %v1864_v36 }
 0x1b2   : > { %1944 = vst [vmem:[%s3768_s22 + $0x8] sm:$0xff] %v1640_v37  ;;  %v2139_v41 = vmul.f32 %v1640_v37, %v1640_v37  ;;  %1946 = vst [vmem:[%s3768_s22 + $0x18] sm:$0xff] %v1866_v38  ;;  %v2141_v42 = vmul.f32 %v1866_v38, %v1866_v38  ;;  %v1642_v43 = vpop.f32.mrb[2].mxu0  ;;  %v1868_v44 = vpop.f32.mrb[2].mxu1 }
 0x1b3   : > { %1947 = vst [vmem:[%s3768_s22 + $0x20] sm:$0xff] %v1642_v43  ;;  %v2018_v45 = vadd.f32 %v1642_v43, %v1638_v35  ;;  %v2142_v46 = vmul.f32 %v1642_v43, %v1642_v43  ;;  %1949 = vst [vmem:[%s3768_s22 + $0x30] sm:$0xff] %v1868_v44  ;;  %v2060_v47 = vadd.f32 %v1868_v44, %v1864_v36  ;;  %v1644_v49 = vpop.f32.mrb[3].mxu0  ;;  %v1870_v50 = vpop.f32.mrb[3].mxu1 }
 0x1b4   : > { %v2144_v48 = vmul.f32 %v1868_v44, %v1868_v44  ;;  %1948 = vst [vmem:[%s3768_s22 + $0x28] sm:$0xff] %v1644_v49  ;;  %v2039_v51 = vadd.f32 %v1644_v49, %v1640_v37  ;;  %v2143_v52 = vmul.f32 %v1644_v49, %v1644_v49  ;;  %1950 = vst [vmem:[%s3768_s22 + $0x38] sm:$0xff] %v1870_v50 }
 0x1b5   : > { %v2081_v53 = vadd.f32 %v1870_v50, %v1866_v38  ;;  %v2145_v54 = vmul.f32 %v1870_v50, %v1870_v50  ;;  %v2202_v55 = vadd.f32 %v2142_v46, %v2138_v39 }
 0x1b6   : > { %v2244_v56 = vadd.f32 %v2144_v48, %v2140_v40  ;;  %v2223_v57 = vadd.f32 %v2143_v52, %v2139_v41 }
 0x1b7   : > { %v2265_v58 = vadd.f32 %v2145_v54, %v2141_v42 }
 0x1b8   : > { %v1648_v59 = vpop.f32.mrb[4].mxu0  ;;  %v1874_v60 = vpop.f32.mrb[4].mxu1 }
 0x1b9   : > { %1951 = vst [vmem:[%s3768_s22 + $0x40] sm:$0xff] %v1648_v59  ;;  %v2019_v61 = vadd.f32 %v2018_v45, %v1648_v59  ;;  %v2146_v62 = vmul.f32 %v1648_v59, %v1648_v59  ;;  %1953 = vst [vmem:[%s3768_s22 + $0x50] sm:$0xff] %v1874_v60  ;;  %v2061_v63 = vadd.f32 %v2060_v47, %v1874_v60  ;;  %v1650_v1 = vpop.f32.mrb[5].mxu0  ;;  %v1876_v2 = vpop.f32.mrb[5].mxu1  ;;  %v2356_v33 = vld [vmem:[%s3768_s22 + $0x18] sm:$0xff] (%p3240_p6) }
 0x1ba   : > { %v2148_v0 = vmul.f32 %v1874_v60, %v1874_v60  ;;  %1952 = vst [vmem:[%s3768_s22 + $0x48] sm:$0xff] %v1650_v1  ;;  %v2040_v3 = vadd.f32 %v2039_v51, %v1650_v1  ;;  %v2147_v4 = vmul.f32 %v1650_v1, %v1650_v1  ;;  %1954 = vst [vmem:[%s3768_s22 + $0x58] sm:$0xff] %v1876_v2  ;;  %v1652_v7 = vpop.f32.mrb[6].mxu0  ;;  %v1878_v8 = vpop.f32.mrb[6].mxu1 }
 0x1bb   : > { %v2082_v5 = vadd.f32 %v2081_v53, %v1876_v2  ;;  %v2149_v6 = vmul.f32 %v1876_v2, %v1876_v2  ;;  %v2203_v9 = vadd.f32 %v2202_v55, %v2146_v62  ;;  %1955 = vst [vmem:[%s3768_s22 + $0x60] sm:$0xff] %v1652_v7  ;;  %v2020_v11 = vadd.f32 %v2019_v61, %v1652_v7  ;;  %v1654_v13 = vpop.f32.mrb[7].mxu0  ;;  %v1880_v14 = vpop.f32.mrb[7].mxu1 }
 0x1bc   : > { %v2245_v10 = vadd.f32 %v2244_v56, %v2148_v0  ;;  %v2150_v12 = vmul.f32 %v1652_v7, %v1652_v7  ;;  %1957 = vst [vmem:[%s3768_s22 + $0x70] sm:$0xff] %v1878_v8  ;;  %v2224_v15 = vadd.f32 %v2223_v57, %v2147_v4  ;;  %v2062_v17 = vadd.f32 %v2061_v63, %v1878_v8 }
 0x1bd   : > { %v2266_v16 = vadd.f32 %v2265_v58, %v2149_v6  ;;  %v2152_v18 = vmul.f32 %v1878_v8, %v1878_v8  ;;  %1956 = vst [vmem:[%s3768_s22 + $0x68] sm:$0xff] %v1654_v13  ;;  %1958 = vst [vmem:[%s3768_s22 + $0x78] sm:$0xff] %v1880_v14  ;;  %v2041_v20 = vadd.f32 %v2040_v3, %v1654_v13 }
 0x1be   : > { %v2204_v19 = vadd.f32 %v2203_v9, %v2150_v12  ;;  %v2151_v21 = vmul.f32 %v1654_v13, %v1654_v13  ;;  %v2083_v22 = vadd.f32 %v2082_v5, %v1880_v14  ;;  %v2153_v24 = vmul.f32 %v1880_v14, %v1880_v14  ;;  %2357 = vst [vmem:[%s3860_s23 + $0x18] sm:$0xff] (%p3240_p6), %v2356_v33 }
 0x1bf   : > { %v2246_v23 = vadd.f32 %v2245_v10, %v2152_v18 }
 0x1c0   : > { %v2225_v25 = vadd.f32 %v2224_v15, %v2151_v21  ;;  %v2267_v26 = vadd.f32 %v2266_v16, %v2153_v24  ;;  %v1658_v27 = vpop.f32.mrb[8].mxu0  ;;  %v1884_v28 = vpop.f32.mrb[8].mxu1 }
 0x1c1   : > { %1959 = vst [vmem:[%s3768_s22 + $0x80] sm:$0xff] %v1658_v27  ;;  %v2021_v29 = vadd.f32 %v2020_v11, %v1658_v27  ;;  %v2154_v30 = vmul.f32 %v1658_v27, %v1658_v27  ;;  %1961 = vst [vmem:[%s3768_s22 + $0x90] sm:$0xff] %v1884_v28  ;;  %v2063_v31 = vadd.f32 %v2062_v17, %v1884_v28  ;;  %v1660_v35 = vpop.f32.mrb[9].mxu0  ;;  %v1886_v36 = vpop.f32.mrb[9].mxu1 }
 0x1c2   : > { %v2156_v34 = vmul.f32 %v1884_v28, %v1884_v28  ;;  %1960 = vst [vmem:[%s3768_s22 + $0x88] sm:$0xff] %v1660_v35  ;;  %v2042_v37 = vadd.f32 %v2041_v20, %v1660_v35  ;;  %v2155_v38 = vmul.f32 %v1660_v35, %v1660_v35  ;;  %1962 = vst [vmem:[%s3768_s22 + $0x98] sm:$0xff] %v1886_v36  ;;  %v1662_v41 = vpop.f32.mrb[10].mxu0  ;;  %v1888_v42 = vpop.f32.mrb[10].mxu1 }
 0x1c3   : > { %v2084_v39 = vadd.f32 %v2083_v22, %v1886_v36  ;;  %v2157_v40 = vmul.f32 %v1886_v36, %v1886_v36  ;;  %v2205_v43 = vadd.f32 %v2204_v19, %v2154_v30  ;;  %1963 = vst [vmem:[%s3768_s22 + $0xa0] sm:$0xff] %v1662_v41  ;;  %v2022_v45 = vadd.f32 %v2021_v29, %v1662_v41  ;;  %v1664_v47 = vpop.f32.mrb[11].mxu0  ;;  %v1890_v48 = vpop.f32.mrb[11].mxu1 }
 0x1c4   : > { %v2247_v44 = vadd.f32 %v2246_v23, %v2156_v34  ;;  %v2158_v46 = vmul.f32 %v1662_v41, %v1662_v41  ;;  %1965 = vst [vmem:[%s3768_s22 + $0xb0] sm:$0xff] %v1888_v42  ;;  %v2226_v49 = vadd.f32 %v2225_v25, %v2155_v38  ;;  %v2064_v51 = vadd.f32 %v2063_v31, %v1888_v42 }
 0x1c5   : > { %v2268_v50 = vadd.f32 %v2267_v26, %v2157_v40  ;;  %v2160_v52 = vmul.f32 %v1888_v42, %v1888_v42  ;;  %1964 = vst [vmem:[%s3768_s22 + $0xa8] sm:$0xff] %v1664_v47  ;;  %1966 = vst [vmem:[%s3768_s22 + $0xb8] sm:$0xff] %v1890_v48  ;;  %v2043_v54 = vadd.f32 %v2042_v37, %v1664_v47 }
 0x1c6   : > { %v2206_v53 = vadd.f32 %v2205_v43, %v2158_v46  ;;  %v2159_v55 = vmul.f32 %v1664_v47, %v1664_v47  ;;  %v2085_v56 = vadd.f32 %v2084_v39, %v1890_v48  ;;  %v2161_v58 = vmul.f32 %v1890_v48, %v1890_v48 }
 0x1c7   : > { %v2248_v57 = vadd.f32 %v2247_v44, %v2160_v52 }
 0x1c8   : > { %v2227_v59 = vadd.f32 %v2226_v49, %v2159_v55  ;;  %v2269_v60 = vadd.f32 %v2268_v50, %v2161_v58  ;;  %v1668_v61 = vpop.f32.mrb[12].mxu0  ;;  %v1894_v62 = vpop.f32.mrb[12].mxu1 }
 0x1c9   : > { %1967 = vst [vmem:[%s3768_s22 + $0xc0] sm:$0xff] %v1668_v61  ;;  %v2023_v63 = vadd.f32 %v2022_v45, %v1668_v61  ;;  %v2162_v0 = vmul.f32 %v1668_v61, %v1668_v61  ;;  %1969 = vst [vmem:[%s3768_s22 + $0xd0] sm:$0xff] %v1894_v62  ;;  %v2065_v1 = vadd.f32 %v2064_v51, %v1894_v62  ;;  %v1670_v3 = vpop.f32.mrb[13].mxu0  ;;  %v1896_v4 = vpop.f32.mrb[13].mxu1 }
 0x1ca   : > { %v2164_v2 = vmul.f32 %v1894_v62, %v1894_v62  ;;  %1968 = vst [vmem:[%s3768_s22 + $0xc8] sm:$0xff] %v1670_v3  ;;  %v2044_v5 = vadd.f32 %v2043_v54, %v1670_v3  ;;  %v2163_v6 = vmul.f32 %v1670_v3, %v1670_v3  ;;  %1970 = vst [vmem:[%s3768_s22 + $0xd8] sm:$0xff] %v1896_v4  ;;  %v1672_v9 = vpop.f32.mrb[14].mxu0  ;;  %v1898_v10 = vpop.f32.mrb[14].mxu1 }
 0x1cb   : > { %v2086_v7 = vadd.f32 %v2085_v56, %v1896_v4  ;;  %v2165_v8 = vmul.f32 %v1896_v4, %v1896_v4  ;;  %v2207_v11 = vadd.f32 %v2206_v53, %v2162_v0  ;;  %1971 = vst [vmem:[%s3768_s22 + $0xe0] sm:$0xff] %v1672_v9  ;;  %v2024_v13 = vadd.f32 %v2023_v63, %v1672_v9  ;;  %v1674_v15 = vpop.f32.mrb[15].mxu0  ;;  %v1900_v16 = vpop.f32.mrb[15].mxu1 }
 0x1cc   : > { %v2249_v12 = vadd.f32 %v2248_v57, %v2164_v2  ;;  %v2166_v14 = vmul.f32 %v1672_v9, %v1672_v9  ;;  %1973 = vst [vmem:[%s3768_s22 + $0xf0] sm:$0xff] %v1898_v10  ;;  %v2228_v17 = vadd.f32 %v2227_v59, %v2163_v6  ;;  %v2066_v19 = vadd.f32 %v2065_v1, %v1898_v10 }
 0x1cd   : > { %v2270_v18 = vadd.f32 %v2269_v60, %v2165_v8  ;;  %v2168_v20 = vmul.f32 %v1898_v10, %v1898_v10  ;;  %1972 = vst [vmem:[%s3768_s22 + $0xe8] sm:$0xff] %v1674_v15  ;;  %1974 = vst [vmem:[%s3768_s22 + $0xf8] sm:$0xff] %v1900_v16  ;;  %v2045_v22 = vadd.f32 %v2044_v5, %v1674_v15 }
 0x1ce   : > { %v2208_v21 = vadd.f32 %v2207_v11, %v2166_v14  ;;  %v2167_v23 = vmul.f32 %v1674_v15, %v1674_v15  ;;  %v2087_v24 = vadd.f32 %v2086_v7, %v1900_v16  ;;  %v2169_v26 = vmul.f32 %v1900_v16, %v1900_v16 }
 0x1cf   : > { %v2250_v25 = vadd.f32 %v2249_v12, %v2168_v20 }
 0x1d0   : > { %v2229_v27 = vadd.f32 %v2228_v17, %v2167_v23  ;;  %v2271_v28 = vadd.f32 %v2270_v18, %v2169_v26  ;;  %v1678_v29 = vpop.f32.mrb[16].mxu0  ;;  %v1904_v30 = vpop.f32.mrb[16].mxu1 }
 0x1d1   : > { %1975 = vst [vmem:[%s3768_s22 + $0x100] sm:$0xff] %v1678_v29  ;;  %v2025_v31 = vadd.f32 %v2024_v13, %v1678_v29  ;;  %v2170_v34 = vmul.f32 %v1678_v29, %v1678_v29  ;;  %1977 = vst [vmem:[%s3768_s22 + $0x110] sm:$0xff] %v1904_v30  ;;  %v2067_v35 = vadd.f32 %v2066_v19, %v1904_v30  ;;  %v1680_v37 = vpop.f32.mrb[17].mxu0  ;;  %v1906_v38 = vpop.f32.mrb[17].mxu1 }
 0x1d2   : > { %v2172_v36 = vmul.f32 %v1904_v30, %v1904_v30  ;;  %1976 = vst [vmem:[%s3768_s22 + $0x108] sm:$0xff] %v1680_v37  ;;  %v2046_v39 = vadd.f32 %v2045_v22, %v1680_v37  ;;  %v2171_v40 = vmul.f32 %v1680_v37, %v1680_v37  ;;  %1978 = vst [vmem:[%s3768_s22 + $0x118] sm:$0xff] %v1906_v38  ;;  %v1682_v43 = vpop.f32.mrb[18].mxu0  ;;  %v1908_v44 = vpop.f32.mrb[18].mxu1 }
 0x1d3   : > { %v2088_v41 = vadd.f32 %v2087_v24, %v1906_v38  ;;  %v2173_v42 = vmul.f32 %v1906_v38, %v1906_v38  ;;  %v2209_v45 = vadd.f32 %v2208_v21, %v2170_v34  ;;  %1979 = vst [vmem:[%s3768_s22 + $0x120] sm:$0xff] %v1682_v43  ;;  %v2026_v47 = vadd.f32 %v2025_v31, %v1682_v43  ;;  %v1684_v49 = vpop.f32.mrb[19].mxu0  ;;  %v1910_v50 = vpop.f32.mrb[19].mxu1 }
 0x1d4   : > { %v2251_v46 = vadd.f32 %v2250_v25, %v2172_v36  ;;  %v2174_v48 = vmul.f32 %v1682_v43, %v1682_v43  ;;  %1981 = vst [vmem:[%s3768_s22 + $0x130] sm:$0xff] %v1908_v44  ;;  %v2230_v51 = vadd.f32 %v2229_v27, %v2171_v40  ;;  %v2068_v53 = vadd.f32 %v2067_v35, %v1908_v44 }
 0x1d5   : > { %v2272_v52 = vadd.f32 %v2271_v28, %v2173_v42  ;;  %v2176_v54 = vmul.f32 %v1908_v44, %v1908_v44  ;;  %1980 = vst [vmem:[%s3768_s22 + $0x128] sm:$0xff] %v1684_v49  ;;  %1982 = vst [vmem:[%s3768_s22 + $0x138] sm:$0xff] %v1910_v50  ;;  %v2047_v56 = vadd.f32 %v2046_v39, %v1684_v49  ;;  %v3179_v35 = vmov 1966171168  }
 0x1d6   : > { %v2210_v55 = vadd.f32 %v2209_v45, %v2174_v48  ;;  %v2175_v57 = vmul.f32 %v1684_v49, %v1684_v49  ;;  %v2089_v58 = vadd.f32 %v2088_v41, %v1910_v50  ;;  %v2177_v60 = vmul.f32 %v1910_v50, %v1910_v50 }
 0x1d7   : > { %v2252_v59 = vadd.f32 %v2251_v46, %v2176_v54  ;;  %v3818_v36 = vunpack.c.l.s4 %v3179_v35 }
 0x1d8   : > { %v2231_v61 = vadd.f32 %v2230_v51, %v2175_v57  ;;  %v2273_v62 = vadd.f32 %v2272_v52, %v2177_v60  ;;  %v1688_v63 = vpop.f32.mrb[20].mxu0  ;;  %v1914_v0 = vpop.f32.mrb[20].mxu1 }
 0x1d9   : > { %1983 = vst [vmem:[%s3768_s22 + $0x140] sm:$0xff] %v1688_v63  ;;  %v2027_v1 = vadd.f32 %v2026_v47, %v1688_v63  ;;  %v2178_v2 = vmul.f32 %v1688_v63, %v1688_v63  ;;  %1985 = vst [vmem:[%s3768_s22 + $0x150] sm:$0xff] %v1914_v0  ;;  %v2069_v3 = vadd.f32 %v2068_v53, %v1914_v0  ;;  %v1690_v5 = vpop.f32.mrb[21].mxu0  ;;  %v1916_v6 = vpop.f32.mrb[21].mxu1 }
 0x1da   : > { %v2180_v4 = vmul.f32 %v1914_v0, %v1914_v0  ;;  %1984 = vst [vmem:[%s3768_s22 + $0x148] sm:$0xff] %v1690_v5  ;;  %v2048_v7 = vadd.f32 %v2047_v56, %v1690_v5  ;;  %v2179_v8 = vmul.f32 %v1690_v5, %v1690_v5  ;;  %1986 = vst [vmem:[%s3768_s22 + $0x158] sm:$0xff] %v1916_v6  ;;  %v1692_v11 = vpop.f32.mrb[22].mxu0  ;;  %v1918_v12 = vpop.f32.mrb[22].mxu1  ;;  %v2110_v5 = vunpack.c.0.s8 %v3818_v36 }
 0x1db   : > { %v2090_v9 = vadd.f32 %v2089_v58, %v1916_v6  ;;  %v2181_v10 = vmul.f32 %v1916_v6, %v1916_v6  ;;  %v2211_v13 = vadd.f32 %v2210_v55, %v2178_v2  ;;  %1987 = vst [vmem:[%s3768_s22 + $0x160] sm:$0xff] %v1692_v11  ;;  %v2028_v15 = vadd.f32 %v2027_v1, %v1692_v11  ;;  %v1694_v17 = vpop.f32.mrb[23].mxu0  ;;  %v1920_v18 = vpop.f32.mrb[23].mxu1 }
 0x1dc   : > { %v2253_v14 = vadd.f32 %v2252_v59, %v2180_v4  ;;  %v2182_v16 = vmul.f32 %v1692_v11, %v1692_v11  ;;  %1989 = vst [vmem:[%s3768_s22 + $0x170] sm:$0xff] %v1918_v12  ;;  %v2232_v19 = vadd.f32 %v2231_v61, %v2179_v8  ;;  %v2070_v21 = vadd.f32 %v2069_v3, %v1918_v12 }
 0x1dd   : > { %v2274_v20 = vadd.f32 %v2273_v62, %v2181_v10  ;;  %v2184_v22 = vmul.f32 %v1918_v12, %v1918_v12  ;;  %1988 = vst [vmem:[%s3768_s22 + $0x168] sm:$0xff] %v1694_v17  ;;  %1990 = vst [vmem:[%s3768_s22 + $0x178] sm:$0xff] %v1920_v18  ;;  %v2049_v24 = vadd.f32 %v2048_v7, %v1694_v17  ;;  %v3830_v6 = vshrl.u32 %v2011_v32, 7 }
 0x1de   : > { %v2212_v23 = vadd.f32 %v2211_v13, %v2182_v16  ;;  %v2183_v25 = vmul.f32 %v1694_v17, %v1694_v17  ;;  %v2091_v26 = vadd.f32 %v2090_v9, %v1920_v18  ;;  %v2185_v28 = vmul.f32 %v1920_v18, %v1920_v18 }
 0x1df   : > { %v2254_v27 = vadd.f32 %v2253_v14, %v2184_v22 }
 0x1e0   : > { %v2233_v29 = vadd.f32 %v2232_v19, %v2183_v25  ;;  %v2275_v30 = vadd.f32 %v2274_v20, %v2185_v28  ;;  %v1698_v31 = vpop.f32.mrb[24].mxu0  ;;  %v1924_v34 = vpop.f32.mrb[24].mxu1 }
 0x1e1   : > { %1991 = vst [vmem:[%s3768_s22 + $0x180] sm:$0xff] %v1698_v31  ;;  %v2029_v37 = vadd.f32 %v2028_v15, %v1698_v31  ;;  %v2186_v38 = vmul.f32 %v1698_v31, %v1698_v31  ;;  %1993 = vst [vmem:[%s3768_s22 + $0x190] sm:$0xff] %v1924_v34  ;;  %v2071_v39 = vadd.f32 %v2070_v21, %v1924_v34  ;;  %v1700_v41 = vpop.f32.mrb[25].mxu0  ;;  %v1926_v42 = vpop.f32.mrb[25].mxu1 }
 0x1e2   : > { %v2188_v40 = vmul.f32 %v1924_v34, %v1924_v34  ;;  %1992 = vst [vmem:[%s3768_s22 + $0x188] sm:$0xff] %v1700_v41  ;;  %v2050_v43 = vadd.f32 %v2049_v24, %v1700_v41  ;;  %v2187_v44 = vmul.f32 %v1700_v41, %v1700_v41  ;;  %1994 = vst [vmem:[%s3768_s22 + $0x198] sm:$0xff] %v1926_v42  ;;  %v1702_v47 = vpop.f32.mrb[26].mxu0  ;;  %v1928_v48 = vpop.f32.mrb[26].mxu1 }
 0x1e3   : > { %v2092_v45 = vadd.f32 %v2091_v26, %v1926_v42  ;;  %v2189_v46 = vmul.f32 %v1926_v42, %v1926_v42  ;;  %v2213_v49 = vadd.f32 %v2212_v23, %v2186_v38  ;;  %1995 = vst [vmem:[%s3768_s22 + $0x1a0] sm:$0xff] %v1702_v47  ;;  %v2030_v51 = vadd.f32 %v2029_v37, %v1702_v47  ;;  %v1704_v53 = vpop.f32.mrb[27].mxu0  ;;  %v1930_v54 = vpop.f32.mrb[27].mxu1 }
 0x1e4   : > { %v2255_v50 = vadd.f32 %v2254_v27, %v2188_v40  ;;  %v2190_v52 = vmul.f32 %v1702_v47, %v1702_v47  ;;  %1997 = vst [vmem:[%s3768_s22 + $0x1b0] sm:$0xff] %v1928_v48  ;;  %v2234_v55 = vadd.f32 %v2233_v29, %v2187_v44  ;;  %v2072_v57 = vadd.f32 %v2071_v39, %v1928_v48 }
 0x1e5   : > { %v2276_v56 = vadd.f32 %v2275_v30, %v2189_v46  ;;  %v2192_v58 = vmul.f32 %v1928_v48, %v1928_v48  ;;  %1996 = vst [vmem:[%s3768_s22 + $0x1a8] sm:$0xff] %v1704_v53  ;;  %1998 = vst [vmem:[%s3768_s22 + $0x1b8] sm:$0xff] %v1930_v54  ;;  %v2051_v60 = vadd.f32 %v2050_v43, %v1704_v53 }
 0x1e6   : > { %v2214_v59 = vadd.f32 %v2213_v49, %v2190_v52  ;;  %v2191_v61 = vmul.f32 %v1704_v53, %v1704_v53  ;;  %v2093_v62 = vadd.f32 %v2092_v45, %v1930_v54  ;;  %v2193_v0 = vmul.f32 %v1930_v54, %v1930_v54 }
 0x1e7   : > { %v2256_v63 = vadd.f32 %v2255_v50, %v2192_v58 }
 0x1e8   : > { %v2235_v1 = vadd.f32 %v2234_v55, %v2191_v61  ;;  %v2277_v2 = vadd.f32 %v2276_v56, %v2193_v0  ;;  %v1708_v3 = vpop.f32.mrb[28].mxu0  ;;  %v1934_v4 = vpop.f32.mrb[28].mxu1 }
 0x1e9   : > { %1999 = vst [vmem:[%s3768_s22 + $0x1c0] sm:$0xff] %v1708_v3  ;;  %v2031_v7 = vadd.f32 %v2030_v51, %v1708_v3  ;;  %v2194_v8 = vmul.f32 %v1708_v3, %v1708_v3  ;;  %2001 = vst [vmem:[%s3768_s22 + $0x1d0] sm:$0xff] %v1934_v4  ;;  %v2073_v9 = vadd.f32 %v2072_v57, %v1934_v4  ;;  %v1710_v11 = vpop.f32.mrb[29].mxu0  ;;  %v1936_v12 = vpop.f32.mrb[29].mxu1 }
 0x1ea   : > { %v2196_v10 = vmul.f32 %v1934_v4, %v1934_v4  ;;  %2000 = vst [vmem:[%s3768_s22 + $0x1c8] sm:$0xff] %v1710_v11  ;;  %v2052_v13 = vadd.f32 %v2051_v60, %v1710_v11  ;;  %v2195_v14 = vmul.f32 %v1710_v11, %v1710_v11  ;;  %2002 = vst [vmem:[%s3768_s22 + $0x1d8] sm:$0xff] %v1936_v12  ;;  %v1712_v32 = vpop.f32.mrb[30].mxu0  ;;  %v1938_v17 = vpop.f32.mrb[30].mxu1 }
 0x1eb   : > { %v2094_v15 = vadd.f32 %v2093_v62, %v1936_v12  ;;  %v2197_v16 = vmul.f32 %v1936_v12, %v1936_v12  ;;  %v2215_v18 = vadd.f32 %v2214_v59, %v2194_v8  ;;  %2003 = vst [vmem:[%s3768_s22 + $0x1e0] sm:$0xff] %v1712_v32  ;;  %v2032_v20 = vadd.f32 %v2031_v7, %v1712_v32  ;;  %v1714_v22 = vpop.f32.mrb[31].mxu0  ;;  %v1940_v23 = vpop.f32.mrb[31].mxu1 }
 0x1ec   : > { %v2257_v19 = vadd.f32 %v2256_v63, %v2196_v10  ;;  %v2198_v21 = vmul.f32 %v1712_v32, %v1712_v32  ;;  %2005 = vst [vmem:[%s3768_s22 + $0x1f0] sm:$0xff] %v1938_v17  ;;  %v2236_v24 = vadd.f32 %v2235_v1, %v2195_v14  ;;  %v2074_v26 = vadd.f32 %v2073_v9, %v1938_v17 }
 0x1ed   : > { %v2278_v25 = vadd.f32 %v2277_v2, %v2197_v16  ;;  %v2200_v27 = vmul.f32 %v1938_v17, %v1938_v17  ;;  %2004 = vst [vmem:[%s3768_s22 + $0x1e8] sm:$0xff] %v1714_v22  ;;  %2006 = vst [vmem:[%s3768_s22 + $0x1f8] sm:$0xff] %v1940_v23  ;;  %v2033_v28 = vrot.slane %v2032_v20, 4  ;;  %v2053_v30 = vadd.f32 %v2052_v13, %v1714_v22 }
 0x1ee   : > { %v2216_v29 = vadd.f32 %v2215_v18, %v2198_v21  ;;  %v2199_v31 = vmul.f32 %v1714_v22, %v1714_v22  ;;  %v2075_v34 = vrot.slane %v2074_v26, 4  ;;  %v2095_v37 = vadd.f32 %v2094_v15, %v1940_v23 }
 0x1ef   : > { %v2258_v35 = vadd.f32 %v2257_v19, %v2200_v27  ;;  %v2201_v38 = vmul.f32 %v1940_v23, %v1940_v23  ;;  %v2034_v39 = vadd.f32 %v2033_v28, %v2032_v20  ;;  %v2054_v41 = vrot.slane %v2053_v30, 4 }
 0x1f0   : > { %v2217_v40 = vrot.slane %v2216_v29, 4  ;;  %v2237_v42 = vadd.f32 %v2236_v24, %v2199_v31  ;;  %v2076_v43 = vadd.f32 %v2075_v34, %v2074_v26  ;;  %v2096_v45 = vrot.slane %v2095_v37, 4 }
 0x1f1   : > { %v2259_v44 = vrot.slane %v2258_v35, 4  ;;  %v2279_v46 = vadd.f32 %v2278_v25, %v2201_v38  ;;  %v2035_v47 = vrot.slane %v2034_v39, 2  ;;  %v2055_v49 = vadd.f32 %v2054_v41, %v2053_v30  ;;  %v2350_v41 = vld [vmem:[%s3768_s22] sm:$0xff] (%p3240_p6) }
 0x1f2   : > { %v2218_v48 = vadd.f32 %v2217_v40, %v2216_v29  ;;  %v2238_v50 = vrot.slane %v2237_v42, 4  ;;  %v2077_v51 = vrot.slane %v2076_v43, 2  ;;  %v2097_v53 = vadd.f32 %v2096_v45, %v2095_v37  ;;  %v2137_v37 = vld [vmem:[%s3761_s14] sm:$0xf]  ;;  %v2360_v45 = vld [vmem:[%s3768_s22 + $0x28] sm:$0xff] (%p3240_p6)  ;;  %2351 = vst [vmem:[%s3860_s23] sm:$0xff] (%p3240_p6), %v2350_v41 }
 0x1f3   : > { %v2260_v52 = vadd.f32 %v2259_v44, %v2258_v35  ;;  %v2280_v54 = vrot.slane %v2279_v46, 4  ;;  %v2036_v55 = vadd.f32 %v2035_v47, %v2034_v39  ;;  %v2056_v57 = vrot.slane %v2055_v49, 2  ;;  %v2358_v44 = vld [vmem:[%s3768_s22 + $0x20] sm:$0xff] (%p3240_p6)  ;;  %2361 = vst [vmem:[%s3860_s23 + $0x48] sm:$0xff] (%p3240_p6), %v2360_v45  ;;  %v2364_v47 = vld [vmem:[%s3768_s22 + $0x38] sm:$0xff] (%p3240_p6) }
 0x1f4   : > { %v2219_v56 = vrot.slane %v2218_v48, 2  ;;  %v2239_v58 = vadd.f32 %v2238_v50, %v2237_v42  ;;  %v2078_v59 = vadd.f32 %v2077_v51, %v2076_v43  ;;  %v2098_v61 = vrot.slane %v2097_v53, 2  ;;  %v2352_v42 = vld [vmem:[%s3768_s22 + $0x8] sm:$0xff] (%p3240_p6)  ;;  %v2354_v43 = vld [vmem:[%s3768_s22 + $0x10] sm:$0xff] (%p3240_p6)  ;;  %2359 = vst [vmem:[%s3860_s23 + $0x40] sm:$0xff] (%p3240_p6), %v2358_v44  ;;  %2365 = vst [vmem:[%s3860_s23 + $0x58] sm:$0xff] (%p3240_p6), %v2364_v47 }
 0x1f5   : > { %v2261_v60 = vrot.slane %v2260_v52, 2  ;;  %v2281_v62 = vadd.f32 %v2280_v54, %v2279_v46  ;;  %v2037_v63 = vrot.slane %v2036_v55, 1  ;;  %v2057_v1 = vadd.f32 %v2056_v57, %v2055_v49  ;;  %2353 = vst [vmem:[%s3860_s23 + $0x8] sm:$0xff] (%p3240_p6), %v2352_v42  ;;  %2355 = vst [vmem:[%s3860_s23 + $0x10] sm:$0xff] (%p3240_p6), %v2354_v43  ;;  %v2362_v46 = vld [vmem:[%s3768_s22 + $0x30] sm:$0xff] (%p3240_p6)  ;;  %v2368_v49 = vld [vmem:[%s3768_s22 + $0x48] sm:$0xff] (%p3240_p6) }
 0x1f6   : > { %v2220_v0 = vadd.f32 %v2219_v56, %v2218_v48  ;;  %v2240_v2 = vrot.slane %v2239_v58, 2  ;;  %v2079_v3 = vrot.slane %v2078_v59, 1  ;;  %v2099_v7 = vadd.f32 %v2098_v61, %v2097_v53  ;;  %v2366_v48 = vld [vmem:[%s3768_s22 + $0x40] sm:$0xff] (%p3240_p6)  ;;  %2363 = vst [vmem:[%s3860_s23 + $0x50] sm:$0xff] (%p3240_p6), %v2362_v46  ;;  %v2370_v50 = vld [vmem:[%s3768_s22 + $0x50] sm:$0xff] (%p3240_p6)  ;;  %v2372_v51 = vld [vmem:[%s3768_s22 + $0x58] sm:$0xff] (%p3240_p6) }
 0x1f7   : > { %v2262_v4 = vadd.f32 %v2261_v60, %v2260_v52  ;;  %v2282_v8 = vrot.slane %v2281_v62, 2  ;;  %v2038_v9 = vadd.f32 %v2037_v63, %v2036_v55  ;;  %v2058_v11 = vrot.slane %v2057_v1, 1  ;;  %2367 = vst [vmem:[%s3860_s23 + $0x80] sm:$0xff] (%p3240_p6), %v2366_v48  ;;  %2369 = vst [vmem:[%s3860_s23 + $0x88] sm:$0xff] (%p3240_p6), %v2368_v49  ;;  %v2374_v52 = vld [vmem:[%s3768_s22 + $0x60] sm:$0xff] (%p3240_p6)  ;;  %v2376_v53 = vld [vmem:[%s3768_s22 + $0x68] sm:$0xff] (%p3240_p6) }
 0x1f8   : > { %v2221_v10 = vrot.slane %v2220_v0, 1  ;;  %v2241_v12 = vadd.f32 %v2240_v2, %v2239_v58  ;;  %v2080_v13 = vadd.f32 %v2079_v3, %v2078_v59  ;;  %v2100_v15 = vrot.slane %v2099_v7, 1  ;;  %2371 = vst [vmem:[%s3860_s23 + $0x90] sm:$0xff] (%p3240_p6), %v2370_v50  ;;  %2373 = vst [vmem:[%s3860_s23 + $0x98] sm:$0xff] (%p3240_p6), %v2372_v51  ;;  %v2378_v54 = vld [vmem:[%s3768_s22 + $0x70] sm:$0xff] (%p3240_p6)  ;;  %v2380_v55 = vld [vmem:[%s3768_s22 + $0x78] sm:$0xff] (%p3240_p6) }
 0x1f9   : > { %v2263_v14 = vrot.slane %v2262_v4, 1  ;;  %v2283_v16 = vadd.f32 %v2282_v8, %v2281_v62  ;;  %v2059_v17 = vadd.f32 %v2058_v11, %v2057_v1  ;;  %v2113_v18 = vsub.s32 %v2110_v5, %v3830_v6  ;;  %v2017_v5 = vld [vmem:[%s3748_s10] sm:$0xf]  ;;  %2375 = vst [vmem:[%s3860_s23 + $0xc0] sm:$0xff] (%p3240_p6), %v2374_v52  ;;  %2377 = vst [vmem:[%s3860_s23 + $0xc8] sm:$0xff] (%p3240_p6), %v2376_v53  ;;  %v2384_v57 = vld [vmem:[%s3768_s22 + $0x88] sm:$0xff] (%p3240_p6) }
 0x1fa   : > { %v2222_v32 = vadd.f32 %v2221_v10, %v2220_v0  ;;  %v2242_v19 = vrot.slane %v2241_v12, 1  ;;  %v2101_v21 = vadd.f32 %v2100_v15, %v2099_v7  ;;  %2379 = vst [vmem:[%s3860_s23 + $0xd0] sm:$0xff] (%p3240_p6), %v2378_v54  ;;  %v2382_v56 = vld [vmem:[%s3768_s22 + $0x80] sm:$0xff] (%p3240_p6)  ;;  %2381 = vst [vmem:[%s3860_s23 + $0xd8] sm:$0xff] (%p3240_p6), %v2380_v55  ;;  %v2386_v58 = vld [vmem:[%s3768_s22 + $0x90] sm:$0xff] (%p3240_p6) }
 0x1fb   : > { %v2264_v20 = vadd.f32 %v2263_v14, %v2262_v4  ;;  %v2284_v22 = vrot.slane %v2283_v16, 1  ;;  %v2106_v23 = vcombine.low %v2038_v9, %v2059_v17  ;;  %2383 = vst [vmem:[%s3860_s23 + $0x100] sm:$0xff] (%p3240_p6), %v2382_v56  ;;  %2385 = vst [vmem:[%s3860_s23 + $0x108] sm:$0xff] (%p3240_p6), %v2384_v57  ;;  %v2388_v59 = vld [vmem:[%s3768_s22 + $0x98] sm:$0xff] (%p3240_p6)  ;;  %v2390_v60 = vld [vmem:[%s3768_s22 + $0xa0] sm:$0xff] (%p3240_p6) }
 0x1fc   : > { %v2243_v24 = vadd.f32 %v2242_v19, %v2241_v12  ;;  %v2107_v25 = vcombine.low %v2080_v13, %v2101_v21  ;;  %2387 = vst [vmem:[%s3860_s23 + $0x110] sm:$0xff] (%p3240_p6), %v2386_v58  ;;  %2389 = vst [vmem:[%s3860_s23 + $0x118] sm:$0xff] (%p3240_p6), %v2388_v59  ;;  %v2392_v61 = vld [vmem:[%s3768_s22 + $0xa8] sm:$0xff] (%p3240_p6)  ;;  %v2394_v62 = vld [vmem:[%s3768_s22 + $0xb0] sm:$0xff] (%p3240_p6) }
 0x1fd   : > { %v2285_v26 = vadd.f32 %v2284_v22, %v2283_v16  ;;  %v2114_v27 = vrot.slane %v2106_v23, %v2113_v18  ;;  %2391 = vst [vmem:[%s3860_s23 + $0x140] sm:$0xff] (%p3240_p6), %v2390_v60  ;;  %v2396_v63 = vld [vmem:[%s3768_s22 + $0xb8] sm:$0xff] (%p3240_p6)  ;;  %2393 = vst [vmem:[%s3860_s23 + $0x148] sm:$0xff] (%p3240_p6), %v2392_v61  ;;  %v2398_v0 = vld [vmem:[%s3768_s22 + $0xc0] sm:$0xff] (%p3240_p6) }
 0x1fe   : > { %v2290_v28 = vcombine.low %v2222_v32, %v2243_v24  ;;  %v2121_v29 = vrot.slane %v2107_v25, %v2113_v18  ;;  %2395 = vst [vmem:[%s3860_s23 + $0x150] sm:$0xff] (%p3240_p6), %v2394_v62  ;;  %2397 = vst [vmem:[%s3860_s23 + $0x158] sm:$0xff] (%p3240_p6), %v2396_v63  ;;  %v2400_v1 = vld [vmem:[%s3768_s22 + $0xc8] sm:$0xff] (%p3240_p6)  ;;  %v2402_v2 = vld [vmem:[%s3768_s22 + $0xd0] sm:$0xff] (%p3240_p6) }
 0x1ff   : > { %v2291_v30 = vcombine.low %v2264_v20, %v2285_v26  ;;  %2399 = vst [vmem:[%s3860_s23 + $0x180] sm:$0xff] (%p3240_p6), %v2398_v0  ;;  %2401 = vst [vmem:[%s3860_s23 + $0x188] sm:$0xff] (%p3240_p6), %v2400_v1  ;;  %v2404_v3 = vld [vmem:[%s3768_s22 + $0xd8] sm:$0xff] (%p3240_p6)  ;;  %v2406_v4 = vld [vmem:[%s3768_s22 + $0xe0] sm:$0xff] (%p3240_p6) }
 0x200   : > { %v2298_v31 = vrot.slane %v2290_v28, %v2113_v18  ;;  %v2122_v34 = vcombine.low %v2114_v27, %v2121_v29  ;;  %2403 = vst [vmem:[%s3860_s23 + $0x190] sm:$0xff] (%p3240_p6), %v2402_v2  ;;  %v2408_v7 = vld [vmem:[%s3768_s22 + $0xe8] sm:$0xff] (%p3240_p6)  ;;  %2405 = vst [vmem:[%s3860_s23 + $0x198] sm:$0xff] (%p3240_p6), %v2404_v3  ;;  %v2410_v8 = vld [vmem:[%s3768_s22 + $0xf0] sm:$0xff] (%p3240_p6) }
 0x201   : > { %v2305_v36 = vrot.slane %v2291_v30, %v2113_v18  ;;  %2407 = vst [vmem:[%s3860_s23 + $0x1c0] sm:$0xff] (%p3240_p6), %v2406_v4  ;;  %2409 = vst [vmem:[%s3860_s23 + $0x1c8] sm:$0xff] (%p3240_p6), %v2408_v7  ;;  %v2412_v9 = vld [vmem:[%s3768_s22 + $0xf8] sm:$0xff] (%p3240_p6)  ;;  %v2414_v10 = vld [vmem:[%s3768_s22 + $0x100] sm:$0xff] (%p3240_p6) }
 0x202   : > { %v2129_v6 = vrot.slane %v2122_v34, %v2113_v18  ;;  %2411 = vst [vmem:[%s3860_s23 + $0x1d0] sm:$0xff] (%p3240_p6), %v2410_v8  ;;  %2413 = vst [vmem:[%s3860_s23 + $0x1d8] sm:$0xff] (%p3240_p6), %v2412_v9  ;;  %v2416_v11 = vld [vmem:[%s3768_s22 + $0x108] sm:$0xff] (%p3240_p6)  ;;  %v2418_v12 = vld [vmem:[%s3768_s22 + $0x110] sm:$0xff] (%p3240_p6) }
 0x203   : > { %v2306_v35 = vcombine.low %v2298_v31, %v2305_v36  ;;  %2331 = sbr.rel (!%p3240_p6) target bundleno = 532 (0x214), region = 59  ;;  %2415 = vst [vmem:[%s3860_s23 + $0x200] sm:$0xff] (%p3240_p6), %v2414_v10  ;;  %v2420_v13 = vld [vmem:[%s3768_s22 + $0x118] sm:$0xff] (%p3240_p6)  ;;  %2417 = vst [vmem:[%s3860_s23 + $0x208] sm:$0xff] (%p3240_p6), %v2416_v11  ;;  %v2422_v14 = vld [vmem:[%s3768_s22 + $0x120] sm:$0xff] (%p3240_p6) }
 0x204   : > { %v2131_v38 = vadd.f32 %v2129_v6, %v2017_v5  ;;  %2419 = vst [vmem:[%s3860_s23 + $0x210] sm:$0xff] (%p3240_p6), %v2418_v12  ;;  %2421 = vst [vmem:[%s3860_s23 + $0x218] sm:$0xff] (%p3240_p6), %v2420_v13  ;;  %v2424_v15 = vld [vmem:[%s3768_s22 + $0x128] sm:$0xff] (%p3240_p6)  ;;  %v2426_v16 = vld [vmem:[%s3768_s22 + $0x130] sm:$0xff] (%p3240_p6) }
 0x205   : > { %v2313_v39 = vrot.slane %v2306_v35, %v2113_v18  ;;  %2423 = vst [vmem:[%s3860_s23 + $0x240] sm:$0xff] (%p3240_p6), %v2422_v14  ;;  %2425 = vst [vmem:[%s3860_s23 + $0x248] sm:$0xff] (%p3240_p6), %v2424_v15  ;;  %v2428_v32 = vld [vmem:[%s3768_s22 + $0x138] sm:$0xff] (%p3240_p6)  ;;  %v2430_v17 = vld [vmem:[%s3768_s22 + $0x140] sm:$0xff] (%p3240_p6) }
 0x206   : > { %2136 = vst.msk [vmem:[%s3748_s10] sm:$0xf] %vm3751_vm0, %v2131_v38  ;;  %2427 = vst [vmem:[%s3860_s23 + $0x250] sm:$0xff] (%p3240_p6), %v2426_v16  ;;  %v2432_v18 = vld [vmem:[%s3768_s22 + $0x148] sm:$0xff] (%p3240_p6)  ;;  %v2434_v19 = vld [vmem:[%s3768_s22 + $0x150] sm:$0xff] (%p3240_p6) }
 0x207   : > { %v2315_v40 = vadd.f32 %v2313_v39, %v2137_v37  ;;  %2429 = vst [vmem:[%s3860_s23 + $0x258] sm:$0xff] (%p3240_p6), %v2428_v32  ;;  %2431 = vst [vmem:[%s3860_s23 + $0x280] sm:$0xff] (%p3240_p6), %v2430_v17  ;;  %v2436_v20 = vld [vmem:[%s3768_s22 + $0x158] sm:$0xff] (%p3240_p6)  ;;  %v2438_v21 = vld [vmem:[%s3768_s22 + $0x160] sm:$0xff] (%p3240_p6) }
 0x208   : > { %2433 = vst [vmem:[%s3860_s23 + $0x288] sm:$0xff] (%p3240_p6), %v2432_v18  ;;  %2435 = vst [vmem:[%s3860_s23 + $0x290] sm:$0xff] (%p3240_p6), %v2434_v19  ;;  %v2440_v22 = vld [vmem:[%s3768_s22 + $0x168] sm:$0xff] (%p3240_p6)  ;;  %v2442_v23 = vld [vmem:[%s3768_s22 + $0x170] sm:$0xff] (%p3240_p6) }
 0x209   : > { %2316 = vst.msk [vmem:[%s3761_s14] sm:$0xf] %vm3751_vm0, %v2315_v40  ;;  %2437 = vst [vmem:[%s3860_s23 + $0x298] sm:$0xff] (%p3240_p6), %v2436_v20  ;;  %v2444_v24 = vld [vmem:[%s3768_s22 + $0x178] sm:$0xff] (%p3240_p6)  ;;  %v2446_v25 = vld [vmem:[%s3768_s22 + $0x180] sm:$0xff] (%p3240_p6) }
 0x20a   : > { %2439 = vst [vmem:[%s3860_s23 + $0x2c0] sm:$0xff] %v2438_v21  ;;  %2441 = vst [vmem:[%s3860_s23 + $0x2c8] sm:$0xff] %v2440_v22  ;;  %v2448_v26 = vld [vmem:[%s3768_s22 + $0x188] sm:$0xff]  ;;  %v2450_v27 = vld [vmem:[%s3768_s22 + $0x190] sm:$0xff] }
 0x20b   : > { %2443 = vst [vmem:[%s3860_s23 + $0x2d0] sm:$0xff] %v2442_v23  ;;  %2445 = vst [vmem:[%s3860_s23 + $0x2d8] sm:$0xff] %v2444_v24  ;;  %v2452_v28 = vld [vmem:[%s3768_s22 + $0x198] sm:$0xff]  ;;  %v2454_v29 = vld [vmem:[%s3768_s22 + $0x1a0] sm:$0xff] }
 0x20c   : > { %2447 = vst [vmem:[%s3860_s23 + $0x300] sm:$0xff] %v2446_v25  ;;  %2449 = vst [vmem:[%s3860_s23 + $0x308] sm:$0xff] %v2448_v26  ;;  %v2456_v30 = vld [vmem:[%s3768_s22 + $0x1a8] sm:$0xff]  ;;  %v2458_v31 = vld [vmem:[%s3768_s22 + $0x1b0] sm:$0xff] }
 0x20d   : > { %2451 = vst [vmem:[%s3860_s23 + $0x310] sm:$0xff] %v2450_v27  ;;  %2453 = vst [vmem:[%s3860_s23 + $0x318] sm:$0xff] %v2452_v28  ;;  %v2460_v34 = vld [vmem:[%s3768_s22 + $0x1b8] sm:$0xff]  ;;  %v2462_v36 = vld [vmem:[%s3768_s22 + $0x1c0] sm:$0xff] }
 0x20e   : > { %2455 = vst [vmem:[%s3860_s23 + $0x340] sm:$0xff] %v2454_v29  ;;  %2457 = vst [vmem:[%s3860_s23 + $0x348] sm:$0xff] %v2456_v30  ;;  %v2464_v5 = vld [vmem:[%s3768_s22 + $0x1c8] sm:$0xff]  ;;  %v2466_v6 = vld [vmem:[%s3768_s22 + $0x1d0] sm:$0xff] }
 0x20f   : > { %2459 = vst [vmem:[%s3860_s23 + $0x350] sm:$0xff] %v2458_v31  ;;  %2461 = vst [vmem:[%s3860_s23 + $0x358] sm:$0xff] %v2460_v34  ;;  %v2468_v35 = vld [vmem:[%s3768_s22 + $0x1d8] sm:$0xff]  ;;  %v2470_v37 = vld [vmem:[%s3768_s22 + $0x1e0] sm:$0xff] }
 0x210   : > { %2463 = vst [vmem:[%s3860_s23 + $0x380] sm:$0xff] %v2462_v36  ;;  %2465 = vst [vmem:[%s3860_s23 + $0x388] sm:$0xff] %v2464_v5  ;;  %v2472_v38 = vld [vmem:[%s3768_s22 + $0x1e8] sm:$0xff]  ;;  %v2474_v39 = vld [vmem:[%s3768_s22 + $0x1f0] sm:$0xff] }
 0x211   : > { %2467 = vst [vmem:[%s3860_s23 + $0x390] sm:$0xff] %v2466_v6  ;;  %2469 = vst [vmem:[%s3860_s23 + $0x398] sm:$0xff] %v2468_v35  ;;  %v2476_v40 = vld [vmem:[%s3768_s22 + $0x1f8] sm:$0xff] }
 0x212   : > { %2471 = vst [vmem:[%s3860_s23 + $0x3c0] sm:$0xff] %v2470_v37  ;;  %2473 = vst [vmem:[%s3860_s23 + $0x3c8] sm:$0xff] %v2472_v38 }
 0x213   : > { %2475 = vst [vmem:[%s3860_s23 + $0x3d0] sm:$0xff] %v2474_v39  ;;  %2477 = vst [vmem:[%s3860_s23 + $0x3d8] sm:$0xff] %v2476_v40 }
 0x214 PF: > { %s15_s19 = sadd.s32 1, %s3176_s19   ;;  %s4010_s15 = smov %s3164_s16 }
 0x215   : > { %p12_p12 = scmp.ge.s32.totalorder %s15_s19, 4   ;;  %s4011_s16 = smov %s3245_s25 }
 0x216   : > { %s4012_s17 = smov %s3172_s18  ;;  %s4013_s18 = smov %s4015_s20 }
 0x217   :  { %14 = sbr.rel (!%p12_p12) target bundleno = 3 (0x3), region = 140 }

// kernel: unet_decoder_forward.12
= control target key start
LH: loop header
LB: loop body
LE: loop exit
PB: predicated region body
PF: predicated region fallthrough
CT: control target
= control target key end

     0   :  { %s1260_s12 = smov 0   ;;  %s1262_s13 = smov 0   ;;  %s1788_s0 = inlined_call_operand.vmem [shape: f32[128,1024], index: 0, kind: input, shape index: {}]   ;;  %s1789_s1 = inlined_call_operand.vmem [shape: f32[1,1024], index: 1, kind: input, shape index: {}]   ;;  %s1790_s2 = inlined_call_operand.vmem [shape: f32[1,1024], index: 2, kind: input, shape index: {}]   ;;  %s1791_s3 = inlined_call_operand.vmem [shape: bf16[128,1024], index: 3, kind: output, shape index: {}]  }
   0x1   :  { %s1264_s14 = smov 0   ;;  %s1266_s15 = smov 0  }
   0x2   :  { %s1268_s16 = smov 0  }
   0x3 LB: > { %s25_s17 = sadd.s32 1, %s1234_s15  ;;  %s1077_s18 = sadd.s32 4294967295, %s1238_s16   ;;  %s1238_s16 = sphi %s1268_s16, %s13_s16   ;;  %s1234_s15 = sphi %s1266_s15, %s1796_s15   ;;  %s1230_s14 = sphi %s1264_s14, %s1795_s14   ;;  %s1226_s13 = sphi %s1262_s13, %s1794_s13   ;;  %s1222_s12 = sphi %s1260_s12, %s1793_s12  }
   0x4   : > { %p27_p0 = scmp.ge.s32.totalorder %s25_s17, 2  ;;  %p41_p1 = scmp.ne.s32.totalorder %s1226_s13, %s1222_s12 }
   0x5   : > { %p42_p2 = scmp.eq.s32.totalorder %s1238_s16, 0  ;;  %p125_p4 = scmp.eq.s32.totalorder %s1077_s18, 1 }
   0x6   : > { %s1798_s17 = smov (%p27_p0, %s25_s17), 0  ;;  %s34_s20 = sadd.s32 1, %s1226_s13 }
   0x7   : > { %p43_p3 = por %p42_p2, %p41_p1  ;;  %s30_s19 = ssub.s32 %s1234_s15, %s1798_s17 }
   0x8   : > { %p32_p5 = scmp.eq.s32.totalorder %s30_s19, 0  ;;  %p1295_p6 = por %p125_p4, %p41_p1 }
   0x9   : > { %p1080_p7 = scmp.ge.s32.totalorder %s1238_s16, 2 }
   0xa   : > { %s1300_s22 = scalar_select %p32_p5, %s1226_s13, %s34_s20  }
   0xb   : > { %147 = sbr.rel (%p1080_p7) target bundleno = 54 (0x36), region = 16 }
  0x12   : > { %150 = sbr.rel (!%p43_p3) target bundleno = 54 (0x36), region = 20  ;;  %s152_s23 = sand.u32 (%p43_p3), 1, %s1226_s13  }
  0x13   : > { %s1126_s24 = sshll.u32 (%p43_p3), %s1234_s15, 5  ;;  %s1081_s25 = sshll.u32 (%p43_p3), %s152_s23, 9 }
  0x14   : > { %s1308_s28 = scalar_lea.vmem (%p43_p3), %s1788_s0, %s1126_s24  ;;  %s1313_s29 = scalar_lea.vmem (%p43_p3), [#allocation2], %s1081_s25 }
  0x15   : > { %v173_v0 = vld [vmem:[%s1308_s28] sm:$0xff] (%p43_p3)  ;;  %v175_v1 = vld [vmem:[%s1308_s28 + $0x8] sm:$0xff] (%p43_p3)  ;;  %v177_v2 = vld [vmem:[%s1308_s28 + $0x10] sm:$0xff] (%p43_p3) }
  0x16   : > { %174 = vst [vmem:[%s1313_s29] sm:$0xff] (%p43_p3), %v173_v0  ;;  %176 = vst [vmem:[%s1313_s29 + $0x8] sm:$0xff] (%p43_p3), %v175_v1  ;;  %v179_v3 = vld [vmem:[%s1308_s28 + $0x18] sm:$0xff] (%p43_p3)  ;;  %v181_v4 = vld [vmem:[%s1308_s28 + $0x40] sm:$0xff] (%p43_p3) }
  0x17   : > { %178 = vst [vmem:[%s1313_s29 + $0x10] sm:$0xff] (%p43_p3), %v177_v2  ;;  %v183_v5 = vld [vmem:[%s1308_s28 + $0x48] sm:$0xff] (%p43_p3)  ;;  %180 = vst [vmem:[%s1313_s29 + $0x18] sm:$0xff] (%p43_p3), %v179_v3  ;;  %v185_v6 = vld [vmem:[%s1308_s28 + $0x50] sm:$0xff] (%p43_p3) }
  0x18   : > { %182 = vst [vmem:[%s1313_s29 + $0x20] sm:$0xff] (%p43_p3), %v181_v4  ;;  %184 = vst [vmem:[%s1313_s29 + $0x28] sm:$0xff] (%p43_p3), %v183_v5  ;;  %v187_v7 = vld [vmem:[%s1308_s28 + $0x58] sm:$0xff] (%p43_p3)  ;;  %v189_v8 = vld [vmem:[%s1308_s28 + $0x80] sm:$0xff] (%p43_p3) }
  0x19   : > { %186 = vst [vmem:[%s1313_s29 + $0x30] sm:$0xff] %v185_v6  ;;  %188 = vst [vmem:[%s1313_s29 + $0x38] sm:$0xff] %v187_v7  ;;  %v191_v9 = vld [vmem:[%s1308_s28 + $0x88] sm:$0xff]  ;;  %v193_v10 = vld [vmem:[%s1308_s28 + $0x90] sm:$0xff] }
  0x1a   : > { %190 = vst [vmem:[%s1313_s29 + $0x40] sm:$0xff] %v189_v8  ;;  %v195_v11 = vld [vmem:[%s1308_s28 + $0x98] sm:$0xff]  ;;  %192 = vst [vmem:[%s1313_s29 + $0x48] sm:$0xff] %v191_v9  ;;  %v197_v12 = vld [vmem:[%s1308_s28 + $0xc0] sm:$0xff] }
  0x1b   : > { %194 = vst [vmem:[%s1313_s29 + $0x50] sm:$0xff] %v193_v10  ;;  %196 = vst [vmem:[%s1313_s29 + $0x58] sm:$0xff] %v195_v11  ;;  %v199_v13 = vld [vmem:[%s1308_s28 + $0xc8] sm:$0xff]  ;;  %v201_v14 = vld [vmem:[%s1308_s28 + $0xd0] sm:$0xff] }
  0x1c   : > { %198 = vst [vmem:[%s1313_s29 + $0x60] sm:$0xff] %v197_v12  ;;  %200 = vst [vmem:[%s1313_s29 + $0x68] sm:$0xff] %v199_v13  ;;  %v203_v15 = vld [vmem:[%s1308_s28 + $0xd8] sm:$0xff]  ;;  %v205_v16 = vld [vmem:[%s1308_s28 + $0x100] sm:$0xff] }
  0x1d   : > { %202 = vst [vmem:[%s1313_s29 + $0x70] sm:$0xff] %v201_v14  ;;  %v207_v17 = vld [vmem:[%s1308_s28 + $0x108] sm:$0xff]  ;;  %204 = vst [vmem:[%s1313_s29 + $0x78] sm:$0xff] %v203_v15  ;;  %v209_v18 = vld [vmem:[%s1308_s28 + $0x110] sm:$0xff] }
  0x1e   : > { %206 = vst [vmem:[%s1313_s29 + $0x80] sm:$0xff] %v205_v16  ;;  %208 = vst [vmem:[%s1313_s29 + $0x88] sm:$0xff] %v207_v17  ;;  %v211_v19 = vld [vmem:[%s1308_s28 + $0x118] sm:$0xff]  ;;  %v213_v20 = vld [vmem:[%s1308_s28 + $0x140] sm:$0xff] }
  0x1f   : > { %210 = vst [vmem:[%s1313_s29 + $0x90] sm:$0xff] %v209_v18  ;;  %212 = vst [vmem:[%s1313_s29 + $0x98] sm:$0xff] %v211_v19  ;;  %v215_v21 = vld [vmem:[%s1308_s28 + $0x148] sm:$0xff]  ;;  %v217_v22 = vld [vmem:[%s1308_s28 + $0x150] sm:$0xff] }
  0x20   : > { %214 = vst [vmem:[%s1313_s29 + $0xa0] sm:$0xff] %v213_v20  ;;  %v219_v23 = vld [vmem:[%s1308_s28 + $0x158] sm:$0xff]  ;;  %216 = vst [vmem:[%s1313_s29 + $0xa8] sm:$0xff] %v215_v21  ;;  %v221_v24 = vld [vmem:[%s1308_s28 + $0x180] sm:$0xff] }
  0x21   : > { %218 = vst [vmem:[%s1313_s29 + $0xb0] sm:$0xff] %v217_v22  ;;  %220 = vst [vmem:[%s1313_s29 + $0xb8] sm:$0xff] %v219_v23  ;;  %v223_v25 = vld [vmem:[%s1308_s28 + $0x188] sm:$0xff]  ;;  %v225_v26 = vld [vmem:[%s1308_s28 + $0x190] sm:$0xff] }
  0x22   : > { %222 = vst [vmem:[%s1313_s29 + $0xc0] sm:$0xff] %v221_v24  ;;  %224 = vst [vmem:[%s1313_s29 + $0xc8] sm:$0xff] %v223_v25  ;;  %v227_v27 = vld [vmem:[%s1308_s28 + $0x198] sm:$0xff]  ;;  %v229_v28 = vld [vmem:[%s1308_s28 + $0x1c0] sm:$0xff] }
  0x23   : > { %226 = vst [vmem:[%s1313_s29 + $0xd0] sm:$0xff] %v225_v26  ;;  %v231_v29 = vld [vmem:[%s1308_s28 + $0x1c8] sm:$0xff]  ;;  %228 = vst [vmem:[%s1313_s29 + $0xd8] sm:$0xff] %v227_v27  ;;  %v233_v30 = vld [vmem:[%s1308_s28 + $0x1d0] sm:$0xff] }
  0x24   : > { %230 = vst [vmem:[%s1313_s29 + $0xe0] sm:$0xff] %v229_v28  ;;  %232 = vst [vmem:[%s1313_s29 + $0xe8] sm:$0xff] %v231_v29  ;;  %v235_v31 = vld [vmem:[%s1308_s28 + $0x1d8] sm:$0xff]  ;;  %v237_v32 = vld [vmem:[%s1308_s28 + $0x200] sm:$0xff] }
  0x25   : > { %234 = vst [vmem:[%s1313_s29 + $0xf0] sm:$0xff] %v233_v30  ;;  %236 = vst [vmem:[%s1313_s29 + $0xf8] sm:$0xff] %v235_v31  ;;  %v239_v33 = vld [vmem:[%s1308_s28 + $0x208] sm:$0xff]  ;;  %v241_v34 = vld [vmem:[%s1308_s28 + $0x210] sm:$0xff] }
  0x26   : > { %238 = vst [vmem:[%s1313_s29 + $0x100] sm:$0xff] %v237_v32  ;;  %v243_v35 = vld [vmem:[%s1308_s28 + $0x218] sm:$0xff]  ;;  %240 = vst [vmem:[%s1313_s29 + $0x108] sm:$0xff] %v239_v33  ;;  %v245_v36 = vld [vmem:[%s1308_s28 + $0x240] sm:$0xff] }
  0x27   : > { %242 = vst [vmem:[%s1313_s29 + $0x110] sm:$0xff] %v241_v34  ;;  %244 = vst [vmem:[%s1313_s29 + $0x118] sm:$0xff] %v243_v35  ;;  %v247_v37 = vld [vmem:[%s1308_s28 + $0x248] sm:$0xff]  ;;  %v249_v38 = vld [vmem:[%s1308_s28 + $0x250] sm:$0xff] }
  0x28   : > { %246 = vst [vmem:[%s1313_s29 + $0x120] sm:$0xff] %v245_v36  ;;  %248 = vst [vmem:[%s1313_s29 + $0x128] sm:$0xff] %v247_v37  ;;  %v251_v39 = vld [vmem:[%s1308_s28 + $0x258] sm:$0xff]  ;;  %v253_v40 = vld [vmem:[%s1308_s28 + $0x280] sm:$0xff] }
  0x29   : > { %250 = vst [vmem:[%s1313_s29 + $0x130] sm:$0xff] %v249_v38  ;;  %v255_v41 = vld [vmem:[%s1308_s28 + $0x288] sm:$0xff]  ;;  %252 = vst [vmem:[%s1313_s29 + $0x138] sm:$0xff] %v251_v39  ;;  %v257_v42 = vld [vmem:[%s1308_s28 + $0x290] sm:$0xff] }
  0x2a   : > { %254 = vst [vmem:[%s1313_s29 + $0x140] sm:$0xff] %v253_v40  ;;  %256 = vst [vmem:[%s1313_s29 + $0x148] sm:$0xff] %v255_v41  ;;  %v259_v43 = vld [vmem:[%s1308_s28 + $0x298] sm:$0xff]  ;;  %v261_v44 = vld [vmem:[%s1308_s28 + $0x2c0] sm:$0xff] }
  0x2b   : > { %258 = vst [vmem:[%s1313_s29 + $0x150] sm:$0xff] %v257_v42  ;;  %260 = vst [vmem:[%s1313_s29 + $0x158] sm:$0xff] %v259_v43  ;;  %v263_v45 = vld [vmem:[%s1308_s28 + $0x2c8] sm:$0xff]  ;;  %v265_v46 = vld [vmem:[%s1308_s28 + $0x2d0] sm:$0xff] }
  0x2c   : > { %262 = vst [vmem:[%s1313_s29 + $0x160] sm:$0xff] %v261_v44  ;;  %v267_v47 = vld [vmem:[%s1308_s28 + $0x2d8] sm:$0xff]  ;;  %264 = vst [vmem:[%s1313_s29 + $0x168] sm:$0xff] %v263_v45  ;;  %v269_v48 = vld [vmem:[%s1308_s28 + $0x300] sm:$0xff] }
  0x2d   : > { %266 = vst [vmem:[%s1313_s29 + $0x170] sm:$0xff] %v265_v46  ;;  %268 = vst [vmem:[%s1313_s29 + $0x178] sm:$0xff] %v267_v47  ;;  %v271_v49 = vld [vmem:[%s1308_s28 + $0x308] sm:$0xff]  ;;  %v273_v50 = vld [vmem:[%s1308_s28 + $0x310] sm:$0xff] }
  0x2e   : > { %270 = vst [vmem:[%s1313_s29 + $0x180] sm:$0xff] %v269_v48  ;;  %272 = vst [vmem:[%s1313_s29 + $0x188] sm:$0xff] %v271_v49  ;;  %v275_v51 = vld [vmem:[%s1308_s28 + $0x318] sm:$0xff]  ;;  %v277_v52 = vld [vmem:[%s1308_s28 + $0x340] sm:$0xff] }
  0x2f   : > { %274 = vst [vmem:[%s1313_s29 + $0x190] sm:$0xff] %v273_v50  ;;  %v279_v53 = vld [vmem:[%s1308_s28 + $0x348] sm:$0xff]  ;;  %276 = vst [vmem:[%s1313_s29 + $0x198] sm:$0xff] %v275_v51  ;;  %v281_v54 = vld [vmem:[%s1308_s28 + $0x350] sm:$0xff] }
  0x30   : > { %278 = vst [vmem:[%s1313_s29 + $0x1a0] sm:$0xff] %v277_v52  ;;  %280 = vst [vmem:[%s1313_s29 + $0x1a8] sm:$0xff] %v279_v53  ;;  %v283_v55 = vld [vmem:[%s1308_s28 + $0x358] sm:$0xff]  ;;  %v285_v56 = vld [vmem:[%s1308_s28 + $0x380] sm:$0xff] }
  0x31   : > { %282 = vst [vmem:[%s1313_s29 + $0x1b0] sm:$0xff] %v281_v54  ;;  %284 = vst [vmem:[%s1313_s29 + $0x1b8] sm:$0xff] %v283_v55  ;;  %v287_v57 = vld [vmem:[%s1308_s28 + $0x388] sm:$0xff]  ;;  %v289_v58 = vld [vmem:[%s1308_s28 + $0x390] sm:$0xff] }
  0x32   : > { %286 = vst [vmem:[%s1313_s29 + $0x1c0] sm:$0xff] %v285_v56  ;;  %v291_v59 = vld [vmem:[%s1308_s28 + $0x398] sm:$0xff]  ;;  %288 = vst [vmem:[%s1313_s29 + $0x1c8] sm:$0xff] %v287_v57  ;;  %v293_v60 = vld [vmem:[%s1308_s28 + $0x3c0] sm:$0xff] }
  0x33   : > { %290 = vst [vmem:[%s1313_s29 + $0x1d0] sm:$0xff] %v289_v58  ;;  %292 = vst [vmem:[%s1313_s29 + $0x1d8] sm:$0xff] %v291_v59  ;;  %v295_v61 = vld [vmem:[%s1308_s28 + $0x3c8] sm:$0xff]  ;;  %v297_v62 = vld [vmem:[%s1308_s28 + $0x3d0] sm:$0xff] }
  0x34   : > { %294 = vst [vmem:[%s1313_s29 + $0x1e0] sm:$0xff] %v293_v60  ;;  %296 = vst [vmem:[%s1313_s29 + $0x1e8] sm:$0xff] %v295_v61  ;;  %v299_v63 = vld [vmem:[%s1308_s28 + $0x3d8] sm:$0xff] }
  0x35   : > { %298 = vst [vmem:[%s1313_s29 + $0x1f0] sm:$0xff] %v297_v62  ;;  %300 = vst [vmem:[%s1313_s29 + $0x1f8] sm:$0xff] %v299_v63 }
  0x36 PF: > { %p1084_p8 = scmp.ge.s32.totalorder %s1238_s16, 1  ;;  %p321_p9 = scmp.lt.s32.totalorder %s1238_s16, 3 }
  0x38   : > { %p322_p10 = pnand %p1084_p8, %p321_p9 }
  0x39   : > { %s328_s30 = sand.u32 (!%p322_p10), 1, %s1222_s12   ;;  %s1087_s4 = sshll.u32 (!%p322_p10), %s1230_s14, 2  ;;  %v438_v0 = vlaneseq (!%p322_p10) }
  0x3a   : > { %325 = sbr.rel (%p322_p10) target bundleno = 139 (0x8b), region = 51  ;;  %s1085_s5 = sshll.u32 (!%p322_p10), %s328_s30, 9 }
  0x3b   : > { %v439_v1 = vshrl.u32 (!%p322_p10), %v438_v0, 7  ;;  %p361_p11 = scmp.lt.s32.totalorder (!%p322_p10), %s1087_s4, 7  ;;  %s1446_s6 = scalar_lea.vmem (!%p322_p10), [#allocation2], %s1085_s5 }
  0x3c   : > { %v372_v4 = vld [vmem:[%s1446_s6] sm:$0xff] (!%p322_p10)  ;;  %v373_v7 = vld [vmem:[%s1446_s6 + $0x8] sm:$0xff] (!%p322_p10)  ;;  %v374_v8 = vld [vmem:[%s1446_s6 + $0x10] sm:$0xff] (!%p322_p10)  ;;  %s1480_s19 = sshll.u32 (!%p322_p10), %s328_s30, 8 }
  0x3d   : > { %v440_v2 = vsub.s32 (!%p322_p10), 0, %v439_v1  ;;  %v444_v3 = vsub.s32 (!%p322_p10), 1, %v439_v1  ;;  %v448_v5 = vsub.s32 (!%p322_p10), 2, %v439_v1  ;;  %v452_v6 = vsub.s32 (!%p322_p10), 3, %v439_v1  ;;  %v376_v9 = vld [vmem:[%s1446_s6 + $0x20] sm:$0xff] (!%p322_p10)  ;;  %v377_v12 = vld [vmem:[%s1446_s6 + $0x28] sm:$0xff] (!%p322_p10) }
  0x3e   : > { %v375_v17 = vld [vmem:[%s1446_s6 + $0x18] sm:$0xff] (!%p322_p10)  ;;  %v378_v18 = vld [vmem:[%s1446_s6 + $0x30] sm:$0xff] (!%p322_p10)  ;;  %v380_v40 = vld [vmem:[%s1446_s6 + $0x40] sm:$0xff] (!%p322_p10)  ;;  %s1511_s12 = scalar_lea.vmem (!%p322_p10), [#allocation3], %s1480_s19 }
  0x3f   : > { %v379_v19 = vld [vmem:[%s1446_s6 + $0x38] sm:$0xff] (!%p322_p10)  ;;  %v381_v41 = vld [vmem:[%s1446_s6 + $0x48] sm:$0xff] (!%p322_p10)  ;;  %v382_v46 = vld [vmem:[%s1446_s6 + $0x50] sm:$0xff] (!%p322_p10) }
  0x40   : > { %v383_v47 = vld [vmem:[%s1446_s6 + $0x58] sm:$0xff] (!%p322_p10)  ;;  %v384_v52 = vld [vmem:[%s1446_s6 + $0x60] sm:$0xff] (!%p322_p10)  ;;  %v385_v53 = vld [vmem:[%s1446_s6 + $0x68] sm:$0xff] (!%p322_p10) }
  0x41   : > { %s1800_s4 = smov (!%p361_p11, %s1087_s4), 7  ;;  %v386_v58 = vld [vmem:[%s1446_s6 + $0x70] sm:$0xff]  ;;  %v387_v59 = vld [vmem:[%s1446_s6 + $0x78] sm:$0xff]  ;;  %s1159_s20 = sshll.u32 (%p1295_p6), %s1230_s14, 4 }
  0x42   : > { %s363_s9 = scalar_lea.vmem %s1789_s1, %s1800_s4  ;;  %s368_s18 = scalar_lea.vmem %s1790_s2, %s1800_s4 }
  0x43   : > { %v436_v10 = vld [vmem:[%s363_s9] sm:$0xf]  ;;  %s1710_s25 = scalar_lea.vmem (%p1295_p6), %s1791_s3, %s1159_s20 }
  0x44   : > { %v522_v11 = vld [vmem:[%s368_s18] sm:$0xf]  ;;  %v1459_v13 = vrot.slane %v436_v10, %v440_v2  ;;  %v1461_v14 = vrot.slane %v436_v10, %v444_v3  ;;  %v1470_v20 = vrot.slane %v436_v10, %v448_v5  ;;  %v1472_v21 = vrot.slane %v436_v10, %v452_v6 }
  0x45   : > { %v1463_v15 = vrot.slane %v522_v11, %v440_v2  ;;  %v1465_v16 = vrot.slane %v522_v11, %v444_v3  ;;  %v1474_v22 = vrot.slane %v522_v11, %v448_v5  ;;  %v1476_v23 = vrot.slane %v522_v11, %v452_v6 }
  0x46   : > { %v458_v24 = vmul.f32 %v1459_v13, %v372_v4  ;;  %v459_v25 = vmul.f32 %v1461_v14, %v373_v7  ;;  %v462_v26 = vmul.f32 %v1459_v13, %v376_v9  ;;  %v463_v27 = vmul.f32 %v1461_v14, %v377_v12 }
  0x47   : > { %v460_v28 = vmul.f32 %v1470_v20, %v374_v8  ;;  %v461_v29 = vmul.f32 %v1472_v21, %v375_v17  ;;  %v464_v30 = vmul.f32 %v1470_v20, %v378_v18  ;;  %v465_v31 = vmul.f32 %v1472_v21, %v379_v19  ;;  %v388_v8 = vld [vmem:[%s1446_s6 + $0x80] sm:$0xff]  ;;  %v389_v17 = vld [vmem:[%s1446_s6 + $0x88] sm:$0xff] }
  0x48   : > { %v544_v32 = vadd.f32 %v1463_v15, %v458_v24  ;;  %v545_v33 = vadd.f32 %v1465_v16, %v459_v25  ;;  %v548_v34 = vadd.f32 %v1463_v15, %v462_v26  ;;  %v549_v35 = vadd.f32 %v1465_v16, %v463_v27  ;;  %v390_v26 = vld [vmem:[%s1446_s6 + $0x90] sm:$0xff]  ;;  %v391_v27 = vld [vmem:[%s1446_s6 + $0x98] sm:$0xff] }
  0x49   : > { %v546_v36 = vadd.f32 %v1474_v22, %v460_v28  ;;  %v547_v37 = vadd.f32 %v1476_v23, %v461_v29  ;;  %v550_v38 = vadd.f32 %v1474_v22, %v464_v30  ;;  %v551_v39 = vadd.f32 %v1476_v23, %v465_v31 }
  0x4a   : > { %v608_v42 = vmax.f32 %v544_v32, 0.0  ;;  %v609_v43 = vmax.f32 %v545_v33, 0.0  ;;  %v612_v44 = vmax.f32 %v548_v34, 0.0  ;;  %v613_v45 = vmax.f32 %v549_v35, 0.0  ;;  %v392_v32 = vld [vmem:[%s1446_s6 + $0xa0] sm:$0xff]  ;;  %v393_v33 = vld [vmem:[%s1446_s6 + $0xa8] sm:$0xff] }
  0x4b   : > { %v610_v48 = vmax.f32 %v546_v36, 0.0  ;;  %v611_v49 = vmax.f32 %v547_v37, 0.0  ;;  %v614_v50 = vmax.f32 %v550_v38, 0.0  ;;  %v615_v51 = vmax.f32 %v551_v39, 0.0  ;;  %v394_v38 = vld [vmem:[%s1446_s6 + $0xb0] sm:$0xff] }
  0x4c   : > { %v1127_v54 = vpack.c.bf16 %v609_v43, %v608_v42  ;;  %v1129_v55 = vpack.c.bf16 %v613_v45, %v612_v44  ;;  %v466_v56 = vmul.f32 %v1459_v13, %v380_v40  ;;  %v467_v57 = vmul.f32 %v1461_v14, %v381_v41  ;;  %v395_v43 = vld [vmem:[%s1446_s6 + $0xb8] sm:$0xff] }
  0x4d   : > { %v1128_v60 = vpack.c.bf16 %v611_v49, %v610_v48  ;;  %v1130_v61 = vpack.c.bf16 %v615_v51, %v614_v50  ;;  %v468_v62 = vmul.f32 %v1470_v20, %v382_v46  ;;  %v469_v63 = vmul.f32 %v1472_v21, %v383_v47  ;;  %v396_v48 = vld [vmem:[%s1446_s6 + $0xc0] sm:$0xff] }
  0x4e   : > { %864 = vst [vmem:[%s1511_s12] sm:$0xff] %v1127_v54  ;;  %866 = vst [vmem:[%s1511_s12 + $0x10] sm:$0xff] %v1129_v55  ;;  %v552_v0 = vadd.f32 %v1463_v15, %v466_v56  ;;  %v553_v1 = vadd.f32 %v1465_v16, %v467_v57  ;;  %v470_v2 = vmul.f32 %v1459_v13, %v384_v52  ;;  %v397_v57 = vld [vmem:[%s1446_s6 + $0xc8] sm:$0xff] }
  0x4f   : > { %v471_v3 = vmul.f32 %v1461_v14, %v385_v53  ;;  %865 = vst [vmem:[%s1511_s12 + $0x8] sm:$0xff] %v1128_v60  ;;  %867 = vst [vmem:[%s1511_s12 + $0x18] sm:$0xff] %v1130_v61  ;;  %v554_v4 = vadd.f32 %v1474_v22, %v468_v62  ;;  %v555_v5 = vadd.f32 %v1476_v23, %v469_v63  ;;  %v398_v62 = vld [vmem:[%s1446_s6 + $0xd0] sm:$0xff]  ;;  %v399_v63 = vld [vmem:[%s1446_s6 + $0xd8] sm:$0xff] }
  0x50   : > { %v472_v6 = vmul.f32 %v1470_v20, %v386_v58  ;;  %v473_v7 = vmul.f32 %v1472_v21, %v387_v59  ;;  %v616_v9 = vmax.f32 %v552_v0, 0.0  ;;  %v617_v10 = vmax.f32 %v553_v1, 0.0 }
  0x51   : > { %v556_v11 = vadd.f32 %v1463_v15, %v470_v2  ;;  %v557_v12 = vadd.f32 %v1465_v16, %v471_v3  ;;  %v618_v18 = vmax.f32 %v554_v4, 0.0  ;;  %v619_v19 = vmax.f32 %v555_v5, 0.0  ;;  %v400_v4 = vld [vmem:[%s1446_s6 + $0xe0] sm:$0xff]  ;;  %v401_v5 = vld [vmem:[%s1446_s6 + $0xe8] sm:$0xff] }
  0x52   : > { %v558_v24 = vadd.f32 %v1474_v22, %v472_v6  ;;  %v559_v25 = vadd.f32 %v1476_v23, %v473_v7  ;;  %v1131_v28 = vpack.c.bf16 %v617_v10, %v616_v9  ;;  %v474_v31 = vmul.f32 %v1459_v13, %v388_v8  ;;  %v402_v10 = vld [vmem:[%s1446_s6 + $0xf0] sm:$0xff] }
  0x53   : > { %v620_v29 = vmax.f32 %v556_v11, 0.0  ;;  %v621_v30 = vmax.f32 %v557_v12, 0.0  ;;  %v1132_v34 = vpack.c.bf16 %v619_v19, %v618_v18  ;;  %v475_v37 = vmul.f32 %v1461_v14, %v389_v17  ;;  %v403_v19 = vld [vmem:[%s1446_s6 + $0xf8] sm:$0xff] }
  0x54   : > { %v622_v35 = vmax.f32 %v558_v24, 0.0  ;;  %v623_v36 = vmax.f32 %v559_v25, 0.0  ;;  %868 = vst [vmem:[%s1511_s12 + $0x20] sm:$0xff] %v1131_v28  ;;  %v560_v40 = vadd.f32 %v1463_v15, %v474_v31  ;;  %v476_v41 = vmul.f32 %v1470_v20, %v390_v26  ;;  %v404_v28 = vld [vmem:[%s1446_s6 + $0x100] sm:$0xff] }
  0x55   : > { %v1133_v39 = vpack.c.bf16 %v621_v30, %v620_v29  ;;  %v477_v42 = vmul.f32 %v1472_v21, %v391_v27  ;;  %869 = vst [vmem:[%s1511_s12 + $0x28] sm:$0xff] %v1132_v34  ;;  %v561_v45 = vadd.f32 %v1465_v16, %v475_v37  ;;  %v478_v46 = vmul.f32 %v1459_v13, %v392_v32  ;;  %v405_v37 = vld [vmem:[%s1446_s6 + $0x108] sm:$0xff] }
  0x56   : > { %v1134_v44 = vpack.c.bf16 %v623_v36, %v622_v35  ;;  %v479_v47 = vmul.f32 %v1461_v14, %v393_v33  ;;  %v624_v49 = vmax.f32 %v560_v40, 0.0  ;;  %v562_v50 = vadd.f32 %v1474_v22, %v476_v41 }
  0x57   : > { %870 = vst [vmem:[%s1511_s12 + $0x30] sm:$0xff] %v1133_v39  ;;  %v563_v51 = vadd.f32 %v1476_v23, %v477_v42  ;;  %v480_v52 = vmul.f32 %v1470_v20, %v394_v38  ;;  %v625_v53 = vmax.f32 %v561_v45, 0.0  ;;  %v564_v54 = vadd.f32 %v1463_v15, %v478_v46  ;;  %v406_v42 = vld [vmem:[%s1446_s6 + $0x110] sm:$0xff] }
  0x58   : > { %871 = vst [vmem:[%s1511_s12 + $0x38] sm:$0xff] %v1134_v44  ;;  %v565_v55 = vadd.f32 %v1465_v16, %v479_v47  ;;  %v481_v56 = vmul.f32 %v1472_v21, %v395_v43  ;;  %v626_v58 = vmax.f32 %v562_v50, 0.0  ;;  %v482_v61 = vmul.f32 %v1459_v13, %v396_v48  ;;  %v407_v43 = vld [vmem:[%s1446_s6 + $0x118] sm:$0xff]  ;;  %v408_v48 = vld [vmem:[%s1446_s6 + $0x120] sm:$0xff] }
  0x59   : > { %v627_v59 = vmax.f32 %v563_v51, 0.0  ;;  %v566_v60 = vadd.f32 %v1474_v22, %v480_v52  ;;  %v1135_v0 = vpack.c.bf16 %v625_v53, %v624_v49  ;;  %v628_v1 = vmax.f32 %v564_v54, 0.0  ;;  %v409_v49 = vld [vmem:[%s1446_s6 + $0x128] sm:$0xff]  ;;  %v410_v54 = vld [vmem:[%s1446_s6 + $0x130] sm:$0xff] }
  0x5a   : > { %v629_v2 = vmax.f32 %v565_v55, 0.0  ;;  %v567_v3 = vadd.f32 %v1476_v23, %v481_v56  ;;  %v483_v8 = vmul.f32 %v1461_v14, %v397_v57  ;;  %v568_v9 = vadd.f32 %v1463_v15, %v482_v61 }
  0x5b   : > { %v1136_v6 = vpack.c.bf16 %v627_v59, %v626_v58  ;;  %v630_v7 = vmax.f32 %v566_v60, 0.0  ;;  %872 = vst [vmem:[%s1511_s12 + $0x40] sm:$0xff] %v1135_v0  ;;  %v484_v17 = vmul.f32 %v1470_v20, %v398_v62  ;;  %v485_v18 = vmul.f32 %v1472_v21, %v399_v63  ;;  %v411_v59 = vld [vmem:[%s1446_s6 + $0x138] sm:$0xff]  ;;  %v412_v0 = vld [vmem:[%s1446_s6 + $0x140] sm:$0xff] }
  0x5c   : > { %v1137_v11 = vpack.c.bf16 %v629_v2, %v628_v1  ;;  %v631_v12 = vmax.f32 %v567_v3, 0.0  ;;  %v569_v24 = vadd.f32 %v1465_v16, %v483_v8  ;;  %v632_v25 = vmax.f32 %v568_v9, 0.0  ;;  %v413_v9 = vld [vmem:[%s1446_s6 + $0x148] sm:$0xff] }
  0x5d   : > { %873 = vst [vmem:[%s1511_s12 + $0x48] sm:$0xff] %v1136_v6  ;;  %v486_v26 = vmul.f32 %v1459_v13, %v400_v4  ;;  %v487_v27 = vmul.f32 %v1461_v14, %v401_v5  ;;  %v570_v30 = vadd.f32 %v1474_v22, %v484_v17  ;;  %v571_v31 = vadd.f32 %v1476_v23, %v485_v18  ;;  %v414_v18 = vld [vmem:[%s1446_s6 + $0x150] sm:$0xff] }
  0x5e   : > { %874 = vst [vmem:[%s1511_s12 + $0x50] sm:$0xff] %v1137_v11  ;;  %v1138_v29 = vpack.c.bf16 %v631_v12, %v630_v7  ;;  %v488_v32 = vmul.f32 %v1470_v20, %v402_v10  ;;  %v633_v33 = vmax.f32 %v569_v24, 0.0  ;;  %v489_v36 = vmul.f32 %v1472_v21, %v403_v19  ;;  %v415_v19 = vld [vmem:[%s1446_s6 + $0x158] sm:$0xff] }
  0x5f   : > { %v572_v34 = vadd.f32 %v1463_v15, %v486_v26  ;;  %v573_v35 = vadd.f32 %v1465_v16, %v487_v27  ;;  %v634_v38 = vmax.f32 %v570_v30, 0.0  ;;  %v635_v39 = vmax.f32 %v571_v31, 0.0 }
  0x60   : > { %875 = vst [vmem:[%s1511_s12 + $0x58] sm:$0xff] %v1138_v29  ;;  %v574_v40 = vadd.f32 %v1474_v22, %v488_v32  ;;  %v490_v41 = vmul.f32 %v1459_v13, %v404_v28  ;;  %v1139_v44 = vpack.c.bf16 %v633_v33, %v632_v25  ;;  %v575_v47 = vadd.f32 %v1476_v23, %v489_v36  ;;  %v416_v28 = vld [vmem:[%s1446_s6 + $0x160] sm:$0xff]  ;;  %v417_v29 = vld [vmem:[%s1446_s6 + $0x168] sm:$0xff] }
  0x61   : > { %v636_v45 = vmax.f32 %v572_v34, 0.0  ;;  %v637_v46 = vmax.f32 %v573_v35, 0.0  ;;  %v1140_v50 = vpack.c.bf16 %v635_v39, %v634_v38  ;;  %v491_v52 = vmul.f32 %v1461_v14, %v405_v37  ;;  %v418_v34 = vld [vmem:[%s1446_s6 + $0x170] sm:$0xff]  ;;  %v419_v39 = vld [vmem:[%s1446_s6 + $0x178] sm:$0xff] }
  0x62   : > { %v638_v51 = vmax.f32 %v574_v40, 0.0  ;;  %v576_v53 = vadd.f32 %v1463_v15, %v490_v41  ;;  %876 = vst [vmem:[%s1511_s12 + $0x60] sm:$0xff] %v1139_v44  ;;  %v639_v56 = vmax.f32 %v575_v47, 0.0  ;;  %v492_v57 = vmul.f32 %v1470_v20, %v406_v42  ;;  %v420_v44 = vld [vmem:[%s1446_s6 + $0x180] sm:$0xff] }
  0x63   : > { %v1141_v55 = vpack.c.bf16 %v637_v46, %v636_v45  ;;  %v493_v58 = vmul.f32 %v1472_v21, %v407_v43  ;;  %877 = vst [vmem:[%s1511_s12 + $0x68] sm:$0xff] %v1140_v50  ;;  %v577_v60 = vadd.f32 %v1465_v16, %v491_v52  ;;  %v494_v62 = vmul.f32 %v1459_v13, %v408_v48 }
  0x64   : > { %v640_v61 = vmax.f32 %v576_v53, 0.0  ;;  %v495_v63 = vmul.f32 %v1461_v14, %v409_v49  ;;  %v1142_v1 = vpack.c.bf16 %v639_v56, %v638_v51  ;;  %v578_v2 = vadd.f32 %v1474_v22, %v492_v57  ;;  %v421_v53 = vld [vmem:[%s1446_s6 + $0x188] sm:$0xff] }
  0x65   : > { %878 = vst [vmem:[%s1511_s12 + $0x70] sm:$0xff] %v1141_v55  ;;  %v579_v3 = vadd.f32 %v1476_v23, %v493_v58  ;;  %v496_v4 = vmul.f32 %v1470_v20, %v410_v54  ;;  %v641_v5 = vmax.f32 %v577_v60, 0.0  ;;  %v580_v6 = vadd.f32 %v1463_v15, %v494_v62  ;;  %v422_v58 = vld [vmem:[%s1446_s6 + $0x190] sm:$0xff] }
  0x66   : > { %v581_v7 = vadd.f32 %v1465_v16, %v495_v63  ;;  %v497_v8 = vmul.f32 %v1472_v21, %v411_v59  ;;  %879 = vst [vmem:[%s1511_s12 + $0x78] sm:$0xff] %v1142_v1  ;;  %v642_v10 = vmax.f32 %v578_v2, 0.0  ;;  %v498_v17 = vmul.f32 %v1459_v13, %v412_v0  ;;  %v423_v59 = vld [vmem:[%s1446_s6 + $0x198] sm:$0xff]  ;;  %v424_v0 = vld [vmem:[%s1446_s6 + $0x1a0] sm:$0xff]  ;;  %v425_v1 = vld [vmem:[%s1446_s6 + $0x1a8] sm:$0xff] }
  0x67   : > { %v643_v11 = vmax.f32 %v579_v3, 0.0  ;;  %v582_v12 = vadd.f32 %v1474_v22, %v496_v4  ;;  %v1143_v24 = vpack.c.bf16 %v641_v5, %v640_v61  ;;  %v644_v25 = vmax.f32 %v580_v6, 0.0  ;;  %v426_v6 = vld [vmem:[%s1446_s6 + $0x1b0] sm:$0xff] }
  0x68   : > { %v645_v26 = vmax.f32 %v581_v7, 0.0  ;;  %v583_v27 = vadd.f32 %v1476_v23, %v497_v8  ;;  %v499_v32 = vmul.f32 %v1461_v14, %v413_v9  ;;  %v584_v33 = vadd.f32 %v1463_v15, %v498_v17 }
  0x69   : > { %v1144_v30 = vpack.c.bf16 %v643_v11, %v642_v10  ;;  %v646_v31 = vmax.f32 %v582_v12, 0.0  ;;  %880 = vst [vmem:[%s1511_s12 + $0x80] sm:$0xff] %v1143_v24  ;;  %v500_v37 = vmul.f32 %v1470_v20, %v414_v18  ;;  %v501_v38 = vmul.f32 %v1472_v21, %v415_v19  ;;  %v427_v11 = vld [vmem:[%s1446_s6 + $0x1b8] sm:$0xff]  ;;  %v428_v24 = vld [vmem:[%s1446_s6 + $0x1c0] sm:$0xff] }
  0x6a   : > { %v1145_v35 = vpack.c.bf16 %v645_v26, %v644_v25  ;;  %v647_v36 = vmax.f32 %v583_v27, 0.0  ;;  %v585_v40 = vadd.f32 %v1465_v16, %v499_v32  ;;  %v648_v41 = vmax.f32 %v584_v33, 0.0  ;;  %v429_v33 = vld [vmem:[%s1446_s6 + $0x1c8] sm:$0xff] }
  0x6b   : > { %881 = vst [vmem:[%s1511_s12 + $0x88] sm:$0xff] %v1144_v30  ;;  %v502_v42 = vmul.f32 %v1459_v13, %v416_v28  ;;  %v503_v43 = vmul.f32 %v1461_v14, %v417_v29  ;;  %v586_v46 = vadd.f32 %v1474_v22, %v500_v37  ;;  %v587_v47 = vadd.f32 %v1476_v23, %v501_v38  ;;  %v430_v38 = vld [vmem:[%s1446_s6 + $0x1d0] sm:$0xff] }
  0x6c   : > { %882 = vst [vmem:[%s1511_s12 + $0x90] sm:$0xff] %v1145_v35  ;;  %v1146_v45 = vpack.c.bf16 %v647_v36, %v646_v31  ;;  %v504_v48 = vmul.f32 %v1470_v20, %v418_v34  ;;  %v649_v49 = vmax.f32 %v585_v40, 0.0  ;;  %v505_v52 = vmul.f32 %v1472_v21, %v419_v39  ;;  %v431_v39 = vld [vmem:[%s1446_s6 + $0x1d8] sm:$0xff] }
  0x6d   : > { %v588_v50 = vadd.f32 %v1463_v15, %v502_v42  ;;  %v589_v51 = vadd.f32 %v1465_v16, %v503_v43  ;;  %v650_v54 = vmax.f32 %v586_v46, 0.0  ;;  %v651_v55 = vmax.f32 %v587_v47, 0.0 }
  0x6e   : > { %883 = vst [vmem:[%s1511_s12 + $0x98] sm:$0xff] %v1146_v45  ;;  %v590_v56 = vadd.f32 %v1474_v22, %v504_v48  ;;  %v506_v57 = vmul.f32 %v1459_v13, %v420_v44  ;;  %v1147_v60 = vpack.c.bf16 %v649_v49, %v648_v41  ;;  %v591_v63 = vadd.f32 %v1476_v23, %v505_v52  ;;  %v432_v44 = vld [vmem:[%s1446_s6 + $0x1e0] sm:$0xff]  ;;  %v433_v45 = vld [vmem:[%s1446_s6 + $0x1e8] sm:$0xff] }
  0x6f   : > { %v652_v61 = vmax.f32 %v588_v50, 0.0  ;;  %v653_v62 = vmax.f32 %v589_v51, 0.0  ;;  %v1148_v2 = vpack.c.bf16 %v651_v55, %v650_v54  ;;  %v507_v4 = vmul.f32 %v1461_v14, %v421_v53  ;;  %v434_v50 = vld [vmem:[%s1446_s6 + $0x1f0] sm:$0xff]  ;;  %v435_v55 = vld [vmem:[%s1446_s6 + $0x1f8] sm:$0xff] }
  0x70   : > { %v654_v3 = vmax.f32 %v590_v56, 0.0  ;;  %v592_v5 = vadd.f32 %v1463_v15, %v506_v57  ;;  %884 = vst [vmem:[%s1511_s12 + $0xa0] sm:$0xff] %v1147_v60  ;;  %v655_v8 = vmax.f32 %v591_v63, 0.0  ;;  %v508_v9 = vmul.f32 %v1470_v20, %v422_v58 }
  0x71   : > { %v1149_v7 = vpack.c.bf16 %v653_v62, %v652_v61  ;;  %v509_v10 = vmul.f32 %v1472_v21, %v423_v59  ;;  %885 = vst [vmem:[%s1511_s12 + $0xa8] sm:$0xff] %v1148_v2  ;;  %v593_v12 = vadd.f32 %v1465_v16, %v507_v4  ;;  %v510_v18 = vmul.f32 %v1459_v13, %v424_v0 }
  0x72   : > { %v656_v17 = vmax.f32 %v592_v5, 0.0  ;;  %v511_v19 = vmul.f32 %v1461_v14, %v425_v1  ;;  %v1150_v25 = vpack.c.bf16 %v655_v8, %v654_v3  ;;  %v594_v26 = vadd.f32 %v1474_v22, %v508_v9 }
  0x73   : > { %886 = vst [vmem:[%s1511_s12 + $0xb0] sm:$0xff] %v1149_v7  ;;  %v595_v27 = vadd.f32 %v1476_v23, %v509_v10  ;;  %v512_v28 = vmul.f32 %v1470_v20, %v426_v6  ;;  %v657_v29 = vmax.f32 %v593_v12, 0.0  ;;  %v596_v30 = vadd.f32 %v1463_v15, %v510_v18  ;;  %v929_v12 = vld [vmem:[%s1511_s12 + $0x20] sm:$0xff] (%p1295_p6)  ;;  %v933_v18 = vld [vmem:[%s1511_s12 + $0x30] sm:$0xff] (%p1295_p6) }
  0x74   : > { %v597_v31 = vadd.f32 %v1465_v16, %v511_v19  ;;  %v513_v32 = vmul.f32 %v1472_v21, %v427_v11  ;;  %887 = vst [vmem:[%s1511_s12 + $0xb8] sm:$0xff] %v1150_v25  ;;  %v658_v34 = vmax.f32 %v594_v26, 0.0  ;;  %v514_v37 = vmul.f32 %v1459_v13, %v428_v24  ;;  %v927_v11 = vld [vmem:[%s1511_s12 + $0x18] sm:$0xff] (%p1295_p6)  ;;  %930 = vst [vmem:[%s1710_s25 + $0x40] sm:$0xff] (%p1295_p6), %v929_v12  ;;  %v937_v24 = vld [vmem:[%s1511_s12 + $0x40] sm:$0xff] (%p1295_p6) }
  0x75   : > { %v659_v35 = vmax.f32 %v595_v27, 0.0  ;;  %v598_v36 = vadd.f32 %v1474_v22, %v512_v28  ;;  %v1151_v40 = vpack.c.bf16 %v657_v29, %v656_v17  ;;  %v660_v41 = vmax.f32 %v596_v30, 0.0  ;;  %v931_v17 = vld [vmem:[%s1511_s12 + $0x28] sm:$0xff] (%p1295_p6)  ;;  %928 = vst [vmem:[%s1710_s25 + $0x28] sm:$0xff] (%p1295_p6), %v927_v11  ;;  %v935_v19 = vld [vmem:[%s1511_s12 + $0x38] sm:$0xff] (%p1295_p6)  ;;  %934 = vst [vmem:[%s1710_s25 + $0x60] sm:$0xff] (%p1295_p6), %v933_v18 }
  0x76   : > { %v661_v42 = vmax.f32 %v597_v31, 0.0  ;;  %v599_v43 = vadd.f32 %v1476_v23, %v513_v32  ;;  %v515_v48 = vmul.f32 %v1461_v14, %v429_v33  ;;  %v600_v49 = vadd.f32 %v1463_v15, %v514_v37  ;;  %932 = vst [vmem:[%s1710_s25 + $0x48] sm:$0xff] (%p1295_p6), %v931_v17  ;;  %936 = vst [vmem:[%s1710_s25 + $0x68] sm:$0xff] (%p1295_p6), %v935_v19  ;;  %v939_v25 = vld [vmem:[%s1511_s12 + $0x48] sm:$0xff] (%p1295_p6)  ;;  %v941_v26 = vld [vmem:[%s1511_s12 + $0x50] sm:$0xff] (%p1295_p6) }
  0x77   : > { %v1152_v46 = vpack.c.bf16 %v659_v35, %v658_v34  ;;  %v662_v47 = vmax.f32 %v598_v36, 0.0  ;;  %888 = vst [vmem:[%s1511_s12 + $0xc0] sm:$0xff] %v1151_v40  ;;  %v516_v53 = vmul.f32 %v1470_v20, %v430_v38  ;;  %v517_v54 = vmul.f32 %v1472_v21, %v431_v39  ;;  %938 = vst [vmem:[%s1710_s25 + $0x80] sm:$0xff] (%p1295_p6), %v937_v24  ;;  %v943_v27 = vld [vmem:[%s1511_s12 + $0x58] sm:$0xff] (%p1295_p6)  ;;  %v945_v28 = vld [vmem:[%s1511_s12 + $0x60] sm:$0xff] (%p1295_p6) }
  0x78   : > { %v1153_v51 = vpack.c.bf16 %v661_v42, %v660_v41  ;;  %v663_v52 = vmax.f32 %v599_v43, 0.0  ;;  %v601_v56 = vadd.f32 %v1465_v16, %v515_v48  ;;  %v664_v57 = vmax.f32 %v600_v49, 0.0  ;;  %940 = vst [vmem:[%s1710_s25 + $0x88] sm:$0xff] (%p1295_p6), %v939_v25  ;;  %942 = vst [vmem:[%s1710_s25 + $0xa0] sm:$0xff] (%p1295_p6), %v941_v26  ;;  %v947_v29 = vld [vmem:[%s1511_s12 + $0x68] sm:$0xff] (%p1295_p6)  ;;  %v949_v30 = vld [vmem:[%s1511_s12 + $0x70] sm:$0xff] (%p1295_p6) }
  0x79   : > { %889 = vst [vmem:[%s1511_s12 + $0xc8] sm:$0xff] %v1152_v46  ;;  %v518_v58 = vmul.f32 %v1459_v13, %v432_v44  ;;  %v519_v59 = vmul.f32 %v1461_v14, %v433_v45  ;;  %v602_v61 = vadd.f32 %v1474_v22, %v516_v53  ;;  %v603_v62 = vadd.f32 %v1476_v23, %v517_v54  ;;  %v951_v31 = vld [vmem:[%s1511_s12 + $0x78] sm:$0xff] (%p1295_p6)  ;;  %v953_v32 = vld [vmem:[%s1511_s12 + $0x80] sm:$0xff] (%p1295_p6)  ;;  %v955_v33 = vld [vmem:[%s1511_s12 + $0x88] sm:$0xff] (%p1295_p6) }
  0x7a   : > { %890 = vst [vmem:[%s1511_s12 + $0xd0] sm:$0xff] %v1153_v51  ;;  %v1154_v60 = vpack.c.bf16 %v663_v52, %v662_v47  ;;  %v520_v63 = vmul.f32 %v1470_v20, %v434_v50  ;;  %v665_v0 = vmax.f32 %v601_v56, 0.0  ;;  %v521_v13 = vmul.f32 %v1472_v21, %v435_v55  ;;  %v921_v21 = vld [vmem:[%s1511_s12] sm:$0xff] (%p1295_p6)  ;;  %944 = vst [vmem:[%s1710_s25 + $0xa8] sm:$0xff] (%p1295_p6), %v943_v27  ;;  %v957_v34 = vld [vmem:[%s1511_s12 + $0x90] sm:$0xff] (%p1295_p6) }
  0x7b   : > { %v604_v1 = vadd.f32 %v1463_v15, %v518_v58  ;;  %v605_v2 = vadd.f32 %v1465_v16, %v519_v59  ;;  %v666_v14 = vmax.f32 %v602_v61, 0.0  ;;  %v667_v3 = vmax.f32 %v603_v62, 0.0  ;;  %922 = vst [vmem:[%s1710_s25] sm:$0xff] (%p1295_p6), %v921_v21  ;;  %946 = vst [vmem:[%s1710_s25 + $0xc0] sm:$0xff] (%p1295_p6), %v945_v28  ;;  %v959_v35 = vld [vmem:[%s1511_s12 + $0x98] sm:$0xff] (%p1295_p6)  ;;  %v961_v36 = vld [vmem:[%s1511_s12 + $0xa0] sm:$0xff] (%p1295_p6) }
  0x7c   : > { %891 = vst [vmem:[%s1511_s12 + $0xd8] sm:$0xff] %v1154_v60  ;;  %v606_v4 = vadd.f32 %v1474_v22, %v520_v63  ;;  %v1155_v5 = vpack.c.bf16 %v665_v0, %v664_v57  ;;  %v607_v20 = vadd.f32 %v1476_v23, %v521_v13  ;;  %902 = sbr.rel (!%p1295_p6) target bundleno = 139 (0x8b), region = 59  ;;  %v923_v22 = vld [vmem:[%s1511_s12 + $0x8] sm:$0xff] (%p1295_p6)  ;;  %v925_v23 = vld [vmem:[%s1511_s12 + $0x10] sm:$0xff] (%p1295_p6)  ;;  %948 = vst [vmem:[%s1710_s25 + $0xc8] sm:$0xff] (%p1295_p6), %v947_v29 }
  0x7d   : > { %v668_v6 = vmax.f32 %v604_v1, 0.0  ;;  %v669_v7 = vmax.f32 %v605_v2, 0.0  ;;  %v1156_v8 = vpack.c.bf16 %v667_v3, %v666_v14  ;;  %924 = vst [vmem:[%s1710_s25 + $0x8] sm:$0xff] (%p1295_p6), %v923_v22  ;;  %926 = vst [vmem:[%s1710_s25 + $0x20] sm:$0xff] (%p1295_p6), %v925_v23  ;;  %v963_v37 = vld [vmem:[%s1511_s12 + $0xa8] sm:$0xff] (%p1295_p6)  ;;  %v965_v38 = vld [vmem:[%s1511_s12 + $0xb0] sm:$0xff] (%p1295_p6) }
  0x7e   : > { %v670_v9 = vmax.f32 %v606_v4, 0.0  ;;  %892 = vst [vmem:[%s1511_s12 + $0xe0] sm:$0xff] %v1155_v5  ;;  %v671_v10 = vmax.f32 %v607_v20, 0.0  ;;  %950 = vst [vmem:[%s1710_s25 + $0xe0] sm:$0xff] (%p1295_p6), %v949_v30  ;;  %v967_v39 = vld [vmem:[%s1511_s12 + $0xb8] sm:$0xff] (%p1295_p6)  ;;  %v969_v40 = vld [vmem:[%s1511_s12 + $0xc0] sm:$0xff] (%p1295_p6) }
  0x7f   : > { %v1157_v15 = vpack.c.bf16 %v669_v7, %v668_v6  ;;  %893 = vst [vmem:[%s1511_s12 + $0xe8] sm:$0xff] %v1156_v8  ;;  %952 = vst [vmem:[%s1710_s25 + $0xe8] sm:$0xff] (%p1295_p6), %v951_v31 }
  0x80   : > { %v1158_v16 = vpack.c.bf16 %v671_v10, %v670_v9  ;;  %954 = vst [vmem:[%s1710_s25 + $0x100] sm:$0xff] (%p1295_p6), %v953_v32  ;;  %956 = vst [vmem:[%s1710_s25 + $0x108] sm:$0xff] (%p1295_p6), %v955_v33  ;;  %v971_v41 = vld [vmem:[%s1511_s12 + $0xc8] sm:$0xff] (%p1295_p6) }
  0x81   : > { %894 = vst [vmem:[%s1511_s12 + $0xf0] sm:$0xff] %v1157_v15  ;;  %958 = vst [vmem:[%s1710_s25 + $0x120] sm:$0xff] (%p1295_p6), %v957_v34  ;;  %v973_v42 = vld [vmem:[%s1511_s12 + $0xd0] sm:$0xff] (%p1295_p6) }
  0x82   : > { %895 = vst [vmem:[%s1511_s12 + $0xf8] sm:$0xff] %v1158_v16  ;;  %960 = vst [vmem:[%s1710_s25 + $0x128] sm:$0xff] (%p1295_p6), %v959_v35 }
  0x83   : > { %962 = vst [vmem:[%s1710_s25 + $0x140] sm:$0xff] %v961_v36  ;;  %964 = vst [vmem:[%s1710_s25 + $0x148] sm:$0xff] %v963_v37  ;;  %v975_v43 = vld [vmem:[%s1511_s12 + $0xd8] sm:$0xff] }
  0x84   : > { %966 = vst [vmem:[%s1710_s25 + $0x160] sm:$0xff] %v965_v38  ;;  %968 = vst [vmem:[%s1710_s25 + $0x168] sm:$0xff] %v967_v39 }
  0x85   : > { %970 = vst [vmem:[%s1710_s25 + $0x180] sm:$0xff] %v969_v40  ;;  %972 = vst [vmem:[%s1710_s25 + $0x188] sm:$0xff] %v971_v41  ;;  %v977_v44 = vld [vmem:[%s1511_s12 + $0xe0] sm:$0xff] }
  0x86   : > { %974 = vst [vmem:[%s1710_s25 + $0x1a0] sm:$0xff] %v973_v42  ;;  %v979_v45 = vld [vmem:[%s1511_s12 + $0xe8] sm:$0xff]  ;;  %976 = vst [vmem:[%s1710_s25 + $0x1a8] sm:$0xff] %v975_v43 }
  0x87   : > { %978 = vst [vmem:[%s1710_s25 + $0x1c0] sm:$0xff] %v977_v44  ;;  %980 = vst [vmem:[%s1710_s25 + $0x1c8] sm:$0xff] %v979_v45 }
  0x88   : > { %v981_v46 = vld [vmem:[%s1511_s12 + $0xf0] sm:$0xff] }
  0x89   : > { %v983_v47 = vld [vmem:[%s1511_s12 + $0xf8] sm:$0xff]  ;;  %982 = vst [vmem:[%s1710_s25 + $0x1e0] sm:$0xff] %v981_v46 }
  0x8a   : > { %984 = vst [vmem:[%s1710_s25 + $0x1e8] sm:$0xff] %v983_v47 }
  0x8b PF: > { %s13_s16 = sadd.s32 1, %s1238_s16   ;;  %s1793_s12 = smov %s1226_s13 }
  0x8c   : > { %p10_p12 = scmp.ge.s32.totalorder %s13_s16, 4   ;;  %s1794_s13 = smov %s1300_s22 }
  0x8d   : > { %s1795_s14 = smov %s1234_s15  ;;  %s1796_s15 = smov %s1798_s17 }
  0x8e   :  { %12 = sbr.rel (!%p10_p12) target bundleno = 3 (0x3), region = 119 }

// kernel: unet_decoder_forward.13
= control target key start
LH: loop header
LB: loop body
LE: loop exit
PB: predicated region body
PF: predicated region fallthrough
CT: control target
= control target key end

     0   :  { %s2757_s15 = smov 0   ;;  %s2759_s16 = smov 0   ;;  %s3930_s0 = inlined_call_operand.vmem [shape: bf16[512,256], index: 0, kind: input, shape index: {}]   ;;  %s3931_s1 = inlined_call_operand.vmem [shape: bf16[256,512], index: 1, kind: input, shape index: {}]   ;;  %s3932_s2 = inlined_call_operand.vmem [shape: f32[512,512], index: 2, kind: output, shape index: {0}]   ;;  %s3933_s3 = inlined_call_operand.vmem [shape: f32[1,512], index: 3, kind: output, shape index: {1}]   ;;  %s3934_s4 = inlined_call_operand.vmem [shape: f32[1,512], index: 4, kind: output, shape index: {2}]  }
   0x1   :  { %s2761_s17 = smov 0   ;;  %s2763_s18 = smov 0  }
   0x2   :  { %s2765_s19 = smov 0  }
   0x3 LB: > { %s27_s20 = sadd.s32 1, %s2724_s18  ;;  %s2356_s21 = sadd.s32 4294967295, %s2728_s19   ;;  %s2728_s19 = sphi %s2765_s19, %s15_s19   ;;  %s2724_s18 = sphi %s2763_s18, %s4019_s18   ;;  %s2720_s17 = sphi %s2761_s17, %s4018_s17   ;;  %s2716_s16 = sphi %s2759_s16, %s4017_s16   ;;  %s2712_s15 = sphi %s2757_s15, %s4016_s15  }
   0x4   : > { %p29_p0 = scmp.ge.s32.totalorder %s27_s20, 2  ;;  %p67_p1 = scmp.ne.s32.totalorder %s2716_s16, %s2712_s15 }
   0x5   : > { %p68_p2 = scmp.eq.s32.totalorder %s2728_s19, 0  ;;  %p99_p4 = scmp.eq.s32.totalorder %s2356_s21, 1 }
   0x6   : > { %s4021_s20 = smov (%p29_p0, %s27_s20), 0  ;;  %s60_s23 = sadd.s32 1, %s2716_s16 }
   0x7   : > { %p69_p3 = por %p68_p2, %p67_p1  ;;  %s57_s22 = ssub.s32 %s2724_s18, %s4021_s20 }
   0x8   : > { %p58_p5 = scmp.eq.s32.totalorder %s57_s22, 0  ;;  %p2792_p6 = por %p99_p4, %p67_p1 }
   0x9   : > { %p2360_p7 = scmp.ge.s32.totalorder %s2728_s19, 2 }
   0xa   : > { %s2797_s25 = scalar_select %p58_p5, %s2716_s16, %s60_s23  }
   0xb   : > { %183 = sbr.rel (%p2360_p7) target bundleno = 38 (0x26), region = 20 }
  0x12   : > { %186 = sbr.rel (!%p69_p3) target bundleno = 38 (0x26), region = 24  ;;  %s188_s26 = sand.u32 (%p69_p3), 1, %s2716_s16  }
  0x13   : > { %s2470_s27 = sshll.u32 (%p69_p3), %s2724_s18, 3  ;;  %s2361_s28 = sshll.u32 (%p69_p3), %s188_s26, 8 }
  0x14   : > { %s2805_s5 = scalar_lea.vmem (%p69_p3), %s3931_s1, %s2470_s27  ;;  %s2810_s6 = scalar_lea.vmem (%p69_p3), [#allocation2], %s2361_s28 }
  0x15   : > { %v283_v0 = vld [vmem:[%s2805_s5] sm:$0xff] (%p69_p3)  ;;  %v285_v1 = vld [vmem:[%s2805_s5 + $0x10] sm:$0xff] (%p69_p3) }
  0x16   : > { %v287_v2 = vld [vmem:[%s2805_s5 + $0x20] sm:$0xff] (%p69_p3)  ;;  %284 = vst [vmem:[%s2810_s6] sm:$0xff] (%p69_p3), %v283_v0  ;;  %286 = vst [vmem:[%s2810_s6 + $0x8] sm:$0xff] (%p69_p3), %v285_v1  ;;  %v289_v3 = vld [vmem:[%s2805_s5 + $0x30] sm:$0xff] (%p69_p3) }
  0x17   : > { %288 = vst [vmem:[%s2810_s6 + $0x10] sm:$0xff] (%p69_p3), %v287_v2  ;;  %v291_v4 = vld [vmem:[%s2805_s5 + $0x40] sm:$0xff] (%p69_p3)  ;;  %v293_v5 = vld [vmem:[%s2805_s5 + $0x50] sm:$0xff] (%p69_p3)  ;;  %290 = vst [vmem:[%s2810_s6 + $0x18] sm:$0xff] (%p69_p3), %v289_v3 }
  0x18   : > { %292 = vst [vmem:[%s2810_s6 + $0x20] sm:$0xff] (%p69_p3), %v291_v4  ;;  %294 = vst [vmem:[%s2810_s6 + $0x28] sm:$0xff] (%p69_p3), %v293_v5  ;;  %v295_v6 = vld [vmem:[%s2805_s5 + $0x60] sm:$0xff] (%p69_p3)  ;;  %v297_v7 = vld [vmem:[%s2805_s5 + $0x70] sm:$0xff] (%p69_p3) }
  0x19   : > { %v299_v8 = vld [vmem:[%s2805_s5 + $0x80] sm:$0xff]  ;;  %296 = vst [vmem:[%s2810_s6 + $0x30] sm:$0xff] %v295_v6  ;;  %298 = vst [vmem:[%s2810_s6 + $0x38] sm:$0xff] %v297_v7  ;;  %v301_v9 = vld [vmem:[%s2805_s5 + $0x90] sm:$0xff] }
  0x1a   : > { %300 = vst [vmem:[%s2810_s6 + $0x40] sm:$0xff] %v299_v8  ;;  %v303_v10 = vld [vmem:[%s2805_s5 + $0xa0] sm:$0xff]  ;;  %v305_v11 = vld [vmem:[%s2805_s5 + $0xb0] sm:$0xff]  ;;  %302 = vst [vmem:[%s2810_s6 + $0x48] sm:$0xff] %v301_v9 }
  0x1b   : > { %304 = vst [vmem:[%s2810_s6 + $0x50] sm:$0xff] %v303_v10  ;;  %306 = vst [vmem:[%s2810_s6 + $0x58] sm:$0xff] %v305_v11  ;;  %v307_v12 = vld [vmem:[%s2805_s5 + $0xc0] sm:$0xff]  ;;  %v309_v13 = vld [vmem:[%s2805_s5 + $0xd0] sm:$0xff] }
  0x1c   : > { %v311_v14 = vld [vmem:[%s2805_s5 + $0xe0] sm:$0xff]  ;;  %308 = vst [vmem:[%s2810_s6 + $0x60] sm:$0xff] %v307_v12  ;;  %310 = vst [vmem:[%s2810_s6 + $0x68] sm:$0xff] %v309_v13  ;;  %v313_v15 = vld [vmem:[%s2805_s5 + $0xf0] sm:$0xff] }
  0x1d   : > { %312 = vst [vmem:[%s2810_s6 + $0x70] sm:$0xff] %v311_v14  ;;  %v315_v16 = vld [vmem:[%s2805_s5 + $0x100] sm:$0xff]  ;;  %v317_v17 = vld [vmem:[%s2805_s5 + $0x110] sm:$0xff]  ;;  %314 = vst [vmem:[%s2810_s6 + $0x78] sm:$0xff] %v313_v15 }
  0x1e   : > { %316 = vst [vmem:[%s2810_s6 + $0x80] sm:$0xff] %v315_v16  ;;  %318 = vst [vmem:[%s2810_s6 + $0x88] sm:$0xff] %v317_v17  ;;  %v319_v18 = vld [vmem:[%s2805_s5 + $0x120] sm:$0xff]  ;;  %v321_v19 = vld [vmem:[%s2805_s5 + $0x130] sm:$0xff] }
  0x1f   : > { %v323_v20 = vld [vmem:[%s2805_s5 + $0x140] sm:$0xff]  ;;  %320 = vst [vmem:[%s2810_s6 + $0x90] sm:$0xff] %v319_v18  ;;  %322 = vst [vmem:[%s2810_s6 + $0x98] sm:$0xff] %v321_v19  ;;  %v325_v21 = vld [vmem:[%s2805_s5 + $0x150] sm:$0xff] }
  0x20   : > { %324 = vst [vmem:[%s2810_s6 + $0xa0] sm:$0xff] %v323_v20  ;;  %v327_v22 = vld [vmem:[%s2805_s5 + $0x160] sm:$0xff]  ;;  %v329_v23 = vld [vmem:[%s2805_s5 + $0x170] sm:$0xff]  ;;  %326 = vst [vmem:[%s2810_s6 + $0xa8] sm:$0xff] %v325_v21 }
  0x21   : > { %328 = vst [vmem:[%s2810_s6 + $0xb0] sm:$0xff] %v327_v22  ;;  %330 = vst [vmem:[%s2810_s6 + $0xb8] sm:$0xff] %v329_v23  ;;  %v331_v24 = vld [vmem:[%s2805_s5 + $0x180] sm:$0xff]  ;;  %v333_v25 = vld [vmem:[%s2805_s5 + $0x190] sm:$0xff] }
  0x22   : > { %v335_v26 = vld [vmem:[%s2805_s5 + $0x1a0] sm:$0xff]  ;;  %332 = vst [vmem:[%s2810_s6 + $0xc0] sm:$0xff] %v331_v24  ;;  %334 = vst [vmem:[%s2810_s6 + $0xc8] sm:$0xff] %v333_v25  ;;  %v337_v27 = vld [vmem:[%s2805_s5 + $0x1b0] sm:$0xff] }
  0x23   : > { %336 = vst [vmem:[%s2810_s6 + $0xd0] sm:$0xff] %v335_v26  ;;  %v339_v28 = vld [vmem:[%s2805_s5 + $0x1c0] sm:$0xff]  ;;  %v341_v29 = vld [vmem:[%s2805_s5 + $0x1d0] sm:$0xff]  ;;  %338 = vst [vmem:[%s2810_s6 + $0xd8] sm:$0xff] %v337_v27 }
  0x24   : > { %340 = vst [vmem:[%s2810_s6 + $0xe0] sm:$0xff] %v339_v28  ;;  %342 = vst [vmem:[%s2810_s6 + $0xe8] sm:$0xff] %v341_v29  ;;  %v343_v30 = vld [vmem:[%s2805_s5 + $0x1e0] sm:$0xff]  ;;  %v345_v31 = vld [vmem:[%s2805_s5 + $0x1f0] sm:$0xff] }
  0x25   : > { %344 = vst [vmem:[%s2810_s6 + $0xf0] sm:$0xff] %v343_v30  ;;  %346 = vst [vmem:[%s2810_s6 + $0xf8] sm:$0xff] %v345_v31 }
  0x26 PF: > { %p2364_p8 = scmp.ge.s32.totalorder %s2728_s19, 1  ;;  %p351_p9 = scmp.lt.s32.totalorder %s2728_s19, 3 }
  0x28   : > { %p352_p10 = pnand %p2364_p8, %p351_p9 }
  0x2a   : > { %355 = sbr.rel (%p352_p10) target bundleno = 576 (0x240), region = 62 }
  0x31   : > { %s358_s7 = sand.u32 1, %s2712_s15   ;;  %v2596_v32 = vld [vmem:[%s3930_s0 + $0x4] ss:$8 sps:$4 sm:$0xff]   ;;  %v2594_v2 = vld [vmem:[%s3930_s0] ss:$8 sps:$4 sm:$0xff]   ;;  %s2367_s15 = sshll.u32 %s2720_s17, 1 }
  0x32   : > { %s2365_s8 = sshll.u32 %s358_s7, 8  ;;  %1024 = vmatprep.mubr.bf16.mxu0 %v2596_v32  ;;  %v2620_v50 = vld [vmem:[%s3930_s0 + $0x104] ss:$8 sps:$4 sm:$0xff]   ;;  %v2618_v3 = vld [vmem:[%s3930_s0 + $0x100] ss:$8 sps:$4 sm:$0xff]   ;;  %s2366_s27 = sshll.u32 %s358_s7, 10 }
  0x33   : > { %s2881_s11 = scalar_lea.vmem [#allocation2], %s2365_s8  ;;  %1184 = vmatprep.mubr.bf16.mxu1 %v2620_v50  ;;  %v2597_v4 = vld [vmem:[%s3930_s0 + $0x14] ss:$8 sps:$4 sm:$0xff]   ;;  %v2599_v6 = vld [vmem:[%s3930_s0 + $0x10] ss:$8 sps:$4 sm:$0xff]   ;;  %s3108_s28 = scalar_lea.vmem [#allocation3], %s2366_s27 }
  0x34   : > { %v2546_v33 = vld [vmem:[%s2881_s11 + $0x4] ss:$8 sps:$4 sm:$0xff]   ;;  %v2548_v34 = vld [vmem:[%s2881_s11] ss:$8 sps:$4 sm:$0xff]   ;;  %v2549_v35 = vld [vmem:[%s2881_s11 + $0x14] ss:$8 sps:$4 sm:$0xff]  }
  0x35   : > { %992 = vmatprep.subr.bf16.mxu0 %v2546_v33  ;;  %2472 = vmatprep.subr.bf16.mxu1 %v2546_v33  ;;  %v2551_v36 = vld [vmem:[%s2881_s11 + $0x10] ss:$8 sps:$4 sm:$0xff]   ;;  %v2552_v37 = vld [vmem:[%s2881_s11 + $0x24] ss:$8 sps:$4 sm:$0xff]   ;;  %v2554_v38 = vld [vmem:[%s2881_s11 + $0x20] ss:$8 sps:$4 sm:$0xff]  }
  0x36   : > { %993 = vmatpush1.bf16.msra.mxu0 %v2548_v34  ;;  %2488 = vmatpush1.bf16.msra.mxu1 %v2548_v34  ;;  %v2555_v39 = vld [vmem:[%s2881_s11 + $0x34] ss:$8 sps:$4 sm:$0xff]   ;;  %v2557_v40 = vld [vmem:[%s2881_s11 + $0x30] ss:$8 sps:$4 sm:$0xff]   ;;  %v2558_v41 = vld [vmem:[%s2881_s11 + $0x44] ss:$8 sps:$4 sm:$0xff]  }
  0x37   : > { %994 = vmatprep.subr.bf16.mxu0 %v2549_v35  ;;  %2473 = vmatprep.subr.bf16.mxu1 %v2549_v35  ;;  %v2560_v42 = vld [vmem:[%s2881_s11 + $0x40] ss:$8 sps:$4 sm:$0xff]   ;;  %v2561_v43 = vld [vmem:[%s2881_s11 + $0x54] ss:$8 sps:$4 sm:$0xff]   ;;  %v2563_v44 = vld [vmem:[%s2881_s11 + $0x50] ss:$8 sps:$4 sm:$0xff]  }
  0x38   : > { %v2564_v45 = vld [vmem:[%s2881_s11 + $0x64] ss:$8 sps:$4 sm:$0xff]   ;;  %v2566_v46 = vld [vmem:[%s2881_s11 + $0x60] ss:$8 sps:$4 sm:$0xff]   ;;  %v2567_v47 = vld [vmem:[%s2881_s11 + $0x74] ss:$8 sps:$4 sm:$0xff]  }
  0x39   : > { %v2569_v48 = vld [vmem:[%s2881_s11 + $0x70] ss:$8 sps:$4 sm:$0xff]   ;;  %v2570_v49 = vld [vmem:[%s2881_s11 + $0x84] ss:$8 sps:$4 sm:$0xff]   ;;  %v2572_v51 = vld [vmem:[%s2881_s11 + $0x80] ss:$8 sps:$4 sm:$0xff]  }
  0x3a   : > { %995 = vmatpush1.bf16.msra.mxu0 %v2551_v36  ;;  %2489 = vmatpush1.bf16.msra.mxu1 %v2551_v36  ;;  %v2573_v52 = vld [vmem:[%s2881_s11 + $0x94] ss:$8 sps:$4 sm:$0xff]   ;;  %v2575_v53 = vld [vmem:[%s2881_s11 + $0x90] ss:$8 sps:$4 sm:$0xff]   ;;  %v2576_v54 = vld [vmem:[%s2881_s11 + $0xa4] ss:$8 sps:$4 sm:$0xff]  }
  0x3b   : > { %996 = vmatprep.subr.bf16.mxu0 %v2552_v37  ;;  %2474 = vmatprep.subr.bf16.mxu1 %v2552_v37  ;;  %v2578_v55 = vld [vmem:[%s2881_s11 + $0xa0] ss:$8 sps:$4 sm:$0xff]   ;;  %v2579_v56 = vld [vmem:[%s2881_s11 + $0xb4] ss:$8 sps:$4 sm:$0xff]   ;;  %v2581_v57 = vld [vmem:[%s2881_s11 + $0xb0] ss:$8 sps:$4 sm:$0xff]  }
  0x3c   : > { %v2582_v58 = vld [vmem:[%s2881_s11 + $0xc4] ss:$8 sps:$4 sm:$0xff]   ;;  %v2584_v59 = vld [vmem:[%s2881_s11 + $0xc0] ss:$8 sps:$4 sm:$0xff]   ;;  %v2585_v60 = vld [vmem:[%s2881_s11 + $0xd4] ss:$8 sps:$4 sm:$0xff]  }
  0x3d   : > { %v2587_v61 = vld [vmem:[%s2881_s11 + $0xd0] ss:$8 sps:$4 sm:$0xff]   ;;  %v2588_v62 = vld [vmem:[%s2881_s11 + $0xe4] ss:$8 sps:$4 sm:$0xff]   ;;  %v2590_v63 = vld [vmem:[%s2881_s11 + $0xe0] ss:$8 sps:$4 sm:$0xff]  }
  0x3e   : > { %997 = vmatpush1.bf16.msra.mxu0 %v2554_v38  ;;  %2490 = vmatpush1.bf16.msra.mxu1 %v2554_v38  ;;  %v2591_v0 = vld [vmem:[%s2881_s11 + $0xf4] ss:$8 sps:$4 sm:$0xff]   ;;  %v2593_v1 = vld [vmem:[%s2881_s11 + $0xf0] ss:$8 sps:$4 sm:$0xff]   ;;  %v2600_v8 = vld [vmem:[%s3930_s0 + $0x24] ss:$8 sps:$4 sm:$0xff]  }
  0x3f   : > { %998 = vmatprep.subr.bf16.mxu0 %v2555_v39  ;;  %2475 = vmatprep.subr.bf16.mxu1 %v2555_v39  ;;  %v2624_v5 = vld [vmem:[%s3930_s0 + $0x114] ss:$8 sps:$4 sm:$0xff]   ;;  %v2626_v7 = vld [vmem:[%s3930_s0 + $0x110] ss:$8 sps:$4 sm:$0xff]   ;;  %v2630_v9 = vld [vmem:[%s3930_s0 + $0x124] ss:$8 sps:$4 sm:$0xff]  }
  0x40   : > { %v2602_v10 = vld [vmem:[%s3930_s0 + $0x20] ss:$8 sps:$4 sm:$0xff]   ;;  %v2603_v12 = vld [vmem:[%s3930_s0 + $0x34] ss:$8 sps:$4 sm:$0xff]   ;;  %v2605_v14 = vld [vmem:[%s3930_s0 + $0x30] ss:$8 sps:$4 sm:$0xff]  }
  0x41   : > { %v2632_v11 = vld [vmem:[%s3930_s0 + $0x120] ss:$8 sps:$4 sm:$0xff]   ;;  %v2636_v13 = vld [vmem:[%s3930_s0 + $0x134] ss:$8 sps:$4 sm:$0xff]   ;;  %v2638_v15 = vld [vmem:[%s3930_s0 + $0x130] ss:$8 sps:$4 sm:$0xff]  }
  0x42   : > { %999 = vmatpush1.bf16.msra.mxu0 %v2557_v40  ;;  %2491 = vmatpush1.bf16.msra.mxu1 %v2557_v40  ;;  %v2606_v16 = vld [vmem:[%s3930_s0 + $0x44] ss:$8 sps:$4 sm:$0xff]   ;;  %v2608_v18 = vld [vmem:[%s3930_s0 + $0x40] ss:$8 sps:$4 sm:$0xff]   ;;  %v2609_v20 = vld [vmem:[%s3930_s0 + $0x54] ss:$8 sps:$4 sm:$0xff]  }
  0x43   : > { %1000 = vmatprep.subr.bf16.mxu0 %v2558_v41  ;;  %2476 = vmatprep.subr.bf16.mxu1 %v2558_v41  ;;  %v2642_v17 = vld [vmem:[%s3930_s0 + $0x144] ss:$8 sps:$4 sm:$0xff]   ;;  %v2644_v19 = vld [vmem:[%s3930_s0 + $0x140] ss:$8 sps:$4 sm:$0xff]   ;;  %v2648_v21 = vld [vmem:[%s3930_s0 + $0x154] ss:$8 sps:$4 sm:$0xff]  }
  0x44   : > { %v2611_v22 = vld [vmem:[%s3930_s0 + $0x50] ss:$8 sps:$4 sm:$0xff]   ;;  %v2612_v24 = vld [vmem:[%s3930_s0 + $0x64] ss:$8 sps:$4 sm:$0xff]   ;;  %v2614_v26 = vld [vmem:[%s3930_s0 + $0x60] ss:$8 sps:$4 sm:$0xff]  }
  0x45   : > { %v2650_v23 = vld [vmem:[%s3930_s0 + $0x150] ss:$8 sps:$4 sm:$0xff]   ;;  %v2654_v25 = vld [vmem:[%s3930_s0 + $0x164] ss:$8 sps:$4 sm:$0xff]   ;;  %v2656_v27 = vld [vmem:[%s3930_s0 + $0x160] ss:$8 sps:$4 sm:$0xff]  }
  0x46   : > { %1001 = vmatpush1.bf16.msra.mxu0 %v2560_v42  ;;  %2492 = vmatpush1.bf16.msra.mxu1 %v2560_v42  ;;  %v2615_v28 = vld [vmem:[%s3930_s0 + $0x74] ss:$8 sps:$4 sm:$0xff]   ;;  %v2617_v30 = vld [vmem:[%s3930_s0 + $0x70] ss:$8 sps:$4 sm:$0xff]   ;;  %v2621_v32 = vld [vmem:[%s3930_s0 + $0x84] ss:$8 sps:$4 sm:$0xff]  }
  0x47   : > { %1002 = vmatprep.subr.bf16.mxu0 %v2561_v43  ;;  %2477 = vmatprep.subr.bf16.mxu1 %v2561_v43  ;;  %v2660_v29 = vld [vmem:[%s3930_s0 + $0x174] ss:$8 sps:$4 sm:$0xff]   ;;  %v2662_v31 = vld [vmem:[%s3930_s0 + $0x170] ss:$8 sps:$4 sm:$0xff]   ;;  %v2666_v33 = vld [vmem:[%s3930_s0 + $0x184] ss:$8 sps:$4 sm:$0xff]  }
  0x48   : > { %v2623_v34 = vld [vmem:[%s3930_s0 + $0x80] ss:$8 sps:$4 sm:$0xff]   ;;  %v2627_v36 = vld [vmem:[%s3930_s0 + $0x94] ss:$8 sps:$4 sm:$0xff]   ;;  %v2629_v38 = vld [vmem:[%s3930_s0 + $0x90] ss:$8 sps:$4 sm:$0xff]  }
  0x49   : > { %v2668_v35 = vld [vmem:[%s3930_s0 + $0x180] ss:$8 sps:$4 sm:$0xff]   ;;  %v2669_v37 = vld [vmem:[%s3930_s0 + $0x194] ss:$8 sps:$4 sm:$0xff]   ;;  %v2671_v39 = vld [vmem:[%s3930_s0 + $0x190] ss:$8 sps:$4 sm:$0xff]  }
  0x4a   : > { %1003 = vmatpush1.bf16.msra.mxu0 %v2563_v44  ;;  %2493 = vmatpush1.bf16.msra.mxu1 %v2563_v44  ;;  %v2633_v40 = vld [vmem:[%s3930_s0 + $0xa4] ss:$8 sps:$4 sm:$0xff]   ;;  %v2635_v42 = vld [vmem:[%s3930_s0 + $0xa0] ss:$8 sps:$4 sm:$0xff]   ;;  %v2639_v44 = vld [vmem:[%s3930_s0 + $0xb4] ss:$8 sps:$4 sm:$0xff]  }
  0x4b   : > { %1004 = vmatprep.subr.bf16.mxu0 %v2564_v45  ;;  %2478 = vmatprep.subr.bf16.mxu1 %v2564_v45  ;;  %v2672_v41 = vld [vmem:[%s3930_s0 + $0x1a4] ss:$8 sps:$4 sm:$0xff]   ;;  %v2674_v43 = vld [vmem:[%s3930_s0 + $0x1a0] ss:$8 sps:$4 sm:$0xff]   ;;  %v2675_v45 = vld [vmem:[%s3930_s0 + $0x1b4] ss:$8 sps:$4 sm:$0xff]  }
  0x4c   : > { %v2647_v50 = vld [vmem:[%s3930_s0 + $0xc0] ss:$8 sps:$4 sm:$0xff]   ;;  %p407_p11 = scmp.lt.s32.totalorder %s2367_s15, 3  ;;  %s2471_s9 = sshll.u32 (%p2792_p6), %s2720_s17, 4 }
  0x4d   : > { %s3660_s12 = scalar_lea.vmem (%p2792_p6), %s3932_s2, %s2471_s9 }
  0x4e   : > { %1005 = vmatpush1.bf16.msra.mxu0 %v2566_v46  ;;  %2494 = vmatpush1.bf16.msra.mxu1 %v2566_v46  ;;  %v2641_v46 = vld [vmem:[%s3930_s0 + $0xb0] ss:$8 sps:$4 sm:$0xff]   ;;  %s4023_s15 = smov (!%p407_p11, %s2367_s15), 3 }
  0x4f   : > { %1006 = vmatprep.subr.bf16.mxu0 %v2567_v47  ;;  %2479 = vmatprep.subr.bf16.mxu1 %v2567_v47  ;;  %v2677_v47 = vld [vmem:[%s3930_s0 + $0x1b0] ss:$8 sps:$4 sm:$0xff]   ;;  %s3292_s30 = scalar_lea.vmem %s3933_s3, %s4023_s15  ;;  %s3312_s8 = scalar_lea.vmem %s3934_s4, %s4023_s15 }
  0x52   : > { %1007 = vmatpush1.bf16.msra.mxu0 %v2569_v48  ;;  %2495 = vmatpush1.bf16.msra.mxu1 %v2569_v48  ;;  %v2645_v48 = vld [vmem:[%s3930_s0 + $0xc4] ss:$8 sps:$4 sm:$0xff]  }
  0x53   : > { %1008 = vmatprep.subr.bf16.mxu0 %v2570_v49  ;;  %2480 = vmatprep.subr.bf16.mxu1 %v2570_v49  ;;  %v2678_v49 = vld [vmem:[%s3930_s0 + $0x1c4] ss:$8 sps:$4 sm:$0xff]  }
  0x56   : > { %1009 = vmatpush1.bf16.msra.mxu0 %v2572_v51  ;;  %2496 = vmatpush1.bf16.msra.mxu1 %v2572_v51  ;;  %v2680_v51 = vld [vmem:[%s3930_s0 + $0x1c0] ss:$8 sps:$4 sm:$0xff]  }
  0x57   : > { %1010 = vmatprep.subr.bf16.mxu0 %v2573_v52  ;;  %2481 = vmatprep.subr.bf16.mxu1 %v2573_v52  ;;  %v2651_v52 = vld [vmem:[%s3930_s0 + $0xd4] ss:$8 sps:$4 sm:$0xff]  }
  0x5a   : > { %1011 = vmatpush1.bf16.msra.mxu0 %v2575_v53  ;;  %2497 = vmatpush1.bf16.msra.mxu1 %v2575_v53  ;;  %v2681_v53 = vld [vmem:[%s3930_s0 + $0x1d4] ss:$8 sps:$4 sm:$0xff]  }
  0x5b   : > { %1012 = vmatprep.subr.bf16.mxu0 %v2576_v54  ;;  %2482 = vmatprep.subr.bf16.mxu1 %v2576_v54  ;;  %v2653_v54 = vld [vmem:[%s3930_s0 + $0xd0] ss:$8 sps:$4 sm:$0xff]  }
  0x5e   : > { %1013 = vmatpush1.bf16.msra.mxu0 %v2578_v55  ;;  %2498 = vmatpush1.bf16.msra.mxu1 %v2578_v55  ;;  %v2683_v55 = vld [vmem:[%s3930_s0 + $0x1d0] ss:$8 sps:$4 sm:$0xff]  }
  0x5f   : > { %1014 = vmatprep.subr.bf16.mxu0 %v2579_v56  ;;  %2483 = vmatprep.subr.bf16.mxu1 %v2579_v56  ;;  %v2657_v56 = vld [vmem:[%s3930_s0 + $0xe4] ss:$8 sps:$4 sm:$0xff]  }
  0x62   : > { %1015 = vmatpush1.bf16.msra.mxu0 %v2581_v57  ;;  %2499 = vmatpush1.bf16.msra.mxu1 %v2581_v57  ;;  %v2684_v57 = vld [vmem:[%s3930_s0 + $0x1e4] ss:$8 sps:$4 sm:$0xff]  }
  0x63   : > { %1016 = vmatprep.subr.bf16.mxu0 %v2582_v58  ;;  %2484 = vmatprep.subr.bf16.mxu1 %v2582_v58  ;;  %v2659_v58 = vld [vmem:[%s3930_s0 + $0xe0] ss:$8 sps:$4 sm:$0xff]  }
  0x66   : > { %1017 = vmatpush1.bf16.msra.mxu0 %v2584_v59  ;;  %2500 = vmatpush1.bf16.msra.mxu1 %v2584_v59  ;;  %v2686_v59 = vld [vmem:[%s3930_s0 + $0x1e0] ss:$8 sps:$4 sm:$0xff]  }
  0x67   : > { %1018 = vmatprep.subr.bf16.mxu0 %v2585_v60  ;;  %2485 = vmatprep.subr.bf16.mxu1 %v2585_v60  ;;  %v2663_v60 = vld [vmem:[%s3930_s0 + $0xf4] ss:$8 sps:$4 sm:$0xff]  }
  0x6a   : > { %1019 = vmatpush1.bf16.msra.mxu0 %v2587_v61  ;;  %2501 = vmatpush1.bf16.msra.mxu1 %v2587_v61  ;;  %v2687_v61 = vld [vmem:[%s3930_s0 + $0x1f4] ss:$8 sps:$4 sm:$0xff]  }
  0x6b   : > { %1020 = vmatprep.subr.bf16.mxu0 %v2588_v62  ;;  %2486 = vmatprep.subr.bf16.mxu1 %v2588_v62  ;;  %v2665_v62 = vld [vmem:[%s3930_s0 + $0xf0] ss:$8 sps:$4 sm:$0xff]  }
  0x6e   : > { %1021 = vmatpush1.bf16.msra.mxu0 %v2590_v63  ;;  %2502 = vmatpush1.bf16.msra.mxu1 %v2590_v63  ;;  %v2689_v63 = vld [vmem:[%s3930_s0 + $0x1f0] ss:$8 sps:$4 sm:$0xff]  }
  0x6f   : > { %1022 = vmatprep.subr.bf16.mxu0 %v2591_v0  ;;  %2487 = vmatprep.subr.bf16.mxu1 %v2591_v0 }
  0x72   : > { %1023 = vmatpush1.bf16.msra.mxu0 %v2593_v1  ;;  %2503 = vmatpush1.bf16.msra.mxu1 %v2593_v1 }
  0x75   : > { %1025 = vmatmul.mubr.bf16.vlgmr.msra.gmra.mrb[0].mxu0 %v2594_v2  ;;  %1185 = vmatmul.mubr.bf16.vlgmr.msra.gmra.mrb[0].mxu1 %v2618_v3 }
  0x76   : > { %1034 = vmatprep.mubr.bf16.mxu0 %v2597_v4  ;;  %1194 = vmatprep.mubr.bf16.mxu1 %v2624_v5 }
  0x7d   : > { %1035 = vmatmul.mubr.bf16.gmra.mrb[4].mxu0 %v2599_v6  ;;  %1195 = vmatmul.mubr.bf16.gmra.mrb[4].mxu1 %v2626_v7 }
  0x7e   : > { %1044 = vmatprep.mubr.bf16.mxu0 %v2600_v8  ;;  %1204 = vmatprep.mubr.bf16.mxu1 %v2630_v9 }
  0x85   : > { %1045 = vmatmul.mubr.bf16.gmra.mrb[8].mxu0 %v2602_v10  ;;  %1205 = vmatmul.mubr.bf16.gmra.mrb[8].mxu1 %v2632_v11 }
  0x86   : > { %1054 = vmatprep.mubr.bf16.mxu0 %v2603_v12  ;;  %1214 = vmatprep.mubr.bf16.mxu1 %v2636_v13 }
  0x8d   : > { %1055 = vmatmul.mubr.bf16.gmra.mrb[12].mxu0 %v2605_v14  ;;  %1215 = vmatmul.mubr.bf16.gmra.mrb[12].mxu1 %v2638_v15 }
  0x8e   : > { %1064 = vmatprep.mubr.bf16.mxu0 %v2606_v16  ;;  %1224 = vmatprep.mubr.bf16.mxu1 %v2642_v17 }
  0x95   : > { %1065 = vmatmul.mubr.bf16.gmra.mrb[16].mxu0 %v2608_v18  ;;  %1225 = vmatmul.mubr.bf16.gmra.mrb[16].mxu1 %v2644_v19 }
  0x96   : > { %1074 = vmatprep.mubr.bf16.mxu0 %v2609_v20  ;;  %1234 = vmatprep.mubr.bf16.mxu1 %v2648_v21 }
  0x9d   : > { %1075 = vmatmul.mubr.bf16.gmra.mrb[20].mxu0 %v2611_v22  ;;  %1235 = vmatmul.mubr.bf16.gmra.mrb[20].mxu1 %v2650_v23 }
  0x9e   : > { %1084 = vmatprep.mubr.bf16.mxu0 %v2612_v24  ;;  %1244 = vmatprep.mubr.bf16.mxu1 %v2654_v25 }
  0xa5   : > { %1085 = vmatmul.mubr.bf16.gmra.mrb[24].mxu0 %v2614_v26  ;;  %1245 = vmatmul.mubr.bf16.gmra.mrb[24].mxu1 %v2656_v27 }
  0xa6   : > { %1094 = vmatprep.mubr.bf16.mxu0 %v2615_v28  ;;  %1254 = vmatprep.mubr.bf16.mxu1 %v2660_v29 }
  0xad   : > { %1095 = vmatmul.mubr.bf16.gmra.mrb[28].mxu0 %v2617_v30  ;;  %1255 = vmatmul.mubr.bf16.gmra.mrb[28].mxu1 %v2662_v31 }
  0xae   : > { %1104 = vmatprep.mubr.bf16.mxu0 %v2621_v32  ;;  %1264 = vmatprep.mubr.bf16.mxu1 %v2666_v33 }
  0xb5   : > { %1105 = vmatmul.mubr.bf16.gmra.mrb[32].mxu0 %v2623_v34  ;;  %1265 = vmatmul.mubr.bf16.gmra.mrb[32].mxu1 %v2668_v35 }
  0xb6   : > { %1114 = vmatprep.mubr.bf16.mxu0 %v2627_v36  ;;  %1274 = vmatprep.mubr.bf16.mxu1 %v2669_v37 }
  0xbd   : > { %1115 = vmatmul.mubr.bf16.gmra.mrb[36].mxu0 %v2629_v38  ;;  %1275 = vmatmul.mubr.bf16.gmra.mrb[36].mxu1 %v2671_v39 }
  0xbe   : > { %1124 = vmatprep.mubr.bf16.mxu0 %v2633_v40  ;;  %1284 = vmatprep.mubr.bf16.mxu1 %v2672_v41 }
  0xc5   : > { %1125 = vmatmul.mubr.bf16.gmra.mrb[40].mxu0 %v2635_v42  ;;  %1285 = vmatmul.mubr.bf16.gmra.mrb[40].mxu1 %v2674_v43 }
  0xc6   : > { %1134 = vmatprep.mubr.bf16.mxu0 %v2639_v44  ;;  %1294 = vmatprep.mubr.bf16.mxu1 %v2675_v45 }
  0xcd   : > { %1135 = vmatmul.mubr.bf16.gmra.mrb[44].mxu0 %v2641_v46  ;;  %1295 = vmatmul.mubr.bf16.gmra.mrb[44].mxu1 %v2677_v47 }
  0xce   : > { %1144 = vmatprep.mubr.bf16.mxu0 %v2645_v48  ;;  %1304 = vmatprep.mubr.bf16.mxu1 %v2678_v49 }
  0xd5   : > { %1145 = vmatmul.mubr.bf16.gmra.mrb[48].mxu0 %v2647_v50  ;;  %1305 = vmatmul.mubr.bf16.gmra.mrb[48].mxu1 %v2680_v51 }
  0xd6   : > { %1154 = vmatprep.mubr.bf16.mxu0 %v2651_v52  ;;  %1314 = vmatprep.mubr.bf16.mxu1 %v2681_v53 }
  0xdd   : > { %1155 = vmatmul.mubr.bf16.gmra.mrb[52].mxu0 %v2653_v54  ;;  %1315 = vmatmul.mubr.bf16.gmra.mrb[52].mxu1 %v2683_v55 }
  0xde   : > { %1164 = vmatprep.mubr.bf16.mxu0 %v2657_v56  ;;  %1324 = vmatprep.mubr.bf16.mxu1 %v2684_v57 }
  0xe5   : > { %1165 = vmatmul.mubr.bf16.gmra.mrb[56].mxu0 %v2659_v58  ;;  %1325 = vmatmul.mubr.bf16.gmra.mrb[56].mxu1 %v2686_v59 }
  0xe6   : > { %1174 = vmatprep.mubr.bf16.mxu0 %v2663_v60  ;;  %1334 = vmatprep.mubr.bf16.mxu1 %v2687_v61 }
  0xed   : > { %1175 = vmatmul.mubr.bf16.gmra.mrb[60].mxu0 %v2665_v62  ;;  %1335 = vmatmul.mubr.bf16.gmra.mrb[60].mxu1 %v2689_v63 }
 0x148   : > { %v1026_v0 = vpop.f32.mrb[0].mxu0  ;;  %v3106_v1 = vpop.f32.mrb[0].mxu1 }
 0x149   : > { %1345 = vst [vmem:[%s3108_s28] sm:$0xff] %v1026_v0  ;;  %v1028_v2 = vpop.f32.mrb[1].mxu0  ;;  %1409 = vst [vmem:[%s3108_s28 + $0x200] sm:$0xff] %v3106_v1  ;;  %v3113_v3 = vpop.f32.mrb[1].mxu1  ;;  %v1647_v6 = vmul.f32 %v1026_v0, %v1026_v0 }
 0x14a   : > { %1346 = vst [vmem:[%s3108_s28 + $0x8] sm:$0xff] %v1028_v2  ;;  %v1030_v4 = vpop.f32.mrb[2].mxu0  ;;  %1410 = vst [vmem:[%s3108_s28 + $0x208] sm:$0xff] %v3113_v3  ;;  %v3118_v5 = vpop.f32.mrb[2].mxu1  ;;  %v1648_v11 = vmul.f32 %v1028_v2, %v1028_v2 }
 0x14b   : > { %1347 = vst [vmem:[%s3108_s28 + $0x10] sm:$0xff] %v1030_v4  ;;  %v1484_v7 = vadd.f32 %v1030_v4, %v1026_v0  ;;  %v1649_v8 = vmul.f32 %v1030_v4, %v1030_v4  ;;  %v1032_v9 = vpop.f32.mrb[3].mxu0  ;;  %1411 = vst [vmem:[%s3108_s28 + $0x210] sm:$0xff] %v3118_v5  ;;  %v3123_v10 = vpop.f32.mrb[3].mxu1 }
 0x14c   : > { %1348 = vst [vmem:[%s3108_s28 + $0x18] sm:$0xff] %v1032_v9  ;;  %v1553_v12 = vadd.f32 %v1032_v9, %v1028_v2  ;;  %v1650_v13 = vmul.f32 %v1032_v9, %v1032_v9  ;;  %1412 = vst [vmem:[%s3108_s28 + $0x218] sm:$0xff] %v3123_v10 }
 0x14d   : > { %v1775_v14 = vadd.f32 %v1649_v8, %v1647_v6 }
 0x14e   : > { %v1844_v15 = vadd.f32 %v1650_v13, %v1648_v11 }
 0x150   : > { %v1036_v16 = vpop.f32.mrb[4].mxu0  ;;  %v3128_v17 = vpop.f32.mrb[4].mxu1 }
 0x151   : > { %1349 = vst [vmem:[%s3108_s28 + $0x20] sm:$0xff] %v1036_v16  ;;  %v1485_v18 = vadd.f32 %v1484_v7, %v1036_v16  ;;  %v1651_v19 = vmul.f32 %v1036_v16, %v1036_v16  ;;  %v1038_v20 = vpop.f32.mrb[5].mxu0  ;;  %1413 = vst [vmem:[%s3108_s28 + $0x220] sm:$0xff] %v3128_v17  ;;  %v3133_v21 = vpop.f32.mrb[5].mxu1 }
 0x152   : > { %1350 = vst [vmem:[%s3108_s28 + $0x28] sm:$0xff] %v1038_v20  ;;  %v1554_v22 = vadd.f32 %v1553_v12, %v1038_v20  ;;  %v1652_v23 = vmul.f32 %v1038_v20, %v1038_v20  ;;  %v1040_v24 = vpop.f32.mrb[6].mxu0  ;;  %1414 = vst [vmem:[%s3108_s28 + $0x228] sm:$0xff] %v3133_v21  ;;  %v3138_v25 = vpop.f32.mrb[6].mxu1 }
 0x153   : > { %v1776_v26 = vadd.f32 %v1775_v14, %v1651_v19  ;;  %1351 = vst [vmem:[%s3108_s28 + $0x30] sm:$0xff] %v1040_v24  ;;  %v1486_v27 = vadd.f32 %v1485_v18, %v1040_v24  ;;  %v1653_v28 = vmul.f32 %v1040_v24, %v1040_v24  ;;  %v1042_v29 = vpop.f32.mrb[7].mxu0  ;;  %1415 = vst [vmem:[%s3108_s28 + $0x230] sm:$0xff] %v3138_v25  ;;  %v3143_v30 = vpop.f32.mrb[7].mxu1 }
 0x154   : > { %v1845_v31 = vadd.f32 %v1844_v15, %v1652_v23  ;;  %1352 = vst [vmem:[%s3108_s28 + $0x38] sm:$0xff] %v1042_v29  ;;  %v1555_v32 = vadd.f32 %v1554_v22, %v1042_v29  ;;  %v1654_v33 = vmul.f32 %v1042_v29, %v1042_v29  ;;  %1416 = vst [vmem:[%s3108_s28 + $0x238] sm:$0xff] %v3143_v30 }
 0x155   : > { %v1777_v34 = vadd.f32 %v1776_v26, %v1653_v28 }
 0x156   : > { %v1846_v35 = vadd.f32 %v1845_v31, %v1654_v33 }
 0x158   : > { %v1046_v36 = vpop.f32.mrb[8].mxu0  ;;  %v3148_v37 = vpop.f32.mrb[8].mxu1 }
 0x159   : > { %1353 = vst [vmem:[%s3108_s28 + $0x40] sm:$0xff] %v1046_v36  ;;  %v1487_v38 = vadd.f32 %v1486_v27, %v1046_v36  ;;  %v1655_v39 = vmul.f32 %v1046_v36, %v1046_v36  ;;  %v1048_v40 = vpop.f32.mrb[9].mxu0  ;;  %1417 = vst [vmem:[%s3108_s28 + $0x240] sm:$0xff] %v3148_v37  ;;  %v3153_v41 = vpop.f32.mrb[9].mxu1 }
 0x15a   : > { %1354 = vst [vmem:[%s3108_s28 + $0x48] sm:$0xff] %v1048_v40  ;;  %v1556_v42 = vadd.f32 %v1555_v32, %v1048_v40  ;;  %v1656_v43 = vmul.f32 %v1048_v40, %v1048_v40  ;;  %v1050_v44 = vpop.f32.mrb[10].mxu0  ;;  %1418 = vst [vmem:[%s3108_s28 + $0x248] sm:$0xff] %v3153_v41  ;;  %v3158_v45 = vpop.f32.mrb[10].mxu1 }
 0x15b   : > { %v1778_v46 = vadd.f32 %v1777_v34, %v1655_v39  ;;  %1355 = vst [vmem:[%s3108_s28 + $0x50] sm:$0xff] %v1050_v44  ;;  %v1488_v47 = vadd.f32 %v1487_v38, %v1050_v44  ;;  %v1657_v48 = vmul.f32 %v1050_v44, %v1050_v44  ;;  %v1052_v49 = vpop.f32.mrb[11].mxu0  ;;  %1419 = vst [vmem:[%s3108_s28 + $0x250] sm:$0xff] %v3158_v45  ;;  %v3163_v50 = vpop.f32.mrb[11].mxu1 }
 0x15c   : > { %v1847_v51 = vadd.f32 %v1846_v35, %v1656_v43  ;;  %1356 = vst [vmem:[%s3108_s28 + $0x58] sm:$0xff] %v1052_v49  ;;  %v1557_v52 = vadd.f32 %v1556_v42, %v1052_v49  ;;  %v1658_v53 = vmul.f32 %v1052_v49, %v1052_v49  ;;  %1420 = vst [vmem:[%s3108_s28 + $0x258] sm:$0xff] %v3163_v50 }
 0x15d   : > { %v1779_v54 = vadd.f32 %v1778_v46, %v1657_v48 }
 0x15e   : > { %v1848_v55 = vadd.f32 %v1847_v51, %v1658_v53 }
 0x160   : > { %v1056_v56 = vpop.f32.mrb[12].mxu0  ;;  %v3168_v57 = vpop.f32.mrb[12].mxu1 }
 0x161   : > { %1357 = vst [vmem:[%s3108_s28 + $0x60] sm:$0xff] %v1056_v56  ;;  %v1489_v58 = vadd.f32 %v1488_v47, %v1056_v56  ;;  %v1659_v59 = vmul.f32 %v1056_v56, %v1056_v56  ;;  %v1058_v60 = vpop.f32.mrb[13].mxu0  ;;  %1421 = vst [vmem:[%s3108_s28 + $0x260] sm:$0xff] %v3168_v57  ;;  %v3173_v61 = vpop.f32.mrb[13].mxu1 }
 0x162   : > { %1358 = vst [vmem:[%s3108_s28 + $0x68] sm:$0xff] %v1058_v60  ;;  %v1558_v62 = vadd.f32 %v1557_v52, %v1058_v60  ;;  %v1660_v63 = vmul.f32 %v1058_v60, %v1058_v60  ;;  %v1060_v0 = vpop.f32.mrb[14].mxu0  ;;  %1422 = vst [vmem:[%s3108_s28 + $0x268] sm:$0xff] %v3173_v61  ;;  %v3178_v2 = vpop.f32.mrb[14].mxu1 }
 0x163   : > { %v1780_v4 = vadd.f32 %v1779_v54, %v1659_v59  ;;  %1359 = vst [vmem:[%s3108_s28 + $0x70] sm:$0xff] %v1060_v0  ;;  %v1490_v6 = vadd.f32 %v1489_v58, %v1060_v0  ;;  %v1661_v7 = vmul.f32 %v1060_v0, %v1060_v0  ;;  %v1062_v8 = vpop.f32.mrb[15].mxu0  ;;  %1423 = vst [vmem:[%s3108_s28 + $0x270] sm:$0xff] %v3178_v2  ;;  %v3183_v9 = vpop.f32.mrb[15].mxu1 }
 0x164   : > { %v1849_v11 = vadd.f32 %v1848_v55, %v1660_v63  ;;  %1360 = vst [vmem:[%s3108_s28 + $0x78] sm:$0xff] %v1062_v8  ;;  %v1559_v12 = vadd.f32 %v1558_v62, %v1062_v8  ;;  %v1662_v13 = vmul.f32 %v1062_v8, %v1062_v8  ;;  %1424 = vst [vmem:[%s3108_s28 + $0x278] sm:$0xff] %v3183_v9 }
 0x165   : > { %v1781_v14 = vadd.f32 %v1780_v4, %v1661_v7 }
 0x166   : > { %v1850_v15 = vadd.f32 %v1849_v11, %v1662_v13 }
 0x168   : > { %v1066_v16 = vpop.f32.mrb[16].mxu0  ;;  %v3188_v18 = vpop.f32.mrb[16].mxu1 }
 0x169   : > { %1361 = vst [vmem:[%s3108_s28 + $0x80] sm:$0xff] %v1066_v16  ;;  %v1491_v19 = vadd.f32 %v1490_v6, %v1066_v16  ;;  %v1663_v20 = vmul.f32 %v1066_v16, %v1066_v16  ;;  %v1068_v22 = vpop.f32.mrb[17].mxu0  ;;  %1425 = vst [vmem:[%s3108_s28 + $0x280] sm:$0xff] %v3188_v18  ;;  %v3193_v23 = vpop.f32.mrb[17].mxu1 }
 0x16a   : > { %1362 = vst [vmem:[%s3108_s28 + $0x88] sm:$0xff] %v1068_v22  ;;  %v1560_v24 = vadd.f32 %v1559_v12, %v1068_v22  ;;  %v1664_v26 = vmul.f32 %v1068_v22, %v1068_v22  ;;  %v1070_v27 = vpop.f32.mrb[18].mxu0  ;;  %1426 = vst [vmem:[%s3108_s28 + $0x288] sm:$0xff] %v3193_v23  ;;  %v3198_v28 = vpop.f32.mrb[18].mxu1 }
 0x16b   : > { %v1782_v29 = vadd.f32 %v1781_v14, %v1663_v20  ;;  %1363 = vst [vmem:[%s3108_s28 + $0x90] sm:$0xff] %v1070_v27  ;;  %v1492_v31 = vadd.f32 %v1491_v19, %v1070_v27  ;;  %v1665_v32 = vmul.f32 %v1070_v27, %v1070_v27  ;;  %v1072_v33 = vpop.f32.mrb[19].mxu0  ;;  %1427 = vst [vmem:[%s3108_s28 + $0x290] sm:$0xff] %v3198_v28  ;;  %v3203_v34 = vpop.f32.mrb[19].mxu1 }
 0x16c   : > { %v1851_v35 = vadd.f32 %v1850_v15, %v1664_v26  ;;  %1364 = vst [vmem:[%s3108_s28 + $0x98] sm:$0xff] %v1072_v33  ;;  %v1561_v36 = vadd.f32 %v1560_v24, %v1072_v33  ;;  %v1666_v38 = vmul.f32 %v1072_v33, %v1072_v33  ;;  %1428 = vst [vmem:[%s3108_s28 + $0x298] sm:$0xff] %v3203_v34 }
 0x16d   : > { %v1783_v39 = vadd.f32 %v1782_v29, %v1665_v32 }
 0x16e   : > { %v1852_v40 = vadd.f32 %v1851_v35, %v1666_v38 }
 0x170   : > { %v1076_v42 = vpop.f32.mrb[20].mxu0  ;;  %v3208_v43 = vpop.f32.mrb[20].mxu1 }
 0x171   : > { %1365 = vst [vmem:[%s3108_s28 + $0xa0] sm:$0xff] %v1076_v42  ;;  %v1493_v44 = vadd.f32 %v1492_v31, %v1076_v42  ;;  %v1667_v46 = vmul.f32 %v1076_v42, %v1076_v42  ;;  %v1078_v47 = vpop.f32.mrb[21].mxu0  ;;  %1429 = vst [vmem:[%s3108_s28 + $0x2a0] sm:$0xff] %v3208_v43  ;;  %v3213_v48 = vpop.f32.mrb[21].mxu1 }
 0x172   : > { %1366 = vst [vmem:[%s3108_s28 + $0xa8] sm:$0xff] %v1078_v47  ;;  %v1562_v49 = vadd.f32 %v1561_v36, %v1078_v47  ;;  %v1668_v51 = vmul.f32 %v1078_v47, %v1078_v47  ;;  %v1080_v52 = vpop.f32.mrb[22].mxu0  ;;  %1430 = vst [vmem:[%s3108_s28 + $0x2a8] sm:$0xff] %v3213_v48  ;;  %v3218_v53 = vpop.f32.mrb[22].mxu1 }
 0x173   : > { %v1784_v54 = vadd.f32 %v1783_v39, %v1667_v46  ;;  %1367 = vst [vmem:[%s3108_s28 + $0xb0] sm:$0xff] %v1080_v52  ;;  %v1494_v55 = vadd.f32 %v1493_v44, %v1080_v52  ;;  %v1669_v56 = vmul.f32 %v1080_v52, %v1080_v52  ;;  %v1082_v58 = vpop.f32.mrb[23].mxu0  ;;  %1431 = vst [vmem:[%s3108_s28 + $0x2b0] sm:$0xff] %v3218_v53  ;;  %v3223_v59 = vpop.f32.mrb[23].mxu1 }
 0x174   : > { %v1853_v60 = vadd.f32 %v1852_v40, %v1668_v51  ;;  %1368 = vst [vmem:[%s3108_s28 + $0xb8] sm:$0xff] %v1082_v58  ;;  %v1563_v62 = vadd.f32 %v1562_v49, %v1082_v58  ;;  %v1670_v63 = vmul.f32 %v1082_v58, %v1082_v58  ;;  %1432 = vst [vmem:[%s3108_s28 + $0x2b8] sm:$0xff] %v3223_v59 }
 0x175   : > { %v1785_v0 = vadd.f32 %v1784_v54, %v1669_v56 }
 0x176   : > { %v1854_v4 = vadd.f32 %v1853_v60, %v1670_v63 }
 0x178   : > { %v1086_v6 = vpop.f32.mrb[24].mxu0  ;;  %v3228_v7 = vpop.f32.mrb[24].mxu1 }
 0x179   : > { %1369 = vst [vmem:[%s3108_s28 + $0xc0] sm:$0xff] %v1086_v6  ;;  %v1495_v8 = vadd.f32 %v1494_v55, %v1086_v6  ;;  %v1671_v11 = vmul.f32 %v1086_v6, %v1086_v6  ;;  %v1088_v12 = vpop.f32.mrb[25].mxu0  ;;  %1433 = vst [vmem:[%s3108_s28 + $0x2c0] sm:$0xff] %v3228_v7  ;;  %v3233_v13 = vpop.f32.mrb[25].mxu1 }
 0x17a   : > { %1370 = vst [vmem:[%s3108_s28 + $0xc8] sm:$0xff] %v1088_v12  ;;  %v1564_v14 = vadd.f32 %v1563_v62, %v1088_v12  ;;  %v1672_v15 = vmul.f32 %v1088_v12, %v1088_v12  ;;  %v1090_v16 = vpop.f32.mrb[26].mxu0  ;;  %1434 = vst [vmem:[%s3108_s28 + $0x2c8] sm:$0xff] %v3233_v13  ;;  %v3238_v19 = vpop.f32.mrb[26].mxu1 }
 0x17b   : > { %v1786_v20 = vadd.f32 %v1785_v0, %v1671_v11  ;;  %1371 = vst [vmem:[%s3108_s28 + $0xd0] sm:$0xff] %v1090_v16  ;;  %v1496_v22 = vadd.f32 %v1495_v8, %v1090_v16  ;;  %v1673_v24 = vmul.f32 %v1090_v16, %v1090_v16  ;;  %v1092_v26 = vpop.f32.mrb[27].mxu0  ;;  %1435 = vst [vmem:[%s3108_s28 + $0x2d0] sm:$0xff] %v3238_v19  ;;  %v3243_v27 = vpop.f32.mrb[27].mxu1 }
 0x17c   : > { %v1855_v29 = vadd.f32 %v1854_v4, %v1672_v15  ;;  %1372 = vst [vmem:[%s3108_s28 + $0xd8] sm:$0xff] %v1092_v26  ;;  %v1565_v31 = vadd.f32 %v1564_v14, %v1092_v26  ;;  %v1674_v32 = vmul.f32 %v1092_v26, %v1092_v26  ;;  %1436 = vst [vmem:[%s3108_s28 + $0x2d8] sm:$0xff] %v3243_v27 }
 0x17d   : > { %v1787_v33 = vadd.f32 %v1786_v20, %v1673_v24 }
 0x17e   : > { %v1856_v35 = vadd.f32 %v1855_v29, %v1674_v32 }
 0x180   : > { %v1096_v36 = vpop.f32.mrb[28].mxu0  ;;  %v3248_v38 = vpop.f32.mrb[28].mxu1 }
 0x181   : > { %1373 = vst [vmem:[%s3108_s28 + $0xe0] sm:$0xff] %v1096_v36  ;;  %v1497_v39 = vadd.f32 %v1496_v22, %v1096_v36  ;;  %v1675_v40 = vmul.f32 %v1096_v36, %v1096_v36  ;;  %v1098_v42 = vpop.f32.mrb[29].mxu0  ;;  %1437 = vst [vmem:[%s3108_s28 + $0x2e0] sm:$0xff] %v3248_v38  ;;  %v3253_v44 = vpop.f32.mrb[29].mxu1 }
 0x182   : > { %1374 = vst [vmem:[%s3108_s28 + $0xe8] sm:$0xff] %v1098_v42  ;;  %v1566_v46 = vadd.f32 %v1565_v31, %v1098_v42  ;;  %v1676_v47 = vmul.f32 %v1098_v42, %v1098_v42  ;;  %v1100_v49 = vpop.f32.mrb[30].mxu0  ;;  %1438 = vst [vmem:[%s3108_s28 + $0x2e8] sm:$0xff] %v3253_v44  ;;  %v3258_v51 = vpop.f32.mrb[30].mxu1  ;;  %v3935_v42 = vlaneseq }
 0x183   : > { %v1788_v52 = vadd.f32 %v1787_v33, %v1675_v40  ;;  %1375 = vst [vmem:[%s3108_s28 + $0xf0] sm:$0xff] %v1100_v49  ;;  %v1498_v54 = vadd.f32 %v1497_v39, %v1100_v49  ;;  %v1677_v55 = vmul.f32 %v1100_v49, %v1100_v49  ;;  %v1102_v56 = vpop.f32.mrb[31].mxu0  ;;  %1439 = vst [vmem:[%s3108_s28 + $0x2f0] sm:$0xff] %v3258_v51  ;;  %v3263_v58 = vpop.f32.mrb[31].mxu1 }
 0x184   : > { %v1857_v60 = vadd.f32 %v1856_v35, %v1676_v47  ;;  %1376 = vst [vmem:[%s3108_s28 + $0xf8] sm:$0xff] %v1102_v56  ;;  %v1567_v62 = vadd.f32 %v1566_v46, %v1102_v56  ;;  %v1678_v63 = vmul.f32 %v1102_v56, %v1102_v56  ;;  %1440 = vst [vmem:[%s3108_s28 + $0x2f8] sm:$0xff] %v3263_v58  ;;  %vm3295_vm0 = vcmp.lt.s32.totalorder %v3935_v42, 256 }
 0x185   : > { %v1789_v0 = vadd.f32 %v1788_v52, %v1677_v55  ;;  %v3975_v47 = vmov 0 }
 0x186   : > { %v1858_v4 = vadd.f32 %v1857_v60, %v1678_v63  ;;  %v3976_v47 = vsel %vm3295_vm0, 4294967295, %v3975_v47 }
 0x187   : > { %3977 = vst [vmem:[#allocation4_spill] sm:$0xff] %v3976_v47 }
 0x188   : > { %v1106_v6 = vpop.f32.mrb[32].mxu0  ;;  %v3268_v8 = vpop.f32.mrb[32].mxu1 }
 0x189   : > { %1377 = vst [vmem:[%s3108_s28 + $0x100] sm:$0xff] %v1106_v6  ;;  %v1499_v11 = vadd.f32 %v1498_v54, %v1106_v6  ;;  %v1679_v12 = vmul.f32 %v1106_v6, %v1106_v6  ;;  %v1108_v14 = vpop.f32.mrb[33].mxu0  ;;  %1441 = vst [vmem:[%s3108_s28 + $0x300] sm:$0xff] %v3268_v8  ;;  %v3273_v15 = vpop.f32.mrb[33].mxu1  ;;  %v2730_v54 = vmov 0.0  }
 0x18a   : > { %1378 = vst [vmem:[%s3108_s28 + $0x108] sm:$0xff] %v1108_v14  ;;  %v1568_v16 = vadd.f32 %v1567_v62, %v1108_v14  ;;  %v1680_v20 = vmul.f32 %v1108_v14, %v1108_v14  ;;  %v1110_v22 = vpop.f32.mrb[34].mxu0  ;;  %1442 = vst [vmem:[%s3108_s28 + $0x308] sm:$0xff] %v3273_v15  ;;  %v3278_v24 = vpop.f32.mrb[34].mxu1 }
 0x18b   : > { %v1790_v26 = vadd.f32 %v1789_v0, %v1679_v12  ;;  %1379 = vst [vmem:[%s3108_s28 + $0x110] sm:$0xff] %v1110_v22  ;;  %v1500_v29 = vadd.f32 %v1499_v11, %v1110_v22  ;;  %v1681_v31 = vmul.f32 %v1110_v22, %v1110_v22  ;;  %v1112_v32 = vpop.f32.mrb[35].mxu0  ;;  %1443 = vst [vmem:[%s3108_s28 + $0x310] sm:$0xff] %v3278_v24  ;;  %v3284_v33 = vpop.f32.mrb[35].mxu1 }
 0x18c   : > { %v1859_v35 = vadd.f32 %v1858_v4, %v1680_v20  ;;  %1380 = vst [vmem:[%s3108_s28 + $0x118] sm:$0xff] %v1112_v32  ;;  %v1569_v36 = vadd.f32 %v1568_v16, %v1112_v32  ;;  %v1682_v39 = vmul.f32 %v1112_v32, %v1112_v32  ;;  %1444 = vst [vmem:[%s3108_s28 + $0x318] sm:$0xff] %v3284_v33 }
 0x18d   : > { %v1791_v40 = vadd.f32 %v1790_v26, %v1681_v31  ;;  %1481 = vst.msk [vmem:[%s3292_s30] sm:$0x3] %vm3295_vm0, %v2730_v54  ;;  %1482 = vst.msk [vmem:[%s3312_s8] sm:$0x3] %vm3295_vm0, %v2730_v54 }
 0x18e   : > { %v1860_v46 = vadd.f32 %v1859_v35, %v1682_v39 }
 0x190   : > { %v1116_v49 = vpop.f32.mrb[36].mxu0  ;;  %v3299_v52 = vpop.f32.mrb[36].mxu1 }
 0x191   : > { %1381 = vst [vmem:[%s3108_s28 + $0x120] sm:$0xff] %v1116_v49  ;;  %v1501_v55 = vadd.f32 %v1500_v29, %v1116_v49  ;;  %v1683_v56 = vmul.f32 %v1116_v49, %v1116_v49  ;;  %v1118_v60 = vpop.f32.mrb[37].mxu0  ;;  %1445 = vst [vmem:[%s3108_s28 + $0x320] sm:$0xff] %v3299_v52  ;;  %v3307_v62 = vpop.f32.mrb[37].mxu1 }
 0x192   : > { %1382 = vst [vmem:[%s3108_s28 + $0x128] sm:$0xff] %v1118_v60  ;;  %v1570_v63 = vadd.f32 %v1569_v36, %v1118_v60  ;;  %v1684_v0 = vmul.f32 %v1118_v60, %v1118_v60  ;;  %v1120_v4 = vpop.f32.mrb[38].mxu0  ;;  %1446 = vst [vmem:[%s3108_s28 + $0x328] sm:$0xff] %v3307_v62  ;;  %v3317_v6 = vpop.f32.mrb[38].mxu1 }
 0x193   : > { %v1792_v11 = vadd.f32 %v1791_v40, %v1683_v56  ;;  %1383 = vst [vmem:[%s3108_s28 + $0x130] sm:$0xff] %v1120_v4  ;;  %v1502_v12 = vadd.f32 %v1501_v55, %v1120_v4  ;;  %v1685_v14 = vmul.f32 %v1120_v4, %v1120_v4  ;;  %v1122_v16 = vpop.f32.mrb[39].mxu0  ;;  %1447 = vst [vmem:[%s3108_s28 + $0x330] sm:$0xff] %v3317_v6  ;;  %v3325_v20 = vpop.f32.mrb[39].mxu1 }
 0x194   : > { %v1861_v22 = vadd.f32 %v1860_v46, %v1684_v0  ;;  %1384 = vst [vmem:[%s3108_s28 + $0x138] sm:$0xff] %v1122_v16  ;;  %v1571_v26 = vadd.f32 %v1570_v63, %v1122_v16  ;;  %v1686_v29 = vmul.f32 %v1122_v16, %v1122_v16  ;;  %1448 = vst [vmem:[%s3108_s28 + $0x338] sm:$0xff] %v3325_v20 }
 0x195   : > { %v1793_v31 = vadd.f32 %v1792_v11, %v1685_v14 }
 0x196   : > { %v1862_v32 = vadd.f32 %v1861_v22, %v1686_v29 }
 0x198   : > { %v1126_v35 = vpop.f32.mrb[40].mxu0  ;;  %v3330_v36 = vpop.f32.mrb[40].mxu1 }
 0x199   : > { %1385 = vst [vmem:[%s3108_s28 + $0x140] sm:$0xff] %v1126_v35  ;;  %v1503_v39 = vadd.f32 %v1502_v12, %v1126_v35  ;;  %v1687_v40 = vmul.f32 %v1126_v35, %v1126_v35  ;;  %v1128_v49 = vpop.f32.mrb[41].mxu0  ;;  %1449 = vst [vmem:[%s3108_s28 + $0x340] sm:$0xff] %v3330_v36  ;;  %v3335_v46 = vpop.f32.mrb[41].mxu1 }
 0x19a   : > { %1386 = vst [vmem:[%s3108_s28 + $0x148] sm:$0xff] %v1128_v49  ;;  %v1572_v54 = vadd.f32 %v1571_v26, %v1128_v49  ;;  %v1688_v55 = vmul.f32 %v1128_v49, %v1128_v49  ;;  %v1130_v56 = vpop.f32.mrb[42].mxu0  ;;  %1450 = vst [vmem:[%s3108_s28 + $0x348] sm:$0xff] %v3335_v46  ;;  %v3340_v60 = vpop.f32.mrb[42].mxu1 }
 0x19b   : > { %v1794_v63 = vadd.f32 %v1793_v31, %v1687_v40  ;;  %1387 = vst [vmem:[%s3108_s28 + $0x150] sm:$0xff] %v1130_v56  ;;  %v1504_v0 = vadd.f32 %v1503_v39, %v1130_v56  ;;  %v1689_v4 = vmul.f32 %v1130_v56, %v1130_v56  ;;  %v1132_v11 = vpop.f32.mrb[43].mxu0  ;;  %1451 = vst [vmem:[%s3108_s28 + $0x350] sm:$0xff] %v3340_v60  ;;  %v3345_v12 = vpop.f32.mrb[43].mxu1 }
 0x19c   : > { %v1863_v14 = vadd.f32 %v1862_v32, %v1688_v55  ;;  %1388 = vst [vmem:[%s3108_s28 + $0x158] sm:$0xff] %v1132_v11  ;;  %v1573_v16 = vadd.f32 %v1572_v54, %v1132_v11  ;;  %v1690_v22 = vmul.f32 %v1132_v11, %v1132_v11  ;;  %1452 = vst [vmem:[%s3108_s28 + $0x358] sm:$0xff] %v3345_v12 }
 0x19d   : > { %v1795_v26 = vadd.f32 %v1794_v63, %v1689_v4 }
 0x19e   : > { %v1864_v29 = vadd.f32 %v1863_v14, %v1690_v22 }
 0x1a0   : > { %v1136_v31 = vpop.f32.mrb[44].mxu0  ;;  %v3350_v35 = vpop.f32.mrb[44].mxu1 }
 0x1a1   : > { %1389 = vst [vmem:[%s3108_s28 + $0x160] sm:$0xff] %v1136_v31  ;;  %v1505_v39 = vadd.f32 %v1504_v0, %v1136_v31  ;;  %v1691_v40 = vmul.f32 %v1136_v31, %v1136_v31  ;;  %v1138_v49 = vpop.f32.mrb[45].mxu0  ;;  %1453 = vst [vmem:[%s3108_s28 + $0x360] sm:$0xff] %v3350_v35  ;;  %v3355_v32 = vpop.f32.mrb[45].mxu1 }
 0x1a2   : > { %1390 = vst [vmem:[%s3108_s28 + $0x168] sm:$0xff] %v1138_v49  ;;  %v1574_v54 = vadd.f32 %v1573_v16, %v1138_v49  ;;  %v1692_v55 = vmul.f32 %v1138_v49, %v1138_v49  ;;  %v1140_v56 = vpop.f32.mrb[46].mxu0  ;;  %1454 = vst [vmem:[%s3108_s28 + $0x368] sm:$0xff] %v3355_v32  ;;  %v3360_v63 = vpop.f32.mrb[46].mxu1 }
 0x1a3   : > { %3978 = vst [vmem:[#allocation5_spill] sm:$0xff] %v3360_v63  ;;  %v1796_v4 = vadd.f32 %v1795_v26, %v1691_v40  ;;  %1391 = vst [vmem:[%s3108_s28 + $0x170] sm:$0xff] %v1140_v56  ;;  %v1506_v0 = vadd.f32 %v1505_v39, %v1140_v56  ;;  %v1693_v11 = vmul.f32 %v1140_v56, %v1140_v56  ;;  %v1142_v14 = vpop.f32.mrb[47].mxu0  ;;  %v3365_v22 = vpop.f32.mrb[47].mxu1 }
 0x1a4   : > { %1455 = vst [vmem:[%s3108_s28 + $0x370] sm:$0xff] %v3360_v63  ;;  %3979 = vst [vmem:[#allocation6_spill] sm:$0xff] %v3365_v22  ;;  %v1865_v16 = vadd.f32 %v1864_v29, %v1692_v55  ;;  %v1575_v31 = vadd.f32 %v1574_v54, %v1142_v14  ;;  %v1694_v49 = vmul.f32 %v1142_v14, %v1142_v14 }
 0x1a5   : > { %1392 = vst [vmem:[%s3108_s28 + $0x178] sm:$0xff] %v1142_v14  ;;  %1456 = vst [vmem:[%s3108_s28 + $0x378] sm:$0xff] %v3365_v22  ;;  %v1797_v42 = vadd.f32 %v1796_v4, %v1693_v11 }
 0x1a6   : > { %v1866_v26 = vadd.f32 %v1865_v16, %v1694_v49 }
 0x1a8   : > { %v1146_v40 = vpop.f32.mrb[48].mxu0  ;;  %v3370_v39 = vpop.f32.mrb[48].mxu1 }
 0x1a9   : > { %3980 = vst [vmem:[#allocation7_spill] sm:$0xff] %v3370_v39  ;;  %1393 = vst [vmem:[%s3108_s28 + $0x180] sm:$0xff] %v1146_v40  ;;  %v1507_v56 = vadd.f32 %v1506_v0, %v1146_v40  ;;  %v1695_v47 = vmul.f32 %v1146_v40, %v1146_v40  ;;  %v1148_v63 = vpop.f32.mrb[49].mxu0  ;;  %v3375_v29 = vpop.f32.mrb[49].mxu1 }
 0x1aa   : > { %1457 = vst [vmem:[%s3108_s28 + $0x380] sm:$0xff] %v3370_v39  ;;  %3981 = vst [vmem:[#allocation8_spill] sm:$0xff] %v3375_v29  ;;  %v1576_v54 = vadd.f32 %v1575_v31, %v1148_v63  ;;  %v1696_v55 = vmul.f32 %v1148_v63, %v1148_v63  ;;  %v1150_v4 = vpop.f32.mrb[50].mxu0  ;;  %v3380_v11 = vpop.f32.mrb[50].mxu1 }
 0x1ab   : > { %1394 = vst [vmem:[%s3108_s28 + $0x188] sm:$0xff] %v1148_v63  ;;  %1458 = vst [vmem:[%s3108_s28 + $0x388] sm:$0xff] %v3375_v29  ;;  %v1798_v14 = vadd.f32 %v1797_v42, %v1695_v47  ;;  %v1508_v0 = vadd.f32 %v1507_v56, %v1150_v4  ;;  %v1697_v16 = vmul.f32 %v1150_v4, %v1150_v4  ;;  %v1152_v49 = vpop.f32.mrb[51].mxu0  ;;  %v3385_v40 = vpop.f32.mrb[51].mxu1 }
 0x1ac   : > { %3982 = vst [vmem:[#allocation9_spill] sm:$0xff] %v3380_v11  ;;  %1395 = vst [vmem:[%s3108_s28 + $0x190] sm:$0xff] %v1150_v4  ;;  %v1867_v31 = vadd.f32 %v1866_v26, %v1696_v55  ;;  %v1577_v63 = vadd.f32 %v1576_v54, %v1152_v49  ;;  %v1698_v39 = vmul.f32 %v1152_v49, %v1152_v49 }
 0x1ad   : > { %1459 = vst [vmem:[%s3108_s28 + $0x390] sm:$0xff] %v3380_v11  ;;  %3983 = vst [vmem:[#allocation10_spill] sm:$0xff] %v3385_v40  ;;  %v1799_v29 = vadd.f32 %v1798_v14, %v1697_v16 }
 0x1ae   : > { %1396 = vst [vmem:[%s3108_s28 + $0x198] sm:$0xff] %v1152_v49  ;;  %1460 = vst [vmem:[%s3108_s28 + $0x398] sm:$0xff] %v3385_v40  ;;  %v1868_v42 = vadd.f32 %v1867_v31, %v1698_v39 }
 0x1b0   : > { %v1156_v47 = vpop.f32.mrb[52].mxu0  ;;  %v3390_v56 = vpop.f32.mrb[52].mxu1 }
 0x1b1   : > { %3984 = vst [vmem:[#allocation11_spill] sm:$0xff] %v3390_v56  ;;  %1397 = vst [vmem:[%s3108_s28 + $0x1a0] sm:$0xff] %v1156_v47  ;;  %v1509_v4 = vadd.f32 %v1508_v0, %v1156_v47  ;;  %v1699_v11 = vmul.f32 %v1156_v47, %v1156_v47  ;;  %v1158_v22 = vpop.f32.mrb[53].mxu0  ;;  %v3395_v26 = vpop.f32.mrb[53].mxu1 }
 0x1b2   : > { %1461 = vst [vmem:[%s3108_s28 + $0x3a0] sm:$0xff] %v3390_v56  ;;  %3985 = vst [vmem:[#allocation12_spill] sm:$0xff] %v3395_v26  ;;  %v1578_v54 = vadd.f32 %v1577_v63, %v1158_v22  ;;  %v1700_v55 = vmul.f32 %v1158_v22, %v1158_v22  ;;  %v1160_v14 = vpop.f32.mrb[54].mxu0  ;;  %v3400_v39 = vpop.f32.mrb[54].mxu1 }
 0x1b3   : > { %1398 = vst [vmem:[%s3108_s28 + $0x1a8] sm:$0xff] %v1158_v22  ;;  %1462 = vst [vmem:[%s3108_s28 + $0x3a8] sm:$0xff] %v3395_v26  ;;  %v1800_v16 = vadd.f32 %v1799_v29, %v1699_v11  ;;  %v1510_v0 = vadd.f32 %v1509_v4, %v1160_v14  ;;  %v1701_v49 = vmul.f32 %v1160_v14, %v1160_v14  ;;  %v1162_v31 = vpop.f32.mrb[55].mxu0  ;;  %v3405_v47 = vpop.f32.mrb[55].mxu1 }
 0x1b4   : > { %3986 = vst [vmem:[#allocation13_spill] sm:$0xff] %v3400_v39  ;;  %1399 = vst [vmem:[%s3108_s28 + $0x1b0] sm:$0xff] %v1160_v14  ;;  %v1869_v63 = vadd.f32 %v1868_v42, %v1700_v55  ;;  %v1579_v22 = vadd.f32 %v1578_v54, %v1162_v31  ;;  %v1702_v56 = vmul.f32 %v1162_v31, %v1162_v31 }
 0x1b5   : > { %1463 = vst [vmem:[%s3108_s28 + $0x3b0] sm:$0xff] %v3400_v39  ;;  %3987 = vst [vmem:[#allocation14_spill] sm:$0xff] %v3405_v47  ;;  %v1801_v26 = vadd.f32 %v1800_v16, %v1701_v49 }
 0x1b6   : > { %1400 = vst [vmem:[%s3108_s28 + $0x1b8] sm:$0xff] %v1162_v31  ;;  %1464 = vst [vmem:[%s3108_s28 + $0x3b8] sm:$0xff] %v3405_v47  ;;  %v1870_v29 = vadd.f32 %v1869_v63, %v1702_v56 }
 0x1b8   : > { %v1166_v11 = vpop.f32.mrb[56].mxu0  ;;  %v3410_v4 = vpop.f32.mrb[56].mxu1 }
 0x1b9   : > { %3988 = vst [vmem:[#allocation15_spill] sm:$0xff] %v3410_v4  ;;  %1401 = vst [vmem:[%s3108_s28 + $0x1c0] sm:$0xff] %v1166_v11  ;;  %v1511_v14 = vadd.f32 %v1510_v0, %v1166_v11  ;;  %v1703_v39 = vmul.f32 %v1166_v11, %v1166_v11  ;;  %v1168_v40 = vpop.f32.mrb[57].mxu0  ;;  %v3415_v42 = vpop.f32.mrb[57].mxu1 }
 0x1ba   : > { %1465 = vst [vmem:[%s3108_s28 + $0x3c0] sm:$0xff] %v3410_v4  ;;  %3989 = vst [vmem:[#allocation16_spill] sm:$0xff] %v3415_v42  ;;  %v1580_v54 = vadd.f32 %v1579_v22, %v1168_v40  ;;  %v1704_v55 = vmul.f32 %v1168_v40, %v1168_v40  ;;  %v1170_v16 = vpop.f32.mrb[58].mxu0  ;;  %v3420_v56 = vpop.f32.mrb[58].mxu1 }
 0x1bb   : > { %1402 = vst [vmem:[%s3108_s28 + $0x1c8] sm:$0xff] %v1168_v40  ;;  %1466 = vst [vmem:[%s3108_s28 + $0x3c8] sm:$0xff] %v3415_v42  ;;  %v1802_v49 = vadd.f32 %v1801_v26, %v1703_v39  ;;  %v1512_v0 = vadd.f32 %v1511_v14, %v1170_v16  ;;  %v1705_v31 = vmul.f32 %v1170_v16, %v1170_v16  ;;  %v1172_v63 = vpop.f32.mrb[59].mxu0  ;;  %v3425_v11 = vpop.f32.mrb[59].mxu1 }
 0x1bc   : > { %3990 = vst [vmem:[#allocation17_spill] sm:$0xff] %v3420_v56  ;;  %1403 = vst [vmem:[%s3108_s28 + $0x1d0] sm:$0xff] %v1170_v16  ;;  %v1871_v22 = vadd.f32 %v1870_v29, %v1704_v55  ;;  %v1581_v40 = vadd.f32 %v1580_v54, %v1172_v63  ;;  %v1706_v4 = vmul.f32 %v1172_v63, %v1172_v63 }
 0x1bd   : > { %1467 = vst [vmem:[%s3108_s28 + $0x3d0] sm:$0xff] %v3420_v56  ;;  %3991 = vst [vmem:[#allocation18_spill] sm:$0xff] %v3425_v11  ;;  %v1803_v42 = vadd.f32 %v1802_v49, %v1705_v31 }
 0x1be   : > { %1404 = vst [vmem:[%s3108_s28 + $0x1d8] sm:$0xff] %v1172_v63  ;;  %1468 = vst [vmem:[%s3108_s28 + $0x3d8] sm:$0xff] %v3425_v11  ;;  %v1872_v26 = vadd.f32 %v1871_v22, %v1706_v4 }
 0x1c0   : > { %v1176_v39 = vpop.f32.mrb[60].mxu0  ;;  %v3430_v14 = vpop.f32.mrb[60].mxu1 }
 0x1c1   : > { %3992 = vst [vmem:[#allocation19_spill] sm:$0xff] %v3430_v14  ;;  %1405 = vst [vmem:[%s3108_s28 + $0x1e0] sm:$0xff] %v1176_v39  ;;  %v1513_v16 = vadd.f32 %v1512_v0, %v1176_v39  ;;  %v1707_v56 = vmul.f32 %v1176_v39, %v1176_v39  ;;  %v1178_v47 = vpop.f32.mrb[61].mxu0  ;;  %v3435_v29 = vpop.f32.mrb[61].mxu1 }
 0x1c2   : > { %1469 = vst [vmem:[%s3108_s28 + $0x3e0] sm:$0xff] %v3430_v14  ;;  %3993 = vst [vmem:[#allocation20_spill] sm:$0xff] %v3435_v29  ;;  %v1582_v54 = vadd.f32 %v1581_v40, %v1178_v47  ;;  %v1708_v55 = vmul.f32 %v1178_v47, %v1178_v47  ;;  %v1180_v49 = vpop.f32.mrb[62].mxu0  ;;  %v3440_v4 = vpop.f32.mrb[62].mxu1 }
 0x1c3   : > { %1406 = vst [vmem:[%s3108_s28 + $0x1e8] sm:$0xff] %v1178_v47  ;;  %1470 = vst [vmem:[%s3108_s28 + $0x3e8] sm:$0xff] %v3435_v29  ;;  %v1804_v31 = vadd.f32 %v1803_v42, %v1707_v56  ;;  %v1514_v0 = vadd.f32 %v1513_v16, %v1180_v49  ;;  %v1709_v63 = vmul.f32 %v1180_v49, %v1180_v49  ;;  %v1182_v22 = vpop.f32.mrb[63].mxu0  ;;  %v3445_v39 = vpop.f32.mrb[63].mxu1 }
 0x1c4   : > { %3994 = vst [vmem:[#allocation21_spill] sm:$0xff] %v3440_v4  ;;  %1407 = vst [vmem:[%s3108_s28 + $0x1f0] sm:$0xff] %v1180_v49  ;;  %v1873_v11 = vadd.f32 %v1872_v26, %v1708_v55  ;;  %v1583_v14 = vadd.f32 %v1582_v54, %v1182_v22  ;;  %v1710_v40 = vmul.f32 %v1182_v22, %v1182_v22 }
 0x1c5   : > { %1471 = vst [vmem:[%s3108_s28 + $0x3f0] sm:$0xff] %v3440_v4  ;;  %3995 = vst [vmem:[#allocation22_spill] sm:$0xff] %v3445_v39  ;;  %v1711_v47 = vmul.f32 %v3106_v1, %v3106_v1  ;;  %v1515_v29 = vadd.f32 %v1514_v0, %v3106_v1  ;;  %v1805_v42 = vadd.f32 %v1804_v31, %v1709_v63 }
 0x1c6   : > { %1408 = vst [vmem:[%s3108_s28 + $0x1f8] sm:$0xff] %v1182_v22  ;;  %1472 = vst [vmem:[%s3108_s28 + $0x3f8] sm:$0xff] %v3445_v39  ;;  %v1712_v56 = vmul.f32 %v3113_v3, %v3113_v3  ;;  %v1584_v16 = vadd.f32 %v1583_v14, %v3113_v3  ;;  %v1874_v49 = vadd.f32 %v1873_v11, %v1710_v40 }
 0x1c7   : > { %v1713_v26 = vmul.f32 %v3118_v5, %v3118_v5  ;;  %v1516_v54 = vadd.f32 %v1515_v29, %v3118_v5  ;;  %v1806_v55 = vadd.f32 %v1805_v42, %v1711_v47  ;;  %v1714_v22 = vmul.f32 %v3123_v10, %v3123_v10 }
 0x1c8   : > { %v1585_v39 = vadd.f32 %v1584_v16, %v3123_v10  ;;  %v1875_v4 = vadd.f32 %v1874_v49, %v1712_v56  ;;  %v1715_v1 = vmul.f32 %v3128_v17, %v3128_v17  ;;  %v1716_v3 = vmul.f32 %v3133_v21, %v3133_v21 }
 0x1c9   : > { %v1517_v31 = vadd.f32 %v1516_v54, %v3128_v17  ;;  %v1807_v0 = vadd.f32 %v1806_v55, %v1713_v26  ;;  %v1717_v5 = vmul.f32 %v3138_v25, %v3138_v25  ;;  %v1718_v10 = vmul.f32 %v3143_v30, %v3143_v30 }
 0x1ca   : > { %v1586_v11 = vadd.f32 %v1585_v39, %v3133_v21  ;;  %v1876_v14 = vadd.f32 %v1875_v4, %v1714_v22  ;;  %v1719_v17 = vmul.f32 %v3148_v37, %v3148_v37  ;;  %v1720_v21 = vmul.f32 %v3153_v41, %v3153_v41 }
 0x1cb   : > { %v1518_v29 = vadd.f32 %v1517_v31, %v3138_v25  ;;  %v1808_v63 = vadd.f32 %v1807_v0, %v1715_v1  ;;  %v1721_v25 = vmul.f32 %v3158_v45, %v3158_v45 }
 0x1cc   : > { %v1587_v40 = vadd.f32 %v1586_v11, %v3143_v30  ;;  %v1877_v47 = vadd.f32 %v1876_v14, %v1716_v3  ;;  %v1722_v30 = vmul.f32 %v3163_v50, %v3163_v50 }
 0x1cd   : > { %v1519_v42 = vadd.f32 %v1518_v29, %v3148_v37  ;;  %v1809_v56 = vadd.f32 %v1808_v63, %v1717_v5  ;;  %v1723_v37 = vmul.f32 %v3168_v57, %v3168_v57 }
 0x1ce   : > { %v1588_v4 = vadd.f32 %v1587_v40, %v3153_v41  ;;  %v1878_v39 = vadd.f32 %v1877_v47, %v1718_v10  ;;  %v1724_v41 = vmul.f32 %v3173_v61, %v3173_v61 }
 0x1cf   : > { %v1520_v16 = vadd.f32 %v1519_v42, %v3158_v45  ;;  %v1810_v49 = vadd.f32 %v1809_v56, %v1719_v17  ;;  %v1725_v45 = vmul.f32 %v3178_v2, %v3178_v2 }
 0x1d0   : > { %v1589_v26 = vadd.f32 %v1588_v4, %v3163_v50  ;;  %v1879_v54 = vadd.f32 %v1878_v39, %v1720_v21  ;;  %v1726_v50 = vmul.f32 %v3183_v9, %v3183_v9 }
 0x1d1   : > { %v1521_v55 = vadd.f32 %v1520_v16, %v3168_v57  ;;  %v1811_v22 = vadd.f32 %v1810_v49, %v1721_v25  ;;  %v1727_v57 = vmul.f32 %v3188_v18, %v3188_v18 }
 0x1d2   : > { %v1590_v1 = vadd.f32 %v1589_v26, %v3173_v61  ;;  %v1880_v31 = vadd.f32 %v1879_v54, %v1722_v30  ;;  %v1728_v61 = vmul.f32 %v3193_v23, %v3193_v23 }
 0x1d3   : > { %v1522_v0 = vadd.f32 %v1521_v55, %v3178_v2  ;;  %v1812_v3 = vadd.f32 %v1811_v22, %v1723_v37  ;;  %v1729_v2 = vmul.f32 %v3198_v28, %v3198_v28 }
 0x1d4   : > { %v1591_v11 = vadd.f32 %v1590_v1, %v3183_v9  ;;  %v1881_v14 = vadd.f32 %v1880_v31, %v1724_v41  ;;  %v1730_v9 = vmul.f32 %v3203_v34, %v3203_v34 }
 0x1d5   : > { %v1813_v5 = vadd.f32 %v1812_v3, %v1725_v45  ;;  %v1523_v29 = vadd.f32 %v1522_v0, %v3188_v18  ;;  %v1731_v18 = vmul.f32 %v3208_v43, %v3208_v43 }
 0x1d6   : > { %v1882_v63 = vadd.f32 %v1881_v14, %v1726_v50  ;;  %v1592_v10 = vadd.f32 %v1591_v11, %v3193_v23  ;;  %v1732_v23 = vmul.f32 %v3213_v48, %v3213_v48 }
 0x1d7   : > { %v1524_v40 = vadd.f32 %v1523_v29, %v3198_v28  ;;  %v1814_v47 = vadd.f32 %v1813_v5, %v1727_v57  ;;  %v1733_v28 = vmul.f32 %v3218_v53, %v3218_v53  ;;  %v1743_v29 = vmul.f32 %v3268_v8, %v3268_v8 }
 0x1d8   : > { %v1593_v17 = vadd.f32 %v1592_v10, %v3203_v34  ;;  %v1883_v42 = vadd.f32 %v1882_v63, %v1728_v61  ;;  %v1734_v34 = vmul.f32 %v3223_v59, %v3223_v59  ;;  %v1744_v63 = vmul.f32 %v3273_v15, %v3273_v15 }
 0x1d9   : > { %v1525_v56 = vadd.f32 %v1524_v40, %v3208_v43  ;;  %v1815_v21 = vadd.f32 %v1814_v47, %v1729_v2  ;;  %v1735_v43 = vmul.f32 %v3228_v7, %v3228_v7  ;;  %v1745_v40 = vmul.f32 %v3278_v24, %v3278_v24 }
 0x1da   : > { %v1594_v4 = vadd.f32 %v1593_v17, %v3213_v48  ;;  %v1884_v39 = vadd.f32 %v1883_v42, %v1730_v9  ;;  %v1736_v48 = vmul.f32 %v3233_v13, %v3233_v13  ;;  %v1746_v9 = vmul.f32 %v3284_v33, %v3284_v33 }
 0x1db   : > { %v1526_v25 = vadd.f32 %v1525_v56, %v3218_v53  ;;  %v1816_v16 = vadd.f32 %v1815_v21, %v1731_v18  ;;  %v1737_v53 = vmul.f32 %v3238_v19, %v3238_v19  ;;  %v1747_v42 = vmul.f32 %v3299_v52, %v3299_v52 }
 0x1dc   : > { %v1595_v49 = vadd.f32 %v1594_v4, %v3223_v59  ;;  %v1885_v30 = vadd.f32 %v1884_v39, %v1732_v23  ;;  %v1738_v59 = vmul.f32 %v3243_v27, %v3243_v27  ;;  %v1748_v56 = vmul.f32 %v3307_v62, %v3307_v62 }
 0x1dd   : > { %v1527_v26 = vadd.f32 %v1526_v25, %v3228_v7  ;;  %v1817_v54 = vadd.f32 %v1816_v16, %v1733_v28  ;;  %v1739_v7 = vmul.f32 %v3248_v38, %v3248_v38  ;;  %v1749_v23 = vmul.f32 %v3317_v6, %v3317_v6 }
 0x1de   : > { %v1596_v37 = vadd.f32 %v1595_v49, %v3233_v13  ;;  %v1886_v55 = vadd.f32 %v1885_v30, %v1734_v34  ;;  %v1740_v13 = vmul.f32 %v3253_v44, %v3253_v44  ;;  %v1750_v39 = vmul.f32 %v3325_v20, %v3325_v20 }
 0x1df   : > { %v1528_v22 = vadd.f32 %v1527_v26, %v3238_v19  ;;  %v1818_v41 = vadd.f32 %v1817_v54, %v1735_v43  ;;  %v1741_v19 = vmul.f32 %v3258_v51, %v3258_v51  ;;  %v1751_v25 = vmul.f32 %v3330_v36, %v3330_v36 }
 0x1e0   : > { %v1597_v1 = vadd.f32 %v1596_v37, %v3243_v27  ;;  %v1887_v31 = vadd.f32 %v1886_v55, %v1736_v48  ;;  %v1742_v27 = vmul.f32 %v3263_v58, %v3263_v58  ;;  %v1752_v34 = vmul.f32 %v3335_v46, %v3335_v46 }
 0x1e1   : > { %v1529_v45 = vadd.f32 %v1528_v22, %v3248_v38  ;;  %v1819_v0 = vadd.f32 %v1818_v41, %v1737_v53  ;;  %v1753_v30 = vmul.f32 %v3340_v60, %v3340_v60  ;;  %v1754_v26 = vmul.f32 %v3345_v12, %v3345_v12 }
 0x1e2   : > { %v1598_v3 = vadd.f32 %v1597_v1, %v3253_v44  ;;  %v1888_v50 = vadd.f32 %v1887_v31, %v1738_v59  ;;  %v1755_v48 = vmul.f32 %v3350_v35, %v3350_v35  ;;  %v1756_v55 = vmul.f32 %v3355_v32, %v3355_v32 }
 0x1e3   : > { %v1530_v11 = vadd.f32 %v1529_v45, %v3258_v51  ;;  %v1820_v14 = vadd.f32 %v1819_v0, %v1739_v7 }
 0x1e4   : > { %v1599_v57 = vadd.f32 %v1598_v3, %v3263_v58  ;;  %v1889_v5 = vadd.f32 %v1888_v50, %v1740_v13 }
 0x1e5   : > { %v1531_v38 = vadd.f32 %v1530_v11, %v3268_v8  ;;  %v1821_v61 = vadd.f32 %v1820_v14, %v1741_v19  ;;  %v4000_v11 = vld [vmem:[#allocation9_spill] sm:$0xff] }
 0x1e6   : > { %v1600_v44 = vadd.f32 %v1599_v57, %v3273_v15  ;;  %v1890_v10 = vadd.f32 %v1889_v5, %v1742_v27  ;;  %v1761_v27 = vmul.f32 %v4000_v11, %v4000_v11  ;;  %v4001_v5 = vld [vmem:[#allocation10_spill] sm:$0xff] }
 0x1e7   : > { %v1822_v51 = vadd.f32 %v1821_v61, %v1743_v29  ;;  %v1532_v2 = vadd.f32 %v1531_v38, %v3278_v24  ;;  %v1762_v29 = vmul.f32 %v4001_v5, %v4001_v5 }
 0x1e8   : > { %v1891_v58 = vadd.f32 %v1890_v10, %v1744_v63  ;;  %v1601_v47 = vadd.f32 %v1600_v44, %v3284_v33  ;;  %v4002_v44 = vld [vmem:[#allocation11_spill] sm:$0xff] }
 0x1e9   : > { %v1823_v8 = vadd.f32 %v1822_v51, %v1745_v40  ;;  %v1533_v17 = vadd.f32 %v1532_v2, %v3299_v52  ;;  %v1763_v10 = vmul.f32 %v4002_v44, %v4002_v44  ;;  %v4003_v2 = vld [vmem:[#allocation12_spill] sm:$0xff] }
 0x1ea   : > { %v1892_v15 = vadd.f32 %v1891_v58, %v1746_v9  ;;  %v1602_v18 = vadd.f32 %v1601_v47, %v3307_v62  ;;  %v1764_v58 = vmul.f32 %v4003_v2, %v4003_v2  ;;  %v4004_v9 = vld [vmem:[#allocation13_spill] sm:$0xff] }
 0x1eb   : > { %v1824_v21 = vadd.f32 %v1823_v8, %v1747_v42  ;;  %v1534_v24 = vadd.f32 %v1533_v17, %v3317_v6  ;;  %v1765_v17 = vmul.f32 %v4004_v9, %v4004_v9 }
 0x1ec   : > { %v1893_v4 = vadd.f32 %v1892_v15, %v1748_v56  ;;  %v1603_v33 = vadd.f32 %v1602_v18, %v3325_v20  ;;  %v4005_v15 = vld [vmem:[#allocation14_spill] sm:$0xff] }
 0x1ed   : > { %v1825_v28 = vadd.f32 %v1824_v21, %v1749_v23  ;;  %v1535_v52 = vadd.f32 %v1534_v24, %v3330_v36  ;;  %v1766_v56 = vmul.f32 %v4005_v15, %v4005_v15  ;;  %v4006_v24 = vld [vmem:[#allocation15_spill] sm:$0xff] }
 0x1ee   : > { %v1894_v16 = vadd.f32 %v1893_v4, %v1750_v39  ;;  %v1604_v62 = vadd.f32 %v1603_v33, %v3335_v46  ;;  %v1767_v4 = vmul.f32 %v4006_v24, %v4006_v24  ;;  %v4007_v39 = vld [vmem:[#allocation16_spill] sm:$0xff] }
 0x1ef   : > { %v1826_v49 = vadd.f32 %v1825_v28, %v1751_v25  ;;  %v1536_v6 = vadd.f32 %v1535_v52, %v3340_v60  ;;  %v3996_v60 = vld [vmem:[#allocation5_spill] sm:$0xff]  ;;  %v1768_v52 = vmul.f32 %v4007_v39, %v4007_v39 }
 0x1f0   : > { %v1895_v43 = vadd.f32 %v1894_v16, %v1752_v34  ;;  %v1605_v20 = vadd.f32 %v1604_v62, %v3345_v12  ;;  %v1757_v41 = vmul.f32 %v3996_v60, %v3996_v60  ;;  %v3997_v12 = vld [vmem:[#allocation6_spill] sm:$0xff]  ;;  %v4008_v16 = vld [vmem:[#allocation17_spill] sm:$0xff] }
 0x1f1   : > { %v1827_v54 = vadd.f32 %v1826_v49, %v1753_v30  ;;  %v1537_v36 = vadd.f32 %v1536_v6, %v3350_v35  ;;  %v1758_v31 = vmul.f32 %v3997_v12, %v3997_v12  ;;  %v3998_v35 = vld [vmem:[#allocation7_spill] sm:$0xff]  ;;  %v1769_v34 = vmul.f32 %v4008_v16, %v4008_v16 }
 0x1f2   : > { %v1896_v37 = vadd.f32 %v1895_v43, %v1754_v26  ;;  %v1606_v46 = vadd.f32 %v1605_v20, %v3355_v32  ;;  %v1759_v0 = vmul.f32 %v3998_v35, %v3998_v35  ;;  %v3999_v32 = vld [vmem:[#allocation8_spill] sm:$0xff]  ;;  %v4009_v49 = vld [vmem:[#allocation19_spill] sm:$0xff]  ;;  %v4010_v43 = vld [vmem:[#allocation18_spill] sm:$0xff] }
 0x1f3   : > { %v1828_v53 = vadd.f32 %v1827_v54, %v1755_v48  ;;  %v1538_v22 = vadd.f32 %v1537_v36, %v3996_v60  ;;  %v1760_v50 = vmul.f32 %v3999_v32, %v3999_v32  ;;  %v1771_v6 = vmul.f32 %v4009_v49, %v4009_v49  ;;  %v4011_v54 = vld [vmem:[#allocation20_spill] sm:$0xff]  ;;  %v4012_v60 = vld [vmem:[#allocation21_spill] sm:$0xff] }
 0x1f4   : > { %v1897_v59 = vadd.f32 %v1896_v37, %v1756_v55  ;;  %v1607_v1 = vadd.f32 %v1606_v46, %v3997_v12  ;;  %v1770_v26 = vmul.f32 %v4010_v43, %v4010_v43  ;;  %v1772_v36 = vmul.f32 %v4011_v54, %v4011_v54  ;;  %v4013_v12 = vld [vmem:[#allocation22_spill] sm:$0xff] }
 0x1f5   : > { %v1829_v7 = vadd.f32 %v1828_v53, %v1757_v41  ;;  %v1539_v45 = vadd.f32 %v1538_v22, %v3998_v35  ;;  %v1773_v41 = vmul.f32 %v4012_v60, %v4012_v60 }
 0x1f6   : > { %v1898_v13 = vadd.f32 %v1897_v59, %v1758_v31  ;;  %v1608_v3 = vadd.f32 %v1607_v1, %v3999_v32  ;;  %v1774_v31 = vmul.f32 %v4013_v12, %v4013_v12 }
 0x1f7   : > { %v1830_v19 = vadd.f32 %v1829_v7, %v1759_v0  ;;  %v1540_v14 = vadd.f32 %v1539_v45, %v4000_v11 }
 0x1f8   : > { %v1899_v57 = vadd.f32 %v1898_v13, %v1760_v50  ;;  %v1609_v38 = vadd.f32 %v1608_v3, %v4001_v5  ;;  %v2731_v50 = vmov 1966171168  }
 0x1f9   : > { %v1831_v61 = vadd.f32 %v1830_v19, %v1761_v27  ;;  %v1541_v63 = vadd.f32 %v1540_v14, %v4002_v44  ;;  %v1626_v19 = vunpack.c.l.s4 %v2731_v50  ;;  %v2022_v50 = vld [vmem:[%s3108_s28 + $0xe0] sm:$0xff] (%p2792_p6) }
 0x1fa   : > { %v1900_v51 = vadd.f32 %v1899_v57, %v1762_v29  ;;  %v1610_v40 = vadd.f32 %v1609_v38, %v4003_v2  ;;  %2023 = vst [vmem:[%s3660_s12 + $0x1c0] sm:$0xff] (%p2792_p6), %v2022_v50  ;;  %v2150_v50 = vld [vmem:[%s3108_s28 + $0x2e0] sm:$0xff] (%p2792_p6) }
 0x1fb   : > { %v1832_v47 = vadd.f32 %v1831_v61, %v1763_v10  ;;  %v1542_v8 = vadd.f32 %v1541_v63, %v4004_v9  ;;  %v1627_v44 = vunpack.c.0.s8 %v1626_v19  ;;  %v4014_v63 = vlaneseq  ;;  %v2024_v19 = vld [vmem:[%s3108_s28 + $0xe8] sm:$0xff] (%p2792_p6)  ;;  %2151 = vst [vmem:[%s3660_s12 + $0x5c0] sm:$0xff] (%p2792_p6), %v2150_v50 }
 0x1fc   : > { %v1901_v42 = vadd.f32 %v1900_v51, %v1764_v58  ;;  %v1611_v18 = vadd.f32 %v1610_v40, %v4005_v15  ;;  %2025 = vst [vmem:[%s3660_s12 + $0x1c8] sm:$0xff] (%p2792_p6), %v2024_v19  ;;  %v2152_v19 = vld [vmem:[%s3108_s28 + $0x2e8] sm:$0xff] (%p2792_p6) }
 0x1fd   : > { %v1833_v21 = vadd.f32 %v1832_v47, %v1765_v17  ;;  %v1543_v23 = vadd.f32 %v1542_v8, %v4006_v24  ;;  %v1629_v10 = vshrl.u32 %v4014_v63, 7  ;;  %v2044_v63 = vld [vmem:[%s3108_s28 + $0x138] sm:$0xff] (%p2792_p6)  ;;  %2153 = vst [vmem:[%s3660_s12 + $0x5c8] sm:$0xff] (%p2792_p6), %v2152_v19 }
 0x1fe   : > { %v1902_v33 = vadd.f32 %v1901_v42, %v1766_v56  ;;  %v1612_v28 = vadd.f32 %v1611_v18, %v4007_v39  ;;  %2045 = vst [vmem:[%s3660_s12 + $0x268] sm:$0xff] (%p2792_p6), %v2044_v63  ;;  %v2172_v63 = vld [vmem:[%s3108_s28 + $0x338] sm:$0xff] (%p2792_p6) }
 0x1ff   : > { %v1834_v25 = vadd.f32 %v1833_v21, %v1767_v4  ;;  %v1544_v62 = vadd.f32 %v1543_v23, %v4008_v16  ;;  %v1630_v42 = vsub.s32 %v1627_v44, %v1629_v10  ;;  %v1483_v4 = vld [vmem:[%s3292_s30] sm:$0x3]  ;;  %v2042_v44 = vld [vmem:[%s3108_s28 + $0x130] sm:$0xff] (%p2792_p6)  ;;  %2173 = vst [vmem:[%s3660_s12 + $0x668] sm:$0xff] (%p2792_p6), %v2172_v63 }
 0x200   : > { %v1903_v30 = vadd.f32 %v1902_v33, %v1768_v52  ;;  %v1613_v20 = vadd.f32 %v1612_v28, %v4010_v43  ;;  %v1646_v28 = vld [vmem:[%s3312_s8] sm:$0x3]  ;;  %2043 = vst [vmem:[%s3660_s12 + $0x260] sm:$0xff] (%p2792_p6), %v2042_v44  ;;  %v2090_v16 = vld [vmem:[%s3108_s28 + $0x1f0] sm:$0xff] (%p2792_p6) }
 0x201   : > { %v1835_v48 = vadd.f32 %v1834_v25, %v1769_v34  ;;  %v1545_v37 = vadd.f32 %v1544_v62, %v4009_v49  ;;  %v1966_v34 = vld [vmem:[%s3108_s28] sm:$0xff] (%p2792_p6)  ;;  %v1968_v49 = vld [vmem:[%s3108_s28 + $0x8] sm:$0xff] (%p2792_p6)  ;;  %2091 = vst [vmem:[%s3660_s12 + $0x3e0] sm:$0xff] (%p2792_p6), %v2090_v16  ;;  %v2170_v44 = vld [vmem:[%s3108_s28 + $0x330] sm:$0xff] (%p2792_p6) }
 0x202   : > { %v1904_v46 = vadd.f32 %v1903_v30, %v1770_v26  ;;  %v1614_v55 = vadd.f32 %v1613_v20, %v4011_v54  ;;  %v1972_v30 = vld [vmem:[%s3108_s28 + $0x18] sm:$0xff] (%p2792_p6)  ;;  %v1974_v43 = vld [vmem:[%s3108_s28 + $0x20] sm:$0xff] (%p2792_p6)  ;;  %v1976_v20 = vld [vmem:[%s3108_s28 + $0x28] sm:$0xff] (%p2792_p6)  ;;  %1967 = vst [vmem:[%s3660_s12] sm:$0xff] (%p2792_p6), %v1966_v34 }
 0x203   : > { %v1836_v53 = vadd.f32 %v1835_v48, %v1771_v6  ;;  %v1546_v22 = vadd.f32 %v1545_v37, %v4012_v60  ;;  %v1970_v6 = vld [vmem:[%s3108_s28 + $0x10] sm:$0xff] (%p2792_p6)  ;;  %1969 = vst [vmem:[%s3660_s12 + $0x8] sm:$0xff] (%p2792_p6), %v1968_v49  ;;  %1973 = vst [vmem:[%s3660_s12 + $0x28] sm:$0xff] (%p2792_p6), %v1972_v30  ;;  %v1980_v54 = vld [vmem:[%s3108_s28 + $0x38] sm:$0xff] (%p2792_p6) }
 0x204   : > { %v1905_v59 = vadd.f32 %v1904_v46, %v1772_v36  ;;  %v1615_v1 = vadd.f32 %v1614_v55, %v4013_v12  ;;  %1971 = vst [vmem:[%s3660_s12 + $0x20] sm:$0xff] (%p2792_p6), %v1970_v6  ;;  %1975 = vst [vmem:[%s3660_s12 + $0x40] sm:$0xff] (%p2792_p6), %v1974_v43  ;;  %v1978_v26 = vld [vmem:[%s3108_s28 + $0x30] sm:$0xff] (%p2792_p6)  ;;  %v1982_v36 = vld [vmem:[%s3108_s28 + $0x40] sm:$0xff] (%p2792_p6) }
 0x205   : > { %v1547_v7 = vrot.slane %v1546_v22, 4  ;;  %v1837_v35 = vadd.f32 %v1836_v53, %v1773_v41  ;;  %1977 = vst [vmem:[%s3660_s12 + $0x48] sm:$0xff] (%p2792_p6), %v1976_v20  ;;  %1979 = vst [vmem:[%s3660_s12 + $0x60] sm:$0xff] (%p2792_p6), %v1978_v26  ;;  %v1984_v48 = vld [vmem:[%s3108_s28 + $0x48] sm:$0xff] (%p2792_p6)  ;;  %v1986_v37 = vld [vmem:[%s3108_s28 + $0x50] sm:$0xff] (%p2792_p6) }
 0x206   : > { %v1616_v45 = vrot.slane %v1615_v1, 4  ;;  %v1906_v0 = vadd.f32 %v1905_v59, %v1774_v31  ;;  %1981 = vst [vmem:[%s3660_s12 + $0x68] sm:$0xff] (%p2792_p6), %v1980_v54  ;;  %1983 = vst [vmem:[%s3660_s12 + $0x80] sm:$0xff] (%p2792_p6), %v1982_v36  ;;  %v1988_v46 = vld [vmem:[%s3108_s28 + $0x58] sm:$0xff] (%p2792_p6)  ;;  %v1990_v55 = vld [vmem:[%s3108_s28 + $0x60] sm:$0xff] (%p2792_p6) }
 0x207   : > { %v1548_v13 = vadd.f32 %v1547_v7, %v1546_v22  ;;  %v1838_v32 = vrot.slane %v1837_v35, 4  ;;  %1985 = vst [vmem:[%s3660_s12 + $0x88] sm:$0xff] (%p2792_p6), %v1984_v48  ;;  %1987 = vst [vmem:[%s3660_s12 + $0xa0] sm:$0xff] (%p2792_p6), %v1986_v37  ;;  %v1992_v53 = vld [vmem:[%s3108_s28 + $0x68] sm:$0xff] (%p2792_p6)  ;;  %v1994_v60 = vld [vmem:[%s3108_s28 + $0x70] sm:$0xff] (%p2792_p6) }
 0x208   : > { %v1617_v3 = vadd.f32 %v1616_v45, %v1615_v1  ;;  %v1907_v11 = vrot.slane %v1906_v0, 4  ;;  %1989 = vst [vmem:[%s3660_s12 + $0xa8] sm:$0xff] (%p2792_p6), %v1988_v46  ;;  %1991 = vst [vmem:[%s3660_s12 + $0xc0] sm:$0xff] (%p2792_p6), %v1990_v55  ;;  %v1996_v22 = vld [vmem:[%s3108_s28 + $0x78] sm:$0xff] (%p2792_p6)  ;;  %v1998_v41 = vld [vmem:[%s3108_s28 + $0x80] sm:$0xff] (%p2792_p6) }
 0x209   : > { %v1549_v14 = vrot.slane %v1548_v13, 2  ;;  %v1839_v27 = vadd.f32 %v1838_v32, %v1837_v35  ;;  %1993 = vst [vmem:[%s3660_s12 + $0xc8] sm:$0xff] (%p2792_p6), %v1992_v53  ;;  %1995 = vst [vmem:[%s3660_s12 + $0xe0] sm:$0xff] (%p2792_p6), %v1994_v60  ;;  %v2000_v59 = vld [vmem:[%s3108_s28 + $0x88] sm:$0xff] (%p2792_p6)  ;;  %v2002_v12 = vld [vmem:[%s3108_s28 + $0x90] sm:$0xff] (%p2792_p6) }
 0x20a   : > { %v1618_v57 = vrot.slane %v1617_v3, 2  ;;  %v1908_v5 = vadd.f32 %v1907_v11, %v1906_v0  ;;  %1997 = vst [vmem:[%s3660_s12 + $0xe8] sm:$0xff] (%p2792_p6), %v1996_v22  ;;  %1999 = vst [vmem:[%s3660_s12 + $0x100] sm:$0xff] (%p2792_p6), %v1998_v41  ;;  %v2004_v1 = vld [vmem:[%s3108_s28 + $0x98] sm:$0xff] (%p2792_p6)  ;;  %v2006_v31 = vld [vmem:[%s3108_s28 + $0xa0] sm:$0xff] (%p2792_p6) }
 0x20b   : > { %v1550_v38 = vadd.f32 %v1549_v14, %v1548_v13  ;;  %v1840_v29 = vrot.slane %v1839_v27, 2  ;;  %2001 = vst [vmem:[%s3660_s12 + $0x108] sm:$0xff] (%p2792_p6), %v2000_v59  ;;  %2003 = vst [vmem:[%s3660_s12 + $0x120] sm:$0xff] (%p2792_p6), %v2002_v12  ;;  %v2008_v7 = vld [vmem:[%s3108_s28 + $0xa8] sm:$0xff] (%p2792_p6)  ;;  %v2010_v35 = vld [vmem:[%s3108_s28 + $0xb0] sm:$0xff] (%p2792_p6) }
 0x20c   : > { %v1619_v61 = vadd.f32 %v1618_v57, %v1617_v3  ;;  %v1909_v51 = vrot.slane %v1908_v5, 2  ;;  %2005 = vst [vmem:[%s3660_s12 + $0x128] sm:$0xff] (%p2792_p6), %v2004_v1  ;;  %2007 = vst [vmem:[%s3660_s12 + $0x140] sm:$0xff] (%p2792_p6), %v2006_v31  ;;  %v2012_v45 = vld [vmem:[%s3108_s28 + $0xb8] sm:$0xff] (%p2792_p6)  ;;  %v2014_v0 = vld [vmem:[%s3108_s28 + $0xc0] sm:$0xff] (%p2792_p6) }
 0x20d   : > { %v1551_v2 = vrot.slane %v1550_v38, 1  ;;  %v1841_v40 = vadd.f32 %v1840_v29, %v1839_v27  ;;  %2009 = vst [vmem:[%s3660_s12 + $0x148] sm:$0xff] (%p2792_p6), %v2008_v7  ;;  %2011 = vst [vmem:[%s3660_s12 + $0x160] sm:$0xff] (%p2792_p6), %v2010_v35  ;;  %v2016_v13 = vld [vmem:[%s3108_s28 + $0xc8] sm:$0xff] (%p2792_p6)  ;;  %v2018_v32 = vld [vmem:[%s3108_s28 + $0xd0] sm:$0xff] (%p2792_p6) }
 0x20e   : > { %v1620_v58 = vrot.slane %v1619_v61, 1  ;;  %v1910_v47 = vadd.f32 %v1909_v51, %v1908_v5  ;;  %2013 = vst [vmem:[%s3660_s12 + $0x168] sm:$0xff] (%p2792_p6), %v2012_v45  ;;  %2015 = vst [vmem:[%s3660_s12 + $0x180] sm:$0xff] (%p2792_p6), %v2014_v0  ;;  %v2020_v3 = vld [vmem:[%s3108_s28 + $0xd8] sm:$0xff] (%p2792_p6)  ;;  %v2026_v11 = vld [vmem:[%s3108_s28 + $0xf0] sm:$0xff] (%p2792_p6) }
 0x20f   : > { %v1552_v9 = vadd.f32 %v1551_v2, %v1550_v38  ;;  %v1842_v8 = vrot.slane %v1841_v40, 1  ;;  %2017 = vst [vmem:[%s3660_s12 + $0x188] sm:$0xff] (%p2792_p6), %v2016_v13  ;;  %2019 = vst [vmem:[%s3660_s12 + $0x1a0] sm:$0xff] (%p2792_p6), %v2018_v32  ;;  %v2028_v14 = vld [vmem:[%s3108_s28 + $0xf8] sm:$0xff] (%p2792_p6)  ;;  %v2030_v27 = vld [vmem:[%s3108_s28 + $0x100] sm:$0xff] (%p2792_p6) }
 0x210   : > { %v1621_v17 = vadd.f32 %v1620_v58, %v1619_v61  ;;  %v1911_v15 = vrot.slane %v1910_v47, 1  ;;  %2021 = vst [vmem:[%s3660_s12 + $0x1a8] sm:$0xff] (%p2792_p6), %v2020_v3  ;;  %2027 = vst [vmem:[%s3660_s12 + $0x1e0] sm:$0xff] (%p2792_p6), %v2026_v11  ;;  %v2032_v57 = vld [vmem:[%s3108_s28 + $0x108] sm:$0xff] (%p2792_p6)  ;;  %v2034_v5 = vld [vmem:[%s3108_s28 + $0x110] sm:$0xff] (%p2792_p6) }
 0x211   : > { %v1843_v18 = vadd.f32 %v1842_v8, %v1841_v40  ;;  %2029 = vst [vmem:[%s3660_s12 + $0x1e8] sm:$0xff] (%p2792_p6), %v2028_v14  ;;  %2031 = vst [vmem:[%s3660_s12 + $0x200] sm:$0xff] (%p2792_p6), %v2030_v27  ;;  %v2036_v38 = vld [vmem:[%s3108_s28 + $0x118] sm:$0xff] (%p2792_p6)  ;;  %v2038_v29 = vld [vmem:[%s3108_s28 + $0x120] sm:$0xff] (%p2792_p6) }
 0x212   : > { %v1624_v56 = vcombine.low %v1552_v9, %v1621_v17  ;;  %v1912_v21 = vadd.f32 %v1911_v15, %v1910_v47  ;;  %2033 = vst [vmem:[%s3660_s12 + $0x208] sm:$0xff] (%p2792_p6), %v2032_v57  ;;  %2035 = vst [vmem:[%s3660_s12 + $0x220] sm:$0xff] (%p2792_p6), %v2034_v5  ;;  %v2040_v61 = vld [vmem:[%s3108_s28 + $0x128] sm:$0xff] (%p2792_p6)  ;;  %v2046_v10 = vld [vmem:[%s3108_s28 + $0x140] sm:$0xff] (%p2792_p6) }
 0x213   : > { %2037 = vst [vmem:[%s3660_s12 + $0x228] sm:$0xff] (%p2792_p6), %v2036_v38  ;;  %2039 = vst [vmem:[%s3660_s12 + $0x240] sm:$0xff] (%p2792_p6), %v2038_v29  ;;  %v2048_v51 = vld [vmem:[%s3108_s28 + $0x148] sm:$0xff] (%p2792_p6)  ;;  %v2050_v2 = vld [vmem:[%s3108_s28 + $0x150] sm:$0xff] (%p2792_p6) }
 0x214   : > { %v1631_v24 = vrot.slane %v1624_v56, %v1630_v42  ;;  %v1915_v23 = vcombine.low %v1843_v18, %v1912_v21  ;;  %2041 = vst [vmem:[%s3660_s12 + $0x248] sm:$0xff] (%p2792_p6), %v2040_v61  ;;  %2047 = vst [vmem:[%s3660_s12 + $0x280] sm:$0xff] (%p2792_p6), %v2046_v10  ;;  %v2052_v40 = vld [vmem:[%s3108_s28 + $0x158] sm:$0xff] (%p2792_p6)  ;;  %v2054_v58 = vld [vmem:[%s3108_s28 + $0x160] sm:$0xff] (%p2792_p6) }
 0x215   : > { %2049 = vst [vmem:[%s3660_s12 + $0x288] sm:$0xff] (%p2792_p6), %v2048_v51  ;;  %2051 = vst [vmem:[%s3660_s12 + $0x2a0] sm:$0xff] (%p2792_p6), %v2050_v2  ;;  %v2056_v47 = vld [vmem:[%s3108_s28 + $0x168] sm:$0xff] (%p2792_p6)  ;;  %v2058_v9 = vld [vmem:[%s3108_s28 + $0x170] sm:$0xff] (%p2792_p6) }
 0x216   : > { %v1638_v33 = vrot.slane %v1631_v24, %v1630_v42  ;;  %v1922_v39 = vrot.slane %v1915_v23, %v1630_v42  ;;  %1947 = sbr.rel (!%p2792_p6) target bundleno = 576 (0x240), region = 74  ;;  %2053 = vst [vmem:[%s3660_s12 + $0x2a8] sm:$0xff] (%p2792_p6), %v2052_v40  ;;  %2055 = vst [vmem:[%s3660_s12 + $0x2c0] sm:$0xff] (%p2792_p6), %v2054_v58  ;;  %v2060_v8 = vld [vmem:[%s3108_s28 + $0x178] sm:$0xff] (%p2792_p6)  ;;  %v2062_v17 = vld [vmem:[%s3108_s28 + $0x180] sm:$0xff] (%p2792_p6) }
 0x217   : > { %2057 = vst [vmem:[%s3660_s12 + $0x2c8] sm:$0xff] (%p2792_p6), %v2056_v47  ;;  %2059 = vst [vmem:[%s3660_s12 + $0x2e0] sm:$0xff] (%p2792_p6), %v2058_v9  ;;  %v2066_v15 = vld [vmem:[%s3108_s28 + $0x190] sm:$0xff] (%p2792_p6)  ;;  %v2068_v18 = vld [vmem:[%s3108_s28 + $0x198] sm:$0xff] (%p2792_p6) }
 0x218   : > { %v1640_v52 = vadd.f32 %v1638_v33, %v1483_v4  ;;  %v1929_v25 = vrot.slane %v1922_v39, %v1630_v42  ;;  %2061 = vst [vmem:[%s3660_s12 + $0x2e8] sm:$0xff] (%p2792_p6), %v2060_v8  ;;  %v2064_v42 = vld [vmem:[%s3108_s28 + $0x188] sm:$0xff] (%p2792_p6)  ;;  %2063 = vst [vmem:[%s3660_s12 + $0x300] sm:$0xff] (%p2792_p6), %v2062_v17  ;;  %v2070_v56 = vld [vmem:[%s3108_s28 + $0x1a0] sm:$0xff] (%p2792_p6) }
 0x219   : > { %2065 = vst [vmem:[%s3660_s12 + $0x308] sm:$0xff] (%p2792_p6), %v2064_v42  ;;  %2067 = vst [vmem:[%s3660_s12 + $0x320] sm:$0xff] (%p2792_p6), %v2066_v15  ;;  %v2072_v21 = vld [vmem:[%s3108_s28 + $0x1a8] sm:$0xff] (%p2792_p6)  ;;  %v2074_v24 = vld [vmem:[%s3108_s28 + $0x1b0] sm:$0xff] (%p2792_p6) }
 0x21a   : > { %1645 = vst.msk [vmem:[%s3292_s30] sm:$0x3] %vm3295_vm0, %v1640_v52  ;;  %v1931_v62 = vadd.f32 %v1929_v25, %v1646_v28  ;;  %2069 = vst [vmem:[%s3660_s12 + $0x328] sm:$0xff] (%p2792_p6), %v2068_v18  ;;  %v2076_v23 = vld [vmem:[%s3108_s28 + $0x1b8] sm:$0xff] (%p2792_p6)  ;;  %v2078_v4 = vld [vmem:[%s3108_s28 + $0x1c0] sm:$0xff] (%p2792_p6) }
 0x21b   : > { %2071 = vst [vmem:[%s3660_s12 + $0x340] sm:$0xff] (%p2792_p6), %v2070_v56  ;;  %2073 = vst [vmem:[%s3660_s12 + $0x348] sm:$0xff] (%p2792_p6), %v2072_v21  ;;  %v2080_v33 = vld [vmem:[%s3108_s28 + $0x1c8] sm:$0xff] (%p2792_p6)  ;;  %v2082_v39 = vld [vmem:[%s3108_s28 + $0x1d0] sm:$0xff] (%p2792_p6) }
 0x21c   : > { %1932 = vst.msk [vmem:[%s3312_s8] sm:$0x3] %vm3295_vm0, %v1931_v62  ;;  %2075 = vst [vmem:[%s3660_s12 + $0x360] sm:$0xff] (%p2792_p6), %v2074_v24  ;;  %v2084_v28 = vld [vmem:[%s3108_s28 + $0x1d8] sm:$0xff] (%p2792_p6)  ;;  %v2086_v52 = vld [vmem:[%s3108_s28 + $0x1e0] sm:$0xff] (%p2792_p6) }
 0x21d   : > { %2077 = vst [vmem:[%s3660_s12 + $0x368] sm:$0xff] %v2076_v23  ;;  %2079 = vst [vmem:[%s3660_s12 + $0x380] sm:$0xff] %v2078_v4  ;;  %v2088_v25 = vld [vmem:[%s3108_s28 + $0x1e8] sm:$0xff]  ;;  %v2092_v62 = vld [vmem:[%s3108_s28 + $0x1f8] sm:$0xff] }
 0x21e   : > { %2081 = vst [vmem:[%s3660_s12 + $0x388] sm:$0xff] %v2080_v33  ;;  %2083 = vst [vmem:[%s3660_s12 + $0x3a0] sm:$0xff] %v2082_v39  ;;  %v2094_v34 = vld [vmem:[%s3108_s28 + $0x200] sm:$0xff]  ;;  %v2096_v49 = vld [vmem:[%s3108_s28 + $0x208] sm:$0xff] }
 0x21f   : > { %2085 = vst [vmem:[%s3660_s12 + $0x3a8] sm:$0xff] %v2084_v28  ;;  %2087 = vst [vmem:[%s3660_s12 + $0x3c0] sm:$0xff] %v2086_v52  ;;  %v2098_v6 = vld [vmem:[%s3108_s28 + $0x210] sm:$0xff]  ;;  %v2100_v30 = vld [vmem:[%s3108_s28 + $0x218] sm:$0xff] }
 0x220   : > { %2089 = vst [vmem:[%s3660_s12 + $0x3c8] sm:$0xff] %v2088_v25  ;;  %2093 = vst [vmem:[%s3660_s12 + $0x3e8] sm:$0xff] %v2092_v62  ;;  %v2102_v43 = vld [vmem:[%s3108_s28 + $0x220] sm:$0xff]  ;;  %v2104_v20 = vld [vmem:[%s3108_s28 + $0x228] sm:$0xff] }
 0x221   : > { %2095 = vst [vmem:[%s3660_s12 + $0x400] sm:$0xff] %v2094_v34  ;;  %2097 = vst [vmem:[%s3660_s12 + $0x408] sm:$0xff] %v2096_v49  ;;  %v2106_v26 = vld [vmem:[%s3108_s28 + $0x230] sm:$0xff]  ;;  %v2108_v54 = vld [vmem:[%s3108_s28 + $0x238] sm:$0xff] }
 0x222   : > { %2099 = vst [vmem:[%s3660_s12 + $0x420] sm:$0xff] %v2098_v6  ;;  %2101 = vst [vmem:[%s3660_s12 + $0x428] sm:$0xff] %v2100_v30  ;;  %v2110_v36 = vld [vmem:[%s3108_s28 + $0x240] sm:$0xff]  ;;  %v2112_v48 = vld [vmem:[%s3108_s28 + $0x248] sm:$0xff] }
 0x223   : > { %2103 = vst [vmem:[%s3660_s12 + $0x440] sm:$0xff] %v2102_v43  ;;  %2105 = vst [vmem:[%s3660_s12 + $0x448] sm:$0xff] %v2104_v20  ;;  %v2114_v37 = vld [vmem:[%s3108_s28 + $0x250] sm:$0xff]  ;;  %v2116_v46 = vld [vmem:[%s3108_s28 + $0x258] sm:$0xff] }
 0x224   : > { %2107 = vst [vmem:[%s3660_s12 + $0x460] sm:$0xff] %v2106_v26  ;;  %2109 = vst [vmem:[%s3660_s12 + $0x468] sm:$0xff] %v2108_v54  ;;  %v2118_v55 = vld [vmem:[%s3108_s28 + $0x260] sm:$0xff]  ;;  %v2120_v53 = vld [vmem:[%s3108_s28 + $0x268] sm:$0xff] }
 0x225   : > { %2111 = vst [vmem:[%s3660_s12 + $0x480] sm:$0xff] %v2110_v36  ;;  %2113 = vst [vmem:[%s3660_s12 + $0x488] sm:$0xff] %v2112_v48  ;;  %v2122_v60 = vld [vmem:[%s3108_s28 + $0x270] sm:$0xff]  ;;  %v2124_v22 = vld [vmem:[%s3108_s28 + $0x278] sm:$0xff] }
 0x226   : > { %2115 = vst [vmem:[%s3660_s12 + $0x4a0] sm:$0xff] %v2114_v37  ;;  %2117 = vst [vmem:[%s3660_s12 + $0x4a8] sm:$0xff] %v2116_v46  ;;  %v2126_v41 = vld [vmem:[%s3108_s28 + $0x280] sm:$0xff]  ;;  %v2128_v59 = vld [vmem:[%s3108_s28 + $0x288] sm:$0xff] }
 0x227   : > { %2119 = vst [vmem:[%s3660_s12 + $0x4c0] sm:$0xff] %v2118_v55  ;;  %2121 = vst [vmem:[%s3660_s12 + $0x4c8] sm:$0xff] %v2120_v53  ;;  %v2130_v12 = vld [vmem:[%s3108_s28 + $0x290] sm:$0xff]  ;;  %v2132_v1 = vld [vmem:[%s3108_s28 + $0x298] sm:$0xff] }
 0x228   : > { %2123 = vst [vmem:[%s3660_s12 + $0x4e0] sm:$0xff] %v2122_v60  ;;  %2125 = vst [vmem:[%s3660_s12 + $0x4e8] sm:$0xff] %v2124_v22  ;;  %v2134_v31 = vld [vmem:[%s3108_s28 + $0x2a0] sm:$0xff]  ;;  %v2136_v7 = vld [vmem:[%s3108_s28 + $0x2a8] sm:$0xff] }
 0x229   : > { %2127 = vst [vmem:[%s3660_s12 + $0x500] sm:$0xff] %v2126_v41  ;;  %2129 = vst [vmem:[%s3660_s12 + $0x508] sm:$0xff] %v2128_v59  ;;  %v2138_v35 = vld [vmem:[%s3108_s28 + $0x2b0] sm:$0xff]  ;;  %v2140_v45 = vld [vmem:[%s3108_s28 + $0x2b8] sm:$0xff] }
 0x22a   : > { %2131 = vst [vmem:[%s3660_s12 + $0x520] sm:$0xff] %v2130_v12  ;;  %2133 = vst [vmem:[%s3660_s12 + $0x528] sm:$0xff] %v2132_v1  ;;  %v2142_v0 = vld [vmem:[%s3108_s28 + $0x2c0] sm:$0xff]  ;;  %v2144_v13 = vld [vmem:[%s3108_s28 + $0x2c8] sm:$0xff] }
 0x22b   : > { %2135 = vst [vmem:[%s3660_s12 + $0x540] sm:$0xff] %v2134_v31  ;;  %2137 = vst [vmem:[%s3660_s12 + $0x548] sm:$0xff] %v2136_v7  ;;  %v2146_v32 = vld [vmem:[%s3108_s28 + $0x2d0] sm:$0xff]  ;;  %v2148_v3 = vld [vmem:[%s3108_s28 + $0x2d8] sm:$0xff] }
 0x22c   : > { %2139 = vst [vmem:[%s3660_s12 + $0x560] sm:$0xff] %v2138_v35  ;;  %2141 = vst [vmem:[%s3660_s12 + $0x568] sm:$0xff] %v2140_v45  ;;  %v2154_v11 = vld [vmem:[%s3108_s28 + $0x2f0] sm:$0xff]  ;;  %v2156_v14 = vld [vmem:[%s3108_s28 + $0x2f8] sm:$0xff] }
 0x22d   : > { %2143 = vst [vmem:[%s3660_s12 + $0x580] sm:$0xff] %v2142_v0  ;;  %2145 = vst [vmem:[%s3660_s12 + $0x588] sm:$0xff] %v2144_v13  ;;  %v2158_v27 = vld [vmem:[%s3108_s28 + $0x300] sm:$0xff]  ;;  %v2160_v57 = vld [vmem:[%s3108_s28 + $0x308] sm:$0xff] }
 0x22e   : > { %2147 = vst [vmem:[%s3660_s12 + $0x5a0] sm:$0xff] %v2146_v32  ;;  %2149 = vst [vmem:[%s3660_s12 + $0x5a8] sm:$0xff] %v2148_v3  ;;  %v2162_v5 = vld [vmem:[%s3108_s28 + $0x310] sm:$0xff]  ;;  %v2164_v38 = vld [vmem:[%s3108_s28 + $0x318] sm:$0xff] }
 0x22f   : > { %2155 = vst [vmem:[%s3660_s12 + $0x5e0] sm:$0xff] %v2154_v11  ;;  %2157 = vst [vmem:[%s3660_s12 + $0x5e8] sm:$0xff] %v2156_v14  ;;  %v2166_v29 = vld [vmem:[%s3108_s28 + $0x320] sm:$0xff]  ;;  %v2168_v61 = vld [vmem:[%s3108_s28 + $0x328] sm:$0xff] }
 0x230   : > { %2159 = vst [vmem:[%s3660_s12 + $0x600] sm:$0xff] %v2158_v27  ;;  %2161 = vst [vmem:[%s3660_s12 + $0x608] sm:$0xff] %v2160_v57  ;;  %v2174_v10 = vld [vmem:[%s3108_s28 + $0x340] sm:$0xff]  ;;  %v2176_v51 = vld [vmem:[%s3108_s28 + $0x348] sm:$0xff] }
 0x231   : > { %2163 = vst [vmem:[%s3660_s12 + $0x620] sm:$0xff] %v2162_v5  ;;  %2165 = vst [vmem:[%s3660_s12 + $0x628] sm:$0xff] %v2164_v38  ;;  %v2178_v2 = vld [vmem:[%s3108_s28 + $0x350] sm:$0xff]  ;;  %v2180_v40 = vld [vmem:[%s3108_s28 + $0x358] sm:$0xff] }
 0x232   : > { %2167 = vst [vmem:[%s3660_s12 + $0x640] sm:$0xff] %v2166_v29  ;;  %2169 = vst [vmem:[%s3660_s12 + $0x648] sm:$0xff] %v2168_v61  ;;  %v2182_v58 = vld [vmem:[%s3108_s28 + $0x360] sm:$0xff]  ;;  %v2184_v47 = vld [vmem:[%s3108_s28 + $0x368] sm:$0xff] }
 0x233   : > { %2171 = vst [vmem:[%s3660_s12 + $0x660] sm:$0xff] %v2170_v44  ;;  %2175 = vst [vmem:[%s3660_s12 + $0x680] sm:$0xff] %v2174_v10  ;;  %v2186_v9 = vld [vmem:[%s3108_s28 + $0x370] sm:$0xff]  ;;  %v2188_v8 = vld [vmem:[%s3108_s28 + $0x378] sm:$0xff] }
 0x234   : > { %2177 = vst [vmem:[%s3660_s12 + $0x688] sm:$0xff] %v2176_v51  ;;  %2179 = vst [vmem:[%s3660_s12 + $0x6a0] sm:$0xff] %v2178_v2  ;;  %v2190_v17 = vld [vmem:[%s3108_s28 + $0x380] sm:$0xff]  ;;  %v2192_v42 = vld [vmem:[%s3108_s28 + $0x388] sm:$0xff] }
 0x235   : > { %2181 = vst [vmem:[%s3660_s12 + $0x6a8] sm:$0xff] %v2180_v40  ;;  %2183 = vst [vmem:[%s3660_s12 + $0x6c0] sm:$0xff] %v2182_v58  ;;  %v2194_v15 = vld [vmem:[%s3108_s28 + $0x390] sm:$0xff]  ;;  %v2196_v18 = vld [vmem:[%s3108_s28 + $0x398] sm:$0xff] }
 0x236   : > { %2185 = vst [vmem:[%s3660_s12 + $0x6c8] sm:$0xff] %v2184_v47  ;;  %2187 = vst [vmem:[%s3660_s12 + $0x6e0] sm:$0xff] %v2186_v9  ;;  %v2198_v56 = vld [vmem:[%s3108_s28 + $0x3a0] sm:$0xff]  ;;  %v2200_v21 = vld [vmem:[%s3108_s28 + $0x3a8] sm:$0xff] }
 0x237   : > { %2189 = vst [vmem:[%s3660_s12 + $0x6e8] sm:$0xff] %v2188_v8  ;;  %2191 = vst [vmem:[%s3660_s12 + $0x700] sm:$0xff] %v2190_v17  ;;  %v2202_v24 = vld [vmem:[%s3108_s28 + $0x3b0] sm:$0xff]  ;;  %v2204_v23 = vld [vmem:[%s3108_s28 + $0x3b8] sm:$0xff] }
 0x238   : > { %2193 = vst [vmem:[%s3660_s12 + $0x708] sm:$0xff] %v2192_v42  ;;  %2195 = vst [vmem:[%s3660_s12 + $0x720] sm:$0xff] %v2194_v15  ;;  %v2206_v4 = vld [vmem:[%s3108_s28 + $0x3c0] sm:$0xff]  ;;  %v2208_v33 = vld [vmem:[%s3108_s28 + $0x3c8] sm:$0xff] }
 0x239   : > { %2197 = vst [vmem:[%s3660_s12 + $0x728] sm:$0xff] %v2196_v18  ;;  %2199 = vst [vmem:[%s3660_s12 + $0x740] sm:$0xff] %v2198_v56  ;;  %v2210_v39 = vld [vmem:[%s3108_s28 + $0x3d0] sm:$0xff]  ;;  %v2212_v28 = vld [vmem:[%s3108_s28 + $0x3d8] sm:$0xff] }
 0x23a   : > { %2201 = vst [vmem:[%s3660_s12 + $0x748] sm:$0xff] %v2200_v21  ;;  %2203 = vst [vmem:[%s3660_s12 + $0x760] sm:$0xff] %v2202_v24  ;;  %v2214_v52 = vld [vmem:[%s3108_s28 + $0x3e0] sm:$0xff]  ;;  %v2216_v25 = vld [vmem:[%s3108_s28 + $0x3e8] sm:$0xff] }
 0x23b   : > { %2205 = vst [vmem:[%s3660_s12 + $0x768] sm:$0xff] %v2204_v23  ;;  %2207 = vst [vmem:[%s3660_s12 + $0x780] sm:$0xff] %v2206_v4  ;;  %v2218_v16 = vld [vmem:[%s3108_s28 + $0x3f0] sm:$0xff]  ;;  %v2220_v62 = vld [vmem:[%s3108_s28 + $0x3f8] sm:$0xff] }
 0x23c   : > { %2209 = vst [vmem:[%s3660_s12 + $0x788] sm:$0xff] %v2208_v33  ;;  %2211 = vst [vmem:[%s3660_s12 + $0x7a0] sm:$0xff] %v2210_v39 }
 0x23d   : > { %2213 = vst [vmem:[%s3660_s12 + $0x7a8] sm:$0xff] %v2212_v28  ;;  %2215 = vst [vmem:[%s3660_s12 + $0x7c0] sm:$0xff] %v2214_v52 }
 0x23e   : > { %2217 = vst [vmem:[%s3660_s12 + $0x7c8] sm:$0xff] %v2216_v25  ;;  %2219 = vst [vmem:[%s3660_s12 + $0x7e0] sm:$0xff] %v2218_v16 }
 0x23f   : > { %2221 = vst [vmem:[%s3660_s12 + $0x7e8] sm:$0xff] %v2220_v62 }
 0x240 PF: > { %s15_s19 = sadd.s32 1, %s2728_s19   ;;  %s4016_s15 = smov %s2716_s16 }
 0x241   : > { %p12_p12 = scmp.ge.s32.totalorder %s15_s19, 4   ;;  %s4017_s16 = smov %s2797_s25 }
 0x242   : > { %s4018_s17 = smov %s2724_s18  ;;  %s4019_s18 = smov %s4021_s20 }
 0x243   :  { %14 = sbr.rel (!%p12_p12) target bundleno = 3 (0x3), region = 155 }

// kernel: tile.68
= control target key start
LH: loop header
LB: loop body
LE: loop exit
PB: predicated region body
PF: predicated region fallthrough
CT: control target
= control target key end

     0   :  { %s22_s0 = inlined_call_operand.vmem [shape: f32[128], index: 0, kind: input, shape index: {}]   ;;  %s23_s1 = inlined_call_operand.vmem [shape: f32[4,128], index: 1, kind: output, shape index: {}]  }
   0x1   :  { %v4_v0 = vld [vmem:[%s22_s0] ss:$0 sm:$0xff] }
   0x2   :  { %5 = vst [vmem:[%s23_s1] sm:$0xf] %v4_v0 }

// kernel: unet_decoder_forward.14
= control target key start
LH: loop header
LB: loop body
LE: loop exit
PB: predicated region body
PF: predicated region fallthrough
CT: control target
= control target key end

     0   :  { %s2117_s12 = smov 0   ;;  %s2119_s13 = smov 0   ;;  %s3049_s0 = inlined_call_operand.vmem [shape: f32[512,512], index: 0, kind: input, shape index: {}]   ;;  %s3050_s1 = inlined_call_operand.vmem [shape: f32[1,512], index: 1, kind: input, shape index: {}]   ;;  %s3051_s2 = inlined_call_operand.vmem [shape: f32[1,512], index: 2, kind: input, shape index: {}]   ;;  %s3052_s3 = inlined_call_operand.vmem [shape: bf16[512,512], index: 3, kind: output, shape index: {}]  }
   0x1   :  { %s2121_s14 = smov 0   ;;  %s2123_s15 = smov 0  }
   0x2   :  { %s2125_s16 = smov 0  }
   0x3 LB: > { %s25_s17 = sadd.s32 1, %s2091_s15  ;;  %s1870_s18 = sadd.s32 4294967295, %s2095_s16   ;;  %s2095_s16 = sphi %s2125_s16, %s13_s16   ;;  %s2091_s15 = sphi %s2123_s15, %s3057_s15   ;;  %s2087_s14 = sphi %s2121_s14, %s3056_s14   ;;  %s2083_s13 = sphi %s2119_s13, %s3055_s13   ;;  %s2079_s12 = sphi %s2117_s12, %s3054_s12  }
   0x4   : > { %p27_p0 = scmp.ge.s32.totalorder %s25_s17, 2  ;;  %p41_p1 = scmp.ne.s32.totalorder %s2083_s13, %s2079_s12 }
   0x5   : > { %p42_p2 = scmp.eq.s32.totalorder %s2095_s16, 0  ;;  %p125_p4 = scmp.eq.s32.totalorder %s1870_s18, 1 }
   0x6   : > { %s3059_s17 = smov (%p27_p0, %s25_s17), 0  ;;  %s34_s20 = sadd.s32 1, %s2083_s13 }
   0x7   : > { %p43_p3 = por %p42_p2, %p41_p1  ;;  %s30_s19 = ssub.s32 %s2091_s15, %s3059_s17 }
   0x8   : > { %p32_p5 = scmp.eq.s32.totalorder %s30_s19, 0  ;;  %p2152_p6 = por %p125_p4, %p41_p1 }
   0x9   : > { %p1873_p7 = scmp.ge.s32.totalorder %s2095_s16, 2 }
   0xa   : > { %s2157_s22 = scalar_select %p32_p5, %s2083_s13, %s34_s20  }
   0xb   : > { %147 = sbr.rel (%p1873_p7) target bundleno = 86 (0x56), region = 16 }
  0x12   : > { %150 = sbr.rel (!%p43_p3) target bundleno = 86 (0x56), region = 20  ;;  %s152_s23 = sand.u32 (%p43_p3), 1, %s2083_s13  }
  0x13   : > { %s1951_s24 = sshll.u32 (%p43_p3), %s2091_s15, 4  ;;  %s1874_s25 = sshll.u32 (%p43_p3), %s152_s23, 10 }
  0x14   : > { %s2165_s28 = scalar_lea.vmem (%p43_p3), %s3049_s0, %s1951_s24  ;;  %s2170_s29 = scalar_lea.vmem (%p43_p3), [#allocation2], %s1874_s25 }
  0x15   : > { %v173_v0 = vld [vmem:[%s2165_s28] sm:$0xff] (%p43_p3)  ;;  %v175_v1 = vld [vmem:[%s2165_s28 + $0x8] sm:$0xff] (%p43_p3) }
  0x16   : > { %v177_v2 = vld [vmem:[%s2165_s28 + $0x20] sm:$0xff] (%p43_p3)  ;;  %174 = vst [vmem:[%s2170_s29] sm:$0xff] (%p43_p3), %v173_v0  ;;  %176 = vst [vmem:[%s2170_s29 + $0x8] sm:$0xff] (%p43_p3), %v175_v1  ;;  %v179_v3 = vld [vmem:[%s2165_s28 + $0x28] sm:$0xff] (%p43_p3) }
  0x17   : > { %178 = vst [vmem:[%s2170_s29 + $0x10] sm:$0xff] (%p43_p3), %v177_v2  ;;  %v181_v4 = vld [vmem:[%s2165_s28 + $0x40] sm:$0xff] (%p43_p3)  ;;  %v183_v5 = vld [vmem:[%s2165_s28 + $0x48] sm:$0xff] (%p43_p3)  ;;  %180 = vst [vmem:[%s2170_s29 + $0x18] sm:$0xff] (%p43_p3), %v179_v3 }
  0x18   : > { %182 = vst [vmem:[%s2170_s29 + $0x20] sm:$0xff] (%p43_p3), %v181_v4  ;;  %184 = vst [vmem:[%s2170_s29 + $0x28] sm:$0xff] (%p43_p3), %v183_v5  ;;  %v185_v6 = vld [vmem:[%s2165_s28 + $0x60] sm:$0xff] (%p43_p3)  ;;  %v187_v7 = vld [vmem:[%s2165_s28 + $0x68] sm:$0xff] (%p43_p3) }
  0x19   : > { %v189_v8 = vld [vmem:[%s2165_s28 + $0x80] sm:$0xff]  ;;  %186 = vst [vmem:[%s2170_s29 + $0x30] sm:$0xff] %v185_v6  ;;  %188 = vst [vmem:[%s2170_s29 + $0x38] sm:$0xff] %v187_v7  ;;  %v191_v9 = vld [vmem:[%s2165_s28 + $0x88] sm:$0xff] }
  0x1a   : > { %190 = vst [vmem:[%s2170_s29 + $0x40] sm:$0xff] %v189_v8  ;;  %v193_v10 = vld [vmem:[%s2165_s28 + $0xa0] sm:$0xff]  ;;  %v195_v11 = vld [vmem:[%s2165_s28 + $0xa8] sm:$0xff]  ;;  %192 = vst [vmem:[%s2170_s29 + $0x48] sm:$0xff] %v191_v9 }
  0x1b   : > { %194 = vst [vmem:[%s2170_s29 + $0x50] sm:$0xff] %v193_v10  ;;  %196 = vst [vmem:[%s2170_s29 + $0x58] sm:$0xff] %v195_v11  ;;  %v197_v12 = vld [vmem:[%s2165_s28 + $0xc0] sm:$0xff]  ;;  %v199_v13 = vld [vmem:[%s2165_s28 + $0xc8] sm:$0xff] }
  0x1c   : > { %v201_v14 = vld [vmem:[%s2165_s28 + $0xe0] sm:$0xff]  ;;  %198 = vst [vmem:[%s2170_s29 + $0x60] sm:$0xff] %v197_v12  ;;  %200 = vst [vmem:[%s2170_s29 + $0x68] sm:$0xff] %v199_v13  ;;  %v203_v15 = vld [vmem:[%s2165_s28 + $0xe8] sm:$0xff] }
  0x1d   : > { %202 = vst [vmem:[%s2170_s29 + $0x70] sm:$0xff] %v201_v14  ;;  %v205_v16 = vld [vmem:[%s2165_s28 + $0x100] sm:$0xff]  ;;  %v207_v17 = vld [vmem:[%s2165_s28 + $0x108] sm:$0xff]  ;;  %204 = vst [vmem:[%s2170_s29 + $0x78] sm:$0xff] %v203_v15 }
  0x1e   : > { %206 = vst [vmem:[%s2170_s29 + $0x80] sm:$0xff] %v205_v16  ;;  %208 = vst [vmem:[%s2170_s29 + $0x88] sm:$0xff] %v207_v17  ;;  %v209_v18 = vld [vmem:[%s2165_s28 + $0x120] sm:$0xff]  ;;  %v211_v19 = vld [vmem:[%s2165_s28 + $0x128] sm:$0xff] }
  0x1f   : > { %v213_v20 = vld [vmem:[%s2165_s28 + $0x140] sm:$0xff]  ;;  %210 = vst [vmem:[%s2170_s29 + $0x90] sm:$0xff] %v209_v18  ;;  %212 = vst [vmem:[%s2170_s29 + $0x98] sm:$0xff] %v211_v19  ;;  %v215_v21 = vld [vmem:[%s2165_s28 + $0x148] sm:$0xff] }
  0x20   : > { %214 = vst [vmem:[%s2170_s29 + $0xa0] sm:$0xff] %v213_v20  ;;  %v217_v22 = vld [vmem:[%s2165_s28 + $0x160] sm:$0xff]  ;;  %v219_v23 = vld [vmem:[%s2165_s28 + $0x168] sm:$0xff]  ;;  %216 = vst [vmem:[%s2170_s29 + $0xa8] sm:$0xff] %v215_v21 }
  0x21   : > { %218 = vst [vmem:[%s2170_s29 + $0xb0] sm:$0xff] %v217_v22  ;;  %220 = vst [vmem:[%s2170_s29 + $0xb8] sm:$0xff] %v219_v23  ;;  %v221_v24 = vld [vmem:[%s2165_s28 + $0x180] sm:$0xff]  ;;  %v223_v25 = vld [vmem:[%s2165_s28 + $0x188] sm:$0xff] }
  0x22   : > { %v225_v26 = vld [vmem:[%s2165_s28 + $0x1a0] sm:$0xff]  ;;  %222 = vst [vmem:[%s2170_s29 + $0xc0] sm:$0xff] %v221_v24  ;;  %224 = vst [vmem:[%s2170_s29 + $0xc8] sm:$0xff] %v223_v25  ;;  %v227_v27 = vld [vmem:[%s2165_s28 + $0x1a8] sm:$0xff] }
  0x23   : > { %226 = vst [vmem:[%s2170_s29 + $0xd0] sm:$0xff] %v225_v26  ;;  %v229_v28 = vld [vmem:[%s2165_s28 + $0x1c0] sm:$0xff]  ;;  %v231_v29 = vld [vmem:[%s2165_s28 + $0x1c8] sm:$0xff]  ;;  %228 = vst [vmem:[%s2170_s29 + $0xd8] sm:$0xff] %v227_v27 }
  0x24   : > { %230 = vst [vmem:[%s2170_s29 + $0xe0] sm:$0xff] %v229_v28  ;;  %232 = vst [vmem:[%s2170_s29 + $0xe8] sm:$0xff] %v231_v29  ;;  %v233_v30 = vld [vmem:[%s2165_s28 + $0x1e0] sm:$0xff]  ;;  %v235_v31 = vld [vmem:[%s2165_s28 + $0x1e8] sm:$0xff] }
  0x25   : > { %v237_v32 = vld [vmem:[%s2165_s28 + $0x200] sm:$0xff]  ;;  %234 = vst [vmem:[%s2170_s29 + $0xf0] sm:$0xff] %v233_v30  ;;  %236 = vst [vmem:[%s2170_s29 + $0xf8] sm:$0xff] %v235_v31  ;;  %v239_v33 = vld [vmem:[%s2165_s28 + $0x208] sm:$0xff] }
  0x26   : > { %238 = vst [vmem:[%s2170_s29 + $0x100] sm:$0xff] %v237_v32  ;;  %v241_v34 = vld [vmem:[%s2165_s28 + $0x220] sm:$0xff]  ;;  %v243_v35 = vld [vmem:[%s2165_s28 + $0x228] sm:$0xff]  ;;  %240 = vst [vmem:[%s2170_s29 + $0x108] sm:$0xff] %v239_v33 }
  0x27   : > { %242 = vst [vmem:[%s2170_s29 + $0x110] sm:$0xff] %v241_v34  ;;  %244 = vst [vmem:[%s2170_s29 + $0x118] sm:$0xff] %v243_v35  ;;  %v245_v36 = vld [vmem:[%s2165_s28 + $0x240] sm:$0xff]  ;;  %v247_v37 = vld [vmem:[%s2165_s28 + $0x248] sm:$0xff] }
  0x28   : > { %v249_v38 = vld [vmem:[%s2165_s28 + $0x260] sm:$0xff]  ;;  %246 = vst [vmem:[%s2170_s29 + $0x120] sm:$0xff] %v245_v36  ;;  %248 = vst [vmem:[%s2170_s29 + $0x128] sm:$0xff] %v247_v37  ;;  %v251_v39 = vld [vmem:[%s2165_s28 + $0x268] sm:$0xff] }
  0x29   : > { %250 = vst [vmem:[%s2170_s29 + $0x130] sm:$0xff] %v249_v38  ;;  %v253_v40 = vld [vmem:[%s2165_s28 + $0x280] sm:$0xff]  ;;  %v255_v41 = vld [vmem:[%s2165_s28 + $0x288] sm:$0xff]  ;;  %252 = vst [vmem:[%s2170_s29 + $0x138] sm:$0xff] %v251_v39 }
  0x2a   : > { %254 = vst [vmem:[%s2170_s29 + $0x140] sm:$0xff] %v253_v40  ;;  %256 = vst [vmem:[%s2170_s29 + $0x148] sm:$0xff] %v255_v41  ;;  %v257_v42 = vld [vmem:[%s2165_s28 + $0x2a0] sm:$0xff]  ;;  %v259_v43 = vld [vmem:[%s2165_s28 + $0x2a8] sm:$0xff] }
  0x2b   : > { %v261_v44 = vld [vmem:[%s2165_s28 + $0x2c0] sm:$0xff]  ;;  %258 = vst [vmem:[%s2170_s29 + $0x150] sm:$0xff] %v257_v42  ;;  %260 = vst [vmem:[%s2170_s29 + $0x158] sm:$0xff] %v259_v43  ;;  %v263_v45 = vld [vmem:[%s2165_s28 + $0x2c8] sm:$0xff] }
  0x2c   : > { %262 = vst [vmem:[%s2170_s29 + $0x160] sm:$0xff] %v261_v44  ;;  %v265_v46 = vld [vmem:[%s2165_s28 + $0x2e0] sm:$0xff]  ;;  %v267_v47 = vld [vmem:[%s2165_s28 + $0x2e8] sm:$0xff]  ;;  %264 = vst [vmem:[%s2170_s29 + $0x168] sm:$0xff] %v263_v45 }
  0x2d   : > { %266 = vst [vmem:[%s2170_s29 + $0x170] sm:$0xff] %v265_v46  ;;  %268 = vst [vmem:[%s2170_s29 + $0x178] sm:$0xff] %v267_v47  ;;  %v269_v48 = vld [vmem:[%s2165_s28 + $0x300] sm:$0xff]  ;;  %v271_v49 = vld [vmem:[%s2165_s28 + $0x308] sm:$0xff] }
  0x2e   : > { %v273_v50 = vld [vmem:[%s2165_s28 + $0x320] sm:$0xff]  ;;  %270 = vst [vmem:[%s2170_s29 + $0x180] sm:$0xff] %v269_v48  ;;  %272 = vst [vmem:[%s2170_s29 + $0x188] sm:$0xff] %v271_v49  ;;  %v275_v51 = vld [vmem:[%s2165_s28 + $0x328] sm:$0xff] }
  0x2f   : > { %274 = vst [vmem:[%s2170_s29 + $0x190] sm:$0xff] %v273_v50  ;;  %v277_v52 = vld [vmem:[%s2165_s28 + $0x340] sm:$0xff]  ;;  %v279_v53 = vld [vmem:[%s2165_s28 + $0x348] sm:$0xff]  ;;  %276 = vst [vmem:[%s2170_s29 + $0x198] sm:$0xff] %v275_v51 }
  0x30   : > { %278 = vst [vmem:[%s2170_s29 + $0x1a0] sm:$0xff] %v277_v52  ;;  %280 = vst [vmem:[%s2170_s29 + $0x1a8] sm:$0xff] %v279_v53  ;;  %v281_v54 = vld [vmem:[%s2165_s28 + $0x360] sm:$0xff]  ;;  %v283_v55 = vld [vmem:[%s2165_s28 + $0x368] sm:$0xff] }
  0x31   : > { %v285_v56 = vld [vmem:[%s2165_s28 + $0x380] sm:$0xff]  ;;  %282 = vst [vmem:[%s2170_s29 + $0x1b0] sm:$0xff] %v281_v54  ;;  %284 = vst [vmem:[%s2170_s29 + $0x1b8] sm:$0xff] %v283_v55  ;;  %v287_v57 = vld [vmem:[%s2165_s28 + $0x388] sm:$0xff] }
  0x32   : > { %286 = vst [vmem:[%s2170_s29 + $0x1c0] sm:$0xff] %v285_v56  ;;  %v289_v58 = vld [vmem:[%s2165_s28 + $0x3a0] sm:$0xff]  ;;  %v291_v59 = vld [vmem:[%s2165_s28 + $0x3a8] sm:$0xff]  ;;  %288 = vst [vmem:[%s2170_s29 + $0x1c8] sm:$0xff] %v287_v57 }
  0x33   : > { %290 = vst [vmem:[%s2170_s29 + $0x1d0] sm:$0xff] %v289_v58  ;;  %292 = vst [vmem:[%s2170_s29 + $0x1d8] sm:$0xff] %v291_v59  ;;  %v293_v60 = vld [vmem:[%s2165_s28 + $0x3c0] sm:$0xff]  ;;  %v295_v61 = vld [vmem:[%s2165_s28 + $0x3c8] sm:$0xff] }
  0x34   : > { %v297_v62 = vld [vmem:[%s2165_s28 + $0x3e0] sm:$0xff]  ;;  %294 = vst [vmem:[%s2170_s29 + $0x1e0] sm:$0xff] %v293_v60  ;;  %296 = vst [vmem:[%s2170_s29 + $0x1e8] sm:$0xff] %v295_v61  ;;  %v299_v63 = vld [vmem:[%s2165_s28 + $0x3e8] sm:$0xff] }
  0x35   : > { %298 = vst [vmem:[%s2170_s29 + $0x1f0] sm:$0xff] %v297_v62  ;;  %v301_v0 = vld [vmem:[%s2165_s28 + $0x400] sm:$0xff]  ;;  %v303_v1 = vld [vmem:[%s2165_s28 + $0x408] sm:$0xff]  ;;  %300 = vst [vmem:[%s2170_s29 + $0x1f8] sm:$0xff] %v299_v63 }
  0x36   : > { %302 = vst [vmem:[%s2170_s29 + $0x200] sm:$0xff] %v301_v0  ;;  %304 = vst [vmem:[%s2170_s29 + $0x208] sm:$0xff] %v303_v1  ;;  %v305_v2 = vld [vmem:[%s2165_s28 + $0x420] sm:$0xff]  ;;  %v307_v3 = vld [vmem:[%s2165_s28 + $0x428] sm:$0xff] }
  0x37   : > { %v309_v4 = vld [vmem:[%s2165_s28 + $0x440] sm:$0xff]  ;;  %306 = vst [vmem:[%s2170_s29 + $0x210] sm:$0xff] %v305_v2  ;;  %308 = vst [vmem:[%s2170_s29 + $0x218] sm:$0xff] %v307_v3  ;;  %v311_v5 = vld [vmem:[%s2165_s28 + $0x448] sm:$0xff] }
  0x38   : > { %310 = vst [vmem:[%s2170_s29 + $0x220] sm:$0xff] %v309_v4  ;;  %v313_v6 = vld [vmem:[%s2165_s28 + $0x460] sm:$0xff]  ;;  %v315_v7 = vld [vmem:[%s2165_s28 + $0x468] sm:$0xff]  ;;  %312 = vst [vmem:[%s2170_s29 + $0x228] sm:$0xff] %v311_v5 }
  0x39   : > { %314 = vst [vmem:[%s2170_s29 + $0x230] sm:$0xff] %v313_v6  ;;  %316 = vst [vmem:[%s2170_s29 + $0x238] sm:$0xff] %v315_v7  ;;  %v317_v8 = vld [vmem:[%s2165_s28 + $0x480] sm:$0xff]  ;;  %v319_v9 = vld [vmem:[%s2165_s28 + $0x488] sm:$0xff] }
  0x3a   : > { %v321_v10 = vld [vmem:[%s2165_s28 + $0x4a0] sm:$0xff]  ;;  %318 = vst [vmem:[%s2170_s29 + $0x240] sm:$0xff] %v317_v8  ;;  %320 = vst [vmem:[%s2170_s29 + $0x248] sm:$0xff] %v319_v9  ;;  %v323_v11 = vld [vmem:[%s2165_s28 + $0x4a8] sm:$0xff] }
  0x3b   : > { %322 = vst [vmem:[%s2170_s29 + $0x250] sm:$0xff] %v321_v10  ;;  %v325_v12 = vld [vmem:[%s2165_s28 + $0x4c0] sm:$0xff]  ;;  %v327_v13 = vld [vmem:[%s2165_s28 + $0x4c8] sm:$0xff]  ;;  %324 = vst [vmem:[%s2170_s29 + $0x258] sm:$0xff] %v323_v11 }
  0x3c   : > { %326 = vst [vmem:[%s2170_s29 + $0x260] sm:$0xff] %v325_v12  ;;  %328 = vst [vmem:[%s2170_s29 + $0x268] sm:$0xff] %v327_v13  ;;  %v329_v14 = vld [vmem:[%s2165_s28 + $0x4e0] sm:$0xff]  ;;  %v331_v15 = vld [vmem:[%s2165_s28 + $0x4e8] sm:$0xff] }
  0x3d   : > { %v333_v16 = vld [vmem:[%s2165_s28 + $0x500] sm:$0xff]  ;;  %330 = vst [vmem:[%s2170_s29 + $0x270] sm:$0xff] %v329_v14  ;;  %332 = vst [vmem:[%s2170_s29 + $0x278] sm:$0xff] %v331_v15  ;;  %v335_v17 = vld [vmem:[%s2165_s28 + $0x508] sm:$0xff] }
  0x3e   : > { %334 = vst [vmem:[%s2170_s29 + $0x280] sm:$0xff] %v333_v16  ;;  %v337_v18 = vld [vmem:[%s2165_s28 + $0x520] sm:$0xff]  ;;  %v339_v19 = vld [vmem:[%s2165_s28 + $0x528] sm:$0xff]  ;;  %336 = vst [vmem:[%s2170_s29 + $0x288] sm:$0xff] %v335_v17 }
  0x3f   : > { %338 = vst [vmem:[%s2170_s29 + $0x290] sm:$0xff] %v337_v18  ;;  %340 = vst [vmem:[%s2170_s29 + $0x298] sm:$0xff] %v339_v19  ;;  %v341_v20 = vld [vmem:[%s2165_s28 + $0x540] sm:$0xff]  ;;  %v343_v21 = vld [vmem:[%s2165_s28 + $0x548] sm:$0xff] }
  0x40   : > { %v345_v22 = vld [vmem:[%s2165_s28 + $0x560] sm:$0xff]  ;;  %342 = vst [vmem:[%s2170_s29 + $0x2a0] sm:$0xff] %v341_v20  ;;  %344 = vst [vmem:[%s2170_s29 + $0x2a8] sm:$0xff] %v343_v21  ;;  %v347_v23 = vld [vmem:[%s2165_s28 + $0x568] sm:$0xff] }
  0x41   : > { %346 = vst [vmem:[%s2170_s29 + $0x2b0] sm:$0xff] %v345_v22  ;;  %v349_v24 = vld [vmem:[%s2165_s28 + $0x580] sm:$0xff]  ;;  %v351_v25 = vld [vmem:[%s2165_s28 + $0x588] sm:$0xff]  ;;  %348 = vst [vmem:[%s2170_s29 + $0x2b8] sm:$0xff] %v347_v23 }
  0x42   : > { %350 = vst [vmem:[%s2170_s29 + $0x2c0] sm:$0xff] %v349_v24  ;;  %352 = vst [vmem:[%s2170_s29 + $0x2c8] sm:$0xff] %v351_v25  ;;  %v353_v26 = vld [vmem:[%s2165_s28 + $0x5a0] sm:$0xff]  ;;  %v355_v27 = vld [vmem:[%s2165_s28 + $0x5a8] sm:$0xff] }
  0x43   : > { %v357_v28 = vld [vmem:[%s2165_s28 + $0x5c0] sm:$0xff]  ;;  %354 = vst [vmem:[%s2170_s29 + $0x2d0] sm:$0xff] %v353_v26  ;;  %356 = vst [vmem:[%s2170_s29 + $0x2d8] sm:$0xff] %v355_v27  ;;  %v359_v29 = vld [vmem:[%s2165_s28 + $0x5c8] sm:$0xff] }
  0x44   : > { %358 = vst [vmem:[%s2170_s29 + $0x2e0] sm:$0xff] %v357_v28  ;;  %v361_v30 = vld [vmem:[%s2165_s28 + $0x5e0] sm:$0xff]  ;;  %v363_v31 = vld [vmem:[%s2165_s28 + $0x5e8] sm:$0xff]  ;;  %360 = vst [vmem:[%s2170_s29 + $0x2e8] sm:$0xff] %v359_v29 }
  0x45   : > { %362 = vst [vmem:[%s2170_s29 + $0x2f0] sm:$0xff] %v361_v30  ;;  %364 = vst [vmem:[%s2170_s29 + $0x2f8] sm:$0xff] %v363_v31  ;;  %v365_v32 = vld [vmem:[%s2165_s28 + $0x600] sm:$0xff]  ;;  %v367_v33 = vld [vmem:[%s2165_s28 + $0x608] sm:$0xff] }
  0x46   : > { %v369_v34 = vld [vmem:[%s2165_s28 + $0x620] sm:$0xff]  ;;  %366 = vst [vmem:[%s2170_s29 + $0x300] sm:$0xff] %v365_v32  ;;  %368 = vst [vmem:[%s2170_s29 + $0x308] sm:$0xff] %v367_v33  ;;  %v371_v35 = vld [vmem:[%s2165_s28 + $0x628] sm:$0xff] }
  0x47   : > { %370 = vst [vmem:[%s2170_s29 + $0x310] sm:$0xff] %v369_v34  ;;  %v373_v36 = vld [vmem:[%s2165_s28 + $0x640] sm:$0xff]  ;;  %v375_v37 = vld [vmem:[%s2165_s28 + $0x648] sm:$0xff]  ;;  %372 = vst [vmem:[%s2170_s29 + $0x318] sm:$0xff] %v371_v35 }
  0x48   : > { %374 = vst [vmem:[%s2170_s29 + $0x320] sm:$0xff] %v373_v36  ;;  %376 = vst [vmem:[%s2170_s29 + $0x328] sm:$0xff] %v375_v37  ;;  %v377_v38 = vld [vmem:[%s2165_s28 + $0x660] sm:$0xff]  ;;  %v379_v39 = vld [vmem:[%s2165_s28 + $0x668] sm:$0xff] }
  0x49   : > { %v381_v40 = vld [vmem:[%s2165_s28 + $0x680] sm:$0xff]  ;;  %378 = vst [vmem:[%s2170_s29 + $0x330] sm:$0xff] %v377_v38  ;;  %380 = vst [vmem:[%s2170_s29 + $0x338] sm:$0xff] %v379_v39  ;;  %v383_v41 = vld [vmem:[%s2165_s28 + $0x688] sm:$0xff] }
  0x4a   : > { %382 = vst [vmem:[%s2170_s29 + $0x340] sm:$0xff] %v381_v40  ;;  %v385_v42 = vld [vmem:[%s2165_s28 + $0x6a0] sm:$0xff]  ;;  %v387_v43 = vld [vmem:[%s2165_s28 + $0x6a8] sm:$0xff]  ;;  %384 = vst [vmem:[%s2170_s29 + $0x348] sm:$0xff] %v383_v41 }
  0x4b   : > { %386 = vst [vmem:[%s2170_s29 + $0x350] sm:$0xff] %v385_v42  ;;  %388 = vst [vmem:[%s2170_s29 + $0x358] sm:$0xff] %v387_v43  ;;  %v389_v44 = vld [vmem:[%s2165_s28 + $0x6c0] sm:$0xff]  ;;  %v391_v45 = vld [vmem:[%s2165_s28 + $0x6c8] sm:$0xff] }
  0x4c   : > { %v393_v46 = vld [vmem:[%s2165_s28 + $0x6e0] sm:$0xff]  ;;  %390 = vst [vmem:[%s2170_s29 + $0x360] sm:$0xff] %v389_v44  ;;  %392 = vst [vmem:[%s2170_s29 + $0x368] sm:$0xff] %v391_v45  ;;  %v395_v47 = vld [vmem:[%s2165_s28 + $0x6e8] sm:$0xff] }
  0x4d   : > { %394 = vst [vmem:[%s2170_s29 + $0x370] sm:$0xff] %v393_v46  ;;  %v397_v48 = vld [vmem:[%s2165_s28 + $0x700] sm:$0xff]  ;;  %v399_v49 = vld [vmem:[%s2165_s28 + $0x708] sm:$0xff]  ;;  %396 = vst [vmem:[%s2170_s29 + $0x378] sm:$0xff] %v395_v47 }
  0x4e   : > { %398 = vst [vmem:[%s2170_s29 + $0x380] sm:$0xff] %v397_v48  ;;  %400 = vst [vmem:[%s2170_s29 + $0x388] sm:$0xff] %v399_v49  ;;  %v401_v50 = vld [vmem:[%s2165_s28 + $0x720] sm:$0xff]  ;;  %v403_v51 = vld [vmem:[%s2165_s28 + $0x728] sm:$0xff] }
  0x4f   : > { %v405_v52 = vld [vmem:[%s2165_s28 + $0x740] sm:$0xff]  ;;  %402 = vst [vmem:[%s2170_s29 + $0x390] sm:$0xff] %v401_v50  ;;  %404 = vst [vmem:[%s2170_s29 + $0x398] sm:$0xff] %v403_v51  ;;  %v407_v53 = vld [vmem:[%s2165_s28 + $0x748] sm:$0xff] }
  0x50   : > { %406 = vst [vmem:[%s2170_s29 + $0x3a0] sm:$0xff] %v405_v52  ;;  %v409_v54 = vld [vmem:[%s2165_s28 + $0x760] sm:$0xff]  ;;  %v411_v55 = vld [vmem:[%s2165_s28 + $0x768] sm:$0xff]  ;;  %408 = vst [vmem:[%s2170_s29 + $0x3a8] sm:$0xff] %v407_v53 }
  0x51   : > { %410 = vst [vmem:[%s2170_s29 + $0x3b0] sm:$0xff] %v409_v54  ;;  %412 = vst [vmem:[%s2170_s29 + $0x3b8] sm:$0xff] %v411_v55  ;;  %v413_v56 = vld [vmem:[%s2165_s28 + $0x780] sm:$0xff]  ;;  %v415_v57 = vld [vmem:[%s2165_s28 + $0x788] sm:$0xff] }
  0x52   : > { %v417_v58 = vld [vmem:[%s2165_s28 + $0x7a0] sm:$0xff]  ;;  %414 = vst [vmem:[%s2170_s29 + $0x3c0] sm:$0xff] %v413_v56  ;;  %416 = vst [vmem:[%s2170_s29 + $0x3c8] sm:$0xff] %v415_v57  ;;  %v419_v59 = vld [vmem:[%s2165_s28 + $0x7a8] sm:$0xff] }
  0x53   : > { %418 = vst [vmem:[%s2170_s29 + $0x3d0] sm:$0xff] %v417_v58  ;;  %v421_v60 = vld [vmem:[%s2165_s28 + $0x7c0] sm:$0xff]  ;;  %v423_v61 = vld [vmem:[%s2165_s28 + $0x7c8] sm:$0xff]  ;;  %420 = vst [vmem:[%s2170_s29 + $0x3d8] sm:$0xff] %v419_v59 }
  0x54   : > { %422 = vst [vmem:[%s2170_s29 + $0x3e0] sm:$0xff] %v421_v60  ;;  %424 = vst [vmem:[%s2170_s29 + $0x3e8] sm:$0xff] %v423_v61  ;;  %v425_v62 = vld [vmem:[%s2165_s28 + $0x7e0] sm:$0xff]  ;;  %v427_v63 = vld [vmem:[%s2165_s28 + $0x7e8] sm:$0xff] }
  0x55   : > { %426 = vst [vmem:[%s2170_s29 + $0x3f0] sm:$0xff] %v425_v62  ;;  %428 = vst [vmem:[%s2170_s29 + $0x3f8] sm:$0xff] %v427_v63 }
  0x56 PF: > { %p1877_p8 = scmp.ge.s32.totalorder %s2095_s16, 1  ;;  %p449_p9 = scmp.lt.s32.totalorder %s2095_s16, 3 }
  0x58   : > { %p450_p10 = pnand %p1877_p8, %p449_p9 }
  0x59   : > { %s456_s30 = sand.u32 (!%p450_p10), 1, %s2079_s12   ;;  %s1880_s4 = sshll.u32 (!%p450_p10), %s2087_s14, 1  ;;  %v630_v0 = vlaneseq (!%p450_p10) }
  0x5a   : > { %453 = sbr.rel (%p450_p10) target bundleno = 241 (0xf1), region = 51  ;;  %s1878_s5 = sshll.u32 (!%p450_p10), %s456_s30, 10 }
  0x5b   : > { %v631_v1 = vshrl.u32 (!%p450_p10), %v630_v0, 7  ;;  %p489_p11 = scmp.lt.s32.totalorder (!%p450_p10), %s1880_s4, 3  ;;  %s2429_s6 = scalar_lea.vmem (!%p450_p10), [#allocation2], %s1878_s5 }
  0x5c   : > { %v500_v4 = vld [vmem:[%s2429_s6] sm:$0xff] (!%p450_p10)  ;;  %v501_v5 = vld [vmem:[%s2429_s6 + $0x8] sm:$0xff] (!%p450_p10)  ;;  %v502_v6 = vld [vmem:[%s2429_s6 + $0x10] sm:$0xff] (!%p450_p10)  ;;  %s2453_s18 = sshll.u32 (!%p450_p10), %s456_s30, 9 }
  0x5d   : > { %v632_v2 = vsub.s32 (!%p450_p10), 0, %v631_v1  ;;  %v636_v3 = vsub.s32 (!%p450_p10), 1, %v631_v1  ;;  %v503_v7 = vld [vmem:[%s2429_s6 + $0x18] sm:$0xff] (!%p450_p10)  ;;  %v504_v10 = vld [vmem:[%s2429_s6 + $0x20] sm:$0xff] (!%p450_p10)  ;;  %v505_v15 = vld [vmem:[%s2429_s6 + $0x28] sm:$0xff] (!%p450_p10)  ;;  %s2484_s19 = scalar_lea.vmem (!%p450_p10), [#allocation3], %s2453_s18 }
  0x5e   : > { %v506_v16 = vld [vmem:[%s2429_s6 + $0x30] sm:$0xff] (!%p450_p10)  ;;  %v507_v17 = vld [vmem:[%s2429_s6 + $0x38] sm:$0xff] (!%p450_p10)  ;;  %v508_v34 = vld [vmem:[%s2429_s6 + $0x40] sm:$0xff] (!%p450_p10) }
  0x5f   : > { %v509_v35 = vld [vmem:[%s2429_s6 + $0x48] sm:$0xff] (!%p450_p10)  ;;  %v510_v40 = vld [vmem:[%s2429_s6 + $0x50] sm:$0xff] (!%p450_p10)  ;;  %v511_v41 = vld [vmem:[%s2429_s6 + $0x58] sm:$0xff] (!%p450_p10) }
  0x60   : > { %v512_v46 = vld [vmem:[%s2429_s6 + $0x60] sm:$0xff] (!%p450_p10)  ;;  %v513_v47 = vld [vmem:[%s2429_s6 + $0x68] sm:$0xff] (!%p450_p10)  ;;  %v514_v52 = vld [vmem:[%s2429_s6 + $0x70] sm:$0xff] (!%p450_p10) }
  0x61   : > { %s3061_s4 = smov (!%p489_p11, %s1880_s4), 3  ;;  %v515_v53 = vld [vmem:[%s2429_s6 + $0x78] sm:$0xff]  ;;  %s2016_s20 = sshll.u32 (%p2152_p6), %s2087_s14, 3 }
  0x62   : > { %s491_s9 = scalar_lea.vmem %s3050_s1, %s3061_s4  ;;  %s496_s12 = scalar_lea.vmem %s3051_s2, %s3061_s4 }
  0x63   : > { %v628_v8 = vld [vmem:[%s491_s9] sm:$0x3]  ;;  %s2907_s25 = scalar_lea.vmem (%p2152_p6), %s3052_s3, %s2016_s20 }
  0x64   : > { %v768_v9 = vld [vmem:[%s496_s12] sm:$0x3]  ;;  %v2442_v11 = vrot.slane %v628_v8, %v632_v2  ;;  %v2444_v12 = vrot.slane %v628_v8, %v636_v3 }
  0x65   : > { %v2446_v13 = vrot.slane %v768_v9, %v632_v2  ;;  %v2448_v14 = vrot.slane %v768_v9, %v636_v3  ;;  %v516_v2 = vld [vmem:[%s2429_s6 + $0x80] sm:$0xff] }
  0x66   : > { %v640_v18 = vmul.f32 %v2442_v11, %v500_v4  ;;  %v641_v19 = vmul.f32 %v2444_v12, %v501_v5  ;;  %v642_v20 = vmul.f32 %v2442_v11, %v502_v6  ;;  %v643_v21 = vmul.f32 %v2444_v12, %v503_v7  ;;  %v517_v7 = vld [vmem:[%s2429_s6 + $0x88] sm:$0xff] }
  0x67   : > { %v644_v22 = vmul.f32 %v2442_v11, %v504_v10  ;;  %v645_v23 = vmul.f32 %v2444_v12, %v505_v15  ;;  %v646_v24 = vmul.f32 %v2442_v11, %v506_v16  ;;  %v647_v25 = vmul.f32 %v2444_v12, %v507_v17  ;;  %v518_v16 = vld [vmem:[%s2429_s6 + $0x90] sm:$0xff]  ;;  %v519_v17 = vld [vmem:[%s2429_s6 + $0x98] sm:$0xff] }
  0x68   : > { %v780_v26 = vadd.f32 %v2446_v13, %v640_v18  ;;  %v781_v27 = vadd.f32 %v2448_v14, %v641_v19  ;;  %v782_v28 = vadd.f32 %v2446_v13, %v642_v20  ;;  %v783_v29 = vadd.f32 %v2448_v14, %v643_v21 }
  0x69   : > { %v784_v30 = vadd.f32 %v2446_v13, %v644_v22  ;;  %v785_v31 = vadd.f32 %v2448_v14, %v645_v23  ;;  %v786_v32 = vadd.f32 %v2446_v13, %v646_v24  ;;  %v787_v33 = vadd.f32 %v2448_v14, %v647_v25  ;;  %v520_v22 = vld [vmem:[%s2429_s6 + $0xa0] sm:$0xff]  ;;  %v521_v23 = vld [vmem:[%s2429_s6 + $0xa8] sm:$0xff] }
  0x6a   : > { %v908_v36 = vmax.f32 %v780_v26, 0.0  ;;  %v909_v37 = vmax.f32 %v781_v27, 0.0  ;;  %v910_v38 = vmax.f32 %v782_v28, 0.0  ;;  %v911_v39 = vmax.f32 %v783_v29, 0.0  ;;  %v522_v28 = vld [vmem:[%s2429_s6 + $0xb0] sm:$0xff] }
  0x6b   : > { %v912_v42 = vmax.f32 %v784_v30, 0.0  ;;  %v913_v43 = vmax.f32 %v785_v31, 0.0  ;;  %v914_v44 = vmax.f32 %v786_v32, 0.0  ;;  %v915_v45 = vmax.f32 %v787_v33, 0.0  ;;  %v523_v33 = vld [vmem:[%s2429_s6 + $0xb8] sm:$0xff] }
  0x6c   : > { %v1952_v48 = vpack.c.bf16 %v909_v37, %v908_v36  ;;  %v1953_v49 = vpack.c.bf16 %v911_v39, %v910_v38  ;;  %v648_v50 = vmul.f32 %v2442_v11, %v508_v34  ;;  %v649_v51 = vmul.f32 %v2444_v12, %v509_v35  ;;  %v524_v38 = vld [vmem:[%s2429_s6 + $0xc0] sm:$0xff] }
  0x6d   : > { %v1954_v54 = vpack.c.bf16 %v913_v43, %v912_v42  ;;  %v1955_v55 = vpack.c.bf16 %v915_v45, %v914_v44  ;;  %v650_v56 = vmul.f32 %v2442_v11, %v510_v40  ;;  %v651_v57 = vmul.f32 %v2444_v12, %v511_v41 }
  0x6e   : > { %1420 = vst [vmem:[%s2484_s19] sm:$0xff] %v1952_v48  ;;  %1421 = vst [vmem:[%s2484_s19 + $0x8] sm:$0xff] %v1953_v49  ;;  %v788_v58 = vadd.f32 %v2446_v13, %v648_v50  ;;  %v789_v59 = vadd.f32 %v2448_v14, %v649_v51  ;;  %v652_v60 = vmul.f32 %v2442_v11, %v512_v46 }
  0x6f   : > { %v653_v61 = vmul.f32 %v2444_v12, %v513_v47  ;;  %1422 = vst [vmem:[%s2484_s19 + $0x10] sm:$0xff] %v1954_v54  ;;  %1423 = vst [vmem:[%s2484_s19 + $0x18] sm:$0xff] %v1955_v55  ;;  %v790_v62 = vadd.f32 %v2446_v13, %v650_v56  ;;  %v791_v63 = vadd.f32 %v2448_v14, %v651_v57  ;;  %v525_v47 = vld [vmem:[%s2429_s6 + $0xc8] sm:$0xff] }
  0x70   : > { %v654_v0 = vmul.f32 %v2442_v11, %v514_v52  ;;  %v655_v1 = vmul.f32 %v2444_v12, %v515_v53  ;;  %v916_v3 = vmax.f32 %v788_v58, 0.0  ;;  %v917_v4 = vmax.f32 %v789_v59, 0.0  ;;  %v526_v52 = vld [vmem:[%s2429_s6 + $0xd0] sm:$0xff]  ;;  %v527_v53 = vld [vmem:[%s2429_s6 + $0xd8] sm:$0xff]  ;;  %v528_v58 = vld [vmem:[%s2429_s6 + $0xe0] sm:$0xff] }
  0x71   : > { %v792_v5 = vadd.f32 %v2446_v13, %v652_v60  ;;  %v793_v6 = vadd.f32 %v2448_v14, %v653_v61  ;;  %v918_v8 = vmax.f32 %v790_v62, 0.0  ;;  %v919_v9 = vmax.f32 %v791_v63, 0.0  ;;  %v529_v59 = vld [vmem:[%s2429_s6 + $0xe8] sm:$0xff] }
  0x72   : > { %v794_v10 = vadd.f32 %v2446_v13, %v654_v0  ;;  %v795_v15 = vadd.f32 %v2448_v14, %v655_v1  ;;  %v1956_v18 = vpack.c.bf16 %v917_v4, %v916_v3  ;;  %v656_v21 = vmul.f32 %v2442_v11, %v516_v2  ;;  %v530_v0 = vld [vmem:[%s2429_s6 + $0xf0] sm:$0xff] }
  0x73   : > { %v920_v19 = vmax.f32 %v792_v5, 0.0  ;;  %v921_v20 = vmax.f32 %v793_v6, 0.0  ;;  %v1957_v24 = vpack.c.bf16 %v919_v9, %v918_v8  ;;  %v657_v27 = vmul.f32 %v2444_v12, %v517_v7  ;;  %v531_v5 = vld [vmem:[%s2429_s6 + $0xf8] sm:$0xff] }
  0x74   : > { %v922_v25 = vmax.f32 %v794_v10, 0.0  ;;  %v923_v26 = vmax.f32 %v795_v15, 0.0  ;;  %1424 = vst [vmem:[%s2484_s19 + $0x20] sm:$0xff] %v1956_v18  ;;  %v796_v30 = vadd.f32 %v2446_v13, %v656_v21  ;;  %v658_v31 = vmul.f32 %v2442_v11, %v518_v16  ;;  %v532_v10 = vld [vmem:[%s2429_s6 + $0x100] sm:$0xff] }
  0x75   : > { %v1958_v29 = vpack.c.bf16 %v921_v20, %v920_v19  ;;  %v659_v32 = vmul.f32 %v2444_v12, %v519_v17  ;;  %1425 = vst [vmem:[%s2484_s19 + $0x28] sm:$0xff] %v1957_v24  ;;  %v797_v35 = vadd.f32 %v2448_v14, %v657_v27  ;;  %v660_v36 = vmul.f32 %v2442_v11, %v520_v22 }
  0x76   : > { %v1959_v34 = vpack.c.bf16 %v923_v26, %v922_v25  ;;  %v661_v37 = vmul.f32 %v2444_v12, %v521_v23  ;;  %v924_v39 = vmax.f32 %v796_v30, 0.0  ;;  %v798_v40 = vadd.f32 %v2446_v13, %v658_v31  ;;  %v533_v23 = vld [vmem:[%s2429_s6 + $0x108] sm:$0xff] }
  0x77   : > { %1426 = vst [vmem:[%s2484_s19 + $0x30] sm:$0xff] %v1958_v29  ;;  %v799_v41 = vadd.f32 %v2448_v14, %v659_v32  ;;  %v662_v42 = vmul.f32 %v2442_v11, %v522_v28  ;;  %v925_v43 = vmax.f32 %v797_v35, 0.0  ;;  %v800_v44 = vadd.f32 %v2446_v13, %v660_v36  ;;  %v534_v28 = vld [vmem:[%s2429_s6 + $0x110] sm:$0xff]  ;;  %v535_v29 = vld [vmem:[%s2429_s6 + $0x118] sm:$0xff]  ;;  %v537_v35 = vld [vmem:[%s2429_s6 + $0x128] sm:$0xff] }
  0x78   : > { %1427 = vst [vmem:[%s2484_s19 + $0x38] sm:$0xff] %v1959_v34  ;;  %v801_v45 = vadd.f32 %v2448_v14, %v661_v37  ;;  %v663_v46 = vmul.f32 %v2444_v12, %v523_v33  ;;  %v926_v48 = vmax.f32 %v798_v40, 0.0  ;;  %v664_v51 = vmul.f32 %v2442_v11, %v524_v38  ;;  %v536_v34 = vld [vmem:[%s2429_s6 + $0x120] sm:$0xff]  ;;  %v538_v40 = vld [vmem:[%s2429_s6 + $0x130] sm:$0xff] }
  0x79   : > { %v927_v49 = vmax.f32 %v799_v41, 0.0  ;;  %v802_v50 = vadd.f32 %v2446_v13, %v662_v42  ;;  %v1960_v54 = vpack.c.bf16 %v925_v43, %v924_v39  ;;  %v928_v55 = vmax.f32 %v800_v44, 0.0 }
  0x7a   : > { %v929_v56 = vmax.f32 %v801_v45, 0.0  ;;  %v803_v57 = vadd.f32 %v2448_v14, %v663_v46  ;;  %v665_v62 = vmul.f32 %v2444_v12, %v525_v47  ;;  %v804_v63 = vadd.f32 %v2446_v13, %v664_v51  ;;  %v539_v45 = vld [vmem:[%s2429_s6 + $0x138] sm:$0xff] }
  0x7b   : > { %v1961_v60 = vpack.c.bf16 %v927_v49, %v926_v48  ;;  %v930_v61 = vmax.f32 %v802_v50, 0.0  ;;  %1428 = vst [vmem:[%s2484_s19 + $0x40] sm:$0xff] %v1960_v54  ;;  %v666_v3 = vmul.f32 %v2442_v11, %v526_v52  ;;  %v667_v4 = vmul.f32 %v2444_v12, %v527_v53  ;;  %v540_v50 = vld [vmem:[%s2429_s6 + $0x140] sm:$0xff] }
  0x7c   : > { %v1962_v1 = vpack.c.bf16 %v929_v56, %v928_v55  ;;  %v931_v2 = vmax.f32 %v803_v57, 0.0  ;;  %v805_v6 = vadd.f32 %v2448_v14, %v665_v62  ;;  %v932_v7 = vmax.f32 %v804_v63, 0.0 }
  0x7d   : > { %1429 = vst [vmem:[%s2484_s19 + $0x48] sm:$0xff] %v1961_v60  ;;  %v668_v8 = vmul.f32 %v2442_v11, %v528_v58  ;;  %v669_v9 = vmul.f32 %v2444_v12, %v529_v59  ;;  %v806_v16 = vadd.f32 %v2446_v13, %v666_v3  ;;  %v807_v17 = vadd.f32 %v2448_v14, %v667_v4  ;;  %v541_v59 = vld [vmem:[%s2429_s6 + $0x148] sm:$0xff] }
  0x7e   : > { %1430 = vst [vmem:[%s2484_s19 + $0x50] sm:$0xff] %v1962_v1  ;;  %v1963_v15 = vpack.c.bf16 %v931_v2, %v930_v61  ;;  %v670_v18 = vmul.f32 %v2442_v11, %v530_v0  ;;  %v933_v19 = vmax.f32 %v805_v6, 0.0  ;;  %v671_v22 = vmul.f32 %v2444_v12, %v531_v5  ;;  %v542_v0 = vld [vmem:[%s2429_s6 + $0x150] sm:$0xff]  ;;  %v543_v1 = vld [vmem:[%s2429_s6 + $0x158] sm:$0xff]  ;;  %v544_v6 = vld [vmem:[%s2429_s6 + $0x160] sm:$0xff] }
  0x7f   : > { %v808_v20 = vadd.f32 %v2446_v13, %v668_v8  ;;  %v809_v21 = vadd.f32 %v2448_v14, %v669_v9  ;;  %v934_v24 = vmax.f32 %v806_v16, 0.0  ;;  %v935_v25 = vmax.f32 %v807_v17, 0.0  ;;  %v546_v16 = vld [vmem:[%s2429_s6 + $0x170] sm:$0xff] }
  0x80   : > { %1431 = vst [vmem:[%s2484_s19 + $0x58] sm:$0xff] %v1963_v15  ;;  %v810_v26 = vadd.f32 %v2446_v13, %v670_v18  ;;  %v672_v27 = vmul.f32 %v2442_v11, %v532_v10  ;;  %v1964_v30 = vpack.c.bf16 %v933_v19, %v932_v7  ;;  %v811_v33 = vadd.f32 %v2448_v14, %v671_v22  ;;  %v545_v7 = vld [vmem:[%s2429_s6 + $0x168] sm:$0xff] }
  0x81   : > { %v936_v31 = vmax.f32 %v808_v20, 0.0  ;;  %v937_v32 = vmax.f32 %v809_v21, 0.0  ;;  %v1965_v36 = vpack.c.bf16 %v935_v25, %v934_v24  ;;  %v673_v38 = vmul.f32 %v2444_v12, %v533_v23  ;;  %v547_v21 = vld [vmem:[%s2429_s6 + $0x178] sm:$0xff] }
  0x82   : > { %v938_v37 = vmax.f32 %v810_v26, 0.0  ;;  %v812_v39 = vadd.f32 %v2446_v13, %v672_v27  ;;  %1432 = vst [vmem:[%s2484_s19 + $0x60] sm:$0xff] %v1964_v30  ;;  %v939_v42 = vmax.f32 %v811_v33, 0.0  ;;  %v674_v43 = vmul.f32 %v2442_v11, %v534_v28  ;;  %v548_v26 = vld [vmem:[%s2429_s6 + $0x180] sm:$0xff] }
  0x83   : > { %v1966_v41 = vpack.c.bf16 %v937_v32, %v936_v31  ;;  %v675_v44 = vmul.f32 %v2444_v12, %v535_v29  ;;  %1433 = vst [vmem:[%s2484_s19 + $0x68] sm:$0xff] %v1965_v36  ;;  %v813_v46 = vadd.f32 %v2448_v14, %v673_v38  ;;  %v676_v48 = vmul.f32 %v2442_v11, %v536_v34 }
  0x84   : > { %v940_v47 = vmax.f32 %v812_v39, 0.0  ;;  %v677_v49 = vmul.f32 %v2444_v12, %v537_v35  ;;  %v1967_v51 = vpack.c.bf16 %v939_v42, %v938_v37  ;;  %v814_v52 = vadd.f32 %v2446_v13, %v674_v43  ;;  %v549_v35 = vld [vmem:[%s2429_s6 + $0x188] sm:$0xff] }
  0x85   : > { %1434 = vst [vmem:[%s2484_s19 + $0x70] sm:$0xff] %v1966_v41  ;;  %v815_v53 = vadd.f32 %v2448_v14, %v675_v44  ;;  %v678_v54 = vmul.f32 %v2442_v11, %v538_v40  ;;  %v941_v55 = vmax.f32 %v813_v46, 0.0  ;;  %v816_v56 = vadd.f32 %v2446_v13, %v676_v48  ;;  %v550_v40 = vld [vmem:[%s2429_s6 + $0x190] sm:$0xff]  ;;  %v551_v41 = vld [vmem:[%s2429_s6 + $0x198] sm:$0xff]  ;;  %v552_v46 = vld [vmem:[%s2429_s6 + $0x1a0] sm:$0xff] }
  0x86   : > { %v817_v57 = vadd.f32 %v2448_v14, %v677_v49  ;;  %v679_v58 = vmul.f32 %v2444_v12, %v539_v45  ;;  %1435 = vst [vmem:[%s2484_s19 + $0x78] sm:$0xff] %v1967_v51  ;;  %v942_v60 = vmax.f32 %v814_v52, 0.0  ;;  %v680_v63 = vmul.f32 %v2442_v11, %v540_v50  ;;  %v554_v52 = vld [vmem:[%s2429_s6 + $0x1b0] sm:$0xff] }
  0x87   : > { %v943_v61 = vmax.f32 %v815_v53, 0.0  ;;  %v818_v62 = vadd.f32 %v2446_v13, %v678_v54  ;;  %v1968_v2 = vpack.c.bf16 %v941_v55, %v940_v47  ;;  %v944_v3 = vmax.f32 %v816_v56, 0.0  ;;  %v553_v47 = vld [vmem:[%s2429_s6 + $0x1a8] sm:$0xff] }
  0x88   : > { %v945_v4 = vmax.f32 %v817_v57, 0.0  ;;  %v819_v5 = vadd.f32 %v2448_v14, %v679_v58  ;;  %v681_v10 = vmul.f32 %v2444_v12, %v541_v59  ;;  %v820_v15 = vadd.f32 %v2446_v13, %v680_v63  ;;  %v555_v57 = vld [vmem:[%s2429_s6 + $0x1b8] sm:$0xff] }
  0x89   : > { %v1969_v8 = vpack.c.bf16 %v943_v61, %v942_v60  ;;  %v946_v9 = vmax.f32 %v818_v62, 0.0  ;;  %1436 = vst [vmem:[%s2484_s19 + $0x80] sm:$0xff] %v1968_v2  ;;  %v682_v19 = vmul.f32 %v2442_v11, %v542_v0  ;;  %v683_v20 = vmul.f32 %v2444_v12, %v543_v1  ;;  %v556_v62 = vld [vmem:[%s2429_s6 + $0x1c0] sm:$0xff] }
  0x8a   : > { %v1970_v17 = vpack.c.bf16 %v945_v4, %v944_v3  ;;  %v947_v18 = vmax.f32 %v819_v5, 0.0  ;;  %v821_v22 = vadd.f32 %v2448_v14, %v681_v10  ;;  %v948_v23 = vmax.f32 %v820_v15, 0.0 }
  0x8b   : > { %1437 = vst [vmem:[%s2484_s19 + $0x88] sm:$0xff] %v1969_v8  ;;  %v684_v24 = vmul.f32 %v2442_v11, %v544_v6  ;;  %v685_v25 = vmul.f32 %v2444_v12, %v545_v7  ;;  %v822_v28 = vadd.f32 %v2446_v13, %v682_v19  ;;  %v823_v29 = vadd.f32 %v2448_v14, %v683_v20  ;;  %v557_v7 = vld [vmem:[%s2429_s6 + $0x1c8] sm:$0xff] }
  0x8c   : > { %1438 = vst [vmem:[%s2484_s19 + $0x90] sm:$0xff] %v1970_v17  ;;  %v1971_v27 = vpack.c.bf16 %v947_v18, %v946_v9  ;;  %v686_v30 = vmul.f32 %v2442_v11, %v546_v16  ;;  %v949_v31 = vmax.f32 %v821_v22, 0.0  ;;  %v687_v34 = vmul.f32 %v2444_v12, %v547_v21  ;;  %v558_v16 = vld [vmem:[%s2429_s6 + $0x1d0] sm:$0xff]  ;;  %v559_v17 = vld [vmem:[%s2429_s6 + $0x1d8] sm:$0xff]  ;;  %v560_v22 = vld [vmem:[%s2429_s6 + $0x1e0] sm:$0xff] }
  0x8d   : > { %v824_v32 = vadd.f32 %v2446_v13, %v684_v24  ;;  %v825_v33 = vadd.f32 %v2448_v14, %v685_v25  ;;  %v950_v36 = vmax.f32 %v822_v28, 0.0  ;;  %v951_v37 = vmax.f32 %v823_v29, 0.0  ;;  %v562_v28 = vld [vmem:[%s2429_s6 + $0x1f0] sm:$0xff] }
  0x8e   : > { %1439 = vst [vmem:[%s2484_s19 + $0x98] sm:$0xff] %v1971_v27  ;;  %v826_v38 = vadd.f32 %v2446_v13, %v686_v30  ;;  %v688_v39 = vmul.f32 %v2442_v11, %v548_v26  ;;  %v1972_v42 = vpack.c.bf16 %v949_v31, %v948_v23  ;;  %v827_v45 = vadd.f32 %v2448_v14, %v687_v34  ;;  %v561_v23 = vld [vmem:[%s2429_s6 + $0x1e8] sm:$0xff] }
  0x8f   : > { %v952_v43 = vmax.f32 %v824_v32, 0.0  ;;  %v953_v44 = vmax.f32 %v825_v33, 0.0  ;;  %v1973_v48 = vpack.c.bf16 %v951_v37, %v950_v36  ;;  %v689_v50 = vmul.f32 %v2444_v12, %v549_v35  ;;  %v563_v33 = vld [vmem:[%s2429_s6 + $0x1f8] sm:$0xff] }
  0x90   : > { %v954_v49 = vmax.f32 %v826_v38, 0.0  ;;  %v828_v51 = vadd.f32 %v2446_v13, %v688_v39  ;;  %1440 = vst [vmem:[%s2484_s19 + $0xa0] sm:$0xff] %v1972_v42  ;;  %v955_v54 = vmax.f32 %v827_v45, 0.0  ;;  %v690_v55 = vmul.f32 %v2442_v11, %v550_v40  ;;  %v564_v38 = vld [vmem:[%s2429_s6 + $0x200] sm:$0xff] }
  0x91   : > { %v1974_v53 = vpack.c.bf16 %v953_v44, %v952_v43  ;;  %v691_v56 = vmul.f32 %v2444_v12, %v551_v41  ;;  %1441 = vst [vmem:[%s2484_s19 + $0xa8] sm:$0xff] %v1973_v48  ;;  %v829_v58 = vadd.f32 %v2448_v14, %v689_v50  ;;  %v692_v60 = vmul.f32 %v2442_v11, %v552_v46 }
  0x92   : > { %v956_v59 = vmax.f32 %v828_v51, 0.0  ;;  %v693_v61 = vmul.f32 %v2444_v12, %v553_v47  ;;  %v1975_v63 = vpack.c.bf16 %v955_v54, %v954_v49  ;;  %v830_v0 = vadd.f32 %v2446_v13, %v690_v55  ;;  %v565_v47 = vld [vmem:[%s2429_s6 + $0x208] sm:$0xff] }
  0x93   : > { %1442 = vst [vmem:[%s2484_s19 + $0xb0] sm:$0xff] %v1974_v53  ;;  %v831_v1 = vadd.f32 %v2448_v14, %v691_v56  ;;  %v694_v2 = vmul.f32 %v2442_v11, %v554_v52  ;;  %v957_v3 = vmax.f32 %v829_v58, 0.0  ;;  %v832_v4 = vadd.f32 %v2446_v13, %v692_v60  ;;  %v566_v52 = vld [vmem:[%s2429_s6 + $0x210] sm:$0xff]  ;;  %v567_v53 = vld [vmem:[%s2429_s6 + $0x218] sm:$0xff]  ;;  %v568_v58 = vld [vmem:[%s2429_s6 + $0x220] sm:$0xff] }
  0x94   : > { %v833_v5 = vadd.f32 %v2448_v14, %v693_v61  ;;  %v695_v6 = vmul.f32 %v2444_v12, %v555_v57  ;;  %1443 = vst [vmem:[%s2484_s19 + $0xb8] sm:$0xff] %v1975_v63  ;;  %v958_v8 = vmax.f32 %v830_v0, 0.0  ;;  %v696_v15 = vmul.f32 %v2442_v11, %v556_v62  ;;  %v570_v0 = vld [vmem:[%s2429_s6 + $0x230] sm:$0xff] }
  0x95   : > { %v959_v9 = vmax.f32 %v831_v1, 0.0  ;;  %v834_v10 = vadd.f32 %v2446_v13, %v694_v2  ;;  %v1976_v18 = vpack.c.bf16 %v957_v3, %v956_v59  ;;  %v960_v19 = vmax.f32 %v832_v4, 0.0  ;;  %v569_v59 = vld [vmem:[%s2429_s6 + $0x228] sm:$0xff] }
  0x96   : > { %v961_v20 = vmax.f32 %v833_v5, 0.0  ;;  %v835_v21 = vadd.f32 %v2448_v14, %v695_v6  ;;  %v697_v26 = vmul.f32 %v2444_v12, %v557_v7  ;;  %v836_v27 = vadd.f32 %v2446_v13, %v696_v15  ;;  %v571_v5 = vld [vmem:[%s2429_s6 + $0x238] sm:$0xff] }
  0x97   : > { %v1977_v24 = vpack.c.bf16 %v959_v9, %v958_v8  ;;  %v962_v25 = vmax.f32 %v834_v10, 0.0  ;;  %1444 = vst [vmem:[%s2484_s19 + $0xc0] sm:$0xff] %v1976_v18  ;;  %v698_v31 = vmul.f32 %v2442_v11, %v558_v16  ;;  %v699_v32 = vmul.f32 %v2444_v12, %v559_v17  ;;  %v572_v10 = vld [vmem:[%s2429_s6 + $0x240] sm:$0xff] }
  0x98   : > { %v1978_v29 = vpack.c.bf16 %v961_v20, %v960_v19  ;;  %v963_v30 = vmax.f32 %v835_v21, 0.0  ;;  %v837_v34 = vadd.f32 %v2448_v14, %v697_v26  ;;  %v964_v35 = vmax.f32 %v836_v27, 0.0 }
  0x99   : > { %1445 = vst [vmem:[%s2484_s19 + $0xc8] sm:$0xff] %v1977_v24  ;;  %v700_v36 = vmul.f32 %v2442_v11, %v560_v22  ;;  %v701_v37 = vmul.f32 %v2444_v12, %v561_v23  ;;  %v838_v40 = vadd.f32 %v2446_v13, %v698_v31  ;;  %v839_v41 = vadd.f32 %v2448_v14, %v699_v32  ;;  %v573_v23 = vld [vmem:[%s2429_s6 + $0x248] sm:$0xff] }
  0x9a   : > { %1446 = vst [vmem:[%s2484_s19 + $0xd0] sm:$0xff] %v1978_v29  ;;  %v1979_v39 = vpack.c.bf16 %v963_v30, %v962_v25  ;;  %v702_v42 = vmul.f32 %v2442_v11, %v562_v28  ;;  %v965_v43 = vmax.f32 %v837_v34, 0.0  ;;  %v703_v46 = vmul.f32 %v2444_v12, %v563_v33  ;;  %v574_v28 = vld [vmem:[%s2429_s6 + $0x250] sm:$0xff]  ;;  %v575_v29 = vld [vmem:[%s2429_s6 + $0x258] sm:$0xff]  ;;  %v576_v34 = vld [vmem:[%s2429_s6 + $0x260] sm:$0xff] }
  0x9b   : > { %v840_v44 = vadd.f32 %v2446_v13, %v700_v36  ;;  %v841_v45 = vadd.f32 %v2448_v14, %v701_v37  ;;  %v966_v48 = vmax.f32 %v838_v40, 0.0  ;;  %v967_v49 = vmax.f32 %v839_v41, 0.0  ;;  %v578_v40 = vld [vmem:[%s2429_s6 + $0x270] sm:$0xff] }
  0x9c   : > { %1447 = vst [vmem:[%s2484_s19 + $0xd8] sm:$0xff] %v1979_v39  ;;  %v842_v50 = vadd.f32 %v2446_v13, %v702_v42  ;;  %v704_v51 = vmul.f32 %v2442_v11, %v564_v38  ;;  %v1980_v54 = vpack.c.bf16 %v965_v43, %v964_v35  ;;  %v843_v57 = vadd.f32 %v2448_v14, %v703_v46  ;;  %v577_v35 = vld [vmem:[%s2429_s6 + $0x268] sm:$0xff] }
  0x9d   : > { %v968_v55 = vmax.f32 %v840_v44, 0.0  ;;  %v969_v56 = vmax.f32 %v841_v45, 0.0  ;;  %v1981_v60 = vpack.c.bf16 %v967_v49, %v966_v48  ;;  %v705_v62 = vmul.f32 %v2444_v12, %v565_v47  ;;  %v579_v45 = vld [vmem:[%s2429_s6 + $0x278] sm:$0xff] }
  0x9e   : > { %v970_v61 = vmax.f32 %v842_v50, 0.0  ;;  %v844_v63 = vadd.f32 %v2446_v13, %v704_v51  ;;  %1448 = vst [vmem:[%s2484_s19 + $0xe0] sm:$0xff] %v1980_v54  ;;  %v971_v2 = vmax.f32 %v843_v57, 0.0  ;;  %v706_v3 = vmul.f32 %v2442_v11, %v566_v52  ;;  %v580_v50 = vld [vmem:[%s2429_s6 + $0x280] sm:$0xff] }
  0x9f   : > { %v1982_v1 = vpack.c.bf16 %v969_v56, %v968_v55  ;;  %v707_v4 = vmul.f32 %v2444_v12, %v567_v53  ;;  %1449 = vst [vmem:[%s2484_s19 + $0xe8] sm:$0xff] %v1981_v60  ;;  %v845_v6 = vadd.f32 %v2448_v14, %v705_v62  ;;  %v708_v8 = vmul.f32 %v2442_v11, %v568_v58 }
  0xa0   : > { %v972_v7 = vmax.f32 %v844_v63, 0.0  ;;  %v709_v9 = vmul.f32 %v2444_v12, %v569_v59  ;;  %v1983_v15 = vpack.c.bf16 %v971_v2, %v970_v61  ;;  %v846_v16 = vadd.f32 %v2446_v13, %v706_v3  ;;  %v581_v59 = vld [vmem:[%s2429_s6 + $0x288] sm:$0xff] }
  0xa1   : > { %1450 = vst [vmem:[%s2484_s19 + $0xf0] sm:$0xff] %v1982_v1  ;;  %v847_v17 = vadd.f32 %v2448_v14, %v707_v4  ;;  %v710_v18 = vmul.f32 %v2442_v11, %v570_v0  ;;  %v973_v19 = vmax.f32 %v845_v6, 0.0  ;;  %v848_v20 = vadd.f32 %v2446_v13, %v708_v8  ;;  %v582_v0 = vld [vmem:[%s2429_s6 + $0x290] sm:$0xff]  ;;  %v583_v1 = vld [vmem:[%s2429_s6 + $0x298] sm:$0xff]  ;;  %v584_v6 = vld [vmem:[%s2429_s6 + $0x2a0] sm:$0xff] }
  0xa2   : > { %v849_v21 = vadd.f32 %v2448_v14, %v709_v9  ;;  %v711_v22 = vmul.f32 %v2444_v12, %v571_v5  ;;  %1451 = vst [vmem:[%s2484_s19 + $0xf8] sm:$0xff] %v1983_v15  ;;  %v974_v24 = vmax.f32 %v846_v16, 0.0  ;;  %v712_v27 = vmul.f32 %v2442_v11, %v572_v10  ;;  %v586_v16 = vld [vmem:[%s2429_s6 + $0x2b0] sm:$0xff] }
  0xa3   : > { %v975_v25 = vmax.f32 %v847_v17, 0.0  ;;  %v850_v26 = vadd.f32 %v2446_v13, %v710_v18  ;;  %v1984_v30 = vpack.c.bf16 %v973_v19, %v972_v7  ;;  %v976_v31 = vmax.f32 %v848_v20, 0.0  ;;  %v585_v7 = vld [vmem:[%s2429_s6 + $0x2a8] sm:$0xff] }
  0xa4   : > { %v977_v32 = vmax.f32 %v849_v21, 0.0  ;;  %v851_v33 = vadd.f32 %v2448_v14, %v711_v22  ;;  %v713_v38 = vmul.f32 %v2444_v12, %v573_v23  ;;  %v852_v39 = vadd.f32 %v2446_v13, %v712_v27  ;;  %v587_v21 = vld [vmem:[%s2429_s6 + $0x2b8] sm:$0xff] }
  0xa5   : > { %v1985_v36 = vpack.c.bf16 %v975_v25, %v974_v24  ;;  %v978_v37 = vmax.f32 %v850_v26, 0.0  ;;  %1452 = vst [vmem:[%s2484_s19 + $0x100] sm:$0xff] %v1984_v30  ;;  %v714_v43 = vmul.f32 %v2442_v11, %v574_v28  ;;  %v715_v44 = vmul.f32 %v2444_v12, %v575_v29  ;;  %v588_v26 = vld [vmem:[%s2429_s6 + $0x2c0] sm:$0xff] }
  0xa6   : > { %v1986_v41 = vpack.c.bf16 %v977_v32, %v976_v31  ;;  %v979_v42 = vmax.f32 %v851_v33, 0.0  ;;  %v853_v46 = vadd.f32 %v2448_v14, %v713_v38  ;;  %v980_v47 = vmax.f32 %v852_v39, 0.0 }
  0xa7   : > { %1453 = vst [vmem:[%s2484_s19 + $0x108] sm:$0xff] %v1985_v36  ;;  %v716_v48 = vmul.f32 %v2442_v11, %v576_v34  ;;  %v717_v49 = vmul.f32 %v2444_v12, %v577_v35  ;;  %v854_v52 = vadd.f32 %v2446_v13, %v714_v43  ;;  %v855_v53 = vadd.f32 %v2448_v14, %v715_v44  ;;  %v589_v35 = vld [vmem:[%s2429_s6 + $0x2c8] sm:$0xff] }
  0xa8   : > { %1454 = vst [vmem:[%s2484_s19 + $0x110] sm:$0xff] %v1986_v41  ;;  %v1987_v51 = vpack.c.bf16 %v979_v42, %v978_v37  ;;  %v718_v54 = vmul.f32 %v2442_v11, %v578_v40  ;;  %v981_v55 = vmax.f32 %v853_v46, 0.0  ;;  %v719_v58 = vmul.f32 %v2444_v12, %v579_v45  ;;  %v590_v40 = vld [vmem:[%s2429_s6 + $0x2d0] sm:$0xff]  ;;  %v591_v41 = vld [vmem:[%s2429_s6 + $0x2d8] sm:$0xff]  ;;  %v592_v46 = vld [vmem:[%s2429_s6 + $0x2e0] sm:$0xff] }
  0xa9   : > { %v856_v56 = vadd.f32 %v2446_v13, %v716_v48  ;;  %v857_v57 = vadd.f32 %v2448_v14, %v717_v49  ;;  %v982_v60 = vmax.f32 %v854_v52, 0.0  ;;  %v983_v61 = vmax.f32 %v855_v53, 0.0  ;;  %v594_v52 = vld [vmem:[%s2429_s6 + $0x2f0] sm:$0xff] }
  0xaa   : > { %1455 = vst [vmem:[%s2484_s19 + $0x118] sm:$0xff] %v1987_v51  ;;  %v858_v62 = vadd.f32 %v2446_v13, %v718_v54  ;;  %v720_v63 = vmul.f32 %v2442_v11, %v580_v50  ;;  %v1988_v2 = vpack.c.bf16 %v981_v55, %v980_v47  ;;  %v859_v5 = vadd.f32 %v2448_v14, %v719_v58  ;;  %v593_v47 = vld [vmem:[%s2429_s6 + $0x2e8] sm:$0xff] }
  0xab   : > { %v984_v3 = vmax.f32 %v856_v56, 0.0  ;;  %v985_v4 = vmax.f32 %v857_v57, 0.0  ;;  %v1989_v8 = vpack.c.bf16 %v983_v61, %v982_v60  ;;  %v721_v10 = vmul.f32 %v2444_v12, %v581_v59  ;;  %v595_v57 = vld [vmem:[%s2429_s6 + $0x2f8] sm:$0xff] }
  0xac   : > { %v986_v9 = vmax.f32 %v858_v62, 0.0  ;;  %v860_v15 = vadd.f32 %v2446_v13, %v720_v63  ;;  %1456 = vst [vmem:[%s2484_s19 + $0x120] sm:$0xff] %v1988_v2  ;;  %v987_v18 = vmax.f32 %v859_v5, 0.0  ;;  %v722_v19 = vmul.f32 %v2442_v11, %v582_v0  ;;  %v596_v62 = vld [vmem:[%s2429_s6 + $0x300] sm:$0xff] }
  0xad   : > { %v1990_v17 = vpack.c.bf16 %v985_v4, %v984_v3  ;;  %v723_v20 = vmul.f32 %v2444_v12, %v583_v1  ;;  %1457 = vst [vmem:[%s2484_s19 + $0x128] sm:$0xff] %v1989_v8  ;;  %v861_v22 = vadd.f32 %v2448_v14, %v721_v10  ;;  %v724_v24 = vmul.f32 %v2442_v11, %v584_v6 }
  0xae   : > { %v988_v23 = vmax.f32 %v860_v15, 0.0  ;;  %v725_v25 = vmul.f32 %v2444_v12, %v585_v7  ;;  %v1991_v27 = vpack.c.bf16 %v987_v18, %v986_v9  ;;  %v862_v28 = vadd.f32 %v2446_v13, %v722_v19  ;;  %v597_v7 = vld [vmem:[%s2429_s6 + $0x308] sm:$0xff] }
  0xaf   : > { %1458 = vst [vmem:[%s2484_s19 + $0x130] sm:$0xff] %v1990_v17  ;;  %v863_v29 = vadd.f32 %v2448_v14, %v723_v20  ;;  %v726_v30 = vmul.f32 %v2442_v11, %v586_v16  ;;  %v989_v31 = vmax.f32 %v861_v22, 0.0  ;;  %v864_v32 = vadd.f32 %v2446_v13, %v724_v24  ;;  %v598_v16 = vld [vmem:[%s2429_s6 + $0x310] sm:$0xff]  ;;  %v599_v17 = vld [vmem:[%s2429_s6 + $0x318] sm:$0xff]  ;;  %v600_v22 = vld [vmem:[%s2429_s6 + $0x320] sm:$0xff] }
  0xb0   : > { %v865_v33 = vadd.f32 %v2448_v14, %v725_v25  ;;  %v727_v34 = vmul.f32 %v2444_v12, %v587_v21  ;;  %1459 = vst [vmem:[%s2484_s19 + $0x138] sm:$0xff] %v1991_v27  ;;  %v990_v36 = vmax.f32 %v862_v28, 0.0  ;;  %v728_v39 = vmul.f32 %v2442_v11, %v588_v26  ;;  %v602_v28 = vld [vmem:[%s2429_s6 + $0x330] sm:$0xff] }
  0xb1   : > { %v991_v37 = vmax.f32 %v863_v29, 0.0  ;;  %v866_v38 = vadd.f32 %v2446_v13, %v726_v30  ;;  %v1992_v42 = vpack.c.bf16 %v989_v31, %v988_v23  ;;  %v992_v43 = vmax.f32 %v864_v32, 0.0  ;;  %v601_v23 = vld [vmem:[%s2429_s6 + $0x328] sm:$0xff] }
  0xb2   : > { %v993_v44 = vmax.f32 %v865_v33, 0.0  ;;  %v867_v45 = vadd.f32 %v2448_v14, %v727_v34  ;;  %v729_v50 = vmul.f32 %v2444_v12, %v589_v35  ;;  %v868_v51 = vadd.f32 %v2446_v13, %v728_v39  ;;  %v603_v33 = vld [vmem:[%s2429_s6 + $0x338] sm:$0xff] }
  0xb3   : > { %v1993_v48 = vpack.c.bf16 %v991_v37, %v990_v36  ;;  %v994_v49 = vmax.f32 %v866_v38, 0.0  ;;  %1460 = vst [vmem:[%s2484_s19 + $0x140] sm:$0xff] %v1992_v42  ;;  %v730_v55 = vmul.f32 %v2442_v11, %v590_v40  ;;  %v731_v56 = vmul.f32 %v2444_v12, %v591_v41  ;;  %v604_v38 = vld [vmem:[%s2429_s6 + $0x340] sm:$0xff] }
  0xb4   : > { %v1994_v53 = vpack.c.bf16 %v993_v44, %v992_v43  ;;  %v995_v54 = vmax.f32 %v867_v45, 0.0  ;;  %v869_v58 = vadd.f32 %v2448_v14, %v729_v50  ;;  %v996_v59 = vmax.f32 %v868_v51, 0.0 }
  0xb5   : > { %1461 = vst [vmem:[%s2484_s19 + $0x148] sm:$0xff] %v1993_v48  ;;  %v732_v60 = vmul.f32 %v2442_v11, %v592_v46  ;;  %v733_v61 = vmul.f32 %v2444_v12, %v593_v47  ;;  %v870_v0 = vadd.f32 %v2446_v13, %v730_v55  ;;  %v871_v1 = vadd.f32 %v2448_v14, %v731_v56  ;;  %v605_v47 = vld [vmem:[%s2429_s6 + $0x348] sm:$0xff] }
  0xb6   : > { %1462 = vst [vmem:[%s2484_s19 + $0x150] sm:$0xff] %v1994_v53  ;;  %v1995_v63 = vpack.c.bf16 %v995_v54, %v994_v49  ;;  %v734_v2 = vmul.f32 %v2442_v11, %v594_v52  ;;  %v997_v3 = vmax.f32 %v869_v58, 0.0  ;;  %v735_v6 = vmul.f32 %v2444_v12, %v595_v57  ;;  %v606_v52 = vld [vmem:[%s2429_s6 + $0x350] sm:$0xff]  ;;  %v607_v53 = vld [vmem:[%s2429_s6 + $0x358] sm:$0xff]  ;;  %v608_v58 = vld [vmem:[%s2429_s6 + $0x360] sm:$0xff] }
  0xb7   : > { %v872_v4 = vadd.f32 %v2446_v13, %v732_v60  ;;  %v873_v5 = vadd.f32 %v2448_v14, %v733_v61  ;;  %v998_v8 = vmax.f32 %v870_v0, 0.0  ;;  %v999_v9 = vmax.f32 %v871_v1, 0.0  ;;  %v610_v0 = vld [vmem:[%s2429_s6 + $0x370] sm:$0xff] }
  0xb8   : > { %1463 = vst [vmem:[%s2484_s19 + $0x158] sm:$0xff] %v1995_v63  ;;  %v874_v10 = vadd.f32 %v2446_v13, %v734_v2  ;;  %v736_v15 = vmul.f32 %v2442_v11, %v596_v62  ;;  %v1996_v18 = vpack.c.bf16 %v997_v3, %v996_v59  ;;  %v875_v21 = vadd.f32 %v2448_v14, %v735_v6  ;;  %v609_v59 = vld [vmem:[%s2429_s6 + $0x368] sm:$0xff] }
  0xb9   : > { %v1000_v19 = vmax.f32 %v872_v4, 0.0  ;;  %v1001_v20 = vmax.f32 %v873_v5, 0.0  ;;  %v1997_v24 = vpack.c.bf16 %v999_v9, %v998_v8  ;;  %v737_v26 = vmul.f32 %v2444_v12, %v597_v7  ;;  %v611_v5 = vld [vmem:[%s2429_s6 + $0x378] sm:$0xff] }
  0xba   : > { %v1002_v25 = vmax.f32 %v874_v10, 0.0  ;;  %v876_v27 = vadd.f32 %v2446_v13, %v736_v15  ;;  %1464 = vst [vmem:[%s2484_s19 + $0x160] sm:$0xff] %v1996_v18  ;;  %v1003_v30 = vmax.f32 %v875_v21, 0.0  ;;  %v738_v31 = vmul.f32 %v2442_v11, %v598_v16  ;;  %v612_v10 = vld [vmem:[%s2429_s6 + $0x380] sm:$0xff] }
  0xbb   : > { %v1998_v29 = vpack.c.bf16 %v1001_v20, %v1000_v19  ;;  %v739_v32 = vmul.f32 %v2444_v12, %v599_v17  ;;  %1465 = vst [vmem:[%s2484_s19 + $0x168] sm:$0xff] %v1997_v24  ;;  %v877_v34 = vadd.f32 %v2448_v14, %v737_v26  ;;  %v740_v36 = vmul.f32 %v2442_v11, %v600_v22 }
  0xbc   : > { %v1004_v35 = vmax.f32 %v876_v27, 0.0  ;;  %v741_v37 = vmul.f32 %v2444_v12, %v601_v23  ;;  %v1999_v39 = vpack.c.bf16 %v1003_v30, %v1002_v25  ;;  %v878_v40 = vadd.f32 %v2446_v13, %v738_v31  ;;  %v613_v23 = vld [vmem:[%s2429_s6 + $0x388] sm:$0xff] }
  0xbd   : > { %1466 = vst [vmem:[%s2484_s19 + $0x170] sm:$0xff] %v1998_v29  ;;  %v879_v41 = vadd.f32 %v2448_v14, %v739_v32  ;;  %v742_v42 = vmul.f32 %v2442_v11, %v602_v28  ;;  %v1005_v43 = vmax.f32 %v877_v34, 0.0  ;;  %v880_v44 = vadd.f32 %v2446_v13, %v740_v36  ;;  %v614_v28 = vld [vmem:[%s2429_s6 + $0x390] sm:$0xff]  ;;  %v615_v29 = vld [vmem:[%s2429_s6 + $0x398] sm:$0xff]  ;;  %v616_v34 = vld [vmem:[%s2429_s6 + $0x3a0] sm:$0xff] }
  0xbe   : > { %v881_v45 = vadd.f32 %v2448_v14, %v741_v37  ;;  %v743_v46 = vmul.f32 %v2444_v12, %v603_v33  ;;  %1467 = vst [vmem:[%s2484_s19 + $0x178] sm:$0xff] %v1999_v39  ;;  %v1006_v48 = vmax.f32 %v878_v40, 0.0  ;;  %v744_v51 = vmul.f32 %v2442_v11, %v604_v38  ;;  %v618_v40 = vld [vmem:[%s2429_s6 + $0x3b0] sm:$0xff] }
  0xbf   : > { %v1007_v49 = vmax.f32 %v879_v41, 0.0  ;;  %v882_v50 = vadd.f32 %v2446_v13, %v742_v42  ;;  %v2000_v54 = vpack.c.bf16 %v1005_v43, %v1004_v35  ;;  %v1008_v55 = vmax.f32 %v880_v44, 0.0  ;;  %v617_v35 = vld [vmem:[%s2429_s6 + $0x3a8] sm:$0xff] }
  0xc0   : > { %v1009_v56 = vmax.f32 %v881_v45, 0.0  ;;  %v883_v57 = vadd.f32 %v2448_v14, %v743_v46  ;;  %v745_v62 = vmul.f32 %v2444_v12, %v605_v47  ;;  %v884_v63 = vadd.f32 %v2446_v13, %v744_v51  ;;  %v619_v45 = vld [vmem:[%s2429_s6 + $0x3b8] sm:$0xff] }
  0xc1   : > { %v2001_v60 = vpack.c.bf16 %v1007_v49, %v1006_v48  ;;  %v1010_v61 = vmax.f32 %v882_v50, 0.0  ;;  %1468 = vst [vmem:[%s2484_s19 + $0x180] sm:$0xff] %v2000_v54  ;;  %v746_v3 = vmul.f32 %v2442_v11, %v606_v52  ;;  %v747_v4 = vmul.f32 %v2444_v12, %v607_v53  ;;  %v620_v50 = vld [vmem:[%s2429_s6 + $0x3c0] sm:$0xff] }
  0xc2   : > { %v2002_v1 = vpack.c.bf16 %v1009_v56, %v1008_v55  ;;  %v1011_v2 = vmax.f32 %v883_v57, 0.0  ;;  %v885_v6 = vadd.f32 %v2448_v14, %v745_v62  ;;  %v1012_v7 = vmax.f32 %v884_v63, 0.0 }
  0xc3   : > { %1469 = vst [vmem:[%s2484_s19 + $0x188] sm:$0xff] %v2001_v60  ;;  %v748_v8 = vmul.f32 %v2442_v11, %v608_v58  ;;  %v749_v9 = vmul.f32 %v2444_v12, %v609_v59  ;;  %v886_v16 = vadd.f32 %v2446_v13, %v746_v3  ;;  %v887_v17 = vadd.f32 %v2448_v14, %v747_v4  ;;  %v621_v59 = vld [vmem:[%s2429_s6 + $0x3c8] sm:$0xff] }
  0xc4   : > { %1470 = vst [vmem:[%s2484_s19 + $0x190] sm:$0xff] %v2002_v1  ;;  %v2003_v15 = vpack.c.bf16 %v1011_v2, %v1010_v61  ;;  %v750_v18 = vmul.f32 %v2442_v11, %v610_v0  ;;  %v1013_v19 = vmax.f32 %v885_v6, 0.0  ;;  %v751_v22 = vmul.f32 %v2444_v12, %v611_v5  ;;  %v622_v0 = vld [vmem:[%s2429_s6 + $0x3d0] sm:$0xff]  ;;  %v623_v1 = vld [vmem:[%s2429_s6 + $0x3d8] sm:$0xff]  ;;  %v624_v6 = vld [vmem:[%s2429_s6 + $0x3e0] sm:$0xff] }
  0xc5   : > { %v888_v20 = vadd.f32 %v2446_v13, %v748_v8  ;;  %v889_v21 = vadd.f32 %v2448_v14, %v749_v9  ;;  %v1014_v24 = vmax.f32 %v886_v16, 0.0  ;;  %v1015_v25 = vmax.f32 %v887_v17, 0.0  ;;  %v626_v16 = vld [vmem:[%s2429_s6 + $0x3f0] sm:$0xff] }
  0xc6   : > { %1471 = vst [vmem:[%s2484_s19 + $0x198] sm:$0xff] %v2003_v15  ;;  %v890_v26 = vadd.f32 %v2446_v13, %v750_v18  ;;  %v752_v27 = vmul.f32 %v2442_v11, %v612_v10  ;;  %v2004_v30 = vpack.c.bf16 %v1013_v19, %v1012_v7  ;;  %v891_v33 = vadd.f32 %v2448_v14, %v751_v22  ;;  %v625_v7 = vld [vmem:[%s2429_s6 + $0x3e8] sm:$0xff] }
  0xc7   : > { %v1016_v31 = vmax.f32 %v888_v20, 0.0  ;;  %v1017_v32 = vmax.f32 %v889_v21, 0.0  ;;  %v2005_v36 = vpack.c.bf16 %v1015_v25, %v1014_v24  ;;  %v753_v38 = vmul.f32 %v2444_v12, %v613_v23  ;;  %v627_v21 = vld [vmem:[%s2429_s6 + $0x3f8] sm:$0xff] }
  0xc8   : > { %v1018_v37 = vmax.f32 %v890_v26, 0.0  ;;  %v892_v39 = vadd.f32 %v2446_v13, %v752_v27  ;;  %1472 = vst [vmem:[%s2484_s19 + $0x1a0] sm:$0xff] %v2004_v30  ;;  %v1019_v42 = vmax.f32 %v891_v33, 0.0  ;;  %v754_v43 = vmul.f32 %v2442_v11, %v614_v28 }
  0xc9   : > { %v2006_v41 = vpack.c.bf16 %v1017_v32, %v1016_v31  ;;  %v755_v44 = vmul.f32 %v2444_v12, %v615_v29  ;;  %1473 = vst [vmem:[%s2484_s19 + $0x1a8] sm:$0xff] %v2005_v36  ;;  %v893_v46 = vadd.f32 %v2448_v14, %v753_v38  ;;  %v756_v48 = vmul.f32 %v2442_v11, %v616_v34 }
  0xca   : > { %v1020_v47 = vmax.f32 %v892_v39, 0.0  ;;  %v757_v49 = vmul.f32 %v2444_v12, %v617_v35  ;;  %v2007_v51 = vpack.c.bf16 %v1019_v42, %v1018_v37  ;;  %v894_v52 = vadd.f32 %v2446_v13, %v754_v43 }
  0xcb   : > { %1474 = vst [vmem:[%s2484_s19 + $0x1b0] sm:$0xff] %v2006_v41  ;;  %v895_v53 = vadd.f32 %v2448_v14, %v755_v44  ;;  %v758_v54 = vmul.f32 %v2442_v11, %v618_v40  ;;  %v1021_v55 = vmax.f32 %v893_v46, 0.0  ;;  %v896_v56 = vadd.f32 %v2446_v13, %v756_v48  ;;  %v1658_v46 = vld [vmem:[%s2484_s19 + $0x20] sm:$0xff] (%p2152_p6)  ;;  %v1662_v48 = vld [vmem:[%s2484_s19 + $0x30] sm:$0xff] (%p2152_p6) }
  0xcc   : > { %v897_v57 = vadd.f32 %v2448_v14, %v757_v49  ;;  %v759_v58 = vmul.f32 %v2444_v12, %v619_v45  ;;  %1475 = vst [vmem:[%s2484_s19 + $0x1b8] sm:$0xff] %v2007_v51  ;;  %v1022_v60 = vmax.f32 %v894_v52, 0.0  ;;  %v760_v63 = vmul.f32 %v2442_v11, %v620_v50  ;;  %v1656_v45 = vld [vmem:[%s2484_s19 + $0x18] sm:$0xff] (%p2152_p6)  ;;  %1659 = vst [vmem:[%s2907_s25 + $0x40] sm:$0xff] (%p2152_p6), %v1658_v46  ;;  %v1666_v50 = vld [vmem:[%s2484_s19 + $0x40] sm:$0xff] (%p2152_p6) }
  0xcd   : > { %v1023_v61 = vmax.f32 %v895_v53, 0.0  ;;  %v898_v62 = vadd.f32 %v2446_v13, %v758_v54  ;;  %v2008_v2 = vpack.c.bf16 %v1021_v55, %v1020_v47  ;;  %v1024_v3 = vmax.f32 %v896_v56, 0.0  ;;  %v1660_v47 = vld [vmem:[%s2484_s19 + $0x28] sm:$0xff] (%p2152_p6)  ;;  %1657 = vst [vmem:[%s2907_s25 + $0x30] sm:$0xff] (%p2152_p6), %v1656_v45  ;;  %v1664_v49 = vld [vmem:[%s2484_s19 + $0x38] sm:$0xff] (%p2152_p6)  ;;  %1663 = vst [vmem:[%s2907_s25 + $0x60] sm:$0xff] (%p2152_p6), %v1662_v48 }
  0xce   : > { %v1025_v4 = vmax.f32 %v897_v57, 0.0  ;;  %v899_v5 = vadd.f32 %v2448_v14, %v759_v58  ;;  %v761_v10 = vmul.f32 %v2444_v12, %v621_v59  ;;  %v900_v15 = vadd.f32 %v2446_v13, %v760_v63  ;;  %1661 = vst [vmem:[%s2907_s25 + $0x50] sm:$0xff] (%p2152_p6), %v1660_v47  ;;  %1665 = vst [vmem:[%s2907_s25 + $0x70] sm:$0xff] (%p2152_p6), %v1664_v49  ;;  %v1668_v51 = vld [vmem:[%s2484_s19 + $0x48] sm:$0xff] (%p2152_p6)  ;;  %v1670_v52 = vld [vmem:[%s2484_s19 + $0x50] sm:$0xff] (%p2152_p6) }
  0xcf   : > { %v2009_v8 = vpack.c.bf16 %v1023_v61, %v1022_v60  ;;  %v1026_v9 = vmax.f32 %v898_v62, 0.0  ;;  %1476 = vst [vmem:[%s2484_s19 + $0x1c0] sm:$0xff] %v2008_v2  ;;  %v762_v19 = vmul.f32 %v2442_v11, %v622_v0  ;;  %v763_v20 = vmul.f32 %v2444_v12, %v623_v1  ;;  %1667 = vst [vmem:[%s2907_s25 + $0x80] sm:$0xff] (%p2152_p6), %v1666_v50  ;;  %v1672_v53 = vld [vmem:[%s2484_s19 + $0x58] sm:$0xff] (%p2152_p6)  ;;  %v1674_v54 = vld [vmem:[%s2484_s19 + $0x60] sm:$0xff] (%p2152_p6) }
  0xd0   : > { %v2010_v17 = vpack.c.bf16 %v1025_v4, %v1024_v3  ;;  %v1027_v18 = vmax.f32 %v899_v5, 0.0  ;;  %v901_v22 = vadd.f32 %v2448_v14, %v761_v10  ;;  %v1028_v23 = vmax.f32 %v900_v15, 0.0  ;;  %1669 = vst [vmem:[%s2907_s25 + $0x90] sm:$0xff] (%p2152_p6), %v1668_v51  ;;  %1671 = vst [vmem:[%s2907_s25 + $0xa0] sm:$0xff] (%p2152_p6), %v1670_v52  ;;  %v1676_v55 = vld [vmem:[%s2484_s19 + $0x68] sm:$0xff] (%p2152_p6)  ;;  %v1678_v56 = vld [vmem:[%s2484_s19 + $0x70] sm:$0xff] (%p2152_p6) }
  0xd1   : > { %1477 = vst [vmem:[%s2484_s19 + $0x1c8] sm:$0xff] %v2009_v8  ;;  %v764_v24 = vmul.f32 %v2442_v11, %v624_v6  ;;  %v765_v25 = vmul.f32 %v2444_v12, %v625_v7  ;;  %v902_v27 = vadd.f32 %v2446_v13, %v762_v19  ;;  %v903_v28 = vadd.f32 %v2448_v14, %v763_v20  ;;  %v1680_v57 = vld [vmem:[%s2484_s19 + $0x78] sm:$0xff] (%p2152_p6)  ;;  %v1682_v58 = vld [vmem:[%s2484_s19 + $0x80] sm:$0xff] (%p2152_p6)  ;;  %v1684_v59 = vld [vmem:[%s2484_s19 + $0x88] sm:$0xff] (%p2152_p6) }
  0xd2   : > { %1478 = vst [vmem:[%s2484_s19 + $0x1d0] sm:$0xff] %v2010_v17  ;;  %v2011_v26 = vpack.c.bf16 %v1027_v18, %v1026_v9  ;;  %v766_v29 = vmul.f32 %v2442_v11, %v626_v16  ;;  %v1029_v30 = vmax.f32 %v901_v22, 0.0  ;;  %v767_v33 = vmul.f32 %v2444_v12, %v627_v21  ;;  %v1650_v12 = vld [vmem:[%s2484_s19] sm:$0xff] (%p2152_p6)  ;;  %1673 = vst [vmem:[%s2907_s25 + $0xb0] sm:$0xff] (%p2152_p6), %v1672_v53  ;;  %v1686_v60 = vld [vmem:[%s2484_s19 + $0x90] sm:$0xff] (%p2152_p6) }
  0xd3   : > { %v904_v31 = vadd.f32 %v2446_v13, %v764_v24  ;;  %v905_v32 = vadd.f32 %v2448_v14, %v765_v25  ;;  %v1030_v34 = vmax.f32 %v902_v27, 0.0  ;;  %v1031_v35 = vmax.f32 %v903_v28, 0.0  ;;  %1651 = vst [vmem:[%s2907_s25] sm:$0xff] (%p2152_p6), %v1650_v12  ;;  %1675 = vst [vmem:[%s2907_s25 + $0xc0] sm:$0xff] (%p2152_p6), %v1674_v54  ;;  %v1688_v61 = vld [vmem:[%s2484_s19 + $0x98] sm:$0xff] (%p2152_p6)  ;;  %v1690_v62 = vld [vmem:[%s2484_s19 + $0xa0] sm:$0xff] (%p2152_p6) }
  0xd4   : > { %1479 = vst [vmem:[%s2484_s19 + $0x1d8] sm:$0xff] %v2011_v26  ;;  %v906_v36 = vadd.f32 %v2446_v13, %v766_v29  ;;  %v2012_v37 = vpack.c.bf16 %v1029_v30, %v1028_v23  ;;  %v907_v11 = vadd.f32 %v2448_v14, %v767_v33  ;;  %1490 = sbr.rel (!%p2152_p6) target bundleno = 241 (0xf1), region = 59  ;;  %v1652_v13 = vld [vmem:[%s2484_s19 + $0x8] sm:$0xff] (%p2152_p6)  ;;  %v1654_v14 = vld [vmem:[%s2484_s19 + $0x10] sm:$0xff] (%p2152_p6)  ;;  %1677 = vst [vmem:[%s2907_s25 + $0xd0] sm:$0xff] (%p2152_p6), %v1676_v55 }
  0xd5   : > { %v1032_v38 = vmax.f32 %v904_v31, 0.0  ;;  %v1033_v39 = vmax.f32 %v905_v32, 0.0  ;;  %v2013_v40 = vpack.c.bf16 %v1031_v35, %v1030_v34  ;;  %1653 = vst [vmem:[%s2907_s25 + $0x10] sm:$0xff] (%p2152_p6), %v1652_v13  ;;  %1655 = vst [vmem:[%s2907_s25 + $0x20] sm:$0xff] (%p2152_p6), %v1654_v14  ;;  %v1692_v63 = vld [vmem:[%s2484_s19 + $0xa8] sm:$0xff] (%p2152_p6)  ;;  %v1694_v0 = vld [vmem:[%s2484_s19 + $0xb0] sm:$0xff] (%p2152_p6) }
  0xd6   : > { %v1034_v41 = vmax.f32 %v906_v36, 0.0  ;;  %1480 = vst [vmem:[%s2484_s19 + $0x1e0] sm:$0xff] %v2012_v37  ;;  %v1035_v43 = vmax.f32 %v907_v11, 0.0  ;;  %1679 = vst [vmem:[%s2907_s25 + $0xe0] sm:$0xff] (%p2152_p6), %v1678_v56  ;;  %v1696_v1 = vld [vmem:[%s2484_s19 + $0xb8] sm:$0xff] (%p2152_p6)  ;;  %v1698_v2 = vld [vmem:[%s2484_s19 + $0xc0] sm:$0xff] (%p2152_p6) }
  0xd7   : > { %v2014_v42 = vpack.c.bf16 %v1033_v39, %v1032_v38  ;;  %1481 = vst [vmem:[%s2484_s19 + $0x1e8] sm:$0xff] %v2013_v40  ;;  %1681 = vst [vmem:[%s2907_s25 + $0xf0] sm:$0xff] (%p2152_p6), %v1680_v57  ;;  %v1700_v3 = vld [vmem:[%s2484_s19 + $0xc8] sm:$0xff] (%p2152_p6)  ;;  %v1702_v4 = vld [vmem:[%s2484_s19 + $0xd0] sm:$0xff] (%p2152_p6) }
  0xd8   : > { %v2015_v44 = vpack.c.bf16 %v1035_v43, %v1034_v41  ;;  %1683 = vst [vmem:[%s2907_s25 + $0x100] sm:$0xff] (%p2152_p6), %v1682_v58  ;;  %1685 = vst [vmem:[%s2907_s25 + $0x110] sm:$0xff] (%p2152_p6), %v1684_v59  ;;  %v1704_v5 = vld [vmem:[%s2484_s19 + $0xd8] sm:$0xff] (%p2152_p6)  ;;  %v1706_v6 = vld [vmem:[%s2484_s19 + $0xe0] sm:$0xff] (%p2152_p6) }
  0xd9   : > { %1482 = vst [vmem:[%s2484_s19 + $0x1f0] sm:$0xff] %v2014_v42  ;;  %1687 = vst [vmem:[%s2907_s25 + $0x120] sm:$0xff] (%p2152_p6), %v1686_v60  ;;  %v1708_v7 = vld [vmem:[%s2484_s19 + $0xe8] sm:$0xff] (%p2152_p6)  ;;  %v1710_v8 = vld [vmem:[%s2484_s19 + $0xf0] sm:$0xff] (%p2152_p6) }
  0xda   : > { %1483 = vst [vmem:[%s2484_s19 + $0x1f8] sm:$0xff] %v2015_v44  ;;  %1689 = vst [vmem:[%s2907_s25 + $0x130] sm:$0xff] (%p2152_p6), %v1688_v61  ;;  %v1712_v9 = vld [vmem:[%s2484_s19 + $0xf8] sm:$0xff] (%p2152_p6)  ;;  %v1714_v10 = vld [vmem:[%s2484_s19 + $0x100] sm:$0xff] (%p2152_p6) }
  0xdb   : > { %1691 = vst [vmem:[%s2907_s25 + $0x140] sm:$0xff] %v1690_v62  ;;  %1693 = vst [vmem:[%s2907_s25 + $0x150] sm:$0xff] %v1692_v63  ;;  %v1716_v15 = vld [vmem:[%s2484_s19 + $0x108] sm:$0xff]  ;;  %v1718_v16 = vld [vmem:[%s2484_s19 + $0x110] sm:$0xff] }
  0xdc   : > { %1695 = vst [vmem:[%s2907_s25 + $0x160] sm:$0xff] %v1694_v0  ;;  %1697 = vst [vmem:[%s2907_s25 + $0x170] sm:$0xff] %v1696_v1  ;;  %v1720_v17 = vld [vmem:[%s2484_s19 + $0x118] sm:$0xff]  ;;  %v1722_v18 = vld [vmem:[%s2484_s19 + $0x120] sm:$0xff] }
  0xdd   : > { %1699 = vst [vmem:[%s2907_s25 + $0x180] sm:$0xff] %v1698_v2  ;;  %1701 = vst [vmem:[%s2907_s25 + $0x190] sm:$0xff] %v1700_v3  ;;  %v1724_v19 = vld [vmem:[%s2484_s19 + $0x128] sm:$0xff]  ;;  %v1726_v20 = vld [vmem:[%s2484_s19 + $0x130] sm:$0xff] }
  0xde   : > { %1703 = vst [vmem:[%s2907_s25 + $0x1a0] sm:$0xff] %v1702_v4  ;;  %1705 = vst [vmem:[%s2907_s25 + $0x1b0] sm:$0xff] %v1704_v5  ;;  %v1728_v21 = vld [vmem:[%s2484_s19 + $0x138] sm:$0xff]  ;;  %v1730_v22 = vld [vmem:[%s2484_s19 + $0x140] sm:$0xff] }
  0xdf   : > { %1707 = vst [vmem:[%s2907_s25 + $0x1c0] sm:$0xff] %v1706_v6  ;;  %1709 = vst [vmem:[%s2907_s25 + $0x1d0] sm:$0xff] %v1708_v7  ;;  %v1732_v23 = vld [vmem:[%s2484_s19 + $0x148] sm:$0xff]  ;;  %v1734_v24 = vld [vmem:[%s2484_s19 + $0x150] sm:$0xff] }
  0xe0   : > { %1711 = vst [vmem:[%s2907_s25 + $0x1e0] sm:$0xff] %v1710_v8  ;;  %1713 = vst [vmem:[%s2907_s25 + $0x1f0] sm:$0xff] %v1712_v9  ;;  %v1736_v25 = vld [vmem:[%s2484_s19 + $0x158] sm:$0xff]  ;;  %v1738_v26 = vld [vmem:[%s2484_s19 + $0x160] sm:$0xff] }
  0xe1   : > { %1715 = vst [vmem:[%s2907_s25 + $0x200] sm:$0xff] %v1714_v10  ;;  %1717 = vst [vmem:[%s2907_s25 + $0x210] sm:$0xff] %v1716_v15  ;;  %v1740_v27 = vld [vmem:[%s2484_s19 + $0x168] sm:$0xff]  ;;  %v1742_v28 = vld [vmem:[%s2484_s19 + $0x170] sm:$0xff] }
  0xe2   : > { %1719 = vst [vmem:[%s2907_s25 + $0x220] sm:$0xff] %v1718_v16  ;;  %1721 = vst [vmem:[%s2907_s25 + $0x230] sm:$0xff] %v1720_v17  ;;  %v1744_v29 = vld [vmem:[%s2484_s19 + $0x178] sm:$0xff]  ;;  %v1746_v30 = vld [vmem:[%s2484_s19 + $0x180] sm:$0xff] }
  0xe3   : > { %1723 = vst [vmem:[%s2907_s25 + $0x240] sm:$0xff] %v1722_v18  ;;  %1725 = vst [vmem:[%s2907_s25 + $0x250] sm:$0xff] %v1724_v19  ;;  %v1748_v31 = vld [vmem:[%s2484_s19 + $0x188] sm:$0xff]  ;;  %v1750_v32 = vld [vmem:[%s2484_s19 + $0x190] sm:$0xff] }
  0xe4   : > { %1727 = vst [vmem:[%s2907_s25 + $0x260] sm:$0xff] %v1726_v20  ;;  %1729 = vst [vmem:[%s2907_s25 + $0x270] sm:$0xff] %v1728_v21  ;;  %v1752_v33 = vld [vmem:[%s2484_s19 + $0x198] sm:$0xff]  ;;  %v1754_v34 = vld [vmem:[%s2484_s19 + $0x1a0] sm:$0xff] }
  0xe5   : > { %1731 = vst [vmem:[%s2907_s25 + $0x280] sm:$0xff] %v1730_v22  ;;  %1733 = vst [vmem:[%s2907_s25 + $0x290] sm:$0xff] %v1732_v23  ;;  %v1756_v35 = vld [vmem:[%s2484_s19 + $0x1a8] sm:$0xff]  ;;  %v1758_v36 = vld [vmem:[%s2484_s19 + $0x1b0] sm:$0xff] }
  0xe6   : > { %1735 = vst [vmem:[%s2907_s25 + $0x2a0] sm:$0xff] %v1734_v24  ;;  %1737 = vst [vmem:[%s2907_s25 + $0x2b0] sm:$0xff] %v1736_v25  ;;  %v1760_v37 = vld [vmem:[%s2484_s19 + $0x1b8] sm:$0xff]  ;;  %v1762_v38 = vld [vmem:[%s2484_s19 + $0x1c0] sm:$0xff] }
  0xe7   : > { %1739 = vst [vmem:[%s2907_s25 + $0x2c0] sm:$0xff] %v1738_v26  ;;  %1741 = vst [vmem:[%s2907_s25 + $0x2d0] sm:$0xff] %v1740_v27  ;;  %v1764_v39 = vld [vmem:[%s2484_s19 + $0x1c8] sm:$0xff]  ;;  %v1766_v11 = vld [vmem:[%s2484_s19 + $0x1d0] sm:$0xff] }
  0xe8   : > { %1743 = vst [vmem:[%s2907_s25 + $0x2e0] sm:$0xff] %v1742_v28  ;;  %1745 = vst [vmem:[%s2907_s25 + $0x2f0] sm:$0xff] %v1744_v29  ;;  %v1768_v40 = vld [vmem:[%s2484_s19 + $0x1d8] sm:$0xff]  ;;  %v1770_v41 = vld [vmem:[%s2484_s19 + $0x1e0] sm:$0xff] }
  0xe9   : > { %1747 = vst [vmem:[%s2907_s25 + $0x300] sm:$0xff] %v1746_v30  ;;  %1749 = vst [vmem:[%s2907_s25 + $0x310] sm:$0xff] %v1748_v31  ;;  %v1772_v42 = vld [vmem:[%s2484_s19 + $0x1e8] sm:$0xff]  ;;  %v1774_v43 = vld [vmem:[%s2484_s19 + $0x1f0] sm:$0xff] }
  0xea   : > { %1751 = vst [vmem:[%s2907_s25 + $0x320] sm:$0xff] %v1750_v32  ;;  %1753 = vst [vmem:[%s2907_s25 + $0x330] sm:$0xff] %v1752_v33  ;;  %v1776_v44 = vld [vmem:[%s2484_s19 + $0x1f8] sm:$0xff] }
  0xeb   : > { %1755 = vst [vmem:[%s2907_s25 + $0x340] sm:$0xff] %v1754_v34  ;;  %1757 = vst [vmem:[%s2907_s25 + $0x350] sm:$0xff] %v1756_v35 }
  0xec   : > { %1759 = vst [vmem:[%s2907_s25 + $0x360] sm:$0xff] %v1758_v36  ;;  %1761 = vst [vmem:[%s2907_s25 + $0x370] sm:$0xff] %v1760_v37 }
  0xed   : > { %1763 = vst [vmem:[%s2907_s25 + $0x380] sm:$0xff] %v1762_v38  ;;  %1765 = vst [vmem:[%s2907_s25 + $0x390] sm:$0xff] %v1764_v39 }
  0xee   : > { %1767 = vst [vmem:[%s2907_s25 + $0x3a0] sm:$0xff] %v1766_v11  ;;  %1769 = vst [vmem:[%s2907_s25 + $0x3b0] sm:$0xff] %v1768_v40 }
  0xef   : > { %1771 = vst [vmem:[%s2907_s25 + $0x3c0] sm:$0xff] %v1770_v41  ;;  %1773 = vst [vmem:[%s2907_s25 + $0x3d0] sm:$0xff] %v1772_v42 }
  0xf0   : > { %1775 = vst [vmem:[%s2907_s25 + $0x3e0] sm:$0xff] %v1774_v43  ;;  %1777 = vst [vmem:[%s2907_s25 + $0x3f0] sm:$0xff] %v1776_v44 }
  0xf1 PF: > { %s13_s16 = sadd.s32 1, %s2095_s16   ;;  %s3054_s12 = smov %s2083_s13 }
  0xf2   : > { %p10_p12 = scmp.ge.s32.totalorder %s13_s16, 4   ;;  %s3055_s13 = smov %s2157_s22 }
  0xf3   : > { %s3056_s14 = smov %s2091_s15  ;;  %s3057_s15 = smov %s3059_s17 }
  0xf4   :  { %12 = sbr.rel (!%p10_p12) target bundleno = 3 (0x3), region = 134 }

// kernel: unet_decoder_forward.15
= control target key start
LH: loop header
LB: loop body
LE: loop exit
PB: predicated region body
PF: predicated region fallthrough
CT: control target
= control target key end

     0   :  { %s2069_s15 = smov 0   ;;  %s2071_s16 = smov 0   ;;  %s2858_s0 = inlined_call_operand.vmem [shape: bf16[2048,128], index: 0, kind: input, shape index: {}]   ;;  %s2859_s1 = inlined_call_operand.vmem [shape: bf16[128,256], index: 1, kind: input, shape index: {}]   ;;  %s2860_s2 = inlined_call_operand.vmem [shape: f32[2048,256], index: 2, kind: output, shape index: {0}]   ;;  %s2861_s3 = inlined_call_operand.vmem [shape: f32[1,256], index: 3, kind: output, shape index: {1}]   ;;  %s2862_s4 = inlined_call_operand.vmem [shape: f32[1,256], index: 4, kind: output, shape index: {2}]  }
   0x1   :  { %s2073_s17 = smov 0   ;;  %s2075_s18 = smov 0  }
   0x2   :  { %s2077_s19 = smov 0   ;;  %s2079_s20 = smov 0  }
   0x3   :  { %s2081_s21 = smov 0   ;;  %s2083_s22 = smov 0  }
   0x4   :  { %s2085_s23 = smov 0  }
   0x5 LB: > { %s24_s24 = sadd.s32 1, %s2033_s21  ;;  %s27_s25 = sadd.s32 1, %s2037_s22  ;;  %s2041_s23 = sphi %s2085_s23, %s15_s23   ;;  %s2037_s22 = sphi %s2083_s22, %s2920_s22   ;;  %s2033_s21 = sphi %s2081_s21, %s2919_s21   ;;  %s2029_s20 = sphi %s2079_s20, %s2918_s20   ;;  %s2025_s19 = sphi %s2077_s19, %s2917_s19   ;;  %s2021_s18 = sphi %s2075_s18, %s2916_s18   ;;  %s2017_s17 = sphi %s2073_s17, %s2915_s17   ;;  %s2013_s16 = sphi %s2071_s16, %s2914_s16   ;;  %s2009_s15 = sphi %s2069_s15, %s2913_s15  }
   0x6   : > { %p25_p0 = scmp.ge.s32.totalorder %s24_s24, 4  ;;  %p67_p1 = scmp.ne.s32.totalorder %s2021_s18, %s2017_s17 }
   0x7   : > { %s1663_s26 = sadd.s32 4294967295, %s2041_s23   ;;  %p68_p2 = scmp.eq.s32.totalorder %s2041_s23, 0 }
   0x8   : > { %s2922_s24 = smov (%p25_p0, %s24_s24), 0  ;;  %s2924_s25 = smov (!%p25_p0, %s27_s25), %s2037_s22 }
   0x9   : > { %p29_p3 = scmp.ge.s32.totalorder %s2924_s25, 2  ;;  %s83_s27 = ssub.s32 %s2033_s21, %s2922_s24 }
   0xa   : > { %p2125_p4 = por %p68_p2, %p67_p1  ;;  %p98_p5 = scmp.ne.s32.totalorder %s2013_s16, %s2009_s15 }
   0xb   : > { %s2926_s25 = smov (%p29_p3, %s2924_s25), 0  ;;  %s60_s29 = sadd.s32 1, %s2021_s18 }
   0xc   : > { %p99_p6 = scmp.eq.s32.totalorder %s1663_s26, 7  ;;  %s57_s30 = ssub.s32 %s2037_s22, %s2926_s25 }
   0xd   : > { %s88_s5 = sadd.s32 1, %s2013_s16  ;;  %p58_p7 = scmp.eq.s32.totalorder %s57_s30, 0 }
   0xe   : > { %s85_s6 = sor.u32 %s83_s27, %s57_s30  ;;  %p2137_p9 = por %p99_p6, %p98_p5 }
   0xf   : > { %p86_p8 = scmp.eq.s32.totalorder %s85_s6, 0  ;;  %p1666_p10 = scmp.ge.s32.totalorder %s2041_s23, 8 }
  0x10   : > { %s2142_s8 = scalar_select %p58_p7, %s2021_s18, %s60_s29  }
  0x11   : > { %s2145_s9 = scalar_select %p86_p8, %s2013_s16, %s88_s5  }
  0x12   : > { %173 = sbr.rel (%p1666_p10) target bundleno = 39 (0x27), region = 16 }
  0x19   : > { %185 = sbr.rel (!%p2125_p4) target bundleno = 39 (0x27), region = 24  ;;  %s187_s10 = sand.u32 (%p2125_p4), 1, %s2021_s18  }
  0x1a   : > { %s1668_s11 = sshll.u32 (%p2125_p4), %s2037_s22, 2  ;;  %s1667_s12 = sshll.u32 (%p2125_p4), %s187_s10, 6 }
  0x1b   : > { %s2155_s26 = scalar_lea.vmem (%p2125_p4), %s2859_s1, %s1668_s11  ;;  %s189_s27 = scalar_lea.vmem (%p2125_p4), [#allocation2], %s1667_s12 }
  0x1c   : > { %v207_v0 = vld [vmem:[%s2155_s26] sm:$0xf] (%p2125_p4)  ;;  %v209_v1 = vld [vmem:[%s2155_s26 + $0x8] sm:$0xf] (%p2125_p4)  ;;  %v211_v2 = vld [vmem:[%s2155_s26 + $0x10] sm:$0xf] (%p2125_p4) }
  0x1d   : > { %208 = vst [vmem:[%s189_s27] sm:$0xf] (%p2125_p4), %v207_v0  ;;  %210 = vst [vmem:[%s189_s27 + $0x4] sm:$0xf] (%p2125_p4), %v209_v1  ;;  %v213_v3 = vld [vmem:[%s2155_s26 + $0x18] sm:$0xf] (%p2125_p4) }
  0x1e   : > { %v215_v4 = vld [vmem:[%s2155_s26 + $0x20] sm:$0xf] (%p2125_p4)  ;;  %212 = vst [vmem:[%s189_s27 + $0x8] sm:$0xf] (%p2125_p4), %v211_v2  ;;  %214 = vst [vmem:[%s189_s27 + $0xc] sm:$0xf] (%p2125_p4), %v213_v3 }
  0x1f   : > { %216 = vst [vmem:[%s189_s27 + $0x10] sm:$0xf] (%p2125_p4), %v215_v4  ;;  %v217_v5 = vld [vmem:[%s2155_s26 + $0x28] sm:$0xf] (%p2125_p4)  ;;  %v219_v6 = vld [vmem:[%s2155_s26 + $0x30] sm:$0xf] (%p2125_p4) }
  0x20   : > { %v221_v7 = vld [vmem:[%s2155_s26 + $0x38] sm:$0xf]  ;;  %218 = vst [vmem:[%s189_s27 + $0x14] sm:$0xf] %v217_v5  ;;  %220 = vst [vmem:[%s189_s27 + $0x18] sm:$0xf] %v219_v6 }
  0x21   : > { %222 = vst [vmem:[%s189_s27 + $0x1c] sm:$0xf] %v221_v7  ;;  %v223_v8 = vld [vmem:[%s2155_s26 + $0x40] sm:$0xf]  ;;  %v225_v9 = vld [vmem:[%s2155_s26 + $0x48] sm:$0xf] }
  0x22   : > { %v227_v10 = vld [vmem:[%s2155_s26 + $0x50] sm:$0xf]  ;;  %224 = vst [vmem:[%s189_s27 + $0x20] sm:$0xf] %v223_v8  ;;  %226 = vst [vmem:[%s189_s27 + $0x24] sm:$0xf] %v225_v9 }
  0x23   : > { %228 = vst [vmem:[%s189_s27 + $0x28] sm:$0xf] %v227_v10  ;;  %v229_v11 = vld [vmem:[%s2155_s26 + $0x58] sm:$0xf]  ;;  %v231_v12 = vld [vmem:[%s2155_s26 + $0x60] sm:$0xf] }
  0x24   : > { %v233_v13 = vld [vmem:[%s2155_s26 + $0x68] sm:$0xf]  ;;  %230 = vst [vmem:[%s189_s27 + $0x2c] sm:$0xf] %v229_v11  ;;  %232 = vst [vmem:[%s189_s27 + $0x30] sm:$0xf] %v231_v12 }
  0x25   : > { %234 = vst [vmem:[%s189_s27 + $0x34] sm:$0xf] %v233_v13  ;;  %v235_v14 = vld [vmem:[%s2155_s26 + $0x70] sm:$0xf]  ;;  %v237_v15 = vld [vmem:[%s2155_s26 + $0x78] sm:$0xf] }
  0x26   : > { %236 = vst [vmem:[%s189_s27 + $0x38] sm:$0xf] %v235_v14  ;;  %238 = vst [vmem:[%s189_s27 + $0x3c] sm:$0xf] %v237_v15 }
  0x27 PF: > { %p1669_p11 = scmp.ge.s32.totalorder %s2041_s23, 1  ;;  %p292_p12 = scmp.lt.s32.totalorder %s2041_s23, 9 }
  0x29   : > { %p293_p13 = pnand %p1669_p11, %p292_p12 }
  0x2b   : > { %296 = sbr.rel (%p293_p13) target bundleno = 515 (0x203), region = 65 }
  0x32   : > { %s299_s28 = sand.u32 1, %s2017_s17   ;;  %p341_p0 = scmp.lt.s32.totalorder %s2029_s20, 1 }
  0x33   : > { %s1670_s29 = sshll.u32 %s299_s28, 6  ;;  %s1672_s30 = sshll.u32 %s2025_s19, 6 }
  0x34   : > { %p335_p1 = scmp.lt.s32.totalorder %s1672_s30, 255  ;;  %s2179_s6 = scalar_lea.vmem [#allocation2], %s1670_s29 }
  0x35   : > { %s342_s5 = scalar_select %p341_p0, %s2029_s20, 1  ;;  %v1931_v16 = vld [vmem:[%s2179_s6] sm:$0xff]   ;;  %v1932_v17 = vld [vmem:[%s2179_s6 + $0x8] sm:$0xff]   ;;  %v1933_v18 = vld [vmem:[%s2179_s6 + $0x10] sm:$0xff]  }
  0x36   : > { %s2928_s30 = smov (!%p335_p1, %s1672_s30), 255  ;;  %1762 = vmatprep.subr.bf16.mxu0 %v1931_v16  ;;  %1842 = vmatprep.subr.bf16.mxu1 %v1931_v16  ;;  %v1934_v19 = vld [vmem:[%s2179_s6 + $0x18] sm:$0xff]   ;;  %v1935_v22 = vld [vmem:[%s2179_s6 + $0x20] sm:$0xff]   ;;  %v1936_v23 = vld [vmem:[%s2179_s6 + $0x28] sm:$0xff]   ;;  %p1714_p2 = scmp.ne.s32.totalorder %s2025_s19, 0 }
  0x37   : > { %s2186_s12 = scalar_lea.vmem %s2861_s3, %s342_s5  ;;  %s2191_s14 = scalar_lea.vmem %s2862_s4, %s342_s5  ;;  %1763 = vmatpush3.bf16.msra.mxu0 %v1931_v16  ;;  %1850 = vmatpush3.bf16.msra.mxu1 %v1931_v16  ;;  %v1937_v24 = vld [vmem:[%s2179_s6 + $0x30] sm:$0xff]   ;;  %v1938_v25 = vld [vmem:[%s2179_s6 + $0x38] sm:$0xff]  }
  0x38   : > { %s1673_s26 = sshll.u32 %s2928_s30, 2  ;;  %1764 = vmatprep.subr.bf16.mxu0 %v1932_v17  ;;  %1843 = vmatprep.subr.bf16.mxu1 %v1932_v17  ;;  %s321_s30 = sand.u32 1, %s2009_s15  }
  0x39   : > { %s2197_s29 = scalar_lea.vmem %s2858_s0, %s1673_s26  ;;  %s1671_s5 = sshll.u32 %s321_s30, 9 }
  0x3a   : > { %v1939_v20 = vld [vmem:[%s2197_s29] sm:$0xff]   ;;  %v1941_v26 = vld [vmem:[%s2197_s29 + $0x8] sm:$0xff]   ;;  %v1943_v28 = vld [vmem:[%s2197_s29 + $0x10] sm:$0xff]   ;;  %s2241_s6 = scalar_lea.vmem [#allocation3], %s1671_s5 }
  0x3b   : > { %1765 = vmatpush3.bf16.msra.mxu0 %v1932_v17  ;;  %1851 = vmatpush3.bf16.msra.mxu1 %v1932_v17  ;;  %v1940_v21 = vld [vmem:[%s2197_s29 + $0x80] sm:$0xff]   ;;  %v1942_v27 = vld [vmem:[%s2197_s29 + $0x88] sm:$0xff]   ;;  %v1944_v29 = vld [vmem:[%s2197_s29 + $0x90] sm:$0xff]  }
  0x3c   : > { %1766 = vmatprep.subr.bf16.mxu0 %v1933_v18  ;;  %1844 = vmatprep.subr.bf16.mxu1 %v1933_v18  ;;  %v1945_v30 = vld [vmem:[%s2197_s29 + $0x18] sm:$0xff]   ;;  %v1947_v32 = vld [vmem:[%s2197_s29 + $0x20] sm:$0xff]   ;;  %v1949_v34 = vld [vmem:[%s2197_s29 + $0x28] sm:$0xff]  }
  0x3d   : > { %1778 = vmatprep.mubr.bf16.mxu0 %v1939_v20  ;;  %1810 = vmatprep.mubr.bf16.mxu1 %v1940_v21  ;;  %v1946_v31 = vld [vmem:[%s2197_s29 + $0x98] sm:$0xff]   ;;  %v1948_v33 = vld [vmem:[%s2197_s29 + $0xa0] sm:$0xff]   ;;  %v1950_v35 = vld [vmem:[%s2197_s29 + $0xa8] sm:$0xff]  }
  0x3e   : > { %v1951_v36 = vld [vmem:[%s2197_s29 + $0x30] sm:$0xff]   ;;  %v1953_v38 = vld [vmem:[%s2197_s29 + $0x38] sm:$0xff]   ;;  %v1955_v40 = vld [vmem:[%s2197_s29 + $0x40] sm:$0xff]  }
  0x3f   : > { %1767 = vmatpush3.bf16.msra.mxu0 %v1933_v18  ;;  %1852 = vmatpush3.bf16.msra.mxu1 %v1933_v18  ;;  %v1952_v37 = vld [vmem:[%s2197_s29 + $0xb0] sm:$0xff]   ;;  %v1954_v39 = vld [vmem:[%s2197_s29 + $0xb8] sm:$0xff]   ;;  %v1956_v41 = vld [vmem:[%s2197_s29 + $0xc0] sm:$0xff]  }
  0x40   : > { %1768 = vmatprep.subr.bf16.mxu0 %v1934_v19  ;;  %1845 = vmatprep.subr.bf16.mxu1 %v1934_v19  ;;  %v1957_v42 = vld [vmem:[%s2197_s29 + $0x48] sm:$0xff]   ;;  %v1959_v44 = vld [vmem:[%s2197_s29 + $0x50] sm:$0xff]   ;;  %v1961_v46 = vld [vmem:[%s2197_s29 + $0x58] sm:$0xff]  }
  0x41   : > { %v1958_v43 = vld [vmem:[%s2197_s29 + $0xc8] sm:$0xff]   ;;  %v1960_v45 = vld [vmem:[%s2197_s29 + $0xd0] sm:$0xff]   ;;  %v1962_v47 = vld [vmem:[%s2197_s29 + $0xd8] sm:$0xff]  }
  0x42   : > { %v1963_v48 = vld [vmem:[%s2197_s29 + $0x60] sm:$0xff]   ;;  %v1965_v50 = vld [vmem:[%s2197_s29 + $0x68] sm:$0xff]   ;;  %v1967_v52 = vld [vmem:[%s2197_s29 + $0x70] sm:$0xff]  }
  0x43   : > { %1769 = vmatpush3.bf16.msra.mxu0 %v1934_v19  ;;  %1853 = vmatpush3.bf16.msra.mxu1 %v1934_v19  ;;  %v1964_v49 = vld [vmem:[%s2197_s29 + $0xe0] sm:$0xff]   ;;  %v1966_v51 = vld [vmem:[%s2197_s29 + $0xe8] sm:$0xff]   ;;  %v1968_v53 = vld [vmem:[%s2197_s29 + $0xf0] sm:$0xff]  }
  0x44   : > { %1770 = vmatprep.subr.bf16.mxu0 %v1935_v22  ;;  %1846 = vmatprep.subr.bf16.mxu1 %v1935_v22  ;;  %v1969_v54 = vld [vmem:[%s2197_s29 + $0x78] sm:$0xff]  }
  0x45   : > { %v1970_v55 = vld [vmem:[%s2197_s29 + $0xf8] sm:$0xff]  }
  0x47   : > { %1771 = vmatpush3.bf16.msra.mxu0 %v1935_v22  ;;  %1854 = vmatpush3.bf16.msra.mxu1 %v1935_v22 }
  0x48   : > { %1772 = vmatprep.subr.bf16.mxu0 %v1936_v23  ;;  %1847 = vmatprep.subr.bf16.mxu1 %v1936_v23 }
  0x4b   : > { %1773 = vmatpush3.bf16.msra.mxu0 %v1936_v23  ;;  %1855 = vmatpush3.bf16.msra.mxu1 %v1936_v23 }
  0x4c   : > { %1774 = vmatprep.subr.bf16.mxu0 %v1937_v24  ;;  %1848 = vmatprep.subr.bf16.mxu1 %v1937_v24 }
  0x4f   : > { %1775 = vmatpush3.bf16.msra.mxu0 %v1937_v24  ;;  %1856 = vmatpush3.bf16.msra.mxu1 %v1937_v24 }
  0x50   : > { %1776 = vmatprep.subr.bf16.mxu0 %v1938_v25  ;;  %1849 = vmatprep.subr.bf16.mxu1 %v1938_v25 }
  0x53   : > { %1777 = vmatpush3.bf16.msra.mxu0 %v1938_v25  ;;  %1857 = vmatpush3.bf16.msra.mxu1 %v1938_v25 }
  0x56   : > { %1779 = vmatmul.mubr.bf16.vlgmr.msra.gmra.mrb[0].mxu0 %v1941_v26  ;;  %1811 = vmatmul.mubr.bf16.vlgmr.msra.gmra.mrb[0].mxu1 %v1942_v27 }
  0x57   : > { %1782 = vmatprep.mubr.bf16.mxu0 %v1943_v28  ;;  %1814 = vmatprep.mubr.bf16.mxu1 %v1944_v29 }
  0x5e   : > { %1783 = vmatmul.mubr.bf16.gmra.mrb[4].mxu0 %v1945_v30  ;;  %1815 = vmatmul.mubr.bf16.gmra.mrb[4].mxu1 %v1946_v31 }
  0x5f   : > { %1786 = vmatprep.mubr.bf16.mxu0 %v1947_v32  ;;  %1818 = vmatprep.mubr.bf16.mxu1 %v1948_v33 }
  0x66   : > { %1787 = vmatmul.mubr.bf16.gmra.mrb[8].mxu0 %v1949_v34  ;;  %1819 = vmatmul.mubr.bf16.gmra.mrb[8].mxu1 %v1950_v35 }
  0x67   : > { %1790 = vmatprep.mubr.bf16.mxu0 %v1951_v36  ;;  %1822 = vmatprep.mubr.bf16.mxu1 %v1952_v37 }
  0x6e   : > { %1791 = vmatmul.mubr.bf16.gmra.mrb[12].mxu0 %v1953_v38  ;;  %1823 = vmatmul.mubr.bf16.gmra.mrb[12].mxu1 %v1954_v39 }
  0x6f   : > { %1794 = vmatprep.mubr.bf16.mxu0 %v1955_v40  ;;  %1826 = vmatprep.mubr.bf16.mxu1 %v1956_v41 }
  0x76   : > { %1795 = vmatmul.mubr.bf16.gmra.mrb[16].mxu0 %v1957_v42  ;;  %1827 = vmatmul.mubr.bf16.gmra.mrb[16].mxu1 %v1958_v43 }
  0x77   : > { %1798 = vmatprep.mubr.bf16.mxu0 %v1959_v44  ;;  %1830 = vmatprep.mubr.bf16.mxu1 %v1960_v45 }
  0x7e   : > { %1799 = vmatmul.mubr.bf16.gmra.mrb[20].mxu0 %v1961_v46  ;;  %1831 = vmatmul.mubr.bf16.gmra.mrb[20].mxu1 %v1962_v47 }
  0x7f   : > { %1802 = vmatprep.mubr.bf16.mxu0 %v1963_v48  ;;  %1834 = vmatprep.mubr.bf16.mxu1 %v1964_v49 }
  0x86   : > { %1803 = vmatmul.mubr.bf16.gmra.mrb[24].mxu0 %v1965_v50  ;;  %1835 = vmatmul.mubr.bf16.gmra.mrb[24].mxu1 %v1966_v51 }
  0x87   : > { %1806 = vmatprep.mubr.bf16.mxu0 %v1967_v52  ;;  %1838 = vmatprep.mubr.bf16.mxu1 %v1968_v53 }
  0x8e   : > { %1807 = vmatmul.mubr.bf16.gmra.mrb[28].mxu0 %v1969_v54  ;;  %1839 = vmatmul.mubr.bf16.gmra.mrb[28].mxu1 %v1970_v55 }
 0x129   : > { %v2237_v56 = vpop.f32.mrb[0].mxu0  ;;  %v2239_v57 = vpop.f32.mrb[0].mxu1 }
 0x12a   : > { %959 = vst [vmem:[%s2241_s6 + $0x10] sm:$0xff] %v2237_v56  ;;  %991 = vst [vmem:[%s2241_s6 + $0x110] sm:$0xff] %v2239_v57  ;;  %v2247_v58 = vpop.f32.mrb[1].mxu0  ;;  %v2249_v59 = vpop.f32.mrb[1].mxu1 }
 0x12b   : > { %957 = vst [vmem:[%s2241_s6] sm:$0xff] %v2247_v58  ;;  %989 = vst [vmem:[%s2241_s6 + $0x100] sm:$0xff] %v2249_v59  ;;  %v2255_v60 = vpop.f32.mrb[2].mxu0  ;;  %v2257_v61 = vpop.f32.mrb[2].mxu1 }
 0x12c   : > { %960 = vst [vmem:[%s2241_s6 + $0x18] sm:$0xff] %v2255_v60  ;;  %992 = vst [vmem:[%s2241_s6 + $0x118] sm:$0xff] %v2257_v61  ;;  %v2263_v62 = vpop.f32.mrb[3].mxu0  ;;  %v2265_v63 = vpop.f32.mrb[3].mxu1 }
 0x12d   : > { %958 = vst [vmem:[%s2241_s6 + $0x8] sm:$0xff] %v2263_v62  ;;  %990 = vst [vmem:[%s2241_s6 + $0x108] sm:$0xff] %v2265_v63 }
 0x131   : > { %v2271_v0 = vpop.f32.mrb[4].mxu0  ;;  %v2273_v1 = vpop.f32.mrb[4].mxu1 }
 0x132   : > { %963 = vst [vmem:[%s2241_s6 + $0x30] sm:$0xff] %v2271_v0  ;;  %995 = vst [vmem:[%s2241_s6 + $0x130] sm:$0xff] %v2273_v1  ;;  %v2279_v2 = vpop.f32.mrb[5].mxu0  ;;  %v2281_v3 = vpop.f32.mrb[5].mxu1 }
 0x133   : > { %961 = vst [vmem:[%s2241_s6 + $0x20] sm:$0xff] %v2279_v2  ;;  %993 = vst [vmem:[%s2241_s6 + $0x120] sm:$0xff] %v2281_v3  ;;  %v2287_v4 = vpop.f32.mrb[6].mxu0  ;;  %v2289_v5 = vpop.f32.mrb[6].mxu1 }
 0x134   : > { %964 = vst [vmem:[%s2241_s6 + $0x38] sm:$0xff] %v2287_v4  ;;  %996 = vst [vmem:[%s2241_s6 + $0x138] sm:$0xff] %v2289_v5  ;;  %v2295_v6 = vpop.f32.mrb[7].mxu0  ;;  %v2297_v7 = vpop.f32.mrb[7].mxu1 }
 0x135   : > { %962 = vst [vmem:[%s2241_s6 + $0x28] sm:$0xff] %v2295_v6  ;;  %994 = vst [vmem:[%s2241_s6 + $0x128] sm:$0xff] %v2297_v7 }
 0x139   : > { %v2303_v8 = vpop.f32.mrb[8].mxu0  ;;  %v2305_v9 = vpop.f32.mrb[8].mxu1 }
 0x13a   : > { %967 = vst [vmem:[%s2241_s6 + $0x50] sm:$0xff] %v2303_v8  ;;  %999 = vst [vmem:[%s2241_s6 + $0x150] sm:$0xff] %v2305_v9  ;;  %v2311_v10 = vpop.f32.mrb[9].mxu0  ;;  %v2313_v11 = vpop.f32.mrb[9].mxu1 }
 0x13b   : > { %965 = vst [vmem:[%s2241_s6 + $0x40] sm:$0xff] %v2311_v10  ;;  %997 = vst [vmem:[%s2241_s6 + $0x140] sm:$0xff] %v2313_v11  ;;  %v2319_v12 = vpop.f32.mrb[10].mxu0  ;;  %v2321_v13 = vpop.f32.mrb[10].mxu1 }
 0x13c   : > { %968 = vst [vmem:[%s2241_s6 + $0x58] sm:$0xff] %v2319_v12  ;;  %1000 = vst [vmem:[%s2241_s6 + $0x158] sm:$0xff] %v2321_v13  ;;  %v2327_v14 = vpop.f32.mrb[11].mxu0  ;;  %v2329_v15 = vpop.f32.mrb[11].mxu1 }
 0x13d   : > { %966 = vst [vmem:[%s2241_s6 + $0x48] sm:$0xff] %v2327_v14  ;;  %998 = vst [vmem:[%s2241_s6 + $0x148] sm:$0xff] %v2329_v15 }
 0x141   : > { %v2335_v16 = vpop.f32.mrb[12].mxu0  ;;  %v2337_v17 = vpop.f32.mrb[12].mxu1 }
 0x142   : > { %971 = vst [vmem:[%s2241_s6 + $0x70] sm:$0xff] %v2335_v16  ;;  %1003 = vst [vmem:[%s2241_s6 + $0x170] sm:$0xff] %v2337_v17  ;;  %v2343_v18 = vpop.f32.mrb[13].mxu0  ;;  %v2345_v19 = vpop.f32.mrb[13].mxu1 }
 0x143   : > { %969 = vst [vmem:[%s2241_s6 + $0x60] sm:$0xff] %v2343_v18  ;;  %1001 = vst [vmem:[%s2241_s6 + $0x160] sm:$0xff] %v2345_v19  ;;  %v2351_v20 = vpop.f32.mrb[14].mxu0  ;;  %v2353_v21 = vpop.f32.mrb[14].mxu1 }
 0x144   : > { %972 = vst [vmem:[%s2241_s6 + $0x78] sm:$0xff] %v2351_v20  ;;  %1004 = vst [vmem:[%s2241_s6 + $0x178] sm:$0xff] %v2353_v21  ;;  %v2359_v22 = vpop.f32.mrb[15].mxu0  ;;  %v2361_v23 = vpop.f32.mrb[15].mxu1 }
 0x145   : > { %970 = vst [vmem:[%s2241_s6 + $0x68] sm:$0xff] %v2359_v22  ;;  %1002 = vst [vmem:[%s2241_s6 + $0x168] sm:$0xff] %v2361_v23 }
 0x149   : > { %v2367_v24 = vpop.f32.mrb[16].mxu0  ;;  %v2369_v25 = vpop.f32.mrb[16].mxu1 }
 0x14a   : > { %975 = vst [vmem:[%s2241_s6 + $0x90] sm:$0xff] %v2367_v24  ;;  %1007 = vst [vmem:[%s2241_s6 + $0x190] sm:$0xff] %v2369_v25  ;;  %v2375_v26 = vpop.f32.mrb[17].mxu0  ;;  %v2377_v27 = vpop.f32.mrb[17].mxu1 }
 0x14b   : > { %973 = vst [vmem:[%s2241_s6 + $0x80] sm:$0xff] %v2375_v26  ;;  %1005 = vst [vmem:[%s2241_s6 + $0x180] sm:$0xff] %v2377_v27  ;;  %v2383_v28 = vpop.f32.mrb[18].mxu0  ;;  %v2385_v29 = vpop.f32.mrb[18].mxu1 }
 0x14c   : > { %976 = vst [vmem:[%s2241_s6 + $0x98] sm:$0xff] %v2383_v28  ;;  %1008 = vst [vmem:[%s2241_s6 + $0x198] sm:$0xff] %v2385_v29  ;;  %v2391_v30 = vpop.f32.mrb[19].mxu0  ;;  %v2393_v31 = vpop.f32.mrb[19].mxu1 }
 0x14d   : > { %974 = vst [vmem:[%s2241_s6 + $0x88] sm:$0xff] %v2391_v30  ;;  %1006 = vst [vmem:[%s2241_s6 + $0x188] sm:$0xff] %v2393_v31 }
 0x151   : > { %v2399_v32 = vpop.f32.mrb[20].mxu0  ;;  %v2401_v33 = vpop.f32.mrb[20].mxu1 }
 0x152   : > { %2889 = vst [vmem:[#allocation4_spill] sm:$0xff] %v2401_v33  ;;  %979 = vst [vmem:[%s2241_s6 + $0xb0] sm:$0xff] %v2399_v32  ;;  %v2407_v34 = vpop.f32.mrb[21].mxu0  ;;  %v2409_v35 = vpop.f32.mrb[21].mxu1 }
 0x153   : > { %1011 = vst [vmem:[%s2241_s6 + $0x1b0] sm:$0xff] %v2401_v33  ;;  %2890 = vst [vmem:[#allocation5_spill] sm:$0xff] %v2409_v35  ;;  %v2415_v36 = vpop.f32.mrb[22].mxu0  ;;  %v2417_v37 = vpop.f32.mrb[22].mxu1 }
 0x154   : > { %977 = vst [vmem:[%s2241_s6 + $0xa0] sm:$0xff] %v2407_v34  ;;  %1009 = vst [vmem:[%s2241_s6 + $0x1a0] sm:$0xff] %v2409_v35  ;;  %v2423_v38 = vpop.f32.mrb[23].mxu0  ;;  %v2425_v39 = vpop.f32.mrb[23].mxu1 }
 0x155   : > { %2891 = vst [vmem:[#allocation6_spill] sm:$0xff] %v2417_v37  ;;  %980 = vst [vmem:[%s2241_s6 + $0xb8] sm:$0xff] %v2415_v36 }
 0x156   : > { %1012 = vst [vmem:[%s2241_s6 + $0x1b8] sm:$0xff] %v2417_v37  ;;  %2892 = vst [vmem:[#allocation7_spill] sm:$0xff] %v2425_v39 }
 0x157   : > { %978 = vst [vmem:[%s2241_s6 + $0xa8] sm:$0xff] %v2423_v38  ;;  %1010 = vst [vmem:[%s2241_s6 + $0x1a8] sm:$0xff] %v2425_v39 }
 0x159   : > { %v2431_v40 = vpop.f32.mrb[24].mxu0  ;;  %v2433_v41 = vpop.f32.mrb[24].mxu1 }
 0x15a   : > { %2893 = vst [vmem:[#allocation8_spill] sm:$0xff] %v2433_v41  ;;  %983 = vst [vmem:[%s2241_s6 + $0xd0] sm:$0xff] %v2431_v40  ;;  %v2439_v42 = vpop.f32.mrb[25].mxu0  ;;  %v2441_v43 = vpop.f32.mrb[25].mxu1 }
 0x15b   : > { %1015 = vst [vmem:[%s2241_s6 + $0x1d0] sm:$0xff] %v2433_v41  ;;  %2894 = vst [vmem:[#allocation9_spill] sm:$0xff] %v2441_v43  ;;  %v2447_v44 = vpop.f32.mrb[26].mxu0  ;;  %v2449_v45 = vpop.f32.mrb[26].mxu1 }
 0x15c   : > { %981 = vst [vmem:[%s2241_s6 + $0xc0] sm:$0xff] %v2439_v42  ;;  %1013 = vst [vmem:[%s2241_s6 + $0x1c0] sm:$0xff] %v2441_v43  ;;  %v2455_v46 = vpop.f32.mrb[27].mxu0  ;;  %v2457_v47 = vpop.f32.mrb[27].mxu1 }
 0x15d   : > { %2895 = vst [vmem:[#allocation10_spill] sm:$0xff] %v2449_v45  ;;  %984 = vst [vmem:[%s2241_s6 + $0xd8] sm:$0xff] %v2447_v44 }
 0x15e   : > { %1016 = vst [vmem:[%s2241_s6 + $0x1d8] sm:$0xff] %v2449_v45  ;;  %2896 = vst [vmem:[#allocation11_spill] sm:$0xff] %v2457_v47 }
 0x15f   : > { %982 = vst [vmem:[%s2241_s6 + $0xc8] sm:$0xff] %v2455_v46  ;;  %1014 = vst [vmem:[%s2241_s6 + $0x1c8] sm:$0xff] %v2457_v47 }
 0x161   : > { %v2463_v48 = vpop.f32.mrb[28].mxu0  ;;  %v2465_v49 = vpop.f32.mrb[28].mxu1  ;;  %1024 = sbr.rel (%p1714_p2) target bundleno = 361 (0x169), region = 73 }
 0x162   : > { %2897 = vst [vmem:[#allocation12_spill] sm:$0xff] %v2465_v49  ;;  %987 = vst [vmem:[%s2241_s6 + $0xf0] sm:$0xff] %v2463_v48  ;;  %v2471_v50 = vpop.f32.mrb[29].mxu0  ;;  %v2473_v51 = vpop.f32.mrb[29].mxu1 }
 0x163   : > { %1019 = vst [vmem:[%s2241_s6 + $0x1f0] sm:$0xff] %v2465_v49  ;;  %2898 = vst [vmem:[#allocation13_spill] sm:$0xff] %v2473_v51  ;;  %v2479_v52 = vpop.f32.mrb[30].mxu0  ;;  %v2481_v53 = vpop.f32.mrb[30].mxu1  ;;  %v2043_v49 = vmov (!%p1714_p2), 0.0  }
 0x164   : > { %985 = vst [vmem:[%s2241_s6 + $0xe0] sm:$0xff] %v2471_v50  ;;  %1017 = vst [vmem:[%s2241_s6 + $0x1e0] sm:$0xff] %v2473_v51  ;;  %v2487_v54 = vpop.f32.mrb[31].mxu0  ;;  %v2489_v55 = vpop.f32.mrb[31].mxu1 }
 0x165   : > { %2899 = vst [vmem:[#allocation14_spill] sm:$0xff] %v2481_v53  ;;  %988 = vst [vmem:[%s2241_s6 + $0xf8] sm:$0xff] %v2479_v52 }
 0x166   : > { %1020 = vst [vmem:[%s2241_s6 + $0x1f8] sm:$0xff] %v2481_v53  ;;  %2900 = vst [vmem:[#allocation15_spill] sm:$0xff] %v2489_v55 }
 0x167   : > { %986 = vst [vmem:[%s2241_s6 + $0xe8] sm:$0xff] %v2487_v54  ;;  %1018 = vst [vmem:[%s2241_s6 + $0x1e8] sm:$0xff] %v2489_v55 }
 0x168   : > { %1025 = vst [vmem:[%s2186_s12] sm:$0x1] %v2043_v49  ;;  %1026 = vst [vmem:[%s2191_s14] sm:$0x1] %v2043_v49 }
 0x169 PF: > { %v1028_v53 = vadd.f32 %v2263_v62, %v2247_v58  ;;  %v1100_v49 = vmul.f32 %v2247_v58, %v2247_v58  ;;  %v1101_v33 = vmul.f32 %v2263_v62, %v2263_v62  ;;  %v1105_v62 = vmul.f32 %v2295_v6, %v2295_v6  ;;  %s1721_s15 = sshll.u32 (%p2137_p9), %s2025_s19, 7 }
 0x16a   : > { %s1250_s7 = sadd.s32 (%p2137_p9), %s2029_s20, %s1721_s15 }
 0x16b   : > { %v1029_v51 = vadd.f32 %v2237_v56, %v1028_v53  ;;  %s1718_s10 = sshll.u32 (%p2137_p9), %s1250_s7, 3 }
 0x16c   : > { %s2710_s17 = scalar_lea.vmem (%p2137_p9), %s2860_s2, %s1718_s10 }
 0x16d   : > { %v1030_v45 = vadd.f32 %v2255_v60, %v1029_v51  ;;  %v1102_v51 = vmul.f32 %v2237_v56, %v2237_v56 }
 0x16f   : > { %v1031_v41 = vadd.f32 %v1030_v45, %v2279_v2 }
 0x171   : > { %v1032_v55 = vadd.f32 %v1031_v41, %v2295_v6  ;;  %v1103_v41 = vmul.f32 %v2255_v60, %v2255_v60 }
 0x173   : > { %v1033_v47 = vadd.f32 %v2271_v0, %v1032_v55  ;;  %v1164_v55 = vadd.f32 %v1101_v33, %v1100_v49  ;;  %v1107_v33 = vmul.f32 %v2287_v4, %v2287_v4 }
 0x175   : > { %v1034_v43 = vadd.f32 %v2287_v4, %v1033_v47  ;;  %v1165_v58 = vadd.f32 %v1164_v55, %v1102_v51  ;;  %v1108_v51 = vmul.f32 %v2311_v10, %v2311_v10  ;;  %v1110_v55 = vmul.f32 %v2303_v8, %v2303_v8 }
 0x177   : > { %v1035_v37 = vadd.f32 %v1034_v43, %v2311_v10  ;;  %v1104_v43 = vmul.f32 %v2279_v2, %v2279_v2 }
 0x179   : > { %v1036_v53 = vadd.f32 %v1035_v37, %v2327_v14  ;;  %v1166_v37 = vadd.f32 %v1165_v58, %v1103_v41  ;;  %v1112_v58 = vmul.f32 %v2343_v18, %v2343_v18 }
 0x17b   : > { %v1037_v45 = vadd.f32 %v2303_v8, %v1036_v53  ;;  %v1106_v53 = vmul.f32 %v2271_v0, %v2271_v0  ;;  %v1167_v35 = vadd.f32 %v1166_v37, %v1104_v43  ;;  %v1113_v37 = vmul.f32 %v2359_v22, %v2359_v22 }
 0x17d   : > { %v1038_v47 = vadd.f32 %v2319_v12, %v1037_v45  ;;  %v1168_v49 = vadd.f32 %v1167_v35, %v1105_v62  ;;  %v1111_v35 = vmul.f32 %v2319_v12, %v2319_v12 }
 0x17f   : > { %v1039_v39 = vadd.f32 %v1038_v47, %v2343_v18  ;;  %v1169_v45 = vadd.f32 %v1168_v49, %v1106_v53  ;;  %v1114_v53 = vmul.f32 %v2335_v16, %v2335_v16 }
 0x181   : > { %v1040_v56 = vadd.f32 %v1039_v39, %v2359_v22  ;;  %v1109_v39 = vmul.f32 %v2327_v14, %v2327_v14  ;;  %v1170_v41 = vadd.f32 %v1169_v45, %v1107_v33  ;;  %v1115_v33 = vmul.f32 %v2351_v20, %v2351_v20 }
 0x182   : > { %v1117_v45 = vmul.f32 %v2391_v30, %v2391_v30 }
 0x183   : > { %v1041_v60 = vadd.f32 %v2335_v16, %v1040_v56  ;;  %v1171_v47 = vadd.f32 %v1170_v41, %v1108_v51 }
 0x185   : > { %v1042_v2 = vadd.f32 %v2351_v20, %v1041_v60  ;;  %v1172_v43 = vadd.f32 %v1171_v47, %v1109_v39  ;;  %v1118_v39 = vmul.f32 %v2367_v24, %v2367_v24  ;;  %v1120_v47 = vmul.f32 %v2407_v34, %v2407_v34 }
 0x187   : > { %v1043_v6 = vadd.f32 %v1042_v2, %v2375_v26  ;;  %v1173_v62 = vadd.f32 %v1172_v43, %v1110_v55  ;;  %v1116_v2 = vmul.f32 %v2375_v26, %v2375_v26 }
 0x189   : > { %v1044_v0 = vadd.f32 %v1043_v6, %v2391_v30  ;;  %v1174_v56 = vadd.f32 %v1173_v62, %v1111_v35  ;;  %v1121_v35 = vmul.f32 %v2423_v38, %v2423_v38  ;;  %v1123_v62 = vmul.f32 %v2415_v36, %v2415_v36 }
 0x18b   : > { %v1045_v4 = vadd.f32 %v2367_v24, %v1044_v0  ;;  %v1175_v60 = vadd.f32 %v1174_v56, %v1112_v58  ;;  %v1119_v0 = vmul.f32 %v2383_v28, %v2383_v28 }
 0x18d   : > { %v1046_v10 = vadd.f32 %v2383_v28, %v1045_v4  ;;  %v1176_v49 = vadd.f32 %v1175_v60, %v1113_v37  ;;  %v1124_v37 = vmul.f32 %v2439_v42, %v2439_v42  ;;  %v1126_v60 = vmul.f32 %v2431_v40, %v2431_v40 }
 0x18f   : > { %v1047_v14 = vadd.f32 %v1046_v10, %v2407_v34  ;;  %v1177_v51 = vadd.f32 %v1176_v49, %v1114_v53  ;;  %v1122_v10 = vmul.f32 %v2399_v32, %v2399_v32 }
 0x191   : > { %v1048_v8 = vadd.f32 %v1047_v14, %v2423_v38  ;;  %v1178_v6 = vadd.f32 %v1177_v51, %v1115_v33  ;;  %v1127_v33 = vmul.f32 %v2447_v44, %v2447_v44  ;;  %v1129_v51 = vmul.f32 %v2487_v54, %v2487_v54 }
 0x193   : > { %v1049_v12 = vadd.f32 %v2399_v32, %v1048_v8  ;;  %v1179_v41 = vadd.f32 %v1178_v6, %v1116_v2  ;;  %v1125_v8 = vmul.f32 %v2455_v46, %v2455_v46 }
 0x195   : > { %v1050_v18 = vadd.f32 %v2415_v36, %v1049_v12  ;;  %v1180_v55 = vadd.f32 %v1179_v41, %v1117_v45  ;;  %v1130_v45 = vmul.f32 %v2463_v48, %v2463_v48  ;;  %v1132_v41 = vmul.f32 %v2249_v59, %v2249_v59 }
 0x197   : > { %v1051_v22 = vadd.f32 %v1050_v18, %v2439_v42  ;;  %v1181_v4 = vadd.f32 %v1180_v55, %v1118_v39  ;;  %v1128_v18 = vmul.f32 %v2471_v50, %v2471_v50 }
 0x199   : > { %v1052_v16 = vadd.f32 %v1051_v22, %v2455_v46  ;;  %v1182_v43 = vadd.f32 %v1181_v4, %v1119_v0  ;;  %v1133_v0 = vmul.f32 %v2265_v63, %v2265_v63  ;;  %v1135_v4 = vmul.f32 %v2257_v61, %v2257_v61 }
 0x19b   : > { %v1053_v20 = vadd.f32 %v2431_v40, %v1052_v16  ;;  %v1183_v58 = vadd.f32 %v1182_v43, %v1120_v47  ;;  %v1131_v16 = vmul.f32 %v2479_v52, %v2479_v52 }
 0x19d   : > { %v1054_v26 = vadd.f32 %v2447_v44, %v1053_v20  ;;  %v1184_v14 = vadd.f32 %v1183_v58, %v1121_v35  ;;  %v1136_v35 = vmul.f32 %v2281_v3, %v2281_v3  ;;  %v1138_v58 = vmul.f32 %v2273_v1, %v2273_v1 }
 0x19f   : > { %v1055_v30 = vadd.f32 %v1054_v26, %v2471_v50  ;;  %v1185_v56 = vadd.f32 %v1184_v14, %v1122_v10  ;;  %v1134_v26 = vmul.f32 %v2239_v57, %v2239_v57 }
 0x1a1   : > { %v1056_v24 = vadd.f32 %v1055_v30, %v2487_v54  ;;  %v1186_v53 = vadd.f32 %v1185_v56, %v1123_v62  ;;  %v1139_v62 = vmul.f32 %v2289_v5, %v2289_v5  ;;  %v1141_v56 = vmul.f32 %v2329_v15, %v2329_v15 }
 0x1a3   : > { %v1057_v28 = vadd.f32 %v2463_v48, %v1056_v24  ;;  %v1187_v12 = vadd.f32 %v1186_v53, %v1124_v37  ;;  %v1137_v24 = vmul.f32 %v2297_v7, %v2297_v7 }
 0x1a5   : > { %v1058_v34 = vadd.f32 %v2479_v52, %v1057_v28  ;;  %v1188_v49 = vadd.f32 %v1187_v12, %v1125_v8  ;;  %v1142_v8 = vmul.f32 %v2305_v9, %v2305_v9  ;;  %v1144_v12 = vmul.f32 %v2345_v19, %v2345_v19 }
 0x1a7   : > { %v1059_v38 = vadd.f32 %v1058_v34, %v2249_v59  ;;  %v1189_v2 = vadd.f32 %v1188_v49, %v1126_v60  ;;  %v1140_v34 = vmul.f32 %v2313_v11, %v2313_v11  ;;  %v1145_v49 = vmul.f32 %v2361_v23, %v2361_v23 }
 0x1a9   : > { %v1060_v32 = vadd.f32 %v1059_v38, %v2265_v63  ;;  %v1190_v22 = vadd.f32 %v1189_v2, %v1127_v33  ;;  %v1146_v2 = vmul.f32 %v2337_v17, %v2337_v17 }
 0x1ab   : > { %v1061_v36 = vadd.f32 %v2239_v57, %v1060_v32  ;;  %v1191_v6 = vadd.f32 %v1190_v22, %v1128_v18  ;;  %v1143_v32 = vmul.f32 %v2321_v13, %v2321_v13  ;;  %v1147_v22 = vmul.f32 %v2353_v21, %v2353_v21 }
 0x1ad   : > { %v1062_v42 = vadd.f32 %v2257_v61, %v1061_v36  ;;  %v1192_v39 = vadd.f32 %v1191_v6, %v1129_v51  ;;  %v1148_v6 = vmul.f32 %v2377_v27, %v2377_v27 }
 0x1af   : > { %v1063_v46 = vadd.f32 %v1062_v42, %v2281_v3  ;;  %v1193_v20 = vadd.f32 %v1192_v39, %v1130_v45  ;;  %v1149_v39 = vmul.f32 %v2393_v31, %v2393_v31 }
 0x1b1   : > { %v1064_v40 = vadd.f32 %v1063_v46, %v2297_v7  ;;  %v1194_v55 = vadd.f32 %v1193_v20, %v1131_v16  ;;  %v1150_v20 = vmul.f32 %v2369_v25, %v2369_v25 }
 0x1b3   : > { %v1065_v44 = vadd.f32 %v2273_v1, %v1064_v40  ;;  %v1195_v47 = vadd.f32 %v1194_v55, %v1132_v41  ;;  %v1151_v55 = vmul.f32 %v2385_v29, %v2385_v29 }
 0x1b5   : > { %v1066_v50 = vadd.f32 %v2289_v5, %v1065_v44  ;;  %v1196_v30 = vadd.f32 %v1195_v47, %v1133_v0 }
 0x1b7   : > { %v1067_v54 = vadd.f32 %v1066_v50, %v2313_v11  ;;  %v1197_v43 = vadd.f32 %v1196_v30, %v1134_v26 }
 0x1b9   : > { %v1068_v48 = vadd.f32 %v1067_v54, %v2329_v15  ;;  %v1198_v10 = vadd.f32 %v1197_v43, %v1135_v4  ;;  %v2901_v15 = vld [vmem:[#allocation5_spill] sm:$0xff] }
 0x1ba   : > { %v1152_v47 = vmul.f32 %v2901_v15, %v2901_v15 }
 0x1bb   : > { %v1069_v52 = vadd.f32 %v2305_v9, %v1068_v48  ;;  %v1199_v28 = vadd.f32 %v1198_v10, %v1136_v35  ;;  %v2902_v9 = vld [vmem:[#allocation7_spill] sm:$0xff] }
 0x1bc   : > { %v1153_v30 = vmul.f32 %v2902_v9, %v2902_v9 }
 0x1bd   : > { %v1070_v59 = vadd.f32 %v2321_v13, %v1069_v52  ;;  %v1200_v14 = vadd.f32 %v1199_v28, %v1137_v24  ;;  %v2903_v13 = vld [vmem:[#allocation4_spill] sm:$0xff] }
 0x1be   : > { %v1154_v43 = vmul.f32 %v2903_v13, %v2903_v13 }
 0x1bf   : > { %v1071_v63 = vadd.f32 %v1070_v59, %v2345_v19  ;;  %v1201_v37 = vadd.f32 %v1200_v14, %v1138_v58  ;;  %v2904_v19 = vld [vmem:[#allocation6_spill] sm:$0xff] }
 0x1c0   : > { %v1155_v10 = vmul.f32 %v2904_v19, %v2904_v19  ;;  %v2912_v58 = vld [vmem:[#allocation14_spill] sm:$0xff] }
 0x1c1   : > { %v1072_v57 = vadd.f32 %v1071_v63, %v2361_v23  ;;  %v1202_v38 = vadd.f32 %v1201_v37, %v1139_v62  ;;  %v2905_v23 = vld [vmem:[#allocation9_spill] sm:$0xff] }
 0x1c3   : > { %v1073_v61 = vadd.f32 %v2337_v17, %v1072_v57  ;;  %v1203_v53 = vadd.f32 %v1202_v38, %v1140_v34  ;;  %v2906_v17 = vld [vmem:[#allocation11_spill] sm:$0xff] }
 0x1c5   : > { %v1074_v3 = vadd.f32 %v2353_v21, %v1073_v61  ;;  %v1204_v60 = vadd.f32 %v1203_v53, %v1141_v56  ;;  %v2907_v21 = vld [vmem:[#allocation8_spill] sm:$0xff]  ;;  %v1156_v61 = vmul.f32 %v2905_v23, %v2905_v23 }
 0x1c7   : > { %v1075_v7 = vadd.f32 %v1074_v3, %v2377_v27  ;;  %v1205_v36 = vadd.f32 %v1204_v60, %v1142_v8  ;;  %v2908_v27 = vld [vmem:[#allocation10_spill] sm:$0xff]  ;;  %v1157_v3 = vmul.f32 %v2906_v17, %v2906_v17 }
 0x1c9   : > { %v1076_v1 = vadd.f32 %v1075_v7, %v2393_v31  ;;  %v1206_v42 = vadd.f32 %v1205_v36, %v1143_v32  ;;  %v2909_v31 = vld [vmem:[#allocation13_spill] sm:$0xff]  ;;  %v1158_v7 = vmul.f32 %v2907_v21, %v2907_v21  ;;  %v1027_v36 = vld [vmem:[%s2186_s12] sm:$0x1] }
 0x1cb   : > { %v1077_v5 = vadd.f32 %v2369_v25, %v1076_v1  ;;  %v1207_v46 = vadd.f32 %v1206_v42, %v1144_v12  ;;  %v2910_v25 = vld [vmem:[#allocation15_spill] sm:$0xff]  ;;  %v1159_v1 = vmul.f32 %v2908_v27, %v2908_v27 }
 0x1cd   : > { %v1078_v11 = vadd.f32 %v2385_v29, %v1077_v5  ;;  %v1208_v40 = vadd.f32 %v1207_v46, %v1145_v49  ;;  %v2911_v29 = vld [vmem:[#allocation12_spill] sm:$0xff]  ;;  %v1160_v5 = vmul.f32 %v2909_v31, %v2909_v31 }
 0x1cf   : > { %v1079_v33 = vadd.f32 %v1078_v11, %v2901_v15  ;;  %v1209_v44 = vadd.f32 %v1208_v40, %v1146_v2  ;;  %v1161_v11 = vmul.f32 %v2910_v25, %v2910_v25 }
 0x1d1   : > { %v1080_v18 = vadd.f32 %v1079_v33, %v2902_v9  ;;  %v1210_v50 = vadd.f32 %v1209_v44, %v1147_v22  ;;  %v1162_v33 = vmul.f32 %v2911_v29, %v2911_v29  ;;  %v1163_v9 = vmul.f32 %v2912_v58, %v2912_v58 }
 0x1d3   : > { %v1081_v51 = vadd.f32 %v2903_v13, %v1080_v18  ;;  %v1211_v54 = vadd.f32 %v1210_v50, %v1148_v6  ;;  %v1412_v50 = vld [vmem:[%s2241_s6 + $0x18] sm:$0xff] (%p2137_p9) }
 0x1d4   : > { %1413 = vst [vmem:[%s2710_s17 + $0x30] sm:$0xff] (%p2137_p9), %v1412_v50 }
 0x1d5   : > { %v1082_v45 = vadd.f32 %v2904_v19, %v1081_v51  ;;  %v1212_v48 = vadd.f32 %v1211_v54, %v1149_v39  ;;  %v1410_v39 = vld [vmem:[%s2241_s6 + $0x10] sm:$0xff] (%p2137_p9)  ;;  %v1420_v54 = vld [vmem:[%s2241_s6 + $0x38] sm:$0xff] (%p2137_p9) }
 0x1d6   : > { %1411 = vst [vmem:[%s2710_s17 + $0x20] sm:$0xff] (%p2137_p9), %v1410_v39  ;;  %1421 = vst [vmem:[%s2710_s17 + $0x70] sm:$0xff] (%p2137_p9), %v1420_v54 }
 0x1d7   : > { %v1083_v16 = vadd.f32 %v1082_v45, %v2905_v23  ;;  %v1213_v52 = vadd.f32 %v1212_v48, %v1150_v20  ;;  %v1099_v45 = vld [vmem:[%s2191_s14] sm:$0x1]  ;;  %v1418_v20 = vld [vmem:[%s2241_s6 + $0x30] sm:$0xff] (%p2137_p9)  ;;  %v1428_v48 = vld [vmem:[%s2241_s6 + $0x58] sm:$0xff] (%p2137_p9) }
 0x1d8   : > { %v1406_v23 = vld [vmem:[%s2241_s6] sm:$0xff] (%p2137_p9)  ;;  %1419 = vst [vmem:[%s2710_s17 + $0x60] sm:$0xff] (%p2137_p9), %v1418_v20  ;;  %1429 = vst [vmem:[%s2710_s17 + $0xb0] sm:$0xff] (%p2137_p9), %v1428_v48 }
 0x1d9   : > { %v1084_v41 = vadd.f32 %v1083_v16, %v2906_v17  ;;  %v1214_v59 = vadd.f32 %v1213_v52, %v1151_v55  ;;  %v1408_v16 = vld [vmem:[%s2241_s6 + $0x8] sm:$0xff] (%p2137_p9)  ;;  %v1414_v17 = vld [vmem:[%s2241_s6 + $0x20] sm:$0xff] (%p2137_p9)  ;;  %v1426_v55 = vld [vmem:[%s2241_s6 + $0x50] sm:$0xff] (%p2137_p9)  ;;  %1407 = vst [vmem:[%s2710_s17] sm:$0xff] (%p2137_p9), %v1406_v23 }
 0x1da   : > { %1409 = vst [vmem:[%s2710_s17 + $0x10] sm:$0xff] (%p2137_p9), %v1408_v16  ;;  %1415 = vst [vmem:[%s2710_s17 + $0x40] sm:$0xff] (%p2137_p9), %v1414_v17  ;;  %v1436_v52 = vld [vmem:[%s2241_s6 + $0x78] sm:$0xff] (%p2137_p9) }
 0x1db   : > { %v1085_v0 = vadd.f32 %v2907_v21, %v1084_v41  ;;  %v1215_v63 = vadd.f32 %v1214_v59, %v1152_v47  ;;  %v1416_v41 = vld [vmem:[%s2241_s6 + $0x28] sm:$0xff] (%p2137_p9)  ;;  %v1422_v21 = vld [vmem:[%s2241_s6 + $0x40] sm:$0xff] (%p2137_p9)  ;;  %1427 = vst [vmem:[%s2710_s17 + $0xa0] sm:$0xff] (%p2137_p9), %v1426_v55  ;;  %v1434_v47 = vld [vmem:[%s2241_s6 + $0x70] sm:$0xff] (%p2137_p9) }
 0x1dc   : > { %1417 = vst [vmem:[%s2710_s17 + $0x50] sm:$0xff] (%p2137_p9), %v1416_v41  ;;  %1423 = vst [vmem:[%s2710_s17 + $0x80] sm:$0xff] (%p2137_p9), %v1422_v21  ;;  %v1444_v59 = vld [vmem:[%s2241_s6 + $0x98] sm:$0xff] (%p2137_p9) }
 0x1dd   : > { %v1086_v26 = vadd.f32 %v2908_v27, %v1085_v0  ;;  %v1216_v57 = vadd.f32 %v1215_v63, %v1153_v30  ;;  %v1424_v0 = vld [vmem:[%s2241_s6 + $0x48] sm:$0xff] (%p2137_p9)  ;;  %v1430_v27 = vld [vmem:[%s2241_s6 + $0x60] sm:$0xff] (%p2137_p9)  ;;  %1435 = vst [vmem:[%s2710_s17 + $0xe0] sm:$0xff] (%p2137_p9), %v1434_v47  ;;  %1437 = vst [vmem:[%s2710_s17 + $0xf0] sm:$0xff] (%p2137_p9), %v1436_v52 }
 0x1de   : > { %1425 = vst [vmem:[%s2710_s17 + $0x90] sm:$0xff] (%p2137_p9), %v1424_v0  ;;  %1431 = vst [vmem:[%s2710_s17 + $0xc0] sm:$0xff] (%p2137_p9), %v1430_v27  ;;  %v1442_v30 = vld [vmem:[%s2241_s6 + $0x90] sm:$0xff] (%p2137_p9)  ;;  %v1452_v63 = vld [vmem:[%s2241_s6 + $0xb8] sm:$0xff] (%p2137_p9) }
 0x1df   : > { %v1087_v4 = vadd.f32 %v1086_v26, %v2909_v31  ;;  %v1217_v62 = vadd.f32 %v1216_v57, %v1154_v43  ;;  %v1432_v26 = vld [vmem:[%s2241_s6 + $0x68] sm:$0xff] (%p2137_p9)  ;;  %v1438_v31 = vld [vmem:[%s2241_s6 + $0x80] sm:$0xff] (%p2137_p9)  ;;  %1443 = vst [vmem:[%s2710_s17 + $0x120] sm:$0xff] (%p2137_p9), %v1442_v30  ;;  %1445 = vst [vmem:[%s2710_s17 + $0x130] sm:$0xff] (%p2137_p9), %v1444_v59 }
 0x1e0   : > { %1433 = vst [vmem:[%s2710_s17 + $0xd0] sm:$0xff] (%p2137_p9), %v1432_v26  ;;  %1439 = vst [vmem:[%s2710_s17 + $0x100] sm:$0xff] (%p2137_p9), %v1438_v31  ;;  %v1450_v43 = vld [vmem:[%s2241_s6 + $0xb0] sm:$0xff] (%p2137_p9)  ;;  %v1460_v57 = vld [vmem:[%s2241_s6 + $0xd8] sm:$0xff] (%p2137_p9) }
 0x1e1   : > { %v1088_v35 = vadd.f32 %v1087_v4, %v2910_v25  ;;  %v1218_v34 = vadd.f32 %v1217_v62, %v1155_v10  ;;  %v1440_v4 = vld [vmem:[%s2241_s6 + $0x88] sm:$0xff] (%p2137_p9)  ;;  %v1446_v25 = vld [vmem:[%s2241_s6 + $0xa0] sm:$0xff] (%p2137_p9)  ;;  %1451 = vst [vmem:[%s2710_s17 + $0x160] sm:$0xff] (%p2137_p9), %v1450_v43  ;;  %1453 = vst [vmem:[%s2710_s17 + $0x170] sm:$0xff] (%p2137_p9), %v1452_v63 }
 0x1e2   : > { %1441 = vst [vmem:[%s2710_s17 + $0x110] sm:$0xff] (%p2137_p9), %v1440_v4  ;;  %1447 = vst [vmem:[%s2710_s17 + $0x140] sm:$0xff] (%p2137_p9), %v1446_v25  ;;  %v1458_v10 = vld [vmem:[%s2241_s6 + $0xd0] sm:$0xff] (%p2137_p9)  ;;  %v1468_v62 = vld [vmem:[%s2241_s6 + $0xf8] sm:$0xff] (%p2137_p9) }
 0x1e3   : > { %v1089_v24 = vadd.f32 %v2911_v29, %v1088_v35  ;;  %v1219_v56 = vadd.f32 %v1218_v34, %v1156_v61  ;;  %v1448_v35 = vld [vmem:[%s2241_s6 + $0xa8] sm:$0xff] (%p2137_p9)  ;;  %v1454_v29 = vld [vmem:[%s2241_s6 + $0xc0] sm:$0xff] (%p2137_p9)  ;;  %1459 = vst [vmem:[%s2710_s17 + $0x1a0] sm:$0xff] (%p2137_p9), %v1458_v10  ;;  %1461 = vst [vmem:[%s2710_s17 + $0x1b0] sm:$0xff] (%p2137_p9), %v1460_v57 }
 0x1e4   : > { %1449 = vst [vmem:[%s2710_s17 + $0x150] sm:$0xff] (%p2137_p9), %v1448_v35  ;;  %1455 = vst [vmem:[%s2710_s17 + $0x180] sm:$0xff] (%p2137_p9), %v1454_v29  ;;  %v1466_v61 = vld [vmem:[%s2241_s6 + $0xf0] sm:$0xff] (%p2137_p9) }
 0x1e5   : > { %v1090_v28 = vadd.f32 %v2912_v58, %v1089_v24  ;;  %v1220_v8 = vadd.f32 %v1219_v56, %v1157_v3  ;;  %v1456_v24 = vld [vmem:[%s2241_s6 + $0xc8] sm:$0xff] (%p2137_p9)  ;;  %v1462_v58 = vld [vmem:[%s2241_s6 + $0xe0] sm:$0xff] (%p2137_p9)  ;;  %1467 = vst [vmem:[%s2710_s17 + $0x1e0] sm:$0xff] (%p2137_p9), %v1466_v61  ;;  %1469 = vst [vmem:[%s2710_s17 + $0x1f0] sm:$0xff] (%p2137_p9), %v1468_v62 }
 0x1e6   : > { %1457 = vst [vmem:[%s2710_s17 + $0x190] sm:$0xff] (%p2137_p9), %v1456_v24  ;;  %1463 = vst [vmem:[%s2710_s17 + $0x1c0] sm:$0xff] (%p2137_p9), %v1462_v58  ;;  %v1472_v3 = vld [vmem:[%s2241_s6 + $0x108] sm:$0xff] (%p2137_p9)  ;;  %v1474_v34 = vld [vmem:[%s2241_s6 + $0x110] sm:$0xff] (%p2137_p9) }
 0x1e7   : > { %v1091_v14 = vrot.slane %v1090_v28, 4  ;;  %v1221_v32 = vadd.f32 %v1220_v8, %v1158_v7  ;;  %1473 = vst [vmem:[%s2710_s17 + $0x210] sm:$0xff] (%p2137_p9), %v1472_v3  ;;  %1475 = vst [vmem:[%s2710_s17 + $0x220] sm:$0xff] (%p2137_p9), %v1474_v34  ;;  %v1478_v7 = vld [vmem:[%s2241_s6 + $0x120] sm:$0xff] (%p2137_p9)  ;;  %v1480_v56 = vld [vmem:[%s2241_s6 + $0x128] sm:$0xff] (%p2137_p9) }
 0x1e8   : > { %1479 = vst [vmem:[%s2710_s17 + $0x240] sm:$0xff] (%p2137_p9), %v1478_v7  ;;  %1481 = vst [vmem:[%s2710_s17 + $0x250] sm:$0xff] (%p2137_p9), %v1480_v56  ;;  %v1486_v8 = vld [vmem:[%s2241_s6 + $0x140] sm:$0xff] (%p2137_p9) }
 0x1e9   : > { %v1092_v37 = vadd.f32 %v1091_v14, %v1090_v28  ;;  %v1222_v12 = vadd.f32 %v1221_v32, %v1159_v1  ;;  %v1464_v28 = vld [vmem:[%s2241_s6 + $0xe8] sm:$0xff] (%p2137_p9)  ;;  %v1470_v14 = vld [vmem:[%s2241_s6 + $0x100] sm:$0xff] (%p2137_p9)  ;;  %v1484_v1 = vld [vmem:[%s2241_s6 + $0x138] sm:$0xff] (%p2137_p9)  ;;  %1487 = vst [vmem:[%s2710_s17 + $0x280] sm:$0xff] (%p2137_p9), %v1486_v8 }
 0x1ea   : > { %1465 = vst [vmem:[%s2710_s17 + $0x1d0] sm:$0xff] (%p2137_p9), %v1464_v28  ;;  %1471 = vst [vmem:[%s2710_s17 + $0x200] sm:$0xff] (%p2137_p9), %v1470_v14  ;;  %v1492_v32 = vld [vmem:[%s2241_s6 + $0x158] sm:$0xff] (%p2137_p9) }
 0x1eb   : > { %v1093_v38 = vrot.slane %v1092_v37, 2  ;;  %v1223_v49 = vadd.f32 %v1222_v12, %v1160_v5  ;;  %1485 = vst [vmem:[%s2710_s17 + $0x270] sm:$0xff] (%p2137_p9), %v1484_v1  ;;  %v1490_v5 = vld [vmem:[%s2241_s6 + $0x150] sm:$0xff] (%p2137_p9)  ;;  %1493 = vst [vmem:[%s2710_s17 + $0x2b0] sm:$0xff] (%p2137_p9), %v1492_v32 }
 0x1ec   : > { %1491 = vst [vmem:[%s2710_s17 + $0x2a0] sm:$0xff] (%p2137_p9), %v1490_v5  ;;  %v1498_v12 = vld [vmem:[%s2241_s6 + $0x170] sm:$0xff] (%p2137_p9) }
 0x1ed   : > { %v1094_v53 = vadd.f32 %v1093_v38, %v1092_v37  ;;  %v1224_v18 = vadd.f32 %v1223_v49, %v1161_v11  ;;  %v1476_v37 = vld [vmem:[%s2241_s6 + $0x118] sm:$0xff] (%p2137_p9)  ;;  %v1482_v38 = vld [vmem:[%s2241_s6 + $0x130] sm:$0xff] (%p2137_p9)  ;;  %v1496_v11 = vld [vmem:[%s2241_s6 + $0x168] sm:$0xff] (%p2137_p9)  ;;  %1499 = vst [vmem:[%s2710_s17 + $0x2e0] sm:$0xff] (%p2137_p9), %v1498_v12 }
 0x1ee   : > { %1477 = vst [vmem:[%s2710_s17 + $0x230] sm:$0xff] (%p2137_p9), %v1476_v37  ;;  %1483 = vst [vmem:[%s2710_s17 + $0x260] sm:$0xff] (%p2137_p9), %v1482_v38  ;;  %v1506_v49 = vld [vmem:[%s2241_s6 + $0x190] sm:$0xff] (%p2137_p9) }
 0x1ef   : > { %v1095_v60 = vrot.slane %v1094_v53, 1  ;;  %v1225_v2 = vadd.f32 %v1224_v18, %v1162_v33  ;;  %1497 = vst [vmem:[%s2710_s17 + $0x2d0] sm:$0xff] (%p2137_p9), %v1496_v11  ;;  %v1504_v33 = vld [vmem:[%s2241_s6 + $0x188] sm:$0xff] (%p2137_p9)  ;;  %1507 = vst [vmem:[%s2710_s17 + $0x320] sm:$0xff] (%p2137_p9), %v1506_v49 }
 0x1f0   : > { %1505 = vst [vmem:[%s2710_s17 + $0x310] sm:$0xff] (%p2137_p9), %v1504_v33  ;;  %v1512_v18 = vld [vmem:[%s2241_s6 + $0x1a8] sm:$0xff] (%p2137_p9) }
 0x1f1   : > { %v1096_v15 = vadd.f32 %v1095_v60, %v1094_v53  ;;  %v1226_v46 = vadd.f32 %v1225_v2, %v1163_v9  ;;  %v1488_v53 = vld [vmem:[%s2241_s6 + $0x148] sm:$0xff] (%p2137_p9)  ;;  %v1494_v60 = vld [vmem:[%s2241_s6 + $0x160] sm:$0xff] (%p2137_p9)  ;;  %1513 = vst [vmem:[%s2710_s17 + $0x350] sm:$0xff] (%p2137_p9), %v1512_v18  ;;  %v1514_v2 = vld [vmem:[%s2241_s6 + $0x1b0] sm:$0xff] (%p2137_p9) }
 0x1f2   : > { %1489 = vst [vmem:[%s2710_s17 + $0x290] sm:$0xff] (%p2137_p9), %v1488_v53  ;;  %1495 = vst [vmem:[%s2710_s17 + $0x2c0] sm:$0xff] (%p2137_p9), %v1494_v60  ;;  %v1510_v9 = vld [vmem:[%s2241_s6 + $0x1a0] sm:$0xff] (%p2137_p9) }
 0x1f3   : > { %v1097_v42 = vadd.f32 %v1096_v15, %v1027_v36  ;;  %v1227_v13 = vrot.slane %v1226_v46, 4  ;;  %v1500_v36 = vld [vmem:[%s2241_s6 + $0x178] sm:$0xff] (%p2137_p9)  ;;  %v1502_v15 = vld [vmem:[%s2241_s6 + $0x180] sm:$0xff] (%p2137_p9)  ;;  %1511 = vst [vmem:[%s2710_s17 + $0x340] sm:$0xff] (%p2137_p9), %v1510_v9  ;;  %1515 = vst [vmem:[%s2710_s17 + $0x360] sm:$0xff] (%p2137_p9), %v1514_v2 }
 0x1f4   : > { %1501 = vst [vmem:[%s2710_s17 + $0x2f0] sm:$0xff] (%p2137_p9), %v1500_v36  ;;  %1503 = vst [vmem:[%s2710_s17 + $0x300] sm:$0xff] (%p2137_p9), %v1502_v15 }
 0x1f5   : > { %1098 = vst [vmem:[%s2186_s12] sm:$0x1] %v1097_v42  ;;  %v1228_v51 = vadd.f32 %v1227_v13, %v1226_v46  ;;  %v1508_v42 = vld [vmem:[%s2241_s6 + $0x198] sm:$0xff] (%p2137_p9)  ;;  %v1518_v13 = vld [vmem:[%s2241_s6 + $0x1c0] sm:$0xff] (%p2137_p9) }
 0x1f6   : > { %1509 = vst [vmem:[%s2710_s17 + $0x330] sm:$0xff] (%p2137_p9), %v1508_v42  ;;  %v1516_v46 = vld [vmem:[%s2241_s6 + $0x1b8] sm:$0xff] (%p2137_p9)  ;;  %1519 = vst [vmem:[%s2710_s17 + $0x380] sm:$0xff] (%p2137_p9), %v1518_v13 }
 0x1f7   : > { %v1229_v22 = vrot.slane %v1228_v51, 2  ;;  %1517 = vst [vmem:[%s2710_s17 + $0x370] sm:$0xff] (%p2137_p9), %v1516_v46 }
 0x1f9   : > { %v1230_v40 = vadd.f32 %v1229_v22, %v1228_v51  ;;  %v1520_v51 = vld [vmem:[%s2241_s6 + $0x1c8] sm:$0xff] (%p2137_p9)  ;;  %v1522_v22 = vld [vmem:[%s2241_s6 + $0x1d0] sm:$0xff] (%p2137_p9) }
 0x1fa   : > { %1521 = vst [vmem:[%s2710_s17 + $0x390] sm:$0xff] (%p2137_p9), %v1520_v51  ;;  %1523 = vst [vmem:[%s2710_s17 + $0x3a0] sm:$0xff] (%p2137_p9), %v1522_v22 }
 0x1fb   : > { %v1231_v19 = vrot.slane %v1230_v40, 1  ;;  %1247 = sbr.rel (!%p2137_p9) target bundleno = 515 (0x203), region = 77 }
 0x1fd   : > { %v1232_v6 = vadd.f32 %v1231_v19, %v1230_v40  ;;  %v1524_v40 = vld [vmem:[%s2241_s6 + $0x1d8] sm:$0xff] (%p2137_p9)  ;;  %v1526_v19 = vld [vmem:[%s2241_s6 + $0x1e0] sm:$0xff] (%p2137_p9) }
 0x1fe   : > { %1525 = vst [vmem:[%s2710_s17 + $0x3b0] sm:$0xff] (%p2137_p9), %v1524_v40  ;;  %1527 = vst [vmem:[%s2710_s17 + $0x3c0] sm:$0xff] (%p2137_p9), %v1526_v19 }
 0x1ff   : > { %v1233_v44 = vadd.f32 %v1232_v6, %v1099_v45  ;;  %v1528_v45 = vld [vmem:[%s2241_s6 + $0x1e8] sm:$0xff] (%p2137_p9)  ;;  %v1530_v6 = vld [vmem:[%s2241_s6 + $0x1f0] sm:$0xff] (%p2137_p9) }
 0x200   : > { %1529 = vst [vmem:[%s2710_s17 + $0x3d0] sm:$0xff] (%p2137_p9), %v1528_v45  ;;  %1531 = vst [vmem:[%s2710_s17 + $0x3e0] sm:$0xff] (%p2137_p9), %v1530_v6 }
 0x201   : > { %1234 = vst [vmem:[%s2191_s14] sm:$0x1] %v1233_v44  ;;  %v1532_v44 = vld [vmem:[%s2241_s6 + $0x1f8] sm:$0xff] (%p2137_p9) }
 0x202   : > { %1533 = vst [vmem:[%s2710_s17 + $0x3f0] sm:$0xff] %v1532_v44 }
 0x203 PF: > { %s15_s23 = sadd.s32 1, %s2041_s23   ;;  %s2913_s15 = smov %s2013_s16 }
 0x204   : > { %p12_p3 = scmp.ge.s32.totalorder %s15_s23, 10   ;;  %s2914_s16 = smov %s2145_s9 }
 0x205   : > { %s2915_s17 = smov %s2021_s18  ;;  %s2916_s18 = smov %s2142_s8 }
 0x206   : > { %s2917_s19 = smov %s2033_s21  ;;  %s2918_s20 = smov %s2037_s22 }
 0x207   : > { %s2919_s21 = smov %s2922_s24  ;;  %s2920_s22 = smov %s2926_s25 }
 0x208   :  { %14 = sbr.rel (!%p12_p3) target bundleno = 5 (0x5), region = 173 }

// kernel: tile.78
= control target key start
LH: loop header
LB: loop body
LE: loop exit
PB: predicated region body
PF: predicated region fallthrough
CT: control target
= control target key end

     0   :  { %s22_s0 = inlined_call_operand.vmem [shape: f32[64], index: 0, kind: input, shape index: {}]   ;;  %s23_s1 = inlined_call_operand.vmem [shape: f32[4,64], index: 1, kind: output, shape index: {}]  }
   0x1   :  { %v4_v0 = vld [vmem:[%s22_s0] ss:$0 sm:$0xff] }
   0x2   :  { %5 = vst [vmem:[%s23_s1] sm:$0xf] %v4_v0 }

// kernel: tile.79
= control target key start
LH: loop header
LB: loop body
LE: loop exit
PB: predicated region body
PF: predicated region fallthrough
CT: control target
= control target key end

     0   :  { %s6_s8 = smov 3  ;;  %vm8_vm0 = vcmask 523264   ;;  %s30_s9 = smov 64   ;;  %vm15_vm1 = vcmask 1048064   ;;  %s50_s0 = inlined_call_operand.vmem [shape: f32[4,64], index: 0, kind: input, shape index: {}]   ;;  %s51_s1 = inlined_call_operand.vmem [shape: f32[1,256], index: 1, kind: output, shape index: {}]  }
   0x1   :  { %v4_v0 = vld [vmem:[%s50_s0] sm:$0xf]  ;;  %s11_s0 = smov 3 }
   0x2   :  { %5 = vst [vmem:[#allocation1] sm:$0xf] %v4_v0 }
   0x9   :  { %v12_v1 = vld [vmem:[#allocation1 + $0x1] ss:$2 sm:%s11_s0]   ;;  %v7_v2 = vld [vmem:[#allocation1] ss:$2 sm:%s6_s8]  }
   0xa   :  { %13 = vrot.lane.b32.xlu0 %v12_v1, %s30_s9  ;;  %9 = vst.msk [vmem:[#allocation0] ss:$8 sm:$0x3] %vm8_vm0, %v7_v2  }
  0x7c   :  { %v14_v3 = vpop.permute.xlu0 %13  }
  0x7d   :  { %16 = vst.msk [vmem:[#allocation0] ss:$8 sm:$0x3] %vm15_vm1, %v14_v3  }
  0x84   :  { %v20_v4 = vld [vmem:[#allocation0] sm:$0x1]  ;;  %v24_v5 = vld [vmem:[#allocation0 + $0x8] sm:$0x1] }
  0x85   :  { %22 = vst [vmem:[%s51_s1] sm:$0x1] %v20_v4  ;;  %28 = vst [vmem:[%s51_s1 + $0x1] sm:$0x1] %v24_v5 }

// kernel: unet_decoder_forward.16
= control target key start
LH: loop header
LB: loop body
LE: loop exit
PB: predicated region body
PF: predicated region fallthrough
CT: control target
= control target key end

     0   :  { %s1955_s12 = smov 0   ;;  %s1957_s13 = smov 0   ;;  %s2556_s0 = inlined_call_operand.vmem [shape: f32[2048,256], index: 0, kind: input, shape index: {}]   ;;  %s2557_s1 = inlined_call_operand.vmem [shape: f32[1,256], index: 1, kind: input, shape index: {}]   ;;  %s2558_s2 = inlined_call_operand.vmem [shape: f32[1,256], index: 2, kind: input, shape index: {}]   ;;  %s2559_s3 = inlined_call_operand.vmem [shape: bf16[2048,256], index: 3, kind: output, shape index: {}]  }
   0x1   :  { %s1959_s14 = smov 0   ;;  %s1961_s15 = smov 0  }
   0x2   :  { %s1963_s16 = smov 0   ;;  %s1965_s17 = smov 0  }
   0x3   :  { %s1967_s18 = smov 0  }
   0x4 LB: > { %s22_s19 = sadd.s32 1, %s1925_s16  ;;  %s25_s20 = sadd.s32 1, %s1929_s17  ;;  %s1933_s18 = sphi %s1967_s18, %s13_s18   ;;  %s1929_s17 = sphi %s1965_s17, %s2566_s17   ;;  %s1925_s16 = sphi %s1963_s16, %s2565_s16   ;;  %s1921_s15 = sphi %s1961_s15, %s2564_s15   ;;  %s1917_s14 = sphi %s1959_s14, %s2563_s14   ;;  %s1913_s13 = sphi %s1957_s13, %s2562_s13   ;;  %s1909_s12 = sphi %s1955_s12, %s2561_s12  }
   0x5   : > { %p23_p0 = scmp.ge.s32.totalorder %s22_s19, 4  ;;  %s1483_s21 = sadd.s32 4294967295, %s1933_s18  }
   0x6   : > { %p41_p1 = scmp.ne.s32.totalorder %s1913_s13, %s1909_s12  ;;  %p42_p2 = scmp.eq.s32.totalorder %s1933_s18, 0 }
   0x7   : > { %s2568_s19 = smov (%p23_p0, %s22_s19), 0  ;;  %s2570_s20 = smov (!%p23_p0, %s25_s20), %s1929_s17 }
   0x8   : > { %p27_p3 = scmp.ge.s32.totalorder %s2570_s20, 2  ;;  %p125_p4 = scmp.eq.s32.totalorder %s1483_s21, 7 }
   0x9   : > { %s29_s22 = ssub.s32 %s1925_s16, %s2568_s19  ;;  %p43_p5 = por %p42_p2, %p41_p1 }
   0xa   : > { %s2572_s20 = smov (%p27_p3, %s2570_s20), 0  ;;  %p2003_p6 = por %p125_p4, %p41_p1 }
   0xb   : > { %s30_s24 = ssub.s32 %s1929_s17, %s2572_s20  ;;  %s34_s26 = sadd.s32 1, %s1913_s13 }
   0xc   : > { %s31_s25 = sor.u32 %s30_s24, %s29_s22  ;;  %p1486_p8 = scmp.ge.s32.totalorder %s1933_s18, 8 }
   0xd   : > { %p32_p7 = scmp.eq.s32.totalorder %s31_s25, 0 }
   0xe   : > { %147 = sbr.rel (%p1486_p8) target bundleno = 59 (0x3b), region = 16 }
   0xf   : > { %s2011_s27 = scalar_select %p32_p7, %s1913_s13, %s34_s26  }
  0x15   : > { %150 = sbr.rel (!%p43_p5) target bundleno = 59 (0x3b), region = 20  ;;  %s152_s28 = sand.u32 (%p43_p5), 1, %s1913_s13  }
  0x16   : > { %s1566_s29 = sshll.u32 (%p43_p5), %s1925_s16, 7  ;;  %s1487_s30 = sshll.u32 (%p43_p5), %s152_s28, 9 }
  0x17   : > { %s157_s4 = sadd.s32 (%p43_p5), %s1929_s17, %s1566_s29  ;;  %s2025_s9 = scalar_lea.vmem (%p43_p5), [#allocation2], %s1487_s30 }
  0x18   : > { %s1490_s5 = sshll.u32 (%p43_p5), %s157_s4, 3 }
  0x19   : > { %s2020_s8 = scalar_lea.vmem (%p43_p5), %s2556_s0, %s1490_s5 }
  0x1a   : > { %v313_v0 = vld [vmem:[%s2020_s8] sm:$0xff] (%p43_p5)  ;;  %v315_v1 = vld [vmem:[%s2020_s8 + $0x10] sm:$0xff] (%p43_p5) }
  0x1b   : > { %v317_v2 = vld [vmem:[%s2020_s8 + $0x20] sm:$0xff] (%p43_p5)  ;;  %314 = vst [vmem:[%s2025_s9] sm:$0xff] (%p43_p5), %v313_v0  ;;  %316 = vst [vmem:[%s2025_s9 + $0x8] sm:$0xff] (%p43_p5), %v315_v1  ;;  %v319_v3 = vld [vmem:[%s2020_s8 + $0x30] sm:$0xff] (%p43_p5) }
  0x1c   : > { %318 = vst [vmem:[%s2025_s9 + $0x10] sm:$0xff] %v317_v2  ;;  %v321_v4 = vld [vmem:[%s2020_s8 + $0x40] sm:$0xff]  ;;  %v323_v5 = vld [vmem:[%s2020_s8 + $0x50] sm:$0xff]  ;;  %320 = vst [vmem:[%s2025_s9 + $0x18] sm:$0xff] %v319_v3 }
  0x1d   : > { %322 = vst [vmem:[%s2025_s9 + $0x20] sm:$0xff] %v321_v4  ;;  %324 = vst [vmem:[%s2025_s9 + $0x28] sm:$0xff] %v323_v5  ;;  %v325_v6 = vld [vmem:[%s2020_s8 + $0x60] sm:$0xff]  ;;  %v327_v7 = vld [vmem:[%s2020_s8 + $0x70] sm:$0xff] }
  0x1e   : > { %v329_v8 = vld [vmem:[%s2020_s8 + $0x80] sm:$0xff]  ;;  %326 = vst [vmem:[%s2025_s9 + $0x30] sm:$0xff] %v325_v6  ;;  %328 = vst [vmem:[%s2025_s9 + $0x38] sm:$0xff] %v327_v7  ;;  %v331_v9 = vld [vmem:[%s2020_s8 + $0x90] sm:$0xff] }
  0x1f   : > { %330 = vst [vmem:[%s2025_s9 + $0x40] sm:$0xff] %v329_v8  ;;  %v333_v10 = vld [vmem:[%s2020_s8 + $0xa0] sm:$0xff]  ;;  %v335_v11 = vld [vmem:[%s2020_s8 + $0xb0] sm:$0xff]  ;;  %332 = vst [vmem:[%s2025_s9 + $0x48] sm:$0xff] %v331_v9 }
  0x20   : > { %334 = vst [vmem:[%s2025_s9 + $0x50] sm:$0xff] %v333_v10  ;;  %336 = vst [vmem:[%s2025_s9 + $0x58] sm:$0xff] %v335_v11  ;;  %v337_v12 = vld [vmem:[%s2020_s8 + $0xc0] sm:$0xff]  ;;  %v339_v13 = vld [vmem:[%s2020_s8 + $0xd0] sm:$0xff] }
  0x21   : > { %v341_v14 = vld [vmem:[%s2020_s8 + $0xe0] sm:$0xff]  ;;  %338 = vst [vmem:[%s2025_s9 + $0x60] sm:$0xff] %v337_v12  ;;  %340 = vst [vmem:[%s2025_s9 + $0x68] sm:$0xff] %v339_v13  ;;  %v343_v15 = vld [vmem:[%s2020_s8 + $0xf0] sm:$0xff] }
  0x22   : > { %342 = vst [vmem:[%s2025_s9 + $0x70] sm:$0xff] %v341_v14  ;;  %v345_v16 = vld [vmem:[%s2020_s8 + $0x100] sm:$0xff]  ;;  %v347_v17 = vld [vmem:[%s2020_s8 + $0x110] sm:$0xff]  ;;  %344 = vst [vmem:[%s2025_s9 + $0x78] sm:$0xff] %v343_v15 }
  0x23   : > { %346 = vst [vmem:[%s2025_s9 + $0x80] sm:$0xff] %v345_v16  ;;  %348 = vst [vmem:[%s2025_s9 + $0x88] sm:$0xff] %v347_v17  ;;  %v349_v18 = vld [vmem:[%s2020_s8 + $0x120] sm:$0xff]  ;;  %v351_v19 = vld [vmem:[%s2020_s8 + $0x130] sm:$0xff] }
  0x24   : > { %v353_v20 = vld [vmem:[%s2020_s8 + $0x140] sm:$0xff]  ;;  %350 = vst [vmem:[%s2025_s9 + $0x90] sm:$0xff] %v349_v18  ;;  %352 = vst [vmem:[%s2025_s9 + $0x98] sm:$0xff] %v351_v19  ;;  %v355_v21 = vld [vmem:[%s2020_s8 + $0x150] sm:$0xff] }
  0x25   : > { %354 = vst [vmem:[%s2025_s9 + $0xa0] sm:$0xff] %v353_v20  ;;  %v357_v22 = vld [vmem:[%s2020_s8 + $0x160] sm:$0xff]  ;;  %v359_v23 = vld [vmem:[%s2020_s8 + $0x170] sm:$0xff]  ;;  %356 = vst [vmem:[%s2025_s9 + $0xa8] sm:$0xff] %v355_v21 }
  0x26   : > { %358 = vst [vmem:[%s2025_s9 + $0xb0] sm:$0xff] %v357_v22  ;;  %360 = vst [vmem:[%s2025_s9 + $0xb8] sm:$0xff] %v359_v23  ;;  %v361_v24 = vld [vmem:[%s2020_s8 + $0x180] sm:$0xff]  ;;  %v363_v25 = vld [vmem:[%s2020_s8 + $0x190] sm:$0xff] }
  0x27   : > { %v365_v26 = vld [vmem:[%s2020_s8 + $0x1a0] sm:$0xff]  ;;  %362 = vst [vmem:[%s2025_s9 + $0xc0] sm:$0xff] %v361_v24  ;;  %364 = vst [vmem:[%s2025_s9 + $0xc8] sm:$0xff] %v363_v25  ;;  %v367_v27 = vld [vmem:[%s2020_s8 + $0x1b0] sm:$0xff] }
  0x28   : > { %366 = vst [vmem:[%s2025_s9 + $0xd0] sm:$0xff] %v365_v26  ;;  %v369_v28 = vld [vmem:[%s2020_s8 + $0x1c0] sm:$0xff]  ;;  %v371_v29 = vld [vmem:[%s2020_s8 + $0x1d0] sm:$0xff]  ;;  %368 = vst [vmem:[%s2025_s9 + $0xd8] sm:$0xff] %v367_v27 }
  0x29   : > { %370 = vst [vmem:[%s2025_s9 + $0xe0] sm:$0xff] %v369_v28  ;;  %372 = vst [vmem:[%s2025_s9 + $0xe8] sm:$0xff] %v371_v29  ;;  %v373_v30 = vld [vmem:[%s2020_s8 + $0x1e0] sm:$0xff]  ;;  %v375_v31 = vld [vmem:[%s2020_s8 + $0x1f0] sm:$0xff] }
  0x2a   : > { %v377_v32 = vld [vmem:[%s2020_s8 + $0x200] sm:$0xff]  ;;  %374 = vst [vmem:[%s2025_s9 + $0xf0] sm:$0xff] %v373_v30  ;;  %376 = vst [vmem:[%s2025_s9 + $0xf8] sm:$0xff] %v375_v31  ;;  %v379_v33 = vld [vmem:[%s2020_s8 + $0x210] sm:$0xff] }
  0x2b   : > { %378 = vst [vmem:[%s2025_s9 + $0x100] sm:$0xff] %v377_v32  ;;  %v381_v34 = vld [vmem:[%s2020_s8 + $0x220] sm:$0xff]  ;;  %v383_v35 = vld [vmem:[%s2020_s8 + $0x230] sm:$0xff]  ;;  %380 = vst [vmem:[%s2025_s9 + $0x108] sm:$0xff] %v379_v33 }
  0x2c   : > { %382 = vst [vmem:[%s2025_s9 + $0x110] sm:$0xff] %v381_v34  ;;  %384 = vst [vmem:[%s2025_s9 + $0x118] sm:$0xff] %v383_v35  ;;  %v385_v36 = vld [vmem:[%s2020_s8 + $0x240] sm:$0xff]  ;;  %v387_v37 = vld [vmem:[%s2020_s8 + $0x250] sm:$0xff] }
  0x2d   : > { %v389_v38 = vld [vmem:[%s2020_s8 + $0x260] sm:$0xff]  ;;  %386 = vst [vmem:[%s2025_s9 + $0x120] sm:$0xff] %v385_v36  ;;  %388 = vst [vmem:[%s2025_s9 + $0x128] sm:$0xff] %v387_v37  ;;  %v391_v39 = vld [vmem:[%s2020_s8 + $0x270] sm:$0xff] }
  0x2e   : > { %390 = vst [vmem:[%s2025_s9 + $0x130] sm:$0xff] %v389_v38  ;;  %v393_v40 = vld [vmem:[%s2020_s8 + $0x280] sm:$0xff]  ;;  %v395_v41 = vld [vmem:[%s2020_s8 + $0x290] sm:$0xff]  ;;  %392 = vst [vmem:[%s2025_s9 + $0x138] sm:$0xff] %v391_v39 }
  0x2f   : > { %394 = vst [vmem:[%s2025_s9 + $0x140] sm:$0xff] %v393_v40  ;;  %396 = vst [vmem:[%s2025_s9 + $0x148] sm:$0xff] %v395_v41  ;;  %v397_v42 = vld [vmem:[%s2020_s8 + $0x2a0] sm:$0xff]  ;;  %v399_v43 = vld [vmem:[%s2020_s8 + $0x2b0] sm:$0xff] }
  0x30   : > { %v401_v44 = vld [vmem:[%s2020_s8 + $0x2c0] sm:$0xff]  ;;  %398 = vst [vmem:[%s2025_s9 + $0x150] sm:$0xff] %v397_v42  ;;  %400 = vst [vmem:[%s2025_s9 + $0x158] sm:$0xff] %v399_v43  ;;  %v403_v45 = vld [vmem:[%s2020_s8 + $0x2d0] sm:$0xff] }
  0x31   : > { %402 = vst [vmem:[%s2025_s9 + $0x160] sm:$0xff] %v401_v44  ;;  %v405_v46 = vld [vmem:[%s2020_s8 + $0x2e0] sm:$0xff]  ;;  %v407_v47 = vld [vmem:[%s2020_s8 + $0x2f0] sm:$0xff]  ;;  %404 = vst [vmem:[%s2025_s9 + $0x168] sm:$0xff] %v403_v45 }
  0x32   : > { %406 = vst [vmem:[%s2025_s9 + $0x170] sm:$0xff] %v405_v46  ;;  %408 = vst [vmem:[%s2025_s9 + $0x178] sm:$0xff] %v407_v47  ;;  %v409_v48 = vld [vmem:[%s2020_s8 + $0x300] sm:$0xff]  ;;  %v411_v49 = vld [vmem:[%s2020_s8 + $0x310] sm:$0xff] }
  0x33   : > { %v413_v50 = vld [vmem:[%s2020_s8 + $0x320] sm:$0xff]  ;;  %410 = vst [vmem:[%s2025_s9 + $0x180] sm:$0xff] %v409_v48  ;;  %412 = vst [vmem:[%s2025_s9 + $0x188] sm:$0xff] %v411_v49  ;;  %v415_v51 = vld [vmem:[%s2020_s8 + $0x330] sm:$0xff] }
  0x34   : > { %414 = vst [vmem:[%s2025_s9 + $0x190] sm:$0xff] %v413_v50  ;;  %v417_v52 = vld [vmem:[%s2020_s8 + $0x340] sm:$0xff]  ;;  %v419_v53 = vld [vmem:[%s2020_s8 + $0x350] sm:$0xff]  ;;  %416 = vst [vmem:[%s2025_s9 + $0x198] sm:$0xff] %v415_v51 }
  0x35   : > { %418 = vst [vmem:[%s2025_s9 + $0x1a0] sm:$0xff] %v417_v52  ;;  %420 = vst [vmem:[%s2025_s9 + $0x1a8] sm:$0xff] %v419_v53  ;;  %v421_v54 = vld [vmem:[%s2020_s8 + $0x360] sm:$0xff]  ;;  %v423_v55 = vld [vmem:[%s2020_s8 + $0x370] sm:$0xff] }
  0x36   : > { %v425_v56 = vld [vmem:[%s2020_s8 + $0x380] sm:$0xff]  ;;  %422 = vst [vmem:[%s2025_s9 + $0x1b0] sm:$0xff] %v421_v54  ;;  %424 = vst [vmem:[%s2025_s9 + $0x1b8] sm:$0xff] %v423_v55  ;;  %v427_v57 = vld [vmem:[%s2020_s8 + $0x390] sm:$0xff] }
  0x37   : > { %426 = vst [vmem:[%s2025_s9 + $0x1c0] sm:$0xff] %v425_v56  ;;  %v429_v58 = vld [vmem:[%s2020_s8 + $0x3a0] sm:$0xff]  ;;  %v431_v59 = vld [vmem:[%s2020_s8 + $0x3b0] sm:$0xff]  ;;  %428 = vst [vmem:[%s2025_s9 + $0x1c8] sm:$0xff] %v427_v57 }
  0x38   : > { %430 = vst [vmem:[%s2025_s9 + $0x1d0] sm:$0xff] %v429_v58  ;;  %432 = vst [vmem:[%s2025_s9 + $0x1d8] sm:$0xff] %v431_v59  ;;  %v433_v60 = vld [vmem:[%s2020_s8 + $0x3c0] sm:$0xff]  ;;  %v435_v61 = vld [vmem:[%s2020_s8 + $0x3d0] sm:$0xff] }
  0x39   : > { %v437_v62 = vld [vmem:[%s2020_s8 + $0x3e0] sm:$0xff]  ;;  %434 = vst [vmem:[%s2025_s9 + $0x1e0] sm:$0xff] %v433_v60  ;;  %436 = vst [vmem:[%s2025_s9 + $0x1e8] sm:$0xff] %v435_v61  ;;  %v439_v63 = vld [vmem:[%s2020_s8 + $0x3f0] sm:$0xff] }
  0x3a   : > { %438 = vst [vmem:[%s2025_s9 + $0x1f0] sm:$0xff] %v437_v62  ;;  %440 = vst [vmem:[%s2025_s9 + $0x1f8] sm:$0xff] %v439_v63 }
  0x3b PF: > { %p1491_p9 = scmp.ge.s32.totalorder %s1933_s18, 1  ;;  %p457_p10 = scmp.lt.s32.totalorder %s1933_s18, 9 }
  0x3d   : > { %p458_p11 = pnand %p1491_p9, %p457_p10 }
  0x3e   : > { %s464_s10 = sand.u32 (!%p458_p11), 1, %s1909_s12   ;;  %p493_p12 = scmp.lt.s32.totalorder (!%p458_p11), %s1921_s15, 1 }
  0x3f   : > { %461 = sbr.rel (%p458_p11) target bundleno = 168 (0xa8), region = 66  ;;  %s1492_s11 = sshll.u32 (!%p458_p11), %s464_s10, 9 }
  0x40   : > { %s2157_s22 = scalar_lea.vmem (!%p458_p11), [#allocation2], %s1492_s11  ;;  %s2177_s30 = sshll.u32 (!%p458_p11), %s464_s10, 8 }
  0x41   : > { %v500_v0 = vld [vmem:[%s2157_s22] sm:$0xff] (!%p458_p11)  ;;  %v501_v1 = vld [vmem:[%s2157_s22 + $0x8] sm:$0xff] (!%p458_p11)  ;;  %v502_v2 = vld [vmem:[%s2157_s22 + $0x10] sm:$0xff] (!%p458_p11)  ;;  %s2208_s4 = scalar_lea.vmem (!%p458_p11), [#allocation3], %s2177_s30 }
  0x42   : > { %v503_v3 = vld [vmem:[%s2157_s22 + $0x18] sm:$0xff] (!%p458_p11)  ;;  %v504_v4 = vld [vmem:[%s2157_s22 + $0x20] sm:$0xff] (!%p458_p11)  ;;  %v505_v5 = vld [vmem:[%s2157_s22 + $0x28] sm:$0xff] (!%p458_p11) }
  0x43   : > { %v506_v6 = vld [vmem:[%s2157_s22 + $0x30] sm:$0xff] (!%p458_p11)  ;;  %v507_v7 = vld [vmem:[%s2157_s22 + $0x38] sm:$0xff] (!%p458_p11)  ;;  %v508_v26 = vld [vmem:[%s2157_s22 + $0x40] sm:$0xff] (!%p458_p11) }
  0x44   : > { %v509_v27 = vld [vmem:[%s2157_s22 + $0x48] sm:$0xff] (!%p458_p11)  ;;  %v510_v32 = vld [vmem:[%s2157_s22 + $0x50] sm:$0xff] (!%p458_p11)  ;;  %v511_v33 = vld [vmem:[%s2157_s22 + $0x58] sm:$0xff] (!%p458_p11) }
  0x45   : > { %v512_v38 = vld [vmem:[%s2157_s22 + $0x60] sm:$0xff] (!%p458_p11)  ;;  %v513_v39 = vld [vmem:[%s2157_s22 + $0x68] sm:$0xff] (!%p458_p11)  ;;  %v514_v44 = vld [vmem:[%s2157_s22 + $0x70] sm:$0xff] (!%p458_p11) }
  0x46   : > { %s494_s21 = scalar_select %p493_p12, %s1921_s15, 1  ;;  %v515_v45 = vld [vmem:[%s2157_s22 + $0x78] sm:$0xff]  ;;  %v516_v58 = vld [vmem:[%s2157_s22 + $0x80] sm:$0xff]  ;;  %v517_v63 = vld [vmem:[%s2157_s22 + $0x88] sm:$0xff] }
  0x47   : > { %s1631_s5 = sshll.u32 (%p2003_p6), %s1917_s14, 7 }
  0x48   : > { %s495_s25 = scalar_lea.vmem %s2557_s1, %s494_s21  ;;  %s498_s29 = scalar_lea.vmem %s2558_s2, %s494_s21 }
  0x49   : > { %v2173_v8 = vld [vmem:[%s495_s25] ss:$0 sm:$0xff]  ;;  %s1099_s6 = sadd.s32 (%p2003_p6), %s1921_s15, %s1631_s5 }
  0x4a   : > { %v2175_v9 = vld [vmem:[%s498_s29] ss:$0 sm:$0xff]  ;;  %v571_v10 = vmul.f32 %v2173_v8, %v500_v0  ;;  %v572_v11 = vmul.f32 %v2173_v8, %v501_v1  ;;  %v573_v12 = vmul.f32 %v2173_v8, %v502_v2  ;;  %v574_v13 = vmul.f32 %v2173_v8, %v503_v3  ;;  %s1563_s23 = sshll.u32 (%p2003_p6), %s1099_s6, 2 }
  0x4b   : > { %v575_v14 = vmul.f32 %v2173_v8, %v504_v4  ;;  %v576_v15 = vmul.f32 %v2173_v8, %v505_v5  ;;  %v577_v16 = vmul.f32 %v2173_v8, %v506_v6  ;;  %v578_v17 = vmul.f32 %v2173_v8, %v507_v7  ;;  %v518_v4 = vld [vmem:[%s2157_s22 + $0x90] sm:$0xff]  ;;  %v519_v5 = vld [vmem:[%s2157_s22 + $0x98] sm:$0xff]  ;;  %s2412_s9 = scalar_lea.vmem (%p2003_p6), %s2559_s3, %s1563_s23 }
  0x4c   : > { %v642_v18 = vadd.f32 %v2175_v9, %v571_v10  ;;  %v643_v19 = vadd.f32 %v2175_v9, %v572_v11  ;;  %v644_v20 = vadd.f32 %v2175_v9, %v573_v12  ;;  %v645_v21 = vadd.f32 %v2175_v9, %v574_v13  ;;  %v520_v12 = vld [vmem:[%s2157_s22 + $0xa0] sm:$0xff]  ;;  %v521_v13 = vld [vmem:[%s2157_s22 + $0xa8] sm:$0xff] }
  0x4d   : > { %v646_v22 = vadd.f32 %v2175_v9, %v575_v14  ;;  %v647_v23 = vadd.f32 %v2175_v9, %v576_v15  ;;  %v648_v24 = vadd.f32 %v2175_v9, %v577_v16  ;;  %v649_v25 = vadd.f32 %v2175_v9, %v578_v17 }
  0x4e   : > { %v706_v28 = vmax.f32 %v642_v18, 0.0  ;;  %v707_v29 = vmax.f32 %v643_v19, 0.0  ;;  %v708_v30 = vmax.f32 %v644_v20, 0.0  ;;  %v709_v31 = vmax.f32 %v645_v21, 0.0  ;;  %v522_v18 = vld [vmem:[%s2157_s22 + $0xb0] sm:$0xff] }
  0x4f   : > { %v710_v34 = vmax.f32 %v646_v22, 0.0  ;;  %v711_v35 = vmax.f32 %v647_v23, 0.0  ;;  %v712_v36 = vmax.f32 %v648_v24, 0.0  ;;  %v713_v37 = vmax.f32 %v649_v25, 0.0  ;;  %v523_v23 = vld [vmem:[%s2157_s22 + $0xb8] sm:$0xff] }
  0x50   : > { %v1635_v40 = vpack.c.bf16 %v707_v29, %v706_v28  ;;  %v1640_v41 = vpack.c.bf16 %v709_v31, %v708_v30  ;;  %v579_v42 = vmul.f32 %v2173_v8, %v508_v26  ;;  %v580_v43 = vmul.f32 %v2173_v8, %v509_v27  ;;  %v524_v28 = vld [vmem:[%s2157_s22 + $0xc0] sm:$0xff] }
  0x51   : > { %v1645_v46 = vpack.c.bf16 %v711_v35, %v710_v34  ;;  %v1650_v47 = vpack.c.bf16 %v713_v37, %v712_v36  ;;  %v581_v48 = vmul.f32 %v2173_v8, %v510_v32  ;;  %v582_v49 = vmul.f32 %v2173_v8, %v511_v33  ;;  %v525_v37 = vld [vmem:[%s2157_s22 + $0xc8] sm:$0xff] }
  0x52   : > { %1636 = vst [vmem:[%s2208_s4] sm:$0xff] %v1635_v40   ;;  %1792 = vst [vmem:[%s2208_s4 + $0x8] sm:$0xff] %v1640_v41   ;;  %v650_v50 = vadd.f32 %v2175_v9, %v579_v42  ;;  %v651_v51 = vadd.f32 %v2175_v9, %v580_v43  ;;  %v583_v52 = vmul.f32 %v2173_v8, %v512_v38  ;;  %v526_v42 = vld [vmem:[%s2157_s22 + $0xd0] sm:$0xff]  ;;  %v527_v43 = vld [vmem:[%s2157_s22 + $0xd8] sm:$0xff] }
  0x53   : > { %v584_v53 = vmul.f32 %v2173_v8, %v513_v39  ;;  %1793 = vst [vmem:[%s2208_s4 + $0x10] sm:$0xff] %v1645_v46   ;;  %1794 = vst [vmem:[%s2208_s4 + $0x18] sm:$0xff] %v1650_v47   ;;  %v652_v54 = vadd.f32 %v2175_v9, %v581_v48  ;;  %v653_v55 = vadd.f32 %v2175_v9, %v582_v49  ;;  %v528_v48 = vld [vmem:[%s2157_s22 + $0xe0] sm:$0xff]  ;;  %v529_v49 = vld [vmem:[%s2157_s22 + $0xe8] sm:$0xff] }
  0x54   : > { %v585_v56 = vmul.f32 %v2173_v8, %v514_v44  ;;  %v586_v57 = vmul.f32 %v2173_v8, %v515_v45  ;;  %v714_v59 = vmax.f32 %v650_v50, 0.0  ;;  %v715_v60 = vmax.f32 %v651_v51, 0.0 }
  0x55   : > { %v654_v61 = vadd.f32 %v2175_v9, %v583_v52  ;;  %v655_v62 = vadd.f32 %v2175_v9, %v584_v53  ;;  %v716_v0 = vmax.f32 %v652_v54, 0.0  ;;  %v717_v1 = vmax.f32 %v653_v55, 0.0  ;;  %v530_v54 = vld [vmem:[%s2157_s22 + $0xf0] sm:$0xff] }
  0x56   : > { %v656_v2 = vadd.f32 %v2175_v9, %v585_v56  ;;  %v657_v3 = vadd.f32 %v2175_v9, %v586_v57  ;;  %v1655_v6 = vpack.c.bf16 %v715_v60, %v714_v59  ;;  %v587_v11 = vmul.f32 %v2173_v8, %v516_v58  ;;  %v531_v59 = vld [vmem:[%s2157_s22 + $0xf8] sm:$0xff] }
  0x57   : > { %v718_v7 = vmax.f32 %v654_v61, 0.0  ;;  %v719_v10 = vmax.f32 %v655_v62, 0.0  ;;  %v1660_v14 = vpack.c.bf16 %v717_v1, %v716_v0  ;;  %v588_v17 = vmul.f32 %v2173_v8, %v517_v63  ;;  %v532_v0 = vld [vmem:[%s2157_s22 + $0x100] sm:$0xff] }
  0x58   : > { %v720_v15 = vmax.f32 %v656_v2, 0.0  ;;  %v721_v16 = vmax.f32 %v657_v3, 0.0  ;;  %1795 = vst [vmem:[%s2208_s4 + $0x20] sm:$0xff] %v1655_v6   ;;  %v658_v20 = vadd.f32 %v2175_v9, %v587_v11  ;;  %v589_v21 = vmul.f32 %v2173_v8, %v518_v4  ;;  %v533_v11 = vld [vmem:[%s2157_s22 + $0x108] sm:$0xff] }
  0x59   : > { %v1665_v19 = vpack.c.bf16 %v719_v10, %v718_v7  ;;  %v590_v22 = vmul.f32 %v2173_v8, %v519_v5  ;;  %1796 = vst [vmem:[%s2208_s4 + $0x28] sm:$0xff] %v1660_v14   ;;  %v659_v25 = vadd.f32 %v2175_v9, %v588_v17  ;;  %v591_v26 = vmul.f32 %v2173_v8, %v520_v12  ;;  %v535_v17 = vld [vmem:[%s2157_s22 + $0x118] sm:$0xff] }
  0x5a   : > { %v1670_v24 = vpack.c.bf16 %v721_v16, %v720_v15  ;;  %v592_v27 = vmul.f32 %v2173_v8, %v521_v13  ;;  %v722_v29 = vmax.f32 %v658_v20, 0.0  ;;  %v660_v30 = vadd.f32 %v2175_v9, %v589_v21  ;;  %v534_v16 = vld [vmem:[%s2157_s22 + $0x110] sm:$0xff] }
  0x5b   : > { %1797 = vst [vmem:[%s2208_s4 + $0x30] sm:$0xff] %v1665_v19   ;;  %v661_v31 = vadd.f32 %v2175_v9, %v590_v22  ;;  %v593_v32 = vmul.f32 %v2173_v8, %v522_v18  ;;  %v723_v33 = vmax.f32 %v659_v25, 0.0  ;;  %v662_v34 = vadd.f32 %v2175_v9, %v591_v26  ;;  %v536_v22 = vld [vmem:[%s2157_s22 + $0x120] sm:$0xff] }
  0x5c   : > { %1798 = vst [vmem:[%s2208_s4 + $0x38] sm:$0xff] %v1670_v24   ;;  %v663_v35 = vadd.f32 %v2175_v9, %v592_v27  ;;  %v594_v36 = vmul.f32 %v2173_v8, %v523_v23  ;;  %v724_v38 = vmax.f32 %v660_v30, 0.0  ;;  %v595_v41 = vmul.f32 %v2173_v8, %v524_v28  ;;  %v537_v23 = vld [vmem:[%s2157_s22 + $0x128] sm:$0xff]  ;;  %v538_v28 = vld [vmem:[%s2157_s22 + $0x130] sm:$0xff] }
  0x5d   : > { %v725_v39 = vmax.f32 %v661_v31, 0.0  ;;  %v664_v40 = vadd.f32 %v2175_v9, %v593_v32  ;;  %v1675_v44 = vpack.c.bf16 %v723_v33, %v722_v29  ;;  %v726_v45 = vmax.f32 %v662_v34, 0.0  ;;  %v539_v33 = vld [vmem:[%s2157_s22 + $0x138] sm:$0xff] }
  0x5e   : > { %v727_v46 = vmax.f32 %v663_v35, 0.0  ;;  %v665_v47 = vadd.f32 %v2175_v9, %v594_v36  ;;  %v596_v52 = vmul.f32 %v2173_v8, %v525_v37  ;;  %v666_v53 = vadd.f32 %v2175_v9, %v595_v41 }
  0x5f   : > { %v1680_v50 = vpack.c.bf16 %v725_v39, %v724_v38  ;;  %v728_v51 = vmax.f32 %v664_v40, 0.0  ;;  %1799 = vst [vmem:[%s2208_s4 + $0x40] sm:$0xff] %v1675_v44   ;;  %v597_v57 = vmul.f32 %v2173_v8, %v526_v42  ;;  %v598_v58 = vmul.f32 %v2173_v8, %v527_v43  ;;  %v540_v38 = vld [vmem:[%s2157_s22 + $0x140] sm:$0xff] }
  0x60   : > { %v1685_v55 = vpack.c.bf16 %v727_v46, %v726_v45  ;;  %v729_v56 = vmax.f32 %v665_v47, 0.0  ;;  %v667_v60 = vadd.f32 %v2175_v9, %v596_v52  ;;  %v730_v61 = vmax.f32 %v666_v53, 0.0  ;;  %v541_v47 = vld [vmem:[%s2157_s22 + $0x148] sm:$0xff]  ;;  %v542_v52 = vld [vmem:[%s2157_s22 + $0x150] sm:$0xff]  ;;  %v543_v53 = vld [vmem:[%s2157_s22 + $0x158] sm:$0xff] }
  0x61   : > { %1800 = vst [vmem:[%s2208_s4 + $0x48] sm:$0xff] %v1680_v50   ;;  %v599_v62 = vmul.f32 %v2173_v8, %v528_v48  ;;  %v600_v63 = vmul.f32 %v2173_v8, %v529_v49  ;;  %v668_v2 = vadd.f32 %v2175_v9, %v597_v57  ;;  %v669_v3 = vadd.f32 %v2175_v9, %v598_v58  ;;  %v544_v58 = vld [vmem:[%s2157_s22 + $0x160] sm:$0xff] }
  0x62   : > { %1801 = vst [vmem:[%s2208_s4 + $0x50] sm:$0xff] %v1685_v55   ;;  %v1690_v1 = vpack.c.bf16 %v729_v56, %v728_v51  ;;  %v601_v4 = vmul.f32 %v2173_v8, %v530_v54  ;;  %v731_v5 = vmax.f32 %v667_v60, 0.0  ;;  %v602_v10 = vmul.f32 %v2173_v8, %v531_v59  ;;  %v545_v59 = vld [vmem:[%s2157_s22 + $0x168] sm:$0xff] }
  0x63   : > { %v670_v6 = vadd.f32 %v2175_v9, %v599_v62  ;;  %v671_v7 = vadd.f32 %v2175_v9, %v600_v63  ;;  %v732_v12 = vmax.f32 %v668_v2, 0.0  ;;  %v733_v13 = vmax.f32 %v669_v3, 0.0 }
  0x64   : > { %1802 = vst [vmem:[%s2208_s4 + $0x58] sm:$0xff] %v1690_v1   ;;  %v672_v14 = vadd.f32 %v2175_v9, %v601_v4  ;;  %v603_v15 = vmul.f32 %v2173_v8, %v532_v0  ;;  %v1695_v18 = vpack.c.bf16 %v731_v5, %v730_v61  ;;  %v673_v21 = vadd.f32 %v2175_v9, %v602_v10  ;;  %v546_v0 = vld [vmem:[%s2157_s22 + $0x170] sm:$0xff]  ;;  %v547_v5 = vld [vmem:[%s2157_s22 + $0x178] sm:$0xff] }
  0x65   : > { %v734_v19 = vmax.f32 %v670_v6, 0.0  ;;  %v735_v20 = vmax.f32 %v671_v7, 0.0  ;;  %v1700_v24 = vpack.c.bf16 %v733_v13, %v732_v12  ;;  %v604_v26 = vmul.f32 %v2173_v8, %v533_v11  ;;  %v548_v12 = vld [vmem:[%s2157_s22 + $0x180] sm:$0xff] }
  0x66   : > { %v736_v25 = vmax.f32 %v672_v14, 0.0  ;;  %v674_v27 = vadd.f32 %v2175_v9, %v603_v15  ;;  %1803 = vst [vmem:[%s2208_s4 + $0x60] sm:$0xff] %v1695_v18   ;;  %v737_v30 = vmax.f32 %v673_v21, 0.0  ;;  %v605_v31 = vmul.f32 %v2173_v8, %v534_v16  ;;  %v549_v21 = vld [vmem:[%s2157_s22 + $0x188] sm:$0xff] }
  0x67   : > { %v1705_v29 = vpack.c.bf16 %v735_v20, %v734_v19  ;;  %v606_v32 = vmul.f32 %v2173_v8, %v535_v17  ;;  %1804 = vst [vmem:[%s2208_s4 + $0x68] sm:$0xff] %v1700_v24   ;;  %v675_v34 = vadd.f32 %v2175_v9, %v604_v26  ;;  %v607_v36 = vmul.f32 %v2173_v8, %v536_v22  ;;  %v550_v26 = vld [vmem:[%s2157_s22 + $0x190] sm:$0xff] }
  0x68   : > { %v738_v35 = vmax.f32 %v674_v27, 0.0  ;;  %v608_v37 = vmul.f32 %v2173_v8, %v537_v23  ;;  %v1710_v39 = vpack.c.bf16 %v737_v30, %v736_v25  ;;  %v676_v40 = vadd.f32 %v2175_v9, %v605_v31  ;;  %v551_v27 = vld [vmem:[%s2157_s22 + $0x198] sm:$0xff] }
  0x69   : > { %1805 = vst [vmem:[%s2208_s4 + $0x70] sm:$0xff] %v1705_v29   ;;  %v677_v41 = vadd.f32 %v2175_v9, %v606_v32  ;;  %v609_v42 = vmul.f32 %v2173_v8, %v538_v28  ;;  %v739_v43 = vmax.f32 %v675_v34, 0.0  ;;  %v678_v44 = vadd.f32 %v2175_v9, %v607_v36  ;;  %v552_v32 = vld [vmem:[%s2157_s22 + $0x1a0] sm:$0xff] }
  0x6a   : > { %v679_v45 = vadd.f32 %v2175_v9, %v608_v37  ;;  %v610_v46 = vmul.f32 %v2173_v8, %v539_v33  ;;  %1806 = vst [vmem:[%s2208_s4 + $0x78] sm:$0xff] %v1710_v39   ;;  %v740_v48 = vmax.f32 %v676_v40, 0.0  ;;  %v611_v51 = vmul.f32 %v2173_v8, %v540_v38  ;;  %v553_v33 = vld [vmem:[%s2157_s22 + $0x1a8] sm:$0xff]  ;;  %v554_v38 = vld [vmem:[%s2157_s22 + $0x1b0] sm:$0xff] }
  0x6b   : > { %v741_v49 = vmax.f32 %v677_v41, 0.0  ;;  %v680_v50 = vadd.f32 %v2175_v9, %v609_v42  ;;  %v1715_v54 = vpack.c.bf16 %v739_v43, %v738_v35  ;;  %v742_v55 = vmax.f32 %v678_v44, 0.0  ;;  %v555_v43 = vld [vmem:[%s2157_s22 + $0x1b8] sm:$0xff] }
  0x6c   : > { %v743_v56 = vmax.f32 %v679_v45, 0.0  ;;  %v681_v57 = vadd.f32 %v2175_v9, %v610_v46  ;;  %v612_v62 = vmul.f32 %v2173_v8, %v541_v47  ;;  %v682_v63 = vadd.f32 %v2175_v9, %v611_v51 }
  0x6d   : > { %v1720_v60 = vpack.c.bf16 %v741_v49, %v740_v48  ;;  %v744_v61 = vmax.f32 %v680_v50, 0.0  ;;  %1807 = vst [vmem:[%s2208_s4 + $0x80] sm:$0xff] %v1715_v54   ;;  %v613_v3 = vmul.f32 %v2173_v8, %v542_v52  ;;  %v614_v4 = vmul.f32 %v2173_v8, %v543_v53  ;;  %v556_v48 = vld [vmem:[%s2157_s22 + $0x1c0] sm:$0xff] }
  0x6e   : > { %v1725_v1 = vpack.c.bf16 %v743_v56, %v742_v55  ;;  %v745_v2 = vmax.f32 %v681_v57, 0.0  ;;  %v683_v6 = vadd.f32 %v2175_v9, %v612_v62  ;;  %v746_v7 = vmax.f32 %v682_v63, 0.0  ;;  %v557_v57 = vld [vmem:[%s2157_s22 + $0x1c8] sm:$0xff]  ;;  %v558_v62 = vld [vmem:[%s2157_s22 + $0x1d0] sm:$0xff]  ;;  %v559_v63 = vld [vmem:[%s2157_s22 + $0x1d8] sm:$0xff] }
  0x6f   : > { %1808 = vst [vmem:[%s2208_s4 + $0x88] sm:$0xff] %v1720_v60   ;;  %v615_v10 = vmul.f32 %v2173_v8, %v544_v58  ;;  %v616_v11 = vmul.f32 %v2173_v8, %v545_v59  ;;  %v684_v14 = vadd.f32 %v2175_v9, %v613_v3  ;;  %v685_v15 = vadd.f32 %v2175_v9, %v614_v4  ;;  %v560_v4 = vld [vmem:[%s2157_s22 + $0x1e0] sm:$0xff] }
  0x70   : > { %1809 = vst [vmem:[%s2208_s4 + $0x90] sm:$0xff] %v1725_v1   ;;  %v1730_v13 = vpack.c.bf16 %v745_v2, %v744_v61  ;;  %v617_v16 = vmul.f32 %v2173_v8, %v546_v0  ;;  %v747_v17 = vmax.f32 %v683_v6, 0.0  ;;  %v618_v20 = vmul.f32 %v2173_v8, %v547_v5  ;;  %v561_v5 = vld [vmem:[%s2157_s22 + $0x1e8] sm:$0xff] }
  0x71   : > { %v686_v18 = vadd.f32 %v2175_v9, %v615_v10  ;;  %v687_v19 = vadd.f32 %v2175_v9, %v616_v11  ;;  %v748_v22 = vmax.f32 %v684_v14, 0.0  ;;  %v749_v23 = vmax.f32 %v685_v15, 0.0 }
  0x72   : > { %1810 = vst [vmem:[%s2208_s4 + $0x98] sm:$0xff] %v1730_v13   ;;  %v688_v24 = vadd.f32 %v2175_v9, %v617_v16  ;;  %v619_v25 = vmul.f32 %v2173_v8, %v548_v12  ;;  %v1735_v28 = vpack.c.bf16 %v747_v17, %v746_v7  ;;  %v689_v31 = vadd.f32 %v2175_v9, %v618_v20  ;;  %v562_v12 = vld [vmem:[%s2157_s22 + $0x1f0] sm:$0xff]  ;;  %v563_v17 = vld [vmem:[%s2157_s22 + $0x1f8] sm:$0xff] }
  0x73   : > { %v750_v29 = vmax.f32 %v686_v18, 0.0  ;;  %v751_v30 = vmax.f32 %v687_v19, 0.0  ;;  %v1740_v34 = vpack.c.bf16 %v749_v23, %v748_v22  ;;  %v620_v36 = vmul.f32 %v2173_v8, %v549_v21 }
  0x74   : > { %v752_v35 = vmax.f32 %v688_v24, 0.0  ;;  %v690_v37 = vadd.f32 %v2175_v9, %v619_v25  ;;  %1811 = vst [vmem:[%s2208_s4 + $0xa0] sm:$0xff] %v1735_v28   ;;  %v753_v40 = vmax.f32 %v689_v31, 0.0  ;;  %v621_v41 = vmul.f32 %v2173_v8, %v550_v26 }
  0x75   : > { %v1745_v39 = vpack.c.bf16 %v751_v30, %v750_v29  ;;  %v622_v42 = vmul.f32 %v2173_v8, %v551_v27  ;;  %1812 = vst [vmem:[%s2208_s4 + $0xa8] sm:$0xff] %v1740_v34   ;;  %v691_v44 = vadd.f32 %v2175_v9, %v620_v36  ;;  %v623_v46 = vmul.f32 %v2173_v8, %v552_v32 }
  0x76   : > { %v754_v45 = vmax.f32 %v690_v37, 0.0  ;;  %v624_v47 = vmul.f32 %v2173_v8, %v553_v33  ;;  %v1750_v49 = vpack.c.bf16 %v753_v40, %v752_v35  ;;  %v692_v50 = vadd.f32 %v2175_v9, %v621_v41 }
  0x77   : > { %1813 = vst [vmem:[%s2208_s4 + $0xb0] sm:$0xff] %v1745_v39   ;;  %v693_v51 = vadd.f32 %v2175_v9, %v622_v42  ;;  %v625_v52 = vmul.f32 %v2173_v8, %v554_v38  ;;  %v755_v53 = vmax.f32 %v691_v44, 0.0  ;;  %v694_v54 = vadd.f32 %v2175_v9, %v623_v46  ;;  %v1121_v42 = vld [vmem:[%s2208_s4 + $0x8] sm:$0xf] (%p2003_p6)  ;;  %v1125_v44 = vld [vmem:[%s2208_s4 + $0x10] sm:$0xf] (%p2003_p6) }
  0x78   : > { %v695_v55 = vadd.f32 %v2175_v9, %v624_v47  ;;  %v626_v56 = vmul.f32 %v2173_v8, %v555_v43  ;;  %1814 = vst [vmem:[%s2208_s4 + $0xb8] sm:$0xff] %v1750_v49   ;;  %v756_v58 = vmax.f32 %v692_v50, 0.0  ;;  %v627_v61 = vmul.f32 %v2173_v8, %v556_v48  ;;  %v1123_v43 = vld [vmem:[%s2208_s4 + $0xc] sm:$0xf] (%p2003_p6)  ;;  %v1129_v46 = vld [vmem:[%s2208_s4 + $0x18] sm:$0xf] (%p2003_p6) }
  0x79   : > { %v757_v59 = vmax.f32 %v693_v51, 0.0  ;;  %v696_v60 = vadd.f32 %v2175_v9, %v625_v52  ;;  %v1755_v0 = vpack.c.bf16 %v755_v53, %v754_v45  ;;  %v758_v1 = vmax.f32 %v694_v54, 0.0  ;;  %v1127_v45 = vld [vmem:[%s2208_s4 + $0x14] sm:$0xf] (%p2003_p6)  ;;  %v1131_v47 = vld [vmem:[%s2208_s4 + $0x1c] sm:$0xf] (%p2003_p6) }
  0x7a   : > { %v759_v2 = vmax.f32 %v695_v55, 0.0  ;;  %v697_v3 = vadd.f32 %v2175_v9, %v626_v56  ;;  %v628_v10 = vmul.f32 %v2173_v8, %v557_v57  ;;  %v698_v11 = vadd.f32 %v2175_v9, %v627_v61  ;;  %v1133_v48 = vld [vmem:[%s2208_s4 + $0x20] sm:$0xf] (%p2003_p6)  ;;  %v1135_v49 = vld [vmem:[%s2208_s4 + $0x24] sm:$0xf] (%p2003_p6) }
  0x7b   : > { %v1760_v6 = vpack.c.bf16 %v757_v59, %v756_v58  ;;  %v760_v7 = vmax.f32 %v696_v60, 0.0  ;;  %1815 = vst [vmem:[%s2208_s4 + $0xc0] sm:$0xff] %v1755_v0   ;;  %v629_v15 = vmul.f32 %v2173_v8, %v558_v62  ;;  %v630_v16 = vmul.f32 %v2173_v8, %v559_v63  ;;  %1122 = vst [vmem:[%s2412_s9 + $0x10] sm:$0xf] (%p2003_p6), %v1121_v42  ;;  %v1137_v50 = vld [vmem:[%s2208_s4 + $0x28] sm:$0xf] (%p2003_p6) }
  0x7c   : > { %v1765_v13 = vpack.c.bf16 %v759_v2, %v758_v1  ;;  %v761_v14 = vmax.f32 %v697_v3, 0.0  ;;  %v699_v18 = vadd.f32 %v2175_v9, %v628_v10  ;;  %v762_v19 = vmax.f32 %v698_v11, 0.0  ;;  %1124 = vst [vmem:[%s2412_s9 + $0x18] sm:$0xf] (%p2003_p6), %v1123_v43  ;;  %1126 = vst [vmem:[%s2412_s9 + $0x20] sm:$0xf] (%p2003_p6), %v1125_v44 }
  0x7d   : > { %1816 = vst [vmem:[%s2208_s4 + $0xc8] sm:$0xff] %v1760_v6   ;;  %v631_v20 = vmul.f32 %v2173_v8, %v560_v4  ;;  %v632_v21 = vmul.f32 %v2173_v8, %v561_v5  ;;  %v700_v23 = vadd.f32 %v2175_v9, %v629_v15  ;;  %v701_v24 = vadd.f32 %v2175_v9, %v630_v16  ;;  %v1139_v51 = vld [vmem:[%s2208_s4 + $0x2c] sm:$0xf] (%p2003_p6)  ;;  %v1141_v52 = vld [vmem:[%s2208_s4 + $0x30] sm:$0xf] (%p2003_p6) }
  0x7e   : > { %1817 = vst [vmem:[%s2208_s4 + $0xd0] sm:$0xff] %v1765_v13   ;;  %v1770_v22 = vpack.c.bf16 %v761_v14, %v760_v7  ;;  %v633_v25 = vmul.f32 %v2173_v8, %v562_v12  ;;  %v763_v26 = vmax.f32 %v699_v18, 0.0  ;;  %v634_v29 = vmul.f32 %v2173_v8, %v563_v17  ;;  %v1117_v8 = vld [vmem:[%s2208_s4] sm:$0xf] (%p2003_p6)  ;;  %1128 = vst [vmem:[%s2412_s9 + $0x28] sm:$0xf] (%p2003_p6), %v1127_v45 }
  0x7f   : > { %v702_v27 = vadd.f32 %v2175_v9, %v631_v20  ;;  %v703_v28 = vadd.f32 %v2175_v9, %v632_v21  ;;  %v764_v30 = vmax.f32 %v700_v23, 0.0  ;;  %v765_v31 = vmax.f32 %v701_v24, 0.0  ;;  %1118 = vst [vmem:[%s2412_s9] sm:$0xf] (%p2003_p6), %v1117_v8  ;;  %1130 = vst [vmem:[%s2412_s9 + $0x30] sm:$0xf] (%p2003_p6), %v1129_v46 }
  0x80   : > { %1818 = vst [vmem:[%s2208_s4 + $0xd8] sm:$0xff] %v1770_v22   ;;  %v704_v32 = vadd.f32 %v2175_v9, %v633_v25  ;;  %v1775_v33 = vpack.c.bf16 %v763_v26, %v762_v19  ;;  %v705_v36 = vadd.f32 %v2175_v9, %v634_v29  ;;  %1096 = sbr.rel (!%p2003_p6) target bundleno = 168 (0xa8), region = 74  ;;  %v1119_v9 = vld [vmem:[%s2208_s4 + $0x4] sm:$0xf] (%p2003_p6)  ;;  %1132 = vst [vmem:[%s2412_s9 + $0x38] sm:$0xf] (%p2003_p6), %v1131_v47 }
  0x81   : > { %v766_v34 = vmax.f32 %v702_v27, 0.0  ;;  %v767_v35 = vmax.f32 %v703_v28, 0.0  ;;  %v1780_v37 = vpack.c.bf16 %v765_v31, %v764_v30  ;;  %1120 = vst [vmem:[%s2412_s9 + $0x8] sm:$0xf] (%p2003_p6), %v1119_v9  ;;  %1134 = vst [vmem:[%s2412_s9 + $0x40] sm:$0xf] (%p2003_p6), %v1133_v48 }
  0x82   : > { %v768_v38 = vmax.f32 %v704_v32, 0.0  ;;  %1819 = vst [vmem:[%s2208_s4 + $0xe0] sm:$0xff] %v1775_v33   ;;  %v769_v40 = vmax.f32 %v705_v36, 0.0  ;;  %1136 = vst [vmem:[%s2412_s9 + $0x48] sm:$0xf] (%p2003_p6), %v1135_v49 }
  0x83   : > { %v1785_v39 = vpack.c.bf16 %v767_v35, %v766_v34  ;;  %1820 = vst [vmem:[%s2208_s4 + $0xe8] sm:$0xff] %v1780_v37   ;;  %1138 = vst [vmem:[%s2412_s9 + $0x50] sm:$0xf] (%p2003_p6), %v1137_v50  ;;  %v1143_v53 = vld [vmem:[%s2208_s4 + $0x34] sm:$0xf] (%p2003_p6) }
  0x84   : > { %v1790_v41 = vpack.c.bf16 %v769_v40, %v768_v38  ;;  %1140 = vst [vmem:[%s2412_s9 + $0x58] sm:$0xf] (%p2003_p6), %v1139_v51  ;;  %1142 = vst [vmem:[%s2412_s9 + $0x60] sm:$0xf] (%p2003_p6), %v1141_v52  ;;  %v1145_v54 = vld [vmem:[%s2208_s4 + $0x38] sm:$0xf] (%p2003_p6) }
  0x85   : > { %1821 = vst [vmem:[%s2208_s4 + $0xf0] sm:$0xff] %v1785_v39   ;;  %v1147_v55 = vld [vmem:[%s2208_s4 + $0x3c] sm:$0xf] (%p2003_p6)  ;;  %1144 = vst [vmem:[%s2412_s9 + $0x68] sm:$0xf] (%p2003_p6), %v1143_v53 }
  0x86   : > { %1822 = vst [vmem:[%s2208_s4 + $0xf8] sm:$0xff] %v1790_v41   ;;  %1146 = vst [vmem:[%s2412_s9 + $0x70] sm:$0xf] (%p2003_p6), %v1145_v54  ;;  %v1149_v56 = vld [vmem:[%s2208_s4 + $0x40] sm:$0xf] (%p2003_p6) }
  0x87   : > { %1148 = vst [vmem:[%s2412_s9 + $0x78] sm:$0xf] %v1147_v55  ;;  %v1151_v57 = vld [vmem:[%s2208_s4 + $0x44] sm:$0xf]  ;;  %v1153_v58 = vld [vmem:[%s2208_s4 + $0x48] sm:$0xf] }
  0x88   : > { %1150 = vst [vmem:[%s2412_s9 + $0x80] sm:$0xf] %v1149_v56  ;;  %1152 = vst [vmem:[%s2412_s9 + $0x88] sm:$0xf] %v1151_v57  ;;  %v1155_v59 = vld [vmem:[%s2208_s4 + $0x4c] sm:$0xf] }
  0x89   : > { %1154 = vst [vmem:[%s2412_s9 + $0x90] sm:$0xf] %v1153_v58  ;;  %v1157_v60 = vld [vmem:[%s2208_s4 + $0x50] sm:$0xf]  ;;  %v1159_v61 = vld [vmem:[%s2208_s4 + $0x54] sm:$0xf] }
  0x8a   : > { %1156 = vst [vmem:[%s2412_s9 + $0x98] sm:$0xf] %v1155_v59  ;;  %1158 = vst [vmem:[%s2412_s9 + $0xa0] sm:$0xf] %v1157_v60  ;;  %v1161_v62 = vld [vmem:[%s2208_s4 + $0x58] sm:$0xf] }
  0x8b   : > { %1160 = vst [vmem:[%s2412_s9 + $0xa8] sm:$0xf] %v1159_v61  ;;  %v1163_v63 = vld [vmem:[%s2208_s4 + $0x5c] sm:$0xf]  ;;  %v1165_v0 = vld [vmem:[%s2208_s4 + $0x60] sm:$0xf] }
  0x8c   : > { %1162 = vst [vmem:[%s2412_s9 + $0xb0] sm:$0xf] %v1161_v62  ;;  %1164 = vst [vmem:[%s2412_s9 + $0xb8] sm:$0xf] %v1163_v63  ;;  %v1167_v1 = vld [vmem:[%s2208_s4 + $0x64] sm:$0xf] }
  0x8d   : > { %1166 = vst [vmem:[%s2412_s9 + $0xc0] sm:$0xf] %v1165_v0  ;;  %v1169_v2 = vld [vmem:[%s2208_s4 + $0x68] sm:$0xf]  ;;  %v1171_v3 = vld [vmem:[%s2208_s4 + $0x6c] sm:$0xf] }
  0x8e   : > { %1168 = vst [vmem:[%s2412_s9 + $0xc8] sm:$0xf] %v1167_v1  ;;  %1170 = vst [vmem:[%s2412_s9 + $0xd0] sm:$0xf] %v1169_v2  ;;  %v1173_v4 = vld [vmem:[%s2208_s4 + $0x70] sm:$0xf] }
  0x8f   : > { %1172 = vst [vmem:[%s2412_s9 + $0xd8] sm:$0xf] %v1171_v3  ;;  %v1175_v5 = vld [vmem:[%s2208_s4 + $0x74] sm:$0xf]  ;;  %v1177_v6 = vld [vmem:[%s2208_s4 + $0x78] sm:$0xf] }
  0x90   : > { %1174 = vst [vmem:[%s2412_s9 + $0xe0] sm:$0xf] %v1173_v4  ;;  %1176 = vst [vmem:[%s2412_s9 + $0xe8] sm:$0xf] %v1175_v5  ;;  %v1179_v7 = vld [vmem:[%s2208_s4 + $0x7c] sm:$0xf] }
  0x91   : > { %1178 = vst [vmem:[%s2412_s9 + $0xf0] sm:$0xf] %v1177_v6  ;;  %v1181_v10 = vld [vmem:[%s2208_s4 + $0x80] sm:$0xf]  ;;  %v1183_v11 = vld [vmem:[%s2208_s4 + $0x84] sm:$0xf] }
  0x92   : > { %1180 = vst [vmem:[%s2412_s9 + $0xf8] sm:$0xf] %v1179_v7  ;;  %1182 = vst [vmem:[%s2412_s9 + $0x100] sm:$0xf] %v1181_v10  ;;  %v1185_v12 = vld [vmem:[%s2208_s4 + $0x88] sm:$0xf] }
  0x93   : > { %1184 = vst [vmem:[%s2412_s9 + $0x108] sm:$0xf] %v1183_v11  ;;  %v1187_v13 = vld [vmem:[%s2208_s4 + $0x8c] sm:$0xf]  ;;  %v1189_v14 = vld [vmem:[%s2208_s4 + $0x90] sm:$0xf] }
  0x94   : > { %1186 = vst [vmem:[%s2412_s9 + $0x110] sm:$0xf] %v1185_v12  ;;  %1188 = vst [vmem:[%s2412_s9 + $0x118] sm:$0xf] %v1187_v13  ;;  %v1191_v15 = vld [vmem:[%s2208_s4 + $0x94] sm:$0xf] }
  0x95   : > { %1190 = vst [vmem:[%s2412_s9 + $0x120] sm:$0xf] %v1189_v14  ;;  %v1193_v16 = vld [vmem:[%s2208_s4 + $0x98] sm:$0xf]  ;;  %v1195_v17 = vld [vmem:[%s2208_s4 + $0x9c] sm:$0xf] }
  0x96   : > { %1192 = vst [vmem:[%s2412_s9 + $0x128] sm:$0xf] %v1191_v15  ;;  %1194 = vst [vmem:[%s2412_s9 + $0x130] sm:$0xf] %v1193_v16  ;;  %v1197_v18 = vld [vmem:[%s2208_s4 + $0xa0] sm:$0xf] }
  0x97   : > { %1196 = vst [vmem:[%s2412_s9 + $0x138] sm:$0xf] %v1195_v17  ;;  %v1199_v19 = vld [vmem:[%s2208_s4 + $0xa4] sm:$0xf]  ;;  %v1201_v20 = vld [vmem:[%s2208_s4 + $0xa8] sm:$0xf] }
  0x98   : > { %1198 = vst [vmem:[%s2412_s9 + $0x140] sm:$0xf] %v1197_v18  ;;  %1200 = vst [vmem:[%s2412_s9 + $0x148] sm:$0xf] %v1199_v19  ;;  %v1203_v21 = vld [vmem:[%s2208_s4 + $0xac] sm:$0xf] }
  0x99   : > { %1202 = vst [vmem:[%s2412_s9 + $0x150] sm:$0xf] %v1201_v20  ;;  %v1205_v22 = vld [vmem:[%s2208_s4 + $0xb0] sm:$0xf]  ;;  %v1207_v23 = vld [vmem:[%s2208_s4 + $0xb4] sm:$0xf] }
  0x9a   : > { %1204 = vst [vmem:[%s2412_s9 + $0x158] sm:$0xf] %v1203_v21  ;;  %1206 = vst [vmem:[%s2412_s9 + $0x160] sm:$0xf] %v1205_v22  ;;  %v1209_v24 = vld [vmem:[%s2208_s4 + $0xb8] sm:$0xf] }
  0x9b   : > { %1208 = vst [vmem:[%s2412_s9 + $0x168] sm:$0xf] %v1207_v23  ;;  %v1211_v25 = vld [vmem:[%s2208_s4 + $0xbc] sm:$0xf]  ;;  %v1213_v26 = vld [vmem:[%s2208_s4 + $0xc0] sm:$0xf] }
  0x9c   : > { %1210 = vst [vmem:[%s2412_s9 + $0x170] sm:$0xf] %v1209_v24  ;;  %1212 = vst [vmem:[%s2412_s9 + $0x178] sm:$0xf] %v1211_v25  ;;  %v1215_v27 = vld [vmem:[%s2208_s4 + $0xc4] sm:$0xf] }
  0x9d   : > { %1214 = vst [vmem:[%s2412_s9 + $0x180] sm:$0xf] %v1213_v26  ;;  %v1217_v28 = vld [vmem:[%s2208_s4 + $0xc8] sm:$0xf]  ;;  %v1219_v29 = vld [vmem:[%s2208_s4 + $0xcc] sm:$0xf] }
  0x9e   : > { %1216 = vst [vmem:[%s2412_s9 + $0x188] sm:$0xf] %v1215_v27  ;;  %1218 = vst [vmem:[%s2412_s9 + $0x190] sm:$0xf] %v1217_v28  ;;  %v1221_v30 = vld [vmem:[%s2208_s4 + $0xd0] sm:$0xf] }
  0x9f   : > { %1220 = vst [vmem:[%s2412_s9 + $0x198] sm:$0xf] %v1219_v29  ;;  %v1223_v31 = vld [vmem:[%s2208_s4 + $0xd4] sm:$0xf]  ;;  %v1225_v32 = vld [vmem:[%s2208_s4 + $0xd8] sm:$0xf] }
  0xa0   : > { %1222 = vst [vmem:[%s2412_s9 + $0x1a0] sm:$0xf] %v1221_v30  ;;  %1224 = vst [vmem:[%s2412_s9 + $0x1a8] sm:$0xf] %v1223_v31  ;;  %v1227_v33 = vld [vmem:[%s2208_s4 + $0xdc] sm:$0xf] }
  0xa1   : > { %1226 = vst [vmem:[%s2412_s9 + $0x1b0] sm:$0xf] %v1225_v32  ;;  %v1229_v34 = vld [vmem:[%s2208_s4 + $0xe0] sm:$0xf]  ;;  %v1231_v35 = vld [vmem:[%s2208_s4 + $0xe4] sm:$0xf] }
  0xa2   : > { %1228 = vst [vmem:[%s2412_s9 + $0x1b8] sm:$0xf] %v1227_v33  ;;  %1230 = vst [vmem:[%s2412_s9 + $0x1c0] sm:$0xf] %v1229_v34  ;;  %v1233_v36 = vld [vmem:[%s2208_s4 + $0xe8] sm:$0xf] }
  0xa3   : > { %1232 = vst [vmem:[%s2412_s9 + $0x1c8] sm:$0xf] %v1231_v35  ;;  %v1235_v37 = vld [vmem:[%s2208_s4 + $0xec] sm:$0xf]  ;;  %v1237_v38 = vld [vmem:[%s2208_s4 + $0xf0] sm:$0xf] }
  0xa4   : > { %1234 = vst [vmem:[%s2412_s9 + $0x1d0] sm:$0xf] %v1233_v36  ;;  %1236 = vst [vmem:[%s2412_s9 + $0x1d8] sm:$0xf] %v1235_v37  ;;  %v1239_v39 = vld [vmem:[%s2208_s4 + $0xf4] sm:$0xf] }
  0xa5   : > { %1238 = vst [vmem:[%s2412_s9 + $0x1e0] sm:$0xf] %v1237_v38  ;;  %v1241_v40 = vld [vmem:[%s2208_s4 + $0xf8] sm:$0xf]  ;;  %v1243_v41 = vld [vmem:[%s2208_s4 + $0xfc] sm:$0xf] }
  0xa6   : > { %1240 = vst [vmem:[%s2412_s9 + $0x1e8] sm:$0xf] %v1239_v39  ;;  %1242 = vst [vmem:[%s2412_s9 + $0x1f0] sm:$0xf] %v1241_v40 }
  0xa7   : > { %1244 = vst [vmem:[%s2412_s9 + $0x1f8] sm:$0xf] %v1243_v41 }
  0xa8 PF: > { %s13_s18 = sadd.s32 1, %s1933_s18   ;;  %s2561_s12 = smov %s1913_s13 }
  0xa9   : > { %p10_p13 = scmp.ge.s32.totalorder %s13_s18, 10   ;;  %s2562_s13 = smov %s2011_s27 }
  0xaa   : > { %s2563_s14 = smov %s1925_s16  ;;  %s2564_s15 = smov %s1929_s17 }
  0xab   : > { %s2565_s16 = smov %s2568_s19  ;;  %s2566_s17 = smov %s2572_s20 }
  0xac   :  { %12 = sbr.rel (!%p10_p13) target bundleno = 4 (0x4), region = 152 }

// kernel: unet_decoder_forward.17
= control target key start
LH: loop header
LB: loop body
LE: loop exit
PB: predicated region body
PF: predicated region fallthrough
CT: control target
= control target key end

     0   :  { %s1212_s12 = smov 0   ;;  %s1446_s0 = inlined_call_operand.vmem [shape: bf16[8192,64], index: 0, kind: input, shape index: {}]   ;;  %s1447_s1 = inlined_call_operand.vmem [shape: bf16[64,128], index: 1, kind: input, shape index: {}]   ;;  %s1448_s2 = inlined_call_operand.vmem [shape: f32[1,128], index: 2, kind: input, shape index: {}]   ;;  %s1449_s3 = inlined_call_operand.vmem [shape: f32[8192,128], index: 3, kind: output, shape index: {}]  }
   0x1 LB: > { %s944_s13 = sadd.s32 4294967295, %s1190_s12   ;;  %p948_p0 = scmp.ge.s32.totalorder %s1190_s12, 1  ;;  %s1190_s12 = sphi %s1212_s12, %s13_s12  }
   0x2   : > { %p138_p1 = scmp.lt.s32.totalorder %s1190_s12, 17 }
   0x4   : > { %p139_p2 = pnand %p948_p0, %p138_p1 }
   0x5   : > { %v1148_v0 = vld [vmem:[%s1447_s1] sm:$0xff] (!%p139_p2)   ;;  %s949_s16 = sshll.u32 (!%p139_p2), %s944_s13, 6  ;;  %v1149_v1 = vld [vmem:[%s1447_s1 + $0x8] sm:$0xff] (!%p139_p2)   ;;  %v1150_v2 = vld [vmem:[%s1447_s1 + $0x10] sm:$0xff] (!%p139_p2)   ;;  %vm438_vm0 = vcmask (!%p139_p2), 523264  }
   0x6   : > { %142 = sbr.rel (%p139_p2) target bundleno = 296 (0x128), region = 32  ;;  %p163_p3 = scmp.lt.s32.totalorder (!%p139_p2), %s949_s16, 1023  ;;  %1060 = vmatprep.subr.bf16.mxu0 (!%p139_p2), %v1148_v0  ;;  %1132 = vmatprep.subr.bf16.mxu1 (!%p139_p2), %v1148_v0  ;;  %v1151_v3 = vld [vmem:[%s1447_s1 + $0x18] sm:$0xff] (!%p139_p2)   ;;  %v1308_v36 = vld [vmem:[%s1448_s2] ss:$0 sm:$0xff] (!%p139_p2) }
   0x7   : > { %1061 = vmatpush3.bf16.msra.mxu0 (!%p139_p2), %v1148_v0  ;;  %1136 = vmatpush3.bf16.msra.mxu1 (!%p139_p2), %v1148_v0 }
   0x8   : > { %1062 = vmatprep.subr.bf16.mxu0 (!%p139_p2), %v1149_v1  ;;  %1133 = vmatprep.subr.bf16.mxu1 (!%p139_p2), %v1149_v1 }
   0xb   : > { %1063 = vmatpush3.bf16.msra.mxu0 (!%p139_p2), %v1149_v1  ;;  %1137 = vmatpush3.bf16.msra.mxu1 (!%p139_p2), %v1149_v1 }
   0xc   : > { %1064 = vmatprep.subr.bf16.mxu0 (!%p139_p2), %v1150_v2  ;;  %1134 = vmatprep.subr.bf16.mxu1 (!%p139_p2), %v1150_v2 }
   0xd   : > { %s1451_s16 = smov (!%p163_p3, %s949_s16), 1023 }
   0xe   : > { %s950_s21 = sshll.u32 %s1451_s16, 2  ;;  %s952_s27 = sshll.u32 %s1451_s16, 3 }
   0xf   : > { %s1238_s26 = scalar_lea.vmem %s1446_s0, %s950_s21  ;;  %1065 = vmatpush3.bf16.msra.mxu0 %v1150_v2  ;;  %1138 = vmatpush3.bf16.msra.mxu1 %v1150_v2  ;;  %s1313_s5 = scalar_lea.vmem %s1449_s3, %s952_s27 }
  0x10   : > { %v1152_v4 = vld [vmem:[%s1238_s26] sm:$0xff]   ;;  %1066 = vmatprep.subr.bf16.mxu0 %v1151_v3  ;;  %1135 = vmatprep.subr.bf16.mxu1 %v1151_v3  ;;  %v1154_v6 = vld [vmem:[%s1238_s26 + $0x8] sm:$0xff]   ;;  %v1156_v8 = vld [vmem:[%s1238_s26 + $0x10] sm:$0xff]  }
  0x11   : > { %v1153_v5 = vld [vmem:[%s1238_s26 + $0x80] sm:$0xff]   ;;  %1068 = vmatprep.mubr.msk.bf16.mxu0 %vm438_vm0, %v1152_v4  ;;  %v1155_v7 = vld [vmem:[%s1238_s26 + $0x88] sm:$0xff]   ;;  %v1157_v9 = vld [vmem:[%s1238_s26 + $0x90] sm:$0xff]  }
  0x12   : > { %1100 = vmatprep.mubr.msk.bf16.mxu1 %vm438_vm0, %v1153_v5  ;;  %v1158_v10 = vld [vmem:[%s1238_s26 + $0x18] sm:$0xff]   ;;  %v1160_v12 = vld [vmem:[%s1238_s26 + $0x20] sm:$0xff]   ;;  %v1162_v14 = vld [vmem:[%s1238_s26 + $0x28] sm:$0xff]  }
  0x13   : > { %1067 = vmatpush3.bf16.msra.mxu0 %v1151_v3  ;;  %1139 = vmatpush3.bf16.msra.mxu1 %v1151_v3  ;;  %v1159_v11 = vld [vmem:[%s1238_s26 + $0x98] sm:$0xff]   ;;  %v1161_v13 = vld [vmem:[%s1238_s26 + $0xa0] sm:$0xff]   ;;  %v1163_v15 = vld [vmem:[%s1238_s26 + $0xa8] sm:$0xff]  }
  0x14   : > { %v1164_v16 = vld [vmem:[%s1238_s26 + $0x30] sm:$0xff]   ;;  %v1166_v18 = vld [vmem:[%s1238_s26 + $0x38] sm:$0xff]   ;;  %v1168_v20 = vld [vmem:[%s1238_s26 + $0x40] sm:$0xff]  }
  0x15   : > { %v1165_v17 = vld [vmem:[%s1238_s26 + $0xb0] sm:$0xff]   ;;  %v1167_v19 = vld [vmem:[%s1238_s26 + $0xb8] sm:$0xff]   ;;  %v1169_v21 = vld [vmem:[%s1238_s26 + $0xc0] sm:$0xff]  }
  0x16   : > { %1069 = vmatmul.mubr.msk.bf16.vlgmr.msra.gmra.mrb[0].mxu0 %vm438_vm0, %v1154_v6  ;;  %1101 = vmatmul.mubr.msk.bf16.vlgmr.msra.gmra.mrb[0].mxu1 %vm438_vm0, %v1155_v7  ;;  %v1170_v22 = vld [vmem:[%s1238_s26 + $0x48] sm:$0xff]   ;;  %v1172_v24 = vld [vmem:[%s1238_s26 + $0x50] sm:$0xff]   ;;  %v1174_v26 = vld [vmem:[%s1238_s26 + $0x58] sm:$0xff]  }
  0x17   : > { %1072 = vmatprep.mubr.msk.bf16.mxu0 %vm438_vm0, %v1156_v8  ;;  %1104 = vmatprep.mubr.msk.bf16.mxu1 %vm438_vm0, %v1157_v9  ;;  %v1171_v23 = vld [vmem:[%s1238_s26 + $0xc8] sm:$0xff]   ;;  %v1173_v25 = vld [vmem:[%s1238_s26 + $0xd0] sm:$0xff]   ;;  %v1175_v27 = vld [vmem:[%s1238_s26 + $0xd8] sm:$0xff]  }
  0x18   : > { %v1176_v28 = vld [vmem:[%s1238_s26 + $0x60] sm:$0xff]   ;;  %v1178_v30 = vld [vmem:[%s1238_s26 + $0x68] sm:$0xff]   ;;  %v1180_v32 = vld [vmem:[%s1238_s26 + $0x70] sm:$0xff]  }
  0x19   : > { %v1177_v29 = vld [vmem:[%s1238_s26 + $0xe0] sm:$0xff]   ;;  %v1179_v31 = vld [vmem:[%s1238_s26 + $0xe8] sm:$0xff]   ;;  %v1181_v33 = vld [vmem:[%s1238_s26 + $0xf0] sm:$0xff]  }
  0x1a   : > { %v1182_v34 = vld [vmem:[%s1238_s26 + $0x78] sm:$0xff]  }
  0x1b   : > { %v1183_v35 = vld [vmem:[%s1238_s26 + $0xf8] sm:$0xff]  }
  0x1e   : > { %1073 = vmatmul.mubr.msk.bf16.gmra.mrb[4].mxu0 %vm438_vm0, %v1158_v10  ;;  %1105 = vmatmul.mubr.msk.bf16.gmra.mrb[4].mxu1 %vm438_vm0, %v1159_v11 }
  0x1f   : > { %1076 = vmatprep.mubr.msk.bf16.mxu0 %vm438_vm0, %v1160_v12  ;;  %1108 = vmatprep.mubr.msk.bf16.mxu1 %vm438_vm0, %v1161_v13 }
  0x26   : > { %1077 = vmatmul.mubr.msk.bf16.gmra.mrb[8].mxu0 %vm438_vm0, %v1162_v14  ;;  %1109 = vmatmul.mubr.msk.bf16.gmra.mrb[8].mxu1 %vm438_vm0, %v1163_v15 }
  0x27   : > { %1080 = vmatprep.mubr.msk.bf16.mxu0 %vm438_vm0, %v1164_v16  ;;  %1112 = vmatprep.mubr.msk.bf16.mxu1 %vm438_vm0, %v1165_v17 }
  0x2e   : > { %1081 = vmatmul.mubr.msk.bf16.gmra.mrb[12].mxu0 %vm438_vm0, %v1166_v18  ;;  %1113 = vmatmul.mubr.msk.bf16.gmra.mrb[12].mxu1 %vm438_vm0, %v1167_v19 }
  0x2f   : > { %1084 = vmatprep.mubr.msk.bf16.mxu0 %vm438_vm0, %v1168_v20  ;;  %1116 = vmatprep.mubr.msk.bf16.mxu1 %vm438_vm0, %v1169_v21 }
  0x36   : > { %1085 = vmatmul.mubr.msk.bf16.gmra.mrb[16].mxu0 %vm438_vm0, %v1170_v22  ;;  %1117 = vmatmul.mubr.msk.bf16.gmra.mrb[16].mxu1 %vm438_vm0, %v1171_v23 }
  0x37   : > { %1088 = vmatprep.mubr.msk.bf16.mxu0 %vm438_vm0, %v1172_v24  ;;  %1120 = vmatprep.mubr.msk.bf16.mxu1 %vm438_vm0, %v1173_v25 }
  0x3e   : > { %1089 = vmatmul.mubr.msk.bf16.gmra.mrb[20].mxu0 %vm438_vm0, %v1174_v26  ;;  %1121 = vmatmul.mubr.msk.bf16.gmra.mrb[20].mxu1 %vm438_vm0, %v1175_v27 }
  0x3f   : > { %1092 = vmatprep.mubr.msk.bf16.mxu0 %vm438_vm0, %v1176_v28  ;;  %1124 = vmatprep.mubr.msk.bf16.mxu1 %vm438_vm0, %v1177_v29 }
  0x46   : > { %1093 = vmatmul.mubr.msk.bf16.gmra.mrb[24].mxu0 %vm438_vm0, %v1178_v30  ;;  %1125 = vmatmul.mubr.msk.bf16.gmra.mrb[24].mxu1 %vm438_vm0, %v1179_v31 }
  0x47   : > { %1096 = vmatprep.mubr.msk.bf16.mxu0 %vm438_vm0, %v1180_v32  ;;  %1128 = vmatprep.mubr.msk.bf16.mxu1 %vm438_vm0, %v1181_v33 }
  0x4e   : > { %1097 = vmatmul.mubr.msk.bf16.gmra.mrb[28].mxu0 %vm438_vm0, %v1182_v34  ;;  %1129 = vmatmul.mubr.msk.bf16.gmra.mrb[28].mxu1 %vm438_vm0, %v1183_v35 }
  0xe9   : > { %v1070_v37 = vpop.f32.mrb[0].mxu0  ;;  %v1102_v38 = vpop.f32.mrb[0].mxu1 }
  0xea   : > { %v578_v39 = vadd.f32 %v1070_v37, %v1308_v36  ;;  %v706_v40 = vadd.f32 %v1102_v38, %v1308_v36  ;;  %v569_v41 = vpop.f32.mrb[1].mxu0  ;;  %v697_v42 = vpop.f32.mrb[1].mxu1 }
  0xeb   : > { %v570_v43 = vadd.f32 %v1308_v36, %v569_v41  ;;  %v698_v44 = vadd.f32 %v1308_v36, %v697_v42  ;;  %v1071_v45 = vpop.f32.mrb[2].mxu0  ;;  %v1103_v46 = vpop.f32.mrb[2].mxu1 }
  0xec   : > { %826 = vst [vmem:[%s1313_s5 + $0x10] sm:$0xff] %v578_v39  ;;  %858 = vst [vmem:[%s1313_s5 + $0x110] sm:$0xff] %v706_v40  ;;  %v581_v47 = vadd.f32 %v1071_v45, %v1308_v36  ;;  %v709_v48 = vadd.f32 %v1103_v46, %v1308_v36  ;;  %v572_v49 = vpop.f32.mrb[3].mxu0  ;;  %v700_v50 = vpop.f32.mrb[3].mxu1 }
  0xed   : > { %824 = vst [vmem:[%s1313_s5] sm:$0xff] %v570_v43  ;;  %856 = vst [vmem:[%s1313_s5 + $0x100] sm:$0xff] %v698_v44  ;;  %v573_v51 = vadd.f32 %v1308_v36, %v572_v49  ;;  %v701_v52 = vadd.f32 %v1308_v36, %v700_v50 }
  0xee   : > { %827 = vst [vmem:[%s1313_s5 + $0x18] sm:$0xff] %v581_v47  ;;  %859 = vst [vmem:[%s1313_s5 + $0x118] sm:$0xff] %v709_v48 }
  0xef   : > { %825 = vst [vmem:[%s1313_s5 + $0x8] sm:$0xff] %v573_v51  ;;  %857 = vst [vmem:[%s1313_s5 + $0x108] sm:$0xff] %v701_v52 }
  0xf1   : > { %v1074_v53 = vpop.f32.mrb[4].mxu0  ;;  %v1106_v54 = vpop.f32.mrb[4].mxu1 }
  0xf2   : > { %v594_v55 = vadd.f32 %v1074_v53, %v1308_v36  ;;  %v722_v56 = vadd.f32 %v1106_v54, %v1308_v36  ;;  %v585_v57 = vpop.f32.mrb[5].mxu0  ;;  %v713_v58 = vpop.f32.mrb[5].mxu1 }
  0xf3   : > { %v586_v59 = vadd.f32 %v1308_v36, %v585_v57  ;;  %v714_v60 = vadd.f32 %v1308_v36, %v713_v58  ;;  %v1075_v61 = vpop.f32.mrb[6].mxu0  ;;  %v1107_v62 = vpop.f32.mrb[6].mxu1 }
  0xf4   : > { %830 = vst [vmem:[%s1313_s5 + $0x30] sm:$0xff] %v594_v55  ;;  %862 = vst [vmem:[%s1313_s5 + $0x130] sm:$0xff] %v722_v56  ;;  %v597_v63 = vadd.f32 %v1075_v61, %v1308_v36  ;;  %v725_v0 = vadd.f32 %v1107_v62, %v1308_v36  ;;  %v588_v1 = vpop.f32.mrb[7].mxu0  ;;  %v716_v2 = vpop.f32.mrb[7].mxu1 }
  0xf5   : > { %828 = vst [vmem:[%s1313_s5 + $0x20] sm:$0xff] %v586_v59  ;;  %860 = vst [vmem:[%s1313_s5 + $0x120] sm:$0xff] %v714_v60  ;;  %v589_v3 = vadd.f32 %v1308_v36, %v588_v1  ;;  %v717_v4 = vadd.f32 %v1308_v36, %v716_v2 }
  0xf6   : > { %831 = vst [vmem:[%s1313_s5 + $0x38] sm:$0xff] %v597_v63  ;;  %863 = vst [vmem:[%s1313_s5 + $0x138] sm:$0xff] %v725_v0 }
  0xf7   : > { %829 = vst [vmem:[%s1313_s5 + $0x28] sm:$0xff] %v589_v3  ;;  %861 = vst [vmem:[%s1313_s5 + $0x128] sm:$0xff] %v717_v4 }
  0xf9   : > { %v1078_v5 = vpop.f32.mrb[8].mxu0  ;;  %v1110_v6 = vpop.f32.mrb[8].mxu1 }
  0xfa   : > { %v610_v7 = vadd.f32 %v1078_v5, %v1308_v36  ;;  %v738_v8 = vadd.f32 %v1110_v6, %v1308_v36  ;;  %v601_v9 = vpop.f32.mrb[9].mxu0  ;;  %v729_v10 = vpop.f32.mrb[9].mxu1 }
  0xfb   : > { %v602_v11 = vadd.f32 %v1308_v36, %v601_v9  ;;  %v730_v12 = vadd.f32 %v1308_v36, %v729_v10  ;;  %v1079_v13 = vpop.f32.mrb[10].mxu0  ;;  %v1111_v14 = vpop.f32.mrb[10].mxu1 }
  0xfc   : > { %834 = vst [vmem:[%s1313_s5 + $0x50] sm:$0xff] %v610_v7  ;;  %866 = vst [vmem:[%s1313_s5 + $0x150] sm:$0xff] %v738_v8  ;;  %v613_v15 = vadd.f32 %v1079_v13, %v1308_v36  ;;  %v741_v16 = vadd.f32 %v1111_v14, %v1308_v36  ;;  %v604_v17 = vpop.f32.mrb[11].mxu0  ;;  %v732_v18 = vpop.f32.mrb[11].mxu1 }
  0xfd   : > { %832 = vst [vmem:[%s1313_s5 + $0x40] sm:$0xff] %v602_v11  ;;  %864 = vst [vmem:[%s1313_s5 + $0x140] sm:$0xff] %v730_v12  ;;  %v605_v19 = vadd.f32 %v1308_v36, %v604_v17  ;;  %v733_v20 = vadd.f32 %v1308_v36, %v732_v18 }
  0xfe   : > { %835 = vst [vmem:[%s1313_s5 + $0x58] sm:$0xff] %v613_v15  ;;  %867 = vst [vmem:[%s1313_s5 + $0x158] sm:$0xff] %v741_v16 }
  0xff   : > { %833 = vst [vmem:[%s1313_s5 + $0x48] sm:$0xff] %v605_v19  ;;  %865 = vst [vmem:[%s1313_s5 + $0x148] sm:$0xff] %v733_v20 }
 0x101   : > { %v1082_v21 = vpop.f32.mrb[12].mxu0  ;;  %v1114_v22 = vpop.f32.mrb[12].mxu1 }
 0x102   : > { %v626_v23 = vadd.f32 %v1082_v21, %v1308_v36  ;;  %v754_v24 = vadd.f32 %v1114_v22, %v1308_v36  ;;  %v617_v25 = vpop.f32.mrb[13].mxu0  ;;  %v745_v26 = vpop.f32.mrb[13].mxu1 }
 0x103   : > { %v618_v27 = vadd.f32 %v1308_v36, %v617_v25  ;;  %v746_v28 = vadd.f32 %v1308_v36, %v745_v26  ;;  %v1083_v29 = vpop.f32.mrb[14].mxu0  ;;  %v1115_v30 = vpop.f32.mrb[14].mxu1 }
 0x104   : > { %838 = vst [vmem:[%s1313_s5 + $0x70] sm:$0xff] %v626_v23  ;;  %870 = vst [vmem:[%s1313_s5 + $0x170] sm:$0xff] %v754_v24  ;;  %v629_v31 = vadd.f32 %v1083_v29, %v1308_v36  ;;  %v757_v32 = vadd.f32 %v1115_v30, %v1308_v36  ;;  %v620_v33 = vpop.f32.mrb[15].mxu0  ;;  %v748_v34 = vpop.f32.mrb[15].mxu1 }
 0x105   : > { %836 = vst [vmem:[%s1313_s5 + $0x60] sm:$0xff] %v618_v27  ;;  %868 = vst [vmem:[%s1313_s5 + $0x160] sm:$0xff] %v746_v28  ;;  %v621_v35 = vadd.f32 %v1308_v36, %v620_v33  ;;  %v749_v37 = vadd.f32 %v1308_v36, %v748_v34 }
 0x106   : > { %839 = vst [vmem:[%s1313_s5 + $0x78] sm:$0xff] %v629_v31  ;;  %871 = vst [vmem:[%s1313_s5 + $0x178] sm:$0xff] %v757_v32 }
 0x107   : > { %837 = vst [vmem:[%s1313_s5 + $0x68] sm:$0xff] %v621_v35  ;;  %869 = vst [vmem:[%s1313_s5 + $0x168] sm:$0xff] %v749_v37 }
 0x109   : > { %v1086_v38 = vpop.f32.mrb[16].mxu0  ;;  %v1118_v39 = vpop.f32.mrb[16].mxu1 }
 0x10a   : > { %v642_v40 = vadd.f32 %v1086_v38, %v1308_v36  ;;  %v770_v41 = vadd.f32 %v1118_v39, %v1308_v36  ;;  %v633_v42 = vpop.f32.mrb[17].mxu0  ;;  %v761_v43 = vpop.f32.mrb[17].mxu1 }
 0x10b   : > { %v634_v44 = vadd.f32 %v1308_v36, %v633_v42  ;;  %v762_v45 = vadd.f32 %v1308_v36, %v761_v43  ;;  %v1087_v46 = vpop.f32.mrb[18].mxu0  ;;  %v1119_v47 = vpop.f32.mrb[18].mxu1 }
 0x10c   : > { %842 = vst [vmem:[%s1313_s5 + $0x90] sm:$0xff] %v642_v40  ;;  %874 = vst [vmem:[%s1313_s5 + $0x190] sm:$0xff] %v770_v41  ;;  %v645_v48 = vadd.f32 %v1087_v46, %v1308_v36  ;;  %v773_v49 = vadd.f32 %v1119_v47, %v1308_v36  ;;  %v636_v50 = vpop.f32.mrb[19].mxu0  ;;  %v764_v51 = vpop.f32.mrb[19].mxu1 }
 0x10d   : > { %840 = vst [vmem:[%s1313_s5 + $0x80] sm:$0xff] %v634_v44  ;;  %872 = vst [vmem:[%s1313_s5 + $0x180] sm:$0xff] %v762_v45  ;;  %v637_v52 = vadd.f32 %v1308_v36, %v636_v50  ;;  %v765_v53 = vadd.f32 %v1308_v36, %v764_v51 }
 0x10e   : > { %843 = vst [vmem:[%s1313_s5 + $0x98] sm:$0xff] %v645_v48  ;;  %875 = vst [vmem:[%s1313_s5 + $0x198] sm:$0xff] %v773_v49 }
 0x10f   : > { %841 = vst [vmem:[%s1313_s5 + $0x88] sm:$0xff] %v637_v52  ;;  %873 = vst [vmem:[%s1313_s5 + $0x188] sm:$0xff] %v765_v53 }
 0x111   : > { %v1090_v54 = vpop.f32.mrb[20].mxu0  ;;  %v1122_v55 = vpop.f32.mrb[20].mxu1 }
 0x112   : > { %v658_v56 = vadd.f32 %v1090_v54, %v1308_v36  ;;  %v786_v57 = vadd.f32 %v1122_v55, %v1308_v36  ;;  %v649_v58 = vpop.f32.mrb[21].mxu0  ;;  %v777_v59 = vpop.f32.mrb[21].mxu1 }
 0x113   : > { %v650_v60 = vadd.f32 %v1308_v36, %v649_v58  ;;  %v778_v61 = vadd.f32 %v1308_v36, %v777_v59  ;;  %v1091_v62 = vpop.f32.mrb[22].mxu0  ;;  %v1123_v63 = vpop.f32.mrb[22].mxu1 }
 0x114   : > { %846 = vst [vmem:[%s1313_s5 + $0xb0] sm:$0xff] %v658_v56  ;;  %878 = vst [vmem:[%s1313_s5 + $0x1b0] sm:$0xff] %v786_v57  ;;  %v661_v0 = vadd.f32 %v1091_v62, %v1308_v36  ;;  %v789_v1 = vadd.f32 %v1123_v63, %v1308_v36  ;;  %v652_v2 = vpop.f32.mrb[23].mxu0  ;;  %v780_v3 = vpop.f32.mrb[23].mxu1 }
 0x115   : > { %844 = vst [vmem:[%s1313_s5 + $0xa0] sm:$0xff] %v650_v60  ;;  %876 = vst [vmem:[%s1313_s5 + $0x1a0] sm:$0xff] %v778_v61  ;;  %v653_v4 = vadd.f32 %v1308_v36, %v652_v2  ;;  %v781_v5 = vadd.f32 %v1308_v36, %v780_v3 }
 0x116   : > { %847 = vst [vmem:[%s1313_s5 + $0xb8] sm:$0xff] %v661_v0  ;;  %879 = vst [vmem:[%s1313_s5 + $0x1b8] sm:$0xff] %v789_v1 }
 0x117   : > { %845 = vst [vmem:[%s1313_s5 + $0xa8] sm:$0xff] %v653_v4  ;;  %877 = vst [vmem:[%s1313_s5 + $0x1a8] sm:$0xff] %v781_v5 }
 0x119   : > { %v1094_v6 = vpop.f32.mrb[24].mxu0  ;;  %v1126_v7 = vpop.f32.mrb[24].mxu1 }
 0x11a   : > { %v674_v8 = vadd.f32 %v1094_v6, %v1308_v36  ;;  %v802_v9 = vadd.f32 %v1126_v7, %v1308_v36  ;;  %v665_v10 = vpop.f32.mrb[25].mxu0  ;;  %v793_v11 = vpop.f32.mrb[25].mxu1 }
 0x11b   : > { %v666_v12 = vadd.f32 %v1308_v36, %v665_v10  ;;  %v794_v13 = vadd.f32 %v1308_v36, %v793_v11  ;;  %v1095_v14 = vpop.f32.mrb[26].mxu0  ;;  %v1127_v15 = vpop.f32.mrb[26].mxu1 }
 0x11c   : > { %850 = vst [vmem:[%s1313_s5 + $0xd0] sm:$0xff] %v674_v8  ;;  %882 = vst [vmem:[%s1313_s5 + $0x1d0] sm:$0xff] %v802_v9  ;;  %v677_v16 = vadd.f32 %v1095_v14, %v1308_v36  ;;  %v805_v17 = vadd.f32 %v1127_v15, %v1308_v36  ;;  %v668_v18 = vpop.f32.mrb[27].mxu0  ;;  %v796_v19 = vpop.f32.mrb[27].mxu1 }
 0x11d   : > { %848 = vst [vmem:[%s1313_s5 + $0xc0] sm:$0xff] %v666_v12  ;;  %880 = vst [vmem:[%s1313_s5 + $0x1c0] sm:$0xff] %v794_v13  ;;  %v669_v20 = vadd.f32 %v1308_v36, %v668_v18  ;;  %v797_v21 = vadd.f32 %v1308_v36, %v796_v19 }
 0x11e   : > { %851 = vst [vmem:[%s1313_s5 + $0xd8] sm:$0xff] %v677_v16  ;;  %883 = vst [vmem:[%s1313_s5 + $0x1d8] sm:$0xff] %v805_v17 }
 0x11f   : > { %849 = vst [vmem:[%s1313_s5 + $0xc8] sm:$0xff] %v669_v20  ;;  %881 = vst [vmem:[%s1313_s5 + $0x1c8] sm:$0xff] %v797_v21 }
 0x121   : > { %v1098_v22 = vpop.f32.mrb[28].mxu0  ;;  %v1130_v23 = vpop.f32.mrb[28].mxu1 }
 0x122   : > { %v690_v24 = vadd.f32 %v1098_v22, %v1308_v36  ;;  %v818_v25 = vadd.f32 %v1130_v23, %v1308_v36  ;;  %v681_v26 = vpop.f32.mrb[29].mxu0  ;;  %v809_v27 = vpop.f32.mrb[29].mxu1 }
 0x123   : > { %v682_v28 = vadd.f32 %v1308_v36, %v681_v26  ;;  %v810_v29 = vadd.f32 %v1308_v36, %v809_v27  ;;  %v1099_v30 = vpop.f32.mrb[30].mxu0  ;;  %v1131_v31 = vpop.f32.mrb[30].mxu1 }
 0x124   : > { %854 = vst [vmem:[%s1313_s5 + $0xf0] sm:$0xff] %v690_v24  ;;  %886 = vst [vmem:[%s1313_s5 + $0x1f0] sm:$0xff] %v818_v25  ;;  %v693_v32 = vadd.f32 %v1099_v30, %v1308_v36  ;;  %v821_v33 = vadd.f32 %v1131_v31, %v1308_v36  ;;  %v684_v34 = vpop.f32.mrb[31].mxu0  ;;  %v812_v35 = vpop.f32.mrb[31].mxu1 }
 0x125   : > { %852 = vst [vmem:[%s1313_s5 + $0xe0] sm:$0xff] %v682_v28  ;;  %884 = vst [vmem:[%s1313_s5 + $0x1e0] sm:$0xff] %v810_v29  ;;  %v685_v37 = vadd.f32 %v1308_v36, %v684_v34  ;;  %v813_v38 = vadd.f32 %v1308_v36, %v812_v35 }
 0x126   : > { %855 = vst [vmem:[%s1313_s5 + $0xf8] sm:$0xff] %v693_v32  ;;  %887 = vst [vmem:[%s1313_s5 + $0x1f8] sm:$0xff] %v821_v33 }
 0x127   : > { %853 = vst [vmem:[%s1313_s5 + $0xe8] sm:$0xff] %v685_v37  ;;  %885 = vst [vmem:[%s1313_s5 + $0x1e8] sm:$0xff] %v813_v38 }
 0x128 PF: > { %s13_s12 = sadd.s32 1, %s1190_s12  }
 0x129   : > { %p10_p4 = scmp.ge.s32.totalorder %s13_s12, 18  }
 0x12b   :  { %12 = sbr.rel (!%p10_p4) target bundleno = 1 (0x1), region = 62 }

</bundles_post_ra>
